<compile_context>
chip_gen: v5e
topology: v5e:2x2
jax: 0.10.0
libtpu: 0.0.40
codegen_flags: <defaults>
</compile_context>

<pallas_src>
import numpy as np
import jax
import jax.numpy as jnp
from jax.experimental import pallas as pl
from jax.experimental.pallas import tpu as pltpu

# ---------------- scaled-down config (real swin_base values in comments) ------
IMG = 32           # image side        (224)
PATCH = 4          # patch size        (4)
IN_CH = 3
EMBED = 32         # stage-0 embed dim (128)
DEPTHS = (2, 2)    # blocks per stage  ((2, 2, 18, 2))
HEADS = (2, 4)     # heads per stage   ((4, 8, 16, 32))
WINDOW = 4         # window size       (7)
MLP_RATIO = 4
NUM_CLASSES = 10   # class_num
LINEAR_NUM = 32    # ClassBlock bottleneck (512)
BN_EPS = 1e-5
LN_EPS = 1e-5
DTYPE = jnp.float32
W_DTYPE = jnp.bfloat16   # matmul weights pre-cast to bf16 (perf feedback)


def _stage_configs():
    cfgs = []
    res, dim = IMG // PATCH, EMBED
    for s, (depth, heads) in enumerate(zip(DEPTHS, HEADS)):
        shifts = tuple(0 if (d % 2 == 0 or res <= WINDOW) else WINDOW // 2
                       for d in range(depth))
        cfgs.append(dict(res=res, dim=dim, heads=heads, shifts=shifts,
                         merge=(s < len(DEPTHS) - 1)))
        if s < len(DEPTHS) - 1:
            res //= 2
            dim *= 2
    return tuple(cfgs), dim


STAGE_CFGS, FINAL_DIM = _stage_configs()


def _full_spec(arr):
    nd = arr.ndim
    return pl.BlockSpec(arr.shape, lambda b, _n=nd: (0,) * _n)


# =========================== in-kernel helpers ================================
def _ln(x, g, b):
    mu = jnp.mean(x, axis=-1, keepdims=True)
    var = jnp.mean((x - mu) ** 2, axis=-1, keepdims=True)
    return (x - mu) * jax.lax.rsqrt(var + LN_EPS) * g + b


def _swin_block(x, blk, *, nW, T, heads, Dh, dim):
    """LN1 -> (cyclic shift + window partition as permutation matmul) -> W-MSA
       (fused QKV + fused proj) -> un-permute -> residual -> LN2 -> MLP -> residual."""
    M = nW * T
    scale = float(Dh) ** -0.5

    h = _ln(x, blk['norm1_g'][...], blk['norm1_b'][...])          # [L, dim] f32
    if 'perm' in blk:
        # exact 0/1 f32 permutation matmul = roll(-shift) + window_partition
        h = jnp.dot(blk['perm'][...], h, preferred_element_type=jnp.float32)

    # ---- fused QKV projection: one [M, dim] x [dim, 3*dim] matmul (bf16 W)
    qkv = jnp.dot(h.astype(jnp.bfloat16), blk['w_qkv'][...],
                  preferred_element_type=jnp.float32) + blk['b_qkv'][...]

    rel_bias = blk['rel_bias'][...]                               # [heads, T, T]
    mask = blk['mask'][...] if 'mask' in blk else None            # [nW, T, T]

    # TODO(synk): heads <= 4 here so a static unroll is fine; at real swin_base
    #   scale fold heads into the einsum batch dim (or lax.fori_loop) instead.
    head_outs = []
    for hd in range(heads):
        q = qkv[:, hd * Dh:(hd + 1) * Dh] * scale
        k = qkv[:, dim + hd * Dh:dim + (hd + 1) * Dh]
        v = qkv[:, 2 * dim + hd * Dh:2 * dim + (hd + 1) * Dh]
        q = q.reshape(nW, T, Dh)
        k = k.reshape(nW, T, Dh)
        v = v.reshape(nW, T, Dh)

        s = jnp.einsum('wtd,wsd->wts', q, k,
                       preferred_element_type=jnp.float32)        # [nW, T, T]
        s = s + rel_bias[hd]                                      # bcast over nW
        if mask is not None:
            s = s + mask
        s = s - jnp.max(s, axis=-1, keepdims=True)
        p = jnp.exp(s)
        # TODO(synk): approximate reciprocal (~1e-3 rel err) on the softmax denom.
        p = p * pl.reciprocal(jnp.sum(p, axis=-1, keepdims=True), approx=True)

        o = jnp.einsum('wts,wsd->wtd', p.astype(jnp.bfloat16),
                       v.astype(jnp.bfloat16),
                       preferred_element_type=jnp.float32)
        head_outs.append(o.reshape(M, Dh))

    # ---- fused output projection: one [M, dim] x [dim, dim] matmul
    attn = jnp.concatenate(head_outs, axis=-1)                    # [M, dim]
    attn = jnp.dot(attn.astype(jnp.bfloat16), blk['w_proj'][...],
                   preferred_element_type=jnp.float32)
    if 'perm_t' in blk:
        # window reverse + roll(+shift) back to canonical token order
        attn = jnp.dot(blk['perm_t'][...], attn,
                       preferred_element_type=jnp.float32)
    x = x + attn + blk['b_proj'][...]

    # ---- MLP with residual
    h2 = _ln(x, blk['norm2_g'][...], blk['norm2_b'][...])
    m = jnp.dot(h2.astype(jnp.bfloat16), blk['fc1_w'][...],
                preferred_element_type=jnp.float32) + blk['fc1_b'][...]
    # TODO(synk): timm uses exact-erf GELU; tanh-approx used here (EUP-friendly).
    m = jax.nn.gelu(m)
    x = x + jnp.dot(m.astype(jnp.bfloat16), blk['fc2_w'][...],
                    preferred_element_type=jnp.float32) + blk['fc2_b'][...]
    return x


def _patch_merge(x, mp):
    """PatchMerging: 2x2 spatial gather (selection matmuls) -> concat(4C)
       -> LayerNorm -> Linear(4C, 2C, bias=False)."""
    parts = [jnp.dot(mp['sel'][f], x, preferred_element_type=jnp.float32)
             for f in range(4)]
    xc = jnp.concatenate(parts, axis=-1)                          # [L/4, 4C]
    h = _ln(xc, mp['norm_g'][...], mp['norm_b'][...])
    return jnp.dot(h.astype(jnp.bfloat16), mp['red_w'][...],
                   preferred_element_type=jnp.float32)            # [L/4, 2C]


def _make_forward_kernel(treedef, n_params):
    def kernel(x_ref, *rest):
        params = jax.tree_util.tree_unflatten(treedef, rest[:n_params])
        o_ref = rest[n_params]

        # ---------------- patch embed: Linear + LayerNorm -------------------
        pe = params['patch']
        tok = x_ref[0]                                            # [L0, P*P*Cin]
        x = jnp.dot(tok.astype(jnp.bfloat16), pe['proj_w'][...],
                    preferred_element_type=jnp.float32) + pe['proj_b'][...]
        x = _ln(x, pe['norm_g'][...], pe['norm_b'][...])          # [L0, EMBED]

        # ---------------- Swin stages ---------------------------------------
        for cfg, sp in zip(STAGE_CFGS, params['stages']):
            dim, heads, res = cfg['dim'], cfg['heads'], cfg['res']
            nW = (res // WINDOW) ** 2
            T = WINDOW * WINDOW
            Dh = dim // heads
            for blk in sp['blocks']:
                x = _swin_block(x, blk, nW=nW, T=T, heads=heads, Dh=Dh, dim=dim)
            if cfg['merge']:
                x = _patch_merge(x, sp['merge'])

        # ---------------- final LN + global pool + ClassBlock ---------------
        fn, cls = params['final_norm'], params['classifier']
        y = _ln(x, fn['g'][...], fn['b'][...])                    # [L1, C1]
        pooled = jnp.mean(y, axis=0, keepdims=True)               # [1, C1]
        h = jnp.dot(pooled, cls['add_w'][...],
                    preferred_element_type=jnp.float32) + cls['add_b'][...]
        h = h * cls['bn_scale'][...] + cls['bn_shift'][...]       # BN1d (eval, folded)
        # TODO(synk): Dropout(p=0.5) active only in training; identity here.
        logits = jnp.dot(h, cls['cls_w'][...],
                         preferred_element_type=jnp.float32) + cls['cls_b'][...]
        o_ref[0] = logits.astype(o_ref.dtype)                     # [1, NUM_CLASSES]

    return kernel


# ================================ glue (JAX) ==================================
def _patchify(x_nchw):
    # One-time input layout prep (NCHW -> per-patch flattened tokens); left to XLA.
    B, Cin, H, W = x_nchw.shape
    x = x_nchw.transpose(0, 2, 3, 1)
    x = x.reshape(B, H // PATCH, PATCH, W // PATCH, PATCH, Cin)
    x = x.transpose(0, 1, 3, 2, 4, 5)
    return x.reshape(B, (H // PATCH) * (W // PATCH), PATCH * PATCH * Cin)


@jax.jit
def ft_net_swin_forward(x_nchw, params):
    tokens = _patchify(x_nchw)                                    # [B, 64, 48]
    B, L0, Din = tokens.shape
    leaves, treedef = jax.tree_util.tree_flatten(params)
    kernel = _make_forward_kernel(treedef, len(leaves))

    tok_spec = pl.BlockSpec((1, L0, Din), lambda b: (b, 0, 0))
    out = pl.pallas_call(
        kernel,
        out_shape=jax.ShapeDtypeStruct((B, 1, NUM_CLASSES), DTYPE),
        grid=(B,),
        in_specs=[tok_spec] + [_full_spec(leaf) for leaf in leaves],
        out_specs=pl.BlockSpec((1, 1, NUM_CLASSES), lambda b: (b, 0, 0)),
        compiler_params=pltpu.CompilerParams(
            dimension_semantics=("parallel",),
            vmem_limit_bytes=32 * 1024 * 1024),
    )(tokens, *leaves)
    return out[:, 0, :]


# ===================== static tables (numpy, prep-time) =======================
def _rel_pos_index(window):
    coords = np.stack(np.meshgrid(np.arange(window), np.arange(window),
                                  indexing='ij'))
    flat = coords.reshape(2, -1)
    rel = (flat[:, :, None] - flat[:, None, :]).transpose(1, 2, 0) + (window - 1)
    return rel[..., 0] * (2 * window - 1) + rel[..., 1]           # [T, T]


def _attn_mask(res, window, shift):
    nW = (res // window) ** 2
    T = window * window
    if shift == 0:
        return np.zeros((nW, T, T), np.float32)
    img_mask = np.zeros((res, res), np.int32)
    cnt = 0
    for hs in (slice(0, -window), slice(-window, -shift), slice(-shift, None)):
        for ws in (slice(0, -window), slice(-window, -shift), slice(-shift, None)):
            img_mask[hs, ws] = cnt
            cnt += 1
    mw = img_mask.reshape(res // window, window, res // window, window)
    mw = mw.transpose(0, 2, 1, 3).reshape(-1, T)
    diff = mw[:, None, :] - mw[:, :, None]
    return np.where(diff != 0, -100.0, 0.0).astype(np.float32)


def _window_perm(res, window, shift):
    """P[m, t] = 1 where windowed position m (of the image rolled by -shift)
       sources canonical token t.  (P @ x) applies roll + window_partition."""
    L = res * res
    P = np.zeros((L, L), np.float32)
    n = res // window
    m = 0
    for wr in range(n):
        for wc in range(n):
            for ir in range(window):
                for ic in range(window):
                    r = (wr * window + ir + shift) % res
                    c = (wc * window + ic + shift) % res
                    P[m, r * res + c] = 1.0
                    m += 1
    return P


def _merge_select(res):
    """Selection matrices for PatchMerging's x0..x3 = x[0::2,0::2], x[1::2,0::2],
       x[0::2,1::2], x[1::2,1::2] gathers (PyTorch concat order)."""
    L = res * res
    Lh = (res // 2) ** 2
    sel = np.zeros((4, Lh, L), np.float32)
    order = [(0, 0), (1, 0), (0, 1), (1, 1)]
    for f, (dr, dc) in enumerate(order):
        for i in range(res // 2):
            for j in range(res // 2):
                sel[f, i * (res // 2) + j, (2 * i + dr) * res + (2 * j + dc)] = 1.0
    return sel


# ============================ deterministic init ==============================
def init_params(key):
    ks = iter(jax.random.split(key, 512))

    def nrm(shape, std, dtype=DTYPE):
        return (jax.random.normal(next(ks), shape, jnp.float32) * std).astype(dtype)

    zeros = lambda s: jnp.zeros(s, DTYPE)
    ones = lambda s: jnp.ones(s, DTYPE)

    p = {}
    fan_in = PATCH * PATCH * IN_CH
    p['patch'] = dict(proj_w=nrm((fan_in, EMBED), (2.0 / fan_in) ** 0.5, W_DTYPE),
                      proj_b=zeros((1, EMBED)),
                      norm_g=ones((1, EMBED)), norm_b=zeros((1, EMBED)))

    T = WINDOW * WINDOW
    rel_idx = _rel_pos_index(WINDOW)                              # static [T, T]

    stages = []
    for cfg in STAGE_CFGS:
        res, dim, heads = cfg['res'], cfg['dim'], cfg['heads']
        nW = (res // WINDOW) ** 2
        hid = MLP_RATIO * dim
        blocks = []
        for shift in cfg['shifts']:
            # relative-position bias precomputed as [heads, T, T] (mask kept
            # separate -> no [heads, nW, T, T] materialization)
            rel_table = nrm(((2 * WINDOW - 1) ** 2, heads), 0.02, jnp.float32)
            rel_bias = rel_table[rel_idx.reshape(-1)].reshape(T, T, heads)
            rel_bias = jnp.transpose(rel_bias, (2, 0, 1)).astype(DTYPE)

            blk = dict(
                norm1_g=ones((1, dim)), norm1_b=zeros((1, dim)),
                # fused QKV weight [dim, 3*dim]: columns = [Wq | Wk | Wv], each
                # head-major, stored bf16
                w_qkv=nrm((dim, 3 * dim), 0.02, W_DTYPE), b_qkv=zeros((1, 3 * dim)),
                w_proj=nrm((dim, dim), 0.02, W_DTYPE), b_proj=zeros((1, dim)),
                rel_bias=rel_bias,
                norm2_g=ones((1, dim)), norm2_b=zeros((1, dim)),
                fc1_w=nrm((dim, hid), 0.02, W_DTYPE), fc1_b=zeros((1, hid)),
                fc2_w=nrm((hid, dim), 0.02, W_DTYPE), fc2_b=zeros((1, dim)),
            )
            if nW > 1 or shift > 0:
                P = _window_perm(res, WINDOW, shift)
                blk['perm'] = jnp.asarray(P, DTYPE)
                blk['perm_t'] = jnp.asarray(P.T, DTYPE)
            if shift > 0:
                blk['mask'] = jnp.asarray(_attn_mask(res, WINDOW, shift), DTYPE)
            blocks.append(blk)
        stage = dict(blocks=blocks)
        if cfg['merge']:
            stage['merge'] = dict(sel=jnp.asarray(_merge_select(res), DTYPE),
                                  norm_g=ones((1, 4 * dim)),
                                  norm_b=zeros((1, 4 * dim)),
                                  red_w=nrm((4 * dim, 2 * dim), 0.02, W_DTYPE))
        stages.append(stage)
    p['stages'] = stages

    dim = FINAL_DIM
    p['final_norm'] = dict(g=ones((1, dim)), b=zeros((1, dim)))

    # ClassBlock(input_dim=dim, class_num, droprate=0.5, linear=LINEAR_NUM)
    bn_g = ones((1, LINEAR_NUM)) + nrm((1, LINEAR_NUM), 0.02)     # normal(1, .02)
    bn_b = zeros((1, LINEAR_NUM))
    bn_rm = zeros((1, LINEAR_NUM))
    bn_rv = ones((1, LINEAR_NUM))
    bn_scale = bn_g * jax.lax.rsqrt(bn_rv + BN_EPS)               # eval-mode fold
    bn_shift = bn_b - bn_rm * bn_scale
    p['classifier'] = dict(
        add_w=nrm((dim, LINEAR_NUM), (2.0 / LINEAR_NUM) ** 0.5),  # kaiming fan_out
        add_b=zeros((1, LINEAR_NUM)),
        bn_scale=bn_scale, bn_shift=bn_shift,
        cls_w=nrm((LINEAR_NUM, NUM_CLASSES), 0.001),
        cls_b=zeros((1, NUM_CLASSES)),
    )
    return p


if __name__ == "__main__":
    key = jax.random.PRNGKey(0)
    pkey, xkey = jax.random.split(key)
    params = init_params(pkey)
    x = jax.random.normal(xkey, (2, IN_CH, IMG, IMG), DTYPE)      # NCHW, like PyTorch
    out = ft_net_swin_forward(x, params)
    out = jax.block_until_ready(out)
    assert out.shape == (2, NUM_CLASSES), out.shape
    assert bool(jnp.all(jnp.isfinite(out)))
    print("KERNEL_OK")
</pallas_src>

<mosaic_0001>
module attributes {stable_mosaic.version = 11 : i64} {
  func.func @kernel(%arg0: i32, %arg1: memref<1x64x48xf32, #tpu.memory_space<vmem>>, %arg2: memref<1x32xf32, #tpu.memory_space<vmem>>, %arg3: memref<64x32xf32, #tpu.memory_space<vmem>>, %arg4: memref<1x32xf32, #tpu.memory_space<vmem>>, %arg5: memref<1x32xf32, #tpu.memory_space<vmem>>, %arg6: memref<1x10xf32, #tpu.memory_space<vmem>>, %arg7: memref<32x10xf32, #tpu.memory_space<vmem>>, %arg8: memref<1x64xf32, #tpu.memory_space<vmem>>, %arg9: memref<1x64xf32, #tpu.memory_space<vmem>>, %arg10: memref<1x32xf32, #tpu.memory_space<vmem>>, %arg11: memref<1x32xf32, #tpu.memory_space<vmem>>, %arg12: memref<1x32xf32, #tpu.memory_space<vmem>>, %arg13: memref<48x32xbf16, #tpu.memory_space<vmem>>, %arg14: memref<1x32xf32, #tpu.memory_space<vmem>>, %arg15: memref<1x96xf32, #tpu.memory_space<vmem>>, %arg16: memref<1x128xf32, #tpu.memory_space<vmem>>, %arg17: memref<32x128xbf16, #tpu.memory_space<vmem>>, %arg18: memref<1x32xf32, #tpu.memory_space<vmem>>, %arg19: memref<128x32xbf16, #tpu.memory_space<vmem>>, %arg20: memref<1x32xf32, #tpu.memory_space<vmem>>, %arg21: memref<1x32xf32, #tpu.memory_space<vmem>>, %arg22: memref<1x32xf32, #tpu.memory_space<vmem>>, %arg23: memref<1x32xf32, #tpu.memory_space<vmem>>, %arg24: memref<64x64xf32, #tpu.memory_space<vmem>>, %arg25: memref<64x64xf32, #tpu.memory_space<vmem>>, %arg26: memref<2x16x16xf32, #tpu.memory_space<vmem>>, %arg27: memref<32x32xbf16, #tpu.memory_space<vmem>>, %arg28: memref<32x96xbf16, #tpu.memory_space<vmem>>, %arg29: memref<1x32xf32, #tpu.memory_space<vmem>>, %arg30: memref<1x96xf32, #tpu.memory_space<vmem>>, %arg31: memref<1x128xf32, #tpu.memory_space<vmem>>, %arg32: memref<32x128xbf16, #tpu.memory_space<vmem>>, %arg33: memref<1x32xf32, #tpu.memory_space<vmem>>, %arg34: memref<128x32xbf16, #tpu.memory_space<vmem>>, %arg35: memref<4x16x16xf32, #tpu.memory_space<vmem>>, %arg36: memref<1x32xf32, #tpu.memory_space<vmem>>, %arg37: memref<1x32xf32, #tpu.memory_space<vmem>>, %arg38: memref<1x32xf32, #tpu.memory_space<vmem>>, %arg39: memref<1x32xf32, #tpu.memory_space<vmem>>, %arg40: memref<64x64xf32, #tpu.memory_space<vmem>>, %arg41: memref<64x64xf32, #tpu.memory_space<vmem>>, %arg42: memref<2x16x16xf32, #tpu.memory_space<vmem>>, %arg43: memref<32x32xbf16, #tpu.memory_space<vmem>>, %arg44: memref<32x96xbf16, #tpu.memory_space<vmem>>, %arg45: memref<1x128xf32, #tpu.memory_space<vmem>>, %arg46: memref<1x128xf32, #tpu.memory_space<vmem>>, %arg47: memref<128x64xbf16, #tpu.memory_space<vmem>>, %arg48: memref<4x16x64xf32, #tpu.memory_space<vmem>>, %arg49: memref<1x64xf32, #tpu.memory_space<vmem>>, %arg50: memref<1x192xf32, #tpu.memory_space<vmem>>, %arg51: memref<1x256xf32, #tpu.memory_space<vmem>>, %arg52: memref<64x256xbf16, #tpu.memory_space<vmem>>, %arg53: memref<1x64xf32, #tpu.memory_space<vmem>>, %arg54: memref<256x64xbf16, #tpu.memory_space<vmem>>, %arg55: memref<1x64xf32, #tpu.memory_space<vmem>>, %arg56: memref<1x64xf32, #tpu.memory_space<vmem>>, %arg57: memref<1x64xf32, #tpu.memory_space<vmem>>, %arg58: memref<1x64xf32, #tpu.memory_space<vmem>>, %arg59: memref<4x16x16xf32, #tpu.memory_space<vmem>>, %arg60: memref<64x64xbf16, #tpu.memory_space<vmem>>, %arg61: memref<64x192xbf16, #tpu.memory_space<vmem>>, %arg62: memref<1x64xf32, #tpu.memory_space<vmem>>, %arg63: memref<1x192xf32, #tpu.memory_space<vmem>>, %arg64: memref<1x256xf32, #tpu.memory_space<vmem>>, %arg65: memref<64x256xbf16, #tpu.memory_space<vmem>>, %arg66: memref<1x64xf32, #tpu.memory_space<vmem>>, %arg67: memref<256x64xbf16, #tpu.memory_space<vmem>>, %arg68: memref<1x64xf32, #tpu.memory_space<vmem>>, %arg69: memref<1x64xf32, #tpu.memory_space<vmem>>, %arg70: memref<1x64xf32, #tpu.memory_space<vmem>>, %arg71: memref<1x64xf32, #tpu.memory_space<vmem>>, %arg72: memref<4x16x16xf32, #tpu.memory_space<vmem>>, %arg73: memref<64x64xbf16, #tpu.memory_space<vmem>>, %arg74: memref<64x192xbf16, #tpu.memory_space<vmem>>, %arg75: memref<1x1x10xf32, #tpu.memory_space<vmem>>) attributes {dimension_semantics = [#tpu.dimension_semantics<parallel>], iteration_bounds = array<i64: 2>, scalar_prefetch = 0 : i64, scratch_operands = 0 : i64, tpu.core_type = #tpu.core_type<tc>, window_params = [{transform_indices = @transform_0, window_bounds = array<i64: 1, 64, 48>}, {pipeline_mode = #tpu.pipeline_mode<synchronous>, transform_indices = @transform_1, window_bounds = array<i64: 1, 32>}, {pipeline_mode = #tpu.pipeline_mode<synchronous>, transform_indices = @transform_2, window_bounds = array<i64: 64, 32>}, {pipeline_mode = #tpu.pipeline_mode<synchronous>, transform_indices = @transform_3, window_bounds = array<i64: 1, 32>}, {pipeline_mode = #tpu.pipeline_mode<synchronous>, transform_indices = @transform_4, window_bounds = array<i64: 1, 32>}, {pipeline_mode = #tpu.pipeline_mode<synchronous>, transform_indices = @transform_5, window_bounds = array<i64: 1, 10>}, {pipeline_mode = #tpu.pipeline_mode<synchronous>, transform_indices = @transform_6, window_bounds = array<i64: 32, 10>}, {pipeline_mode = #tpu.pipeline_mode<synchronous>, transform_indices = @transform_7, window_bounds = array<i64: 1, 64>}, {pipeline_mode = #tpu.pipeline_mode<synchronous>, transform_indices = @transform_8, window_bounds = array<i64: 1, 64>}, {pipeline_mode = #tpu.pipeline_mode<synchronous>, transform_indices = @transform_9, window_bounds = array<i64: 1, 32>}, {pipeline_mode = #tpu.pipeline_mode<synchronous>, transform_indices = @transform_10, window_bounds = array<i64: 1, 32>}, {pipeline_mode = #tpu.pipeline_mode<synchronous>, transform_indices = @transform_11, window_bounds = array<i64: 1, 32>}, {pipeline_mode = #tpu.pipeline_mode<synchronous>, transform_indices = @transform_12, window_bounds = array<i64: 48, 32>}, {pipeline_mode = #tpu.pipeline_mode<synchronous>, transform_indices = @transform_13, window_bounds = array<i64: 1, 32>}, {pipeline_mode = #tpu.pipeline_mode<synchronous>, transform_indices = @transform_14, window_bounds = array<i64: 1, 96>}, {pipeline_mode = #tpu.pipeline_mode<synchronous>, transform_indices = @transform_15, window_bounds = array<i64: 1, 128>}, {pipeline_mode = #tpu.pipeline_mode<synchronous>, transform_indices = @transform_16, window_bounds = array<i64: 32, 128>}, {pipeline_mode = #tpu.pipeline_mode<synchronous>, transform_indices = @transform_17, window_bounds = array<i64: 1, 32>}, {pipeline_mode = #tpu.pipeline_mode<synchronous>, transform_indices = @transform_18, window_bounds = array<i64: 128, 32>}, {pipeline_mode = #tpu.pipeline_mode<synchronous>, transform_indices = @transform_19, window_bounds = array<i64: 1, 32>}, {pipeline_mode = #tpu.pipeline_mode<synchronous>, transform_indices = @transform_20, window_bounds = array<i64: 1, 32>}, {pipeline_mode = #tpu.pipeline_mode<synchronous>, transform_indices = @transform_21, window_bounds = array<i64: 1, 32>}, {pipeline_mode = #tpu.pipeline_mode<synchronous>, transform_indices = @transform_22, window_bounds = array<i64: 1, 32>}, {pipeline_mode = #tpu.pipeline_mode<synchronous>, transform_indices = @transform_23, window_bounds = array<i64: 64, 64>}, {pipeline_mode = #tpu.pipeline_mode<synchronous>, transform_indices = @transform_24, window_bounds = array<i64: 64, 64>}, {pipeline_mode = #tpu.pipeline_mode<synchronous>, transform_indices = @transform_25, window_bounds = array<i64: 2, 16, 16>}, {pipeline_mode = #tpu.pipeline_mode<synchronous>, transform_indices = @transform_26, window_bounds = array<i64: 32, 32>}, {pipeline_mode = #tpu.pipeline_mode<synchronous>, transform_indices = @transform_27, window_bounds = array<i64: 32, 96>}, {pipeline_mode = #tpu.pipeline_mode<synchronous>, transform_indices = @transform_28, window_bounds = array<i64: 1, 32>}, {pipeline_mode = #tpu.pipeline_mode<synchronous>, transform_indices = @transform_29, window_bounds = array<i64: 1, 96>}, {pipeline_mode = #tpu.pipeline_mode<synchronous>, transform_indices = @transform_30, window_bounds = array<i64: 1, 128>}, {pipeline_mode = #tpu.pipeline_mode<synchronous>, transform_indices = @transform_31, window_bounds = array<i64: 32, 128>}, {pipeline_mode = #tpu.pipeline_mode<synchronous>, transform_indices = @transform_32, window_bounds = array<i64: 1, 32>}, {pipeline_mode = #tpu.pipeline_mode<synchronous>, transform_indices = @transform_33, window_bounds = array<i64: 128, 32>}, {pipeline_mode = #tpu.pipeline_mode<synchronous>, transform_indices = @transform_34, window_bounds = array<i64: 4, 16, 16>}, {pipeline_mode = #tpu.pipeline_mode<synchronous>, transform_indices = @transform_35, window_bounds = array<i64: 1, 32>}, {pipeline_mode = #tpu.pipeline_mode<synchronous>, transform_indices = @transform_36, window_bounds = array<i64: 1, 32>}, {pipeline_mode = #tpu.pipeline_mode<synchronous>, transform_indices = @transform_37, window_bounds = array<i64: 1, 32>}, {pipeline_mode = #tpu.pipeline_mode<synchronous>, transform_indices = @transform_38, window_bounds = array<i64: 1, 32>}, {pipeline_mode = #tpu.pipeline_mode<synchronous>, transform_indices = @transform_39, window_bounds = array<i64: 64, 64>}, {pipeline_mode = #tpu.pipeline_mode<synchronous>, transform_indices = @transform_40, window_bounds = array<i64: 64, 64>}, {pipeline_mode = #tpu.pipeline_mode<synchronous>, transform_indices = @transform_41, window_bounds = array<i64: 2, 16, 16>}, {pipeline_mode = #tpu.pipeline_mode<synchronous>, transform_indices = @transform_42, window_bounds = array<i64: 32, 32>}, {pipeline_mode = #tpu.pipeline_mode<synchronous>, transform_indices = @transform_43, window_bounds = array<i64: 32, 96>}, {pipeline_mode = #tpu.pipeline_mode<synchronous>, transform_indices = @transform_44, window_bounds = array<i64: 1, 128>}, {pipeline_mode = #tpu.pipeline_mode<synchronous>, transform_indices = @transform_45, window_bounds = array<i64: 1, 128>}, {pipeline_mode = #tpu.pipeline_mode<synchronous>, transform_indices = @transform_46, window_bounds = array<i64: 128, 64>}, {pipeline_mode = #tpu.pipeline_mode<synchronous>, transform_indices = @transform_47, window_bounds = array<i64: 4, 16, 64>}, {pipeline_mode = #tpu.pipeline_mode<synchronous>, transform_indices = @transform_48, window_bounds = array<i64: 1, 64>}, {pipeline_mode = #tpu.pipeline_mode<synchronous>, transform_indices = @transform_49, window_bounds = array<i64: 1, 192>}, {pipeline_mode = #tpu.pipeline_mode<synchronous>, transform_indices = @transform_50, window_bounds = array<i64: 1, 256>}, {pipeline_mode = #tpu.pipeline_mode<synchronous>, transform_indices = @transform_51, window_bounds = array<i64: 64, 256>}, {pipeline_mode = #tpu.pipeline_mode<synchronous>, transform_indices = @transform_52, window_bounds = array<i64: 1, 64>}, {pipeline_mode = #tpu.pipeline_mode<synchronous>, transform_indices = @transform_53, window_bounds = array<i64: 256, 64>}, {pipeline_mode = #tpu.pipeline_mode<synchronous>, transform_indices = @transform_54, window_bounds = array<i64: 1, 64>}, {pipeline_mode = #tpu.pipeline_mode<synchronous>, transform_indices = @transform_55, window_bounds = array<i64: 1, 64>}, {pipeline_mode = #tpu.pipeline_mode<synchronous>, transform_indices = @transform_56, window_bounds = array<i64: 1, 64>}, {pipeline_mode = #tpu.pipeline_mode<synchronous>, transform_indices = @transform_57, window_bounds = array<i64: 1, 64>}, {pipeline_mode = #tpu.pipeline_mode<synchronous>, transform_indices = @transform_58, window_bounds = array<i64: 4, 16, 16>}, {pipeline_mode = #tpu.pipeline_mode<synchronous>, transform_indices = @transform_59, window_bounds = array<i64: 64, 64>}, {pipeline_mode = #tpu.pipeline_mode<synchronous>, transform_indices = @transform_60, window_bounds = array<i64: 64, 192>}, {pipeline_mode = #tpu.pipeline_mode<synchronous>, transform_indices = @transform_61, window_bounds = array<i64: 1, 64>}, {pipeline_mode = #tpu.pipeline_mode<synchronous>, transform_indices = @transform_62, window_bounds = array<i64: 1, 192>}, {pipeline_mode = #tpu.pipeline_mode<synchronous>, transform_indices = @transform_63, window_bounds = array<i64: 1, 256>}, {pipeline_mode = #tpu.pipeline_mode<synchronous>, transform_indices = @transform_64, window_bounds = array<i64: 64, 256>}, {pipeline_mode = #tpu.pipeline_mode<synchronous>, transform_indices = @transform_65, window_bounds = array<i64: 1, 64>}, {pipeline_mode = #tpu.pipeline_mode<synchronous>, transform_indices = @transform_66, window_bounds = array<i64: 256, 64>}, {pipeline_mode = #tpu.pipeline_mode<synchronous>, transform_indices = @transform_67, window_bounds = array<i64: 1, 64>}, {pipeline_mode = #tpu.pipeline_mode<synchronous>, transform_indices = @transform_68, window_bounds = array<i64: 1, 64>}, {pipeline_mode = #tpu.pipeline_mode<synchronous>, transform_indices = @transform_69, window_bounds = array<i64: 1, 64>}, {pipeline_mode = #tpu.pipeline_mode<synchronous>, transform_indices = @transform_70, window_bounds = array<i64: 1, 64>}, {pipeline_mode = #tpu.pipeline_mode<synchronous>, transform_indices = @transform_71, window_bounds = array<i64: 4, 16, 16>}, {pipeline_mode = #tpu.pipeline_mode<synchronous>, transform_indices = @transform_72, window_bounds = array<i64: 64, 64>}, {pipeline_mode = #tpu.pipeline_mode<synchronous>, transform_indices = @transform_73, window_bounds = array<i64: 64, 192>}, {transform_indices = @transform_74, window_bounds = array<i64: 1, 1, 10>}]} {
    %c0 = arith.constant 0 : index
    %c0_0 = arith.constant 0 : index
    %c0_1 = arith.constant 0 : index
    %0 = vector.load %arg1[%c0, %c0_0, %c0_1] : memref<1x64x48xf32, #tpu.memory_space<vmem>>, vector<1x64x48xf32>
    %1 = vector.shape_cast %0 : vector<1x64x48xf32> to vector<64x48xf32>
    %2 = arith.truncf %1 : vector<64x48xf32> to vector<64x48xbf16>
    %c0_2 = arith.constant 0 : index
    %c0_3 = arith.constant 0 : index
    %3 = vector.load %arg13[%c0_2, %c0_3] : memref<48x32xbf16, #tpu.memory_space<vmem>>, vector<48x32xbf16>
    %cst = arith.constant dense<0.000000e+00> : vector<64x32xf32>
    %4 = tpu.matmul %2, %3, %cst {dimension_numbers = #tpu.dot_dimension_numbers<[1], [0], [0], [1], [0, 0, 1, 1], [], []>} : vector<64x48xbf16>, vector<48x32xbf16>, vector<64x32xf32> -> vector<64x32xf32>
    %c0_4 = arith.constant 0 : index
    %c0_5 = arith.constant 0 : index
    %5 = vector.load %arg12[%c0_4, %c0_5] : memref<1x32xf32, #tpu.memory_space<vmem>>, vector<1x32xf32>
    %6 = vector.broadcast %5 : vector<1x32xf32> to vector<64x32xf32>
    %7 = arith.addf %4, %6 : vector<64x32xf32>
    %c0_6 = arith.constant 0 : index
    %c0_7 = arith.constant 0 : index
    %8 = vector.load %arg11[%c0_6, %c0_7] : memref<1x32xf32, #tpu.memory_space<vmem>>, vector<1x32xf32>
    %c0_8 = arith.constant 0 : index
    %c0_9 = arith.constant 0 : index
    %9 = vector.load %arg10[%c0_8, %c0_9] : memref<1x32xf32, #tpu.memory_space<vmem>>, vector<1x32xf32>
    %cst_10 = arith.constant dense<0.000000e+00> : vector<64xf32>
    %10 = vector.multi_reduction <add>, %7, %cst_10 [1] : vector<64x32xf32> to vector<64xf32>
    %11 = vector.shape_cast %10 : vector<64xf32> to vector<64x1xf32>
    %cst_11 = arith.constant 3.200000e+01 : f32
    %12 = vector.broadcast %cst_11 : f32 to vector<64x1xf32>
    %13 = arith.divf %11, %12 : vector<64x1xf32>
    %14 = vector.broadcast %13 : vector<64x1xf32> to vector<64x32xf32>
    %15 = arith.subf %7, %14 : vector<64x32xf32>
    %16 = arith.mulf %15, %15 : vector<64x32xf32>
    %cst_12 = arith.constant dense<0.000000e+00> : vector<64xf32>
    %17 = vector.multi_reduction <add>, %16, %cst_12 [1] : vector<64x32xf32> to vector<64xf32>
    %18 = vector.shape_cast %17 : vector<64xf32> to vector<64x1xf32>
    %cst_13 = arith.constant 3.200000e+01 : f32
    %19 = vector.broadcast %cst_13 : f32 to vector<64x1xf32>
    %20 = arith.divf %18, %19 : vector<64x1xf32>
    %21 = vector.broadcast %13 : vector<64x1xf32> to vector<64x32xf32>
    %22 = arith.subf %7, %21 : vector<64x32xf32>
    %cst_14 = arith.constant 9.99999974E-6 : f32
    %23 = vector.broadcast %cst_14 : f32 to vector<64x1xf32>
    %24 = arith.addf %20, %23 : vector<64x1xf32>
    %25 = math.rsqrt %24 : vector<64x1xf32>
    %26 = vector.broadcast %25 : vector<64x1xf32> to vector<64x32xf32>
    %27 = arith.mulf %22, %26 : vector<64x32xf32>
    %28 = vector.broadcast %8 : vector<1x32xf32> to vector<64x32xf32>
    %29 = arith.mulf %27, %28 : vector<64x32xf32>
    %30 = vector.broadcast %9 : vector<1x32xf32> to vector<64x32xf32>
    %31 = arith.addf %29, %30 : vector<64x32xf32>
    %c0_15 = arith.constant 0 : index
    %c0_16 = arith.constant 0 : index
    %32 = vector.load %arg21[%c0_15, %c0_16] : memref<1x32xf32, #tpu.memory_space<vmem>>, vector<1x32xf32>
    %c0_17 = arith.constant 0 : index
    %c0_18 = arith.constant 0 : index
    %33 = vector.load %arg20[%c0_17, %c0_18] : memref<1x32xf32, #tpu.memory_space<vmem>>, vector<1x32xf32>
    %cst_19 = arith.constant dense<0.000000e+00> : vector<64xf32>
    %34 = vector.multi_reduction <add>, %31, %cst_19 [1] : vector<64x32xf32> to vector<64xf32>
    %35 = vector.shape_cast %34 : vector<64xf32> to vector<64x1xf32>
    %cst_20 = arith.constant 3.200000e+01 : f32
    %36 = vector.broadcast %cst_20 : f32 to vector<64x1xf32>
    %37 = arith.divf %35, %36 : vector<64x1xf32>
    %38 = vector.broadcast %37 : vector<64x1xf32> to vector<64x32xf32>
    %39 = arith.subf %31, %38 : vector<64x32xf32>
    %40 = arith.mulf %39, %39 : vector<64x32xf32>
    %cst_21 = arith.constant dense<0.000000e+00> : vector<64xf32>
    %41 = vector.multi_reduction <add>, %40, %cst_21 [1] : vector<64x32xf32> to vector<64xf32>
    %42 = vector.shape_cast %41 : vector<64xf32> to vector<64x1xf32>
    %cst_22 = arith.constant 3.200000e+01 : f32
    %43 = vector.broadcast %cst_22 : f32 to vector<64x1xf32>
    %44 = arith.divf %42, %43 : vector<64x1xf32>
    %45 = vector.broadcast %37 : vector<64x1xf32> to vector<64x32xf32>
    %46 = arith.subf %31, %45 : vector<64x32xf32>
    %cst_23 = arith.constant 9.99999974E-6 : f32
    %47 = vector.broadcast %cst_23 : f32 to vector<64x1xf32>
    %48 = arith.addf %44, %47 : vector<64x1xf32>
    %49 = math.rsqrt %48 : vector<64x1xf32>
    %50 = vector.broadcast %49 : vector<64x1xf32> to vector<64x32xf32>
    %51 = arith.mulf %46, %50 : vector<64x32xf32>
    %52 = vector.broadcast %32 : vector<1x32xf32> to vector<64x32xf32>
    %53 = arith.mulf %51, %52 : vector<64x32xf32>
    %54 = vector.broadcast %33 : vector<1x32xf32> to vector<64x32xf32>
    %55 = arith.addf %53, %54 : vector<64x32xf32>
    %c0_24 = arith.constant 0 : index
    %c0_25 = arith.constant 0 : index
    %56 = vector.load %arg24[%c0_24, %c0_25] : memref<64x64xf32, #tpu.memory_space<vmem>>, vector<64x64xf32>
    %cst_26 = arith.constant dense<0.000000e+00> : vector<64x32xf32>
    %57 = tpu.matmul %56, %55, %cst_26 {dimension_numbers = #tpu.dot_dimension_numbers<[1], [0], [0], [1], [0, 0, 1, 1], [], []>} : vector<64x64xf32>, vector<64x32xf32>, vector<64x32xf32> -> vector<64x32xf32>
    %58 = arith.truncf %57 : vector<64x32xf32> to vector<64x32xbf16>
    %c0_27 = arith.constant 0 : index
    %c0_28 = arith.constant 0 : index
    %59 = vector.load %arg28[%c0_27, %c0_28] : memref<32x96xbf16, #tpu.memory_space<vmem>>, vector<32x96xbf16>
    %cst_29 = arith.constant dense<0.000000e+00> : vector<64x96xf32>
    %60 = tpu.matmul %58, %59, %cst_29 {dimension_numbers = #tpu.dot_dimension_numbers<[1], [0], [0], [1], [0, 0, 1, 1], [], []>} : vector<64x32xbf16>, vector<32x96xbf16>, vector<64x96xf32> -> vector<64x96xf32>
    %c0_30 = arith.constant 0 : index
    %c0_31 = arith.constant 0 : index
    %61 = vector.load %arg15[%c0_30, %c0_31] : memref<1x96xf32, #tpu.memory_space<vmem>>, vector<1x96xf32>
    %62 = vector.broadcast %61 : vector<1x96xf32> to vector<64x96xf32>
    %63 = arith.addf %60, %62 : vector<64x96xf32>
    %c0_32 = arith.constant 0 : index
    %c0_33 = arith.constant 0 : index
    %c0_34 = arith.constant 0 : index
    %64 = vector.load %arg26[%c0_32, %c0_33, %c0_34] : memref<2x16x16xf32, #tpu.memory_space<vmem>>, vector<2x16x16xf32>
    %65 = vector.extract_strided_slice %63 {offsets = [0, 0], sizes = [64, 16], strides = [1, 1]} : vector<64x96xf32> to vector<64x16xf32>
    %cst_35 = arith.constant 2.500000e-01 : f32
    %66 = vector.broadcast %cst_35 : f32 to vector<64x16xf32>
    %67 = arith.mulf %65, %66 : vector<64x16xf32>
    %68 = vector.extract_strided_slice %63 {offsets = [0, 32], sizes = [64, 16], strides = [1, 1]} : vector<64x96xf32> to vector<64x16xf32>
    %69 = vector.extract_strided_slice %63 {offsets = [0, 64], sizes = [64, 16], strides = [1, 1]} : vector<64x96xf32> to vector<64x16xf32>
    %70 = vector.shape_cast %67 : vector<64x16xf32> to vector<4x16x16xf32>
    %71 = vector.shape_cast %68 : vector<64x16xf32> to vector<4x16x16xf32>
    %72 = vector.shape_cast %69 : vector<64x16xf32> to vector<4x16x16xf32>
    "tpu.trace_start"() <{level = 10 : i32, message = "wtd,wsd->wts"}> : () -> ()
    %cst_36 = arith.constant dense<0.000000e+00> : vector<4x16x16xf32>
    %73 = tpu.matmul %70, %71, %cst_36 {dimension_numbers = #tpu.dot_dimension_numbers<[2], [2], [1], [1], [0, 0, 0, 1, 1, 1], [0], [0]>} : vector<4x16x16xf32>, vector<4x16x16xf32>, vector<4x16x16xf32> -> vector<4x16x16xf32>
    "tpu.trace_stop"() : () -> ()
    %74 = vector.extract_strided_slice %64 {offsets = [0, 0, 0], sizes = [1, 16, 16], strides = [1, 1, 1]} : vector<2x16x16xf32> to vector<1x16x16xf32>
    %75 = vector.shape_cast %74 : vector<1x16x16xf32> to vector<16x16xf32>
    %76 = vector.shape_cast %75 : vector<16x16xf32> to vector<1x16x16xf32>
    %77 = vector.broadcast %76 : vector<1x16x16xf32> to vector<4x16x16xf32>
    %78 = arith.addf %73, %77 : vector<4x16x16xf32>
    %cst_37 = arith.constant dense<0xFF800000> : vector<4x16xf32>
    %79 = vector.multi_reduction <maximumf>, %78, %cst_37 [2] : vector<4x16x16xf32> to vector<4x16xf32>
    %80 = vector.shape_cast %79 : vector<4x16xf32> to vector<4x16x1xf32>
    %81 = vector.broadcast %80 : vector<4x16x1xf32> to vector<4x16x16xf32>
    %82 = arith.subf %78, %81 : vector<4x16x16xf32>
    %83 = math.exp %82 : vector<4x16x16xf32>
    %cst_38 = arith.constant dense<0.000000e+00> : vector<4x16xf32>
    %84 = vector.multi_reduction <add>, %83, %cst_38 [2] : vector<4x16x16xf32> to vector<4x16xf32>
    %85 = vector.shape_cast %84 : vector<4x16xf32> to vector<4x16x1xf32>
    %86 = tpu.reciprocal %85 {approx = true} : vector<4x16x1xf32> -> vector<4x16x1xf32>
    %87 = vector.broadcast %86 : vector<4x16x1xf32> to vector<4x16x16xf32>
    %88 = arith.mulf %83, %87 : vector<4x16x16xf32>
    %89 = arith.truncf %88 : vector<4x16x16xf32> to vector<4x16x16xbf16>
    %90 = arith.truncf %72 : vector<4x16x16xf32> to vector<4x16x16xbf16>
    "tpu.trace_start"() <{level = 10 : i32, message = "wts,wsd->wtd"}> : () -> ()
    %cst_39 = arith.constant dense<0.000000e+00> : vector<4x16x16xf32>
    %91 = tpu.matmul %89, %90, %cst_39 {dimension_numbers = #tpu.dot_dimension_numbers<[2], [1], [1], [2], [0, 0, 0, 1, 1, 2], [0], [0]>} : vector<4x16x16xbf16>, vector<4x16x16xbf16>, vector<4x16x16xf32> -> vector<4x16x16xf32>
    "tpu.trace_stop"() : () -> ()
    %92 = vector.shape_cast %91 : vector<4x16x16xf32> to vector<64x16xf32>
    %93 = vector.extract_strided_slice %63 {offsets = [0, 16], sizes = [64, 16], strides = [1, 1]} : vector<64x96xf32> to vector<64x16xf32>
    %cst_40 = arith.constant 2.500000e-01 : f32
    %94 = vector.broadcast %cst_40 : f32 to vector<64x16xf32>
    %95 = arith.mulf %93, %94 : vector<64x16xf32>
    %96 = vector.extract_strided_slice %63 {offsets = [0, 48], sizes = [64, 16], strides = [1, 1]} : vector<64x96xf32> to vector<64x16xf32>
    %97 = vector.extract_strided_slice %63 {offsets = [0, 80], sizes = [64, 16], strides = [1, 1]} : vector<64x96xf32> to vector<64x16xf32>
    %98 = vector.shape_cast %95 : vector<64x16xf32> to vector<4x16x16xf32>
    %99 = vector.shape_cast %96 : vector<64x16xf32> to vector<4x16x16xf32>
    %100 = vector.shape_cast %97 : vector<64x16xf32> to vector<4x16x16xf32>
    "tpu.trace_start"() <{level = 10 : i32, message = "wtd,wsd->wts"}> : () -> ()
    %cst_41 = arith.constant dense<0.000000e+00> : vector<4x16x16xf32>
    %101 = tpu.matmul %98, %99, %cst_41 {dimension_numbers = #tpu.dot_dimension_numbers<[2], [2], [1], [1], [0, 0, 0, 1, 1, 1], [0], [0]>} : vector<4x16x16xf32>, vector<4x16x16xf32>, vector<4x16x16xf32> -> vector<4x16x16xf32>
    "tpu.trace_stop"() : () -> ()
    %102 = vector.extract_strided_slice %64 {offsets = [1, 0, 0], sizes = [1, 16, 16], strides = [1, 1, 1]} : vector<2x16x16xf32> to vector<1x16x16xf32>
    %103 = vector.shape_cast %102 : vector<1x16x16xf32> to vector<16x16xf32>
    %104 = vector.shape_cast %103 : vector<16x16xf32> to vector<1x16x16xf32>
    %105 = vector.broadcast %104 : vector<1x16x16xf32> to vector<4x16x16xf32>
    %106 = arith.addf %101, %105 : vector<4x16x16xf32>
    %cst_42 = arith.constant dense<0xFF800000> : vector<4x16xf32>
    %107 = vector.multi_reduction <maximumf>, %106, %cst_42 [2] : vector<4x16x16xf32> to vector<4x16xf32>
    %108 = vector.shape_cast %107 : vector<4x16xf32> to vector<4x16x1xf32>
    %109 = vector.broadcast %108 : vector<4x16x1xf32> to vector<4x16x16xf32>
    %110 = arith.subf %106, %109 : vector<4x16x16xf32>
    %111 = math.exp %110 : vector<4x16x16xf32>
    %cst_43 = arith.constant dense<0.000000e+00> : vector<4x16xf32>
    %112 = vector.multi_reduction <add>, %111, %cst_43 [2] : vector<4x16x16xf32> to vector<4x16xf32>
    %113 = vector.shape_cast %112 : vector<4x16xf32> to vector<4x16x1xf32>
    %114 = tpu.reciprocal %113 {approx = true} : vector<4x16x1xf32> -> vector<4x16x1xf32>
    %115 = vector.broadcast %114 : vector<4x16x1xf32> to vector<4x16x16xf32>
    %116 = arith.mulf %111, %115 : vector<4x16x16xf32>
    %117 = arith.truncf %116 : vector<4x16x16xf32> to vector<4x16x16xbf16>
    %118 = arith.truncf %100 : vector<4x16x16xf32> to vector<4x16x16xbf16>
    "tpu.trace_start"() <{level = 10 : i32, message = "wts,wsd->wtd"}> : () -> ()
    %cst_44 = arith.constant dense<0.000000e+00> : vector<4x16x16xf32>
    %119 = tpu.matmul %117, %118, %cst_44 {dimension_numbers = #tpu.dot_dimension_numbers<[2], [1], [1], [2], [0, 0, 0, 1, 1, 2], [0], [0]>} : vector<4x16x16xbf16>, vector<4x16x16xbf16>, vector<4x16x16xf32> -> vector<4x16x16xf32>
    "tpu.trace_stop"() : () -> ()
    %120 = vector.shape_cast %119 : vector<4x16x16xf32> to vector<64x16xf32>
    %121 = tpu.concatenate %92, %120 in 1 : vector<64x16xf32>, vector<64x16xf32> -> vector<64x32xf32>
    %122 = arith.truncf %121 : vector<64x32xf32> to vector<64x32xbf16>
    %c0_45 = arith.constant 0 : index
    %c0_46 = arith.constant 0 : index
    %123 = vector.load %arg27[%c0_45, %c0_46] : memref<32x32xbf16, #tpu.memory_space<vmem>>, vector<32x32xbf16>
    %cst_47 = arith.constant dense<0.000000e+00> : vector<64x32xf32>
    %124 = tpu.matmul %122, %123, %cst_47 {dimension_numbers = #tpu.dot_dimension_numbers<[1], [0], [0], [1], [0, 0, 1, 1], [], []>} : vector<64x32xbf16>, vector<32x32xbf16>, vector<64x32xf32> -> vector<64x32xf32>
    %c0_48 = arith.constant 0 : index
    %c0_49 = arith.constant 0 : index
    %125 = vector.load %arg25[%c0_48, %c0_49] : memref<64x64xf32, #tpu.memory_space<vmem>>, vector<64x64xf32>
    %cst_50 = arith.constant dense<0.000000e+00> : vector<64x32xf32>
    %126 = tpu.matmul %125, %124, %cst_50 {dimension_numbers = #tpu.dot_dimension_numbers<[1], [0], [0], [1], [0, 0, 1, 1], [], []>} : vector<64x64xf32>, vector<64x32xf32>, vector<64x32xf32> -> vector<64x32xf32>
    %127 = arith.addf %31, %126 : vector<64x32xf32>
    %c0_51 = arith.constant 0 : index
    %c0_52 = arith.constant 0 : index
    %128 = vector.load %arg14[%c0_51, %c0_52] : memref<1x32xf32, #tpu.memory_space<vmem>>, vector<1x32xf32>
    %129 = vector.broadcast %128 : vector<1x32xf32> to vector<64x32xf32>
    %130 = arith.addf %127, %129 : vector<64x32xf32>
    %c0_53 = arith.constant 0 : index
    %c0_54 = arith.constant 0 : index
    %131 = vector.load %arg23[%c0_53, %c0_54] : memref<1x32xf32, #tpu.memory_space<vmem>>, vector<1x32xf32>
    %c0_55 = arith.constant 0 : index
    %c0_56 = arith.constant 0 : index
    %132 = vector.load %arg22[%c0_55, %c0_56] : memref<1x32xf32, #tpu.memory_space<vmem>>, vector<1x32xf32>
    %cst_57 = arith.constant dense<0.000000e+00> : vector<64xf32>
    %133 = vector.multi_reduction <add>, %130, %cst_57 [1] : vector<64x32xf32> to vector<64xf32>
    %134 = vector.shape_cast %133 : vector<64xf32> to vector<64x1xf32>
    %cst_58 = arith.constant 3.200000e+01 : f32
    %135 = vector.broadcast %cst_58 : f32 to vector<64x1xf32>
    %136 = arith.divf %134, %135 : vector<64x1xf32>
    %137 = vector.broadcast %136 : vector<64x1xf32> to vector<64x32xf32>
    %138 = arith.subf %130, %137 : vector<64x32xf32>
    %139 = arith.mulf %138, %138 : vector<64x32xf32>
    %cst_59 = arith.constant dense<0.000000e+00> : vector<64xf32>
    %140 = vector.multi_reduction <add>, %139, %cst_59 [1] : vector<64x32xf32> to vector<64xf32>
    %141 = vector.shape_cast %140 : vector<64xf32> to vector<64x1xf32>
    %cst_60 = arith.constant 3.200000e+01 : f32
    %142 = vector.broadcast %cst_60 : f32 to vector<64x1xf32>
    %143 = arith.divf %141, %142 : vector<64x1xf32>
    %144 = vector.broadcast %136 : vector<64x1xf32> to vector<64x32xf32>
    %145 = arith.subf %130, %144 : vector<64x32xf32>
    %cst_61 = arith.constant 9.99999974E-6 : f32
    %146 = vector.broadcast %cst_61 : f32 to vector<64x1xf32>
    %147 = arith.addf %143, %146 : vector<64x1xf32>
    %148 = math.rsqrt %147 : vector<64x1xf32>
    %149 = vector.broadcast %148 : vector<64x1xf32> to vector<64x32xf32>
    %150 = arith.mulf %145, %149 : vector<64x32xf32>
    %151 = vector.broadcast %131 : vector<1x32xf32> to vector<64x32xf32>
    %152 = arith.mulf %150, %151 : vector<64x32xf32>
    %153 = vector.broadcast %132 : vector<1x32xf32> to vector<64x32xf32>
    %154 = arith.addf %152, %153 : vector<64x32xf32>
    %155 = arith.truncf %154 : vector<64x32xf32> to vector<64x32xbf16>
    %c0_62 = arith.constant 0 : index
    %c0_63 = arith.constant 0 : index
    %156 = vector.load %arg17[%c0_62, %c0_63] : memref<32x128xbf16, #tpu.memory_space<vmem>>, vector<32x128xbf16>
    %cst_64 = arith.constant dense<0.000000e+00> : vector<64x128xf32>
    %157 = tpu.matmul %155, %156, %cst_64 {dimension_numbers = #tpu.dot_dimension_numbers<[1], [0], [0], [1], [0, 0, 1, 1], [], []>} : vector<64x32xbf16>, vector<32x128xbf16>, vector<64x128xf32> -> vector<64x128xf32>
    %c0_65 = arith.constant 0 : index
    %c0_66 = arith.constant 0 : index
    %158 = vector.load %arg16[%c0_65, %c0_66] : memref<1x128xf32, #tpu.memory_space<vmem>>, vector<1x128xf32>
    %159 = vector.broadcast %158 : vector<1x128xf32> to vector<64x128xf32>
    %160 = arith.addf %157, %159 : vector<64x128xf32>
    %161 = arith.mulf %160, %160 : vector<64x128xf32>
    %162 = arith.mulf %160, %161 : vector<64x128xf32>
    %cst_67 = arith.constant 4.471500e-02 : f32
    %163 = vector.broadcast %cst_67 : f32 to vector<64x128xf32>
    %164 = arith.mulf %163, %162 : vector<64x128xf32>
    %165 = arith.addf %160, %164 : vector<64x128xf32>
    %cst_68 = arith.constant 0.797884583 : f32
    %166 = vector.broadcast %cst_68 : f32 to vector<64x128xf32>
    %167 = arith.mulf %166, %165 : vector<64x128xf32>
    %168 = math.tanh %167 : vector<64x128xf32>
    %cst_69 = arith.constant 1.000000e+00 : f32
    %169 = vector.broadcast %cst_69 : f32 to vector<64x128xf32>
    %170 = arith.addf %169, %168 : vector<64x128xf32>
    %cst_70 = arith.constant 5.000000e-01 : f32
    %171 = vector.broadcast %cst_70 : f32 to vector<64x128xf32>
    %172 = arith.mulf %171, %170 : vector<64x128xf32>
    %173 = arith.mulf %160, %172 : vector<64x128xf32>
    %174 = arith.truncf %173 : vector<64x128xf32> to vector<64x128xbf16>
    %c0_71 = arith.constant 0 : index
    %c0_72 = arith.constant 0 : index
    %175 = vector.load %arg19[%c0_71, %c0_72] : memref<128x32xbf16, #tpu.memory_space<vmem>>, vector<128x32xbf16>
    %cst_73 = arith.constant dense<0.000000e+00> : vector<64x32xf32>
    %176 = tpu.matmul %174, %175, %cst_73 {dimension_numbers = #tpu.dot_dimension_numbers<[1], [0], [0], [1], [0, 0, 1, 1], [], []>} : vector<64x128xbf16>, vector<128x32xbf16>, vector<64x32xf32> -> vector<64x32xf32>
    %177 = arith.addf %130, %176 : vector<64x32xf32>
    %c0_74 = arith.constant 0 : index
    %c0_75 = arith.constant 0 : index
    %178 = vector.load %arg18[%c0_74, %c0_75] : memref<1x32xf32, #tpu.memory_space<vmem>>, vector<1x32xf32>
    %179 = vector.broadcast %178 : vector<1x32xf32> to vector<64x32xf32>
    %180 = arith.addf %177, %179 : vector<64x32xf32>
    %c0_76 = arith.constant 0 : index
    %c0_77 = arith.constant 0 : index
    %181 = vector.load %arg37[%c0_76, %c0_77] : memref<1x32xf32, #tpu.memory_space<vmem>>, vector<1x32xf32>
    %c0_78 = arith.constant 0 : index
    %c0_79 = arith.constant 0 : index
    %182 = vector.load %arg36[%c0_78, %c0_79] : memref<1x32xf32, #tpu.memory_space<vmem>>, vector<1x32xf32>
    %cst_80 = arith.constant dense<0.000000e+00> : vector<64xf32>
    %183 = vector.multi_reduction <add>, %180, %cst_80 [1] : vector<64x32xf32> to vector<64xf32>
    %184 = vector.shape_cast %183 : vector<64xf32> to vector<64x1xf32>
    %cst_81 = arith.constant 3.200000e+01 : f32
    %185 = vector.broadcast %cst_81 : f32 to vector<64x1xf32>
    %186 = arith.divf %184, %185 : vector<64x1xf32>
    %187 = vector.broadcast %186 : vector<64x1xf32> to vector<64x32xf32>
    %188 = arith.subf %180, %187 : vector<64x32xf32>
    %189 = arith.mulf %188, %188 : vector<64x32xf32>
    %cst_82 = arith.constant dense<0.000000e+00> : vector<64xf32>
    %190 = vector.multi_reduction <add>, %189, %cst_82 [1] : vector<64x32xf32> to vector<64xf32>
    %191 = vector.shape_cast %190 : vector<64xf32> to vector<64x1xf32>
    %cst_83 = arith.constant 3.200000e+01 : f32
    %192 = vector.broadcast %cst_83 : f32 to vector<64x1xf32>
    %193 = arith.divf %191, %192 : vector<64x1xf32>
    %194 = vector.broadcast %186 : vector<64x1xf32> to vector<64x32xf32>
    %195 = arith.subf %180, %194 : vector<64x32xf32>
    %cst_84 = arith.constant 9.99999974E-6 : f32
    %196 = vector.broadcast %cst_84 : f32 to vector<64x1xf32>
    %197 = arith.addf %193, %196 : vector<64x1xf32>
    %198 = math.rsqrt %197 : vector<64x1xf32>
    %199 = vector.broadcast %198 : vector<64x1xf32> to vector<64x32xf32>
    %200 = arith.mulf %195, %199 : vector<64x32xf32>
    %201 = vector.broadcast %181 : vector<1x32xf32> to vector<64x32xf32>
    %202 = arith.mulf %200, %201 : vector<64x32xf32>
    %203 = vector.broadcast %182 : vector<1x32xf32> to vector<64x32xf32>
    %204 = arith.addf %202, %203 : vector<64x32xf32>
    %c0_85 = arith.constant 0 : index
    %c0_86 = arith.constant 0 : index
    %205 = vector.load %arg40[%c0_85, %c0_86] : memref<64x64xf32, #tpu.memory_space<vmem>>, vector<64x64xf32>
    %cst_87 = arith.constant dense<0.000000e+00> : vector<64x32xf32>
    %206 = tpu.matmul %205, %204, %cst_87 {dimension_numbers = #tpu.dot_dimension_numbers<[1], [0], [0], [1], [0, 0, 1, 1], [], []>} : vector<64x64xf32>, vector<64x32xf32>, vector<64x32xf32> -> vector<64x32xf32>
    %207 = arith.truncf %206 : vector<64x32xf32> to vector<64x32xbf16>
    %c0_88 = arith.constant 0 : index
    %c0_89 = arith.constant 0 : index
    %208 = vector.load %arg44[%c0_88, %c0_89] : memref<32x96xbf16, #tpu.memory_space<vmem>>, vector<32x96xbf16>
    %cst_90 = arith.constant dense<0.000000e+00> : vector<64x96xf32>
    %209 = tpu.matmul %207, %208, %cst_90 {dimension_numbers = #tpu.dot_dimension_numbers<[1], [0], [0], [1], [0, 0, 1, 1], [], []>} : vector<64x32xbf16>, vector<32x96xbf16>, vector<64x96xf32> -> vector<64x96xf32>
    %c0_91 = arith.constant 0 : index
    %c0_92 = arith.constant 0 : index
    %210 = vector.load %arg30[%c0_91, %c0_92] : memref<1x96xf32, #tpu.memory_space<vmem>>, vector<1x96xf32>
    %211 = vector.broadcast %210 : vector<1x96xf32> to vector<64x96xf32>
    %212 = arith.addf %209, %211 : vector<64x96xf32>
    %c0_93 = arith.constant 0 : index
    %c0_94 = arith.constant 0 : index
    %c0_95 = arith.constant 0 : index
    %213 = vector.load %arg42[%c0_93, %c0_94, %c0_95] : memref<2x16x16xf32, #tpu.memory_space<vmem>>, vector<2x16x16xf32>
    %c0_96 = arith.constant 0 : index
    %c0_97 = arith.constant 0 : index
    %c0_98 = arith.constant 0 : index
    %214 = vector.load %arg35[%c0_96, %c0_97, %c0_98] : memref<4x16x16xf32, #tpu.memory_space<vmem>>, vector<4x16x16xf32>
    %215 = vector.extract_strided_slice %212 {offsets = [0, 0], sizes = [64, 16], strides = [1, 1]} : vector<64x96xf32> to vector<64x16xf32>
    %cst_99 = arith.constant 2.500000e-01 : f32
    %216 = vector.broadcast %cst_99 : f32 to vector<64x16xf32>
    %217 = arith.mulf %215, %216 : vector<64x16xf32>
    %218 = vector.extract_strided_slice %212 {offsets = [0, 32], sizes = [64, 16], strides = [1, 1]} : vector<64x96xf32> to vector<64x16xf32>
    %219 = vector.extract_strided_slice %212 {offsets = [0, 64], sizes = [64, 16], strides = [1, 1]} : vector<64x96xf32> to vector<64x16xf32>
    %220 = vector.shape_cast %217 : vector<64x16xf32> to vector<4x16x16xf32>
    %221 = vector.shape_cast %218 : vector<64x16xf32> to vector<4x16x16xf32>
    %222 = vector.shape_cast %219 : vector<64x16xf32> to vector<4x16x16xf32>
    "tpu.trace_start"() <{level = 10 : i32, message = "wtd,wsd->wts"}> : () -> ()
    %cst_100 = arith.constant dense<0.000000e+00> : vector<4x16x16xf32>
    %223 = tpu.matmul %220, %221, %cst_100 {dimension_numbers = #tpu.dot_dimension_numbers<[2], [2], [1], [1], [0, 0, 0, 1, 1, 1], [0], [0]>} : vector<4x16x16xf32>, vector<4x16x16xf32>, vector<4x16x16xf32> -> vector<4x16x16xf32>
    "tpu.trace_stop"() : () -> ()
    %224 = vector.extract_strided_slice %213 {offsets = [0, 0, 0], sizes = [1, 16, 16], strides = [1, 1, 1]} : vector<2x16x16xf32> to vector<1x16x16xf32>
    %225 = vector.shape_cast %224 : vector<1x16x16xf32> to vector<16x16xf32>
    %226 = vector.shape_cast %225 : vector<16x16xf32> to vector<1x16x16xf32>
    %227 = vector.broadcast %226 : vector<1x16x16xf32> to vector<4x16x16xf32>
    %228 = arith.addf %223, %227 : vector<4x16x16xf32>
    %229 = arith.addf %228, %214 : vector<4x16x16xf32>
    %cst_101 = arith.constant dense<0xFF800000> : vector<4x16xf32>
    %230 = vector.multi_reduction <maximumf>, %229, %cst_101 [2] : vector<4x16x16xf32> to vector<4x16xf32>
    %231 = vector.shape_cast %230 : vector<4x16xf32> to vector<4x16x1xf32>
    %232 = vector.broadcast %231 : vector<4x16x1xf32> to vector<4x16x16xf32>
    %233 = arith.subf %229, %232 : vector<4x16x16xf32>
    %234 = math.exp %233 : vector<4x16x16xf32>
    %cst_102 = arith.constant dense<0.000000e+00> : vector<4x16xf32>
    %235 = vector.multi_reduction <add>, %234, %cst_102 [2] : vector<4x16x16xf32> to vector<4x16xf32>
    %236 = vector.shape_cast %235 : vector<4x16xf32> to vector<4x16x1xf32>
    %237 = tpu.reciprocal %236 {approx = true} : vector<4x16x1xf32> -> vector<4x16x1xf32>
    %238 = vector.broadcast %237 : vector<4x16x1xf32> to vector<4x16x16xf32>
    %239 = arith.mulf %234, %238 : vector<4x16x16xf32>
    %240 = arith.truncf %239 : vector<4x16x16xf32> to vector<4x16x16xbf16>
    %241 = arith.truncf %222 : vector<4x16x16xf32> to vector<4x16x16xbf16>
    "tpu.trace_start"() <{level = 10 : i32, message = "wts,wsd->wtd"}> : () -> ()
    %cst_103 = arith.constant dense<0.000000e+00> : vector<4x16x16xf32>
    %242 = tpu.matmul %240, %241, %cst_103 {dimension_numbers = #tpu.dot_dimension_numbers<[2], [1], [1], [2], [0, 0, 0, 1, 1, 2], [0], [0]>} : vector<4x16x16xbf16>, vector<4x16x16xbf16>, vector<4x16x16xf32> -> vector<4x16x16xf32>
    "tpu.trace_stop"() : () -> ()
    %243 = vector.shape_cast %242 : vector<4x16x16xf32> to vector<64x16xf32>
    %244 = vector.extract_strided_slice %212 {offsets = [0, 16], sizes = [64, 16], strides = [1, 1]} : vector<64x96xf32> to vector<64x16xf32>
    %cst_104 = arith.constant 2.500000e-01 : f32
    %245 = vector.broadcast %cst_104 : f32 to vector<64x16xf32>
    %246 = arith.mulf %244, %245 : vector<64x16xf32>
    %247 = vector.extract_strided_slice %212 {offsets = [0, 48], sizes = [64, 16], strides = [1, 1]} : vector<64x96xf32> to vector<64x16xf32>
    %248 = vector.extract_strided_slice %212 {offsets = [0, 80], sizes = [64, 16], strides = [1, 1]} : vector<64x96xf32> to vector<64x16xf32>
    %249 = vector.shape_cast %246 : vector<64x16xf32> to vector<4x16x16xf32>
    %250 = vector.shape_cast %247 : vector<64x16xf32> to vector<4x16x16xf32>
    %251 = vector.shape_cast %248 : vector<64x16xf32> to vector<4x16x16xf32>
    "tpu.trace_start"() <{level = 10 : i32, message = "wtd,wsd->wts"}> : () -> ()
    %cst_105 = arith.constant dense<0.000000e+00> : vector<4x16x16xf32>
    %252 = tpu.matmul %249, %250, %cst_105 {dimension_numbers = #tpu.dot_dimension_numbers<[2], [2], [1], [1], [0, 0, 0, 1, 1, 1], [0], [0]>} : vector<4x16x16xf32>, vector<4x16x16xf32>, vector<4x16x16xf32> -> vector<4x16x16xf32>
    "tpu.trace_stop"() : () -> ()
    %253 = vector.extract_strided_slice %213 {offsets = [1, 0, 0], sizes = [1, 16, 16], strides = [1, 1, 1]} : vector<2x16x16xf32> to vector<1x16x16xf32>
    %254 = vector.shape_cast %253 : vector<1x16x16xf32> to vector<16x16xf32>
    %255 = vector.shape_cast %254 : vector<16x16xf32> to vector<1x16x16xf32>
    %256 = vector.broadcast %255 : vector<1x16x16xf32> to vector<4x16x16xf32>
    %257 = arith.addf %252, %256 : vector<4x16x16xf32>
    %258 = arith.addf %257, %214 : vector<4x16x16xf32>
    %cst_106 = arith.constant dense<0xFF800000> : vector<4x16xf32>
    %259 = vector.multi_reduction <maximumf>, %258, %cst_106 [2] : vector<4x16x16xf32> to vector<4x16xf32>
    %260 = vector.shape_cast %259 : vector<4x16xf32> to vector<4x16x1xf32>
    %261 = vector.broadcast %260 : vector<4x16x1xf32> to vector<4x16x16xf32>
    %262 = arith.subf %258, %261 : vector<4x16x16xf32>
    %263 = math.exp %262 : vector<4x16x16xf32>
    %cst_107 = arith.constant dense<0.000000e+00> : vector<4x16xf32>
    %264 = vector.multi_reduction <add>, %263, %cst_107 [2] : vector<4x16x16xf32> to vector<4x16xf32>
    %265 = vector.shape_cast %264 : vector<4x16xf32> to vector<4x16x1xf32>
    %266 = tpu.reciprocal %265 {approx = true} : vector<4x16x1xf32> -> vector<4x16x1xf32>
    %267 = vector.broadcast %266 : vector<4x16x1xf32> to vector<4x16x16xf32>
    %268 = arith.mulf %263, %267 : vector<4x16x16xf32>
    %269 = arith.truncf %268 : vector<4x16x16xf32> to vector<4x16x16xbf16>
    %270 = arith.truncf %251 : vector<4x16x16xf32> to vector<4x16x16xbf16>
    "tpu.trace_start"() <{level = 10 : i32, message = "wts,wsd->wtd"}> : () -> ()
    %cst_108 = arith.constant dense<0.000000e+00> : vector<4x16x16xf32>
    %271 = tpu.matmul %269, %270, %cst_108 {dimension_numbers = #tpu.dot_dimension_numbers<[2], [1], [1], [2], [0, 0, 0, 1, 1, 2], [0], [0]>} : vector<4x16x16xbf16>, vector<4x16x16xbf16>, vector<4x16x16xf32> -> vector<4x16x16xf32>
    "tpu.trace_stop"() : () -> ()
    %272 = vector.shape_cast %271 : vector<4x16x16xf32> to vector<64x16xf32>
    %273 = tpu.concatenate %243, %272 in 1 : vector<64x16xf32>, vector<64x16xf32> -> vector<64x32xf32>
    %274 = arith.truncf %273 : vector<64x32xf32> to vector<64x32xbf16>
    %c0_109 = arith.constant 0 : index
    %c0_110 = arith.constant 0 : index
    %275 = vector.load %arg43[%c0_109, %c0_110] : memref<32x32xbf16, #tpu.memory_space<vmem>>, vector<32x32xbf16>
    %cst_111 = arith.constant dense<0.000000e+00> : vector<64x32xf32>
    %276 = tpu.matmul %274, %275, %cst_111 {dimension_numbers = #tpu.dot_dimension_numbers<[1], [0], [0], [1], [0, 0, 1, 1], [], []>} : vector<64x32xbf16>, vector<32x32xbf16>, vector<64x32xf32> -> vector<64x32xf32>
    %c0_112 = arith.constant 0 : index
    %c0_113 = arith.constant 0 : index
    %277 = vector.load %arg41[%c0_112, %c0_113] : memref<64x64xf32, #tpu.memory_space<vmem>>, vector<64x64xf32>
    %cst_114 = arith.constant dense<0.000000e+00> : vector<64x32xf32>
    %278 = tpu.matmul %277, %276, %cst_114 {dimension_numbers = #tpu.dot_dimension_numbers<[1], [0], [0], [1], [0, 0, 1, 1], [], []>} : vector<64x64xf32>, vector<64x32xf32>, vector<64x32xf32> -> vector<64x32xf32>
    %279 = arith.addf %180, %278 : vector<64x32xf32>
    %c0_115 = arith.constant 0 : index
    %c0_116 = arith.constant 0 : index
    %280 = vector.load %arg29[%c0_115, %c0_116] : memref<1x32xf32, #tpu.memory_space<vmem>>, vector<1x32xf32>
    %281 = vector.broadcast %280 : vector<1x32xf32> to vector<64x32xf32>
    %282 = arith.addf %279, %281 : vector<64x32xf32>
    %c0_117 = arith.constant 0 : index
    %c0_118 = arith.constant 0 : index
    %283 = vector.load %arg39[%c0_117, %c0_118] : memref<1x32xf32, #tpu.memory_space<vmem>>, vector<1x32xf32>
    %c0_119 = arith.constant 0 : index
    %c0_120 = arith.constant 0 : index
    %284 = vector.load %arg38[%c0_119, %c0_120] : memref<1x32xf32, #tpu.memory_space<vmem>>, vector<1x32xf32>
    %cst_121 = arith.constant dense<0.000000e+00> : vector<64xf32>
    %285 = vector.multi_reduction <add>, %282, %cst_121 [1] : vector<64x32xf32> to vector<64xf32>
    %286 = vector.shape_cast %285 : vector<64xf32> to vector<64x1xf32>
    %cst_122 = arith.constant 3.200000e+01 : f32
    %287 = vector.broadcast %cst_122 : f32 to vector<64x1xf32>
    %288 = arith.divf %286, %287 : vector<64x1xf32>
    %289 = vector.broadcast %288 : vector<64x1xf32> to vector<64x32xf32>
    %290 = arith.subf %282, %289 : vector<64x32xf32>
    %291 = arith.mulf %290, %290 : vector<64x32xf32>
    %cst_123 = arith.constant dense<0.000000e+00> : vector<64xf32>
    %292 = vector.multi_reduction <add>, %291, %cst_123 [1] : vector<64x32xf32> to vector<64xf32>
    %293 = vector.shape_cast %292 : vector<64xf32> to vector<64x1xf32>
    %cst_124 = arith.constant 3.200000e+01 : f32
    %294 = vector.broadcast %cst_124 : f32 to vector<64x1xf32>
    %295 = arith.divf %293, %294 : vector<64x1xf32>
    %296 = vector.broadcast %288 : vector<64x1xf32> to vector<64x32xf32>
    %297 = arith.subf %282, %296 : vector<64x32xf32>
    %cst_125 = arith.constant 9.99999974E-6 : f32
    %298 = vector.broadcast %cst_125 : f32 to vector<64x1xf32>
    %299 = arith.addf %295, %298 : vector<64x1xf32>
    %300 = math.rsqrt %299 : vector<64x1xf32>
    %301 = vector.broadcast %300 : vector<64x1xf32> to vector<64x32xf32>
    %302 = arith.mulf %297, %301 : vector<64x32xf32>
    %303 = vector.broadcast %283 : vector<1x32xf32> to vector<64x32xf32>
    %304 = arith.mulf %302, %303 : vector<64x32xf32>
    %305 = vector.broadcast %284 : vector<1x32xf32> to vector<64x32xf32>
    %306 = arith.addf %304, %305 : vector<64x32xf32>
    %307 = arith.truncf %306 : vector<64x32xf32> to vector<64x32xbf16>
    %c0_126 = arith.constant 0 : index
    %c0_127 = arith.constant 0 : index
    %308 = vector.load %arg32[%c0_126, %c0_127] : memref<32x128xbf16, #tpu.memory_space<vmem>>, vector<32x128xbf16>
    %cst_128 = arith.constant dense<0.000000e+00> : vector<64x128xf32>
    %309 = tpu.matmul %307, %308, %cst_128 {dimension_numbers = #tpu.dot_dimension_numbers<[1], [0], [0], [1], [0, 0, 1, 1], [], []>} : vector<64x32xbf16>, vector<32x128xbf16>, vector<64x128xf32> -> vector<64x128xf32>
    %c0_129 = arith.constant 0 : index
    %c0_130 = arith.constant 0 : index
    %310 = vector.load %arg31[%c0_129, %c0_130] : memref<1x128xf32, #tpu.memory_space<vmem>>, vector<1x128xf32>
    %311 = vector.broadcast %310 : vector<1x128xf32> to vector<64x128xf32>
    %312 = arith.addf %309, %311 : vector<64x128xf32>
    %313 = arith.mulf %312, %312 : vector<64x128xf32>
    %314 = arith.mulf %312, %313 : vector<64x128xf32>
    %cst_131 = arith.constant 4.471500e-02 : f32
    %315 = vector.broadcast %cst_131 : f32 to vector<64x128xf32>
    %316 = arith.mulf %315, %314 : vector<64x128xf32>
    %317 = arith.addf %312, %316 : vector<64x128xf32>
    %cst_132 = arith.constant 0.797884583 : f32
    %318 = vector.broadcast %cst_132 : f32 to vector<64x128xf32>
    %319 = arith.mulf %318, %317 : vector<64x128xf32>
    %320 = math.tanh %319 : vector<64x128xf32>
    %cst_133 = arith.constant 1.000000e+00 : f32
    %321 = vector.broadcast %cst_133 : f32 to vector<64x128xf32>
    %322 = arith.addf %321, %320 : vector<64x128xf32>
    %cst_134 = arith.constant 5.000000e-01 : f32
    %323 = vector.broadcast %cst_134 : f32 to vector<64x128xf32>
    %324 = arith.mulf %323, %322 : vector<64x128xf32>
    %325 = arith.mulf %312, %324 : vector<64x128xf32>
    %326 = arith.truncf %325 : vector<64x128xf32> to vector<64x128xbf16>
    %c0_135 = arith.constant 0 : index
    %c0_136 = arith.constant 0 : index
    %327 = vector.load %arg34[%c0_135, %c0_136] : memref<128x32xbf16, #tpu.memory_space<vmem>>, vector<128x32xbf16>
    %cst_137 = arith.constant dense<0.000000e+00> : vector<64x32xf32>
    %328 = tpu.matmul %326, %327, %cst_137 {dimension_numbers = #tpu.dot_dimension_numbers<[1], [0], [0], [1], [0, 0, 1, 1], [], []>} : vector<64x128xbf16>, vector<128x32xbf16>, vector<64x32xf32> -> vector<64x32xf32>
    %329 = arith.addf %282, %328 : vector<64x32xf32>
    %c0_138 = arith.constant 0 : index
    %c0_139 = arith.constant 0 : index
    %330 = vector.load %arg33[%c0_138, %c0_139] : memref<1x32xf32, #tpu.memory_space<vmem>>, vector<1x32xf32>
    %331 = vector.broadcast %330 : vector<1x32xf32> to vector<64x32xf32>
    %332 = arith.addf %329, %331 : vector<64x32xf32>
    %c0_140 = arith.constant 0 : index
    %c0_141 = arith.constant 0 : index
    %c0_142 = arith.constant 0 : index
    %333 = vector.load %arg48[%c0_140, %c0_141, %c0_142] : memref<4x16x64xf32, #tpu.memory_space<vmem>>, vector<1x16x64xf32>
    %334 = vector.shape_cast %333 : vector<1x16x64xf32> to vector<16x64xf32>
    %cst_143 = arith.constant dense<0.000000e+00> : vector<16x32xf32>
    %335 = tpu.matmul %334, %332, %cst_143 {dimension_numbers = #tpu.dot_dimension_numbers<[1], [0], [0], [1], [0, 0, 1, 1], [], []>} : vector<16x64xf32>, vector<64x32xf32>, vector<16x32xf32> -> vector<16x32xf32>
    %c1 = arith.constant 1 : index
    %c0_144 = arith.constant 0 : index
    %c0_145 = arith.constant 0 : index
    %336 = vector.load %arg48[%c1, %c0_144, %c0_145] : memref<4x16x64xf32, #tpu.memory_space<vmem>>, vector<1x16x64xf32>
    %337 = vector.shape_cast %336 : vector<1x16x64xf32> to vector<16x64xf32>
    %cst_146 = arith.constant dense<0.000000e+00> : vector<16x32xf32>
    %338 = tpu.matmul %337, %332, %cst_146 {dimension_numbers = #tpu.dot_dimension_numbers<[1], [0], [0], [1], [0, 0, 1, 1], [], []>} : vector<16x64xf32>, vector<64x32xf32>, vector<16x32xf32> -> vector<16x32xf32>
    %c2 = arith.constant 2 : index
    %c0_147 = arith.constant 0 : index
    %c0_148 = arith.constant 0 : index
    %339 = vector.load %arg48[%c2, %c0_147, %c0_148] : memref<4x16x64xf32, #tpu.memory_space<vmem>>, vector<1x16x64xf32>
    %340 = vector.shape_cast %339 : vector<1x16x64xf32> to vector<16x64xf32>
    %cst_149 = arith.constant dense<0.000000e+00> : vector<16x32xf32>
    %341 = tpu.matmul %340, %332, %cst_149 {dimension_numbers = #tpu.dot_dimension_numbers<[1], [0], [0], [1], [0, 0, 1, 1], [], []>} : vector<16x64xf32>, vector<64x32xf32>, vector<16x32xf32> -> vector<16x32xf32>
    %c3 = arith.constant 3 : index
    %c0_150 = arith.constant 0 : index
    %c0_151 = arith.constant 0 : index
    %342 = vector.load %arg48[%c3, %c0_150, %c0_151] : memref<4x16x64xf32, #tpu.memory_space<vmem>>, vector<1x16x64xf32>
    %343 = vector.shape_cast %342 : vector<1x16x64xf32> to vector<16x64xf32>
    %cst_152 = arith.constant dense<0.000000e+00> : vector<16x32xf32>
    %344 = tpu.matmul %343, %332, %cst_152 {dimension_numbers = #tpu.dot_dimension_numbers<[1], [0], [0], [1], [0, 0, 1, 1], [], []>} : vector<16x64xf32>, vector<64x32xf32>, vector<16x32xf32> -> vector<16x32xf32>
    %345 = tpu.concatenate %335, %338, %341, %344 in 1 : vector<16x32xf32>, vector<16x32xf32>, vector<16x32xf32>, vector<16x32xf32> -> vector<16x128xf32>
    %c0_153 = arith.constant 0 : index
    %c0_154 = arith.constant 0 : index
    %346 = vector.load %arg46[%c0_153, %c0_154] : memref<1x128xf32, #tpu.memory_space<vmem>>, vector<1x128xf32>
    %c0_155 = arith.constant 0 : index
    %c0_156 = arith.constant 0 : index
    %347 = vector.load %arg45[%c0_155, %c0_156] : memref<1x128xf32, #tpu.memory_space<vmem>>, vector<1x128xf32>
    %cst_157 = arith.constant dense<0.000000e+00> : vector<16xf32>
    %348 = vector.multi_reduction <add>, %345, %cst_157 [1] : vector<16x128xf32> to vector<16xf32>
    %349 = vector.shape_cast %348 : vector<16xf32> to vector<16x1xf32>
    %cst_158 = arith.constant 1.280000e+02 : f32
    %350 = vector.broadcast %cst_158 : f32 to vector<16x1xf32>
    %351 = arith.divf %349, %350 : vector<16x1xf32>
    %352 = vector.broadcast %351 : vector<16x1xf32> to vector<16x128xf32>
    %353 = arith.subf %345, %352 : vector<16x128xf32>
    %354 = arith.mulf %353, %353 : vector<16x128xf32>
    %cst_159 = arith.constant dense<0.000000e+00> : vector<16xf32>
    %355 = vector.multi_reduction <add>, %354, %cst_159 [1] : vector<16x128xf32> to vector<16xf32>
    %356 = vector.shape_cast %355 : vector<16xf32> to vector<16x1xf32>
    %cst_160 = arith.constant 1.280000e+02 : f32
    %357 = vector.broadcast %cst_160 : f32 to vector<16x1xf32>
    %358 = arith.divf %356, %357 : vector<16x1xf32>
    %359 = vector.broadcast %351 : vector<16x1xf32> to vector<16x128xf32>
    %360 = arith.subf %345, %359 : vector<16x128xf32>
    %cst_161 = arith.constant 9.99999974E-6 : f32
    %361 = vector.broadcast %cst_161 : f32 to vector<16x1xf32>
    %362 = arith.addf %358, %361 : vector<16x1xf32>
    %363 = math.rsqrt %362 : vector<16x1xf32>
    %364 = vector.broadcast %363 : vector<16x1xf32> to vector<16x128xf32>
    %365 = arith.mulf %360, %364 : vector<16x128xf32>
    %366 = vector.broadcast %346 : vector<1x128xf32> to vector<16x128xf32>
    %367 = arith.mulf %365, %366 : vector<16x128xf32>
    %368 = vector.broadcast %347 : vector<1x128xf32> to vector<16x128xf32>
    %369 = arith.addf %367, %368 : vector<16x128xf32>
    %370 = arith.truncf %369 : vector<16x128xf32> to vector<16x128xbf16>
    %c0_162 = arith.constant 0 : index
    %c0_163 = arith.constant 0 : index
    %371 = vector.load %arg47[%c0_162, %c0_163] : memref<128x64xbf16, #tpu.memory_space<vmem>>, vector<128x64xbf16>
    %cst_164 = arith.constant dense<0.000000e+00> : vector<16x64xf32>
    %372 = tpu.matmul %370, %371, %cst_164 {dimension_numbers = #tpu.dot_dimension_numbers<[1], [0], [0], [1], [0, 0, 1, 1], [], []>} : vector<16x128xbf16>, vector<128x64xbf16>, vector<16x64xf32> -> vector<16x64xf32>
    %c0_165 = arith.constant 0 : index
    %c0_166 = arith.constant 0 : index
    %373 = vector.load %arg56[%c0_165, %c0_166] : memref<1x64xf32, #tpu.memory_space<vmem>>, vector<1x64xf32>
    %c0_167 = arith.constant 0 : index
    %c0_168 = arith.constant 0 : index
    %374 = vector.load %arg55[%c0_167, %c0_168] : memref<1x64xf32, #tpu.memory_space<vmem>>, vector<1x64xf32>
    %cst_169 = arith.constant dense<0.000000e+00> : vector<16xf32>
    %375 = vector.multi_reduction <add>, %372, %cst_169 [1] : vector<16x64xf32> to vector<16xf32>
    %376 = vector.shape_cast %375 : vector<16xf32> to vector<16x1xf32>
    %cst_170 = arith.constant 6.400000e+01 : f32
    %377 = vector.broadcast %cst_170 : f32 to vector<16x1xf32>
    %378 = arith.divf %376, %377 : vector<16x1xf32>
    %379 = vector.broadcast %378 : vector<16x1xf32> to vector<16x64xf32>
    %380 = arith.subf %372, %379 : vector<16x64xf32>
    %381 = arith.mulf %380, %380 : vector<16x64xf32>
    %cst_171 = arith.constant dense<0.000000e+00> : vector<16xf32>
    %382 = vector.multi_reduction <add>, %381, %cst_171 [1] : vector<16x64xf32> to vector<16xf32>
    %383 = vector.shape_cast %382 : vector<16xf32> to vector<16x1xf32>
    %cst_172 = arith.constant 6.400000e+01 : f32
    %384 = vector.broadcast %cst_172 : f32 to vector<16x1xf32>
    %385 = arith.divf %383, %384 : vector<16x1xf32>
    %386 = vector.broadcast %378 : vector<16x1xf32> to vector<16x64xf32>
    %387 = arith.subf %372, %386 : vector<16x64xf32>
    %cst_173 = arith.constant 9.99999974E-6 : f32
    %388 = vector.broadcast %cst_173 : f32 to vector<16x1xf32>
    %389 = arith.addf %385, %388 : vector<16x1xf32>
    %390 = math.rsqrt %389 : vector<16x1xf32>
    %391 = vector.broadcast %390 : vector<16x1xf32> to vector<16x64xf32>
    %392 = arith.mulf %387, %391 : vector<16x64xf32>
    %393 = vector.broadcast %373 : vector<1x64xf32> to vector<16x64xf32>
    %394 = arith.mulf %392, %393 : vector<16x64xf32>
    %395 = vector.broadcast %374 : vector<1x64xf32> to vector<16x64xf32>
    %396 = arith.addf %394, %395 : vector<16x64xf32>
    %397 = arith.truncf %396 : vector<16x64xf32> to vector<16x64xbf16>
    %c0_174 = arith.constant 0 : index
    %c0_175 = arith.constant 0 : index
    %398 = vector.load %arg61[%c0_174, %c0_175] : memref<64x192xbf16, #tpu.memory_space<vmem>>, vector<64x192xbf16>
    %cst_176 = arith.constant dense<0.000000e+00> : vector<16x192xf32>
    %399 = tpu.matmul %397, %398, %cst_176 {dimension_numbers = #tpu.dot_dimension_numbers<[1], [0], [0], [1], [0, 0, 1, 1], [], []>} : vector<16x64xbf16>, vector<64x192xbf16>, vector<16x192xf32> -> vector<16x192xf32>
    %c0_177 = arith.constant 0 : index
    %c0_178 = arith.constant 0 : index
    %400 = vector.load %arg50[%c0_177, %c0_178] : memref<1x192xf32, #tpu.memory_space<vmem>>, vector<1x192xf32>
    %401 = vector.broadcast %400 : vector<1x192xf32> to vector<16x192xf32>
    %402 = arith.addf %399, %401 : vector<16x192xf32>
    %c0_179 = arith.constant 0 : index
    %c0_180 = arith.constant 0 : index
    %c0_181 = arith.constant 0 : index
    %403 = vector.load %arg59[%c0_179, %c0_180, %c0_181] : memref<4x16x16xf32, #tpu.memory_space<vmem>>, vector<4x16x16xf32>
    %404 = vector.extract_strided_slice %402 {offsets = [0, 0], sizes = [16, 16], strides = [1, 1]} : vector<16x192xf32> to vector<16x16xf32>
    %cst_182 = arith.constant 2.500000e-01 : f32
    %405 = vector.broadcast %cst_182 : f32 to vector<16x16xf32>
    %406 = arith.mulf %404, %405 : vector<16x16xf32>
    %407 = vector.extract_strided_slice %402 {offsets = [0, 64], sizes = [16, 16], strides = [1, 1]} : vector<16x192xf32> to vector<16x16xf32>
    %408 = vector.extract_strided_slice %402 {offsets = [0, 128], sizes = [16, 16], strides = [1, 1]} : vector<16x192xf32> to vector<16x16xf32>
    %409 = vector.shape_cast %406 : vector<16x16xf32> to vector<1x16x16xf32>
    %410 = vector.shape_cast %407 : vector<16x16xf32> to vector<1x16x16xf32>
    %411 = vector.shape_cast %408 : vector<16x16xf32> to vector<1x16x16xf32>
    "tpu.trace_start"() <{level = 10 : i32, message = "wtd,wsd->wts"}> : () -> ()
    %cst_183 = arith.constant dense<0.000000e+00> : vector<1x16x16xf32>
    %412 = tpu.matmul %409, %410, %cst_183 {dimension_numbers = #tpu.dot_dimension_numbers<[2], [2], [1], [1], [0, 0, 0, 1, 1, 1], [0], [0]>} : vector<1x16x16xf32>, vector<1x16x16xf32>, vector<1x16x16xf32> -> vector<1x16x16xf32>
    "tpu.trace_stop"() : () -> ()
    %413 = vector.extract_strided_slice %403 {offsets = [0, 0, 0], sizes = [1, 16, 16], strides = [1, 1, 1]} : vector<4x16x16xf32> to vector<1x16x16xf32>
    %414 = vector.shape_cast %413 : vector<1x16x16xf32> to vector<16x16xf32>
    %415 = vector.shape_cast %414 : vector<16x16xf32> to vector<1x16x16xf32>
    %416 = arith.addf %412, %415 : vector<1x16x16xf32>
    %cst_184 = arith.constant dense<0xFF800000> : vector<1x16xf32>
    %417 = vector.multi_reduction <maximumf>, %416, %cst_184 [2] : vector<1x16x16xf32> to vector<1x16xf32>
    %418 = vector.shape_cast %417 : vector<1x16xf32> to vector<1x16x1xf32>
    %419 = vector.broadcast %418 : vector<1x16x1xf32> to vector<1x16x16xf32>
    %420 = arith.subf %416, %419 : vector<1x16x16xf32>
    %421 = math.exp %420 : vector<1x16x16xf32>
    %cst_185 = arith.constant dense<0.000000e+00> : vector<1x16xf32>
    %422 = vector.multi_reduction <add>, %421, %cst_185 [2] : vector<1x16x16xf32> to vector<1x16xf32>
    %423 = vector.shape_cast %422 : vector<1x16xf32> to vector<1x16x1xf32>
    %424 = tpu.reciprocal %423 {approx = true} : vector<1x16x1xf32> -> vector<1x16x1xf32>
    %425 = vector.broadcast %424 : vector<1x16x1xf32> to vector<1x16x16xf32>
    %426 = arith.mulf %421, %425 : vector<1x16x16xf32>
    %427 = arith.truncf %426 : vector<1x16x16xf32> to vector<1x16x16xbf16>
    %428 = arith.truncf %411 : vector<1x16x16xf32> to vector<1x16x16xbf16>
    "tpu.trace_start"() <{level = 10 : i32, message = "wts,wsd->wtd"}> : () -> ()
    %cst_186 = arith.constant dense<0.000000e+00> : vector<1x16x16xf32>
    %429 = tpu.matmul %427, %428, %cst_186 {dimension_numbers = #tpu.dot_dimension_numbers<[2], [1], [1], [2], [0, 0, 0, 1, 1, 2], [0], [0]>} : vector<1x16x16xbf16>, vector<1x16x16xbf16>, vector<1x16x16xf32> -> vector<1x16x16xf32>
    "tpu.trace_stop"() : () -> ()
    %430 = vector.shape_cast %429 : vector<1x16x16xf32> to vector<16x16xf32>
    %431 = vector.extract_strided_slice %402 {offsets = [0, 16], sizes = [16, 16], strides = [1, 1]} : vector<16x192xf32> to vector<16x16xf32>
    %cst_187 = arith.constant 2.500000e-01 : f32
    %432 = vector.broadcast %cst_187 : f32 to vector<16x16xf32>
    %433 = arith.mulf %431, %432 : vector<16x16xf32>
    %434 = vector.extract_strided_slice %402 {offsets = [0, 80], sizes = [16, 16], strides = [1, 1]} : vector<16x192xf32> to vector<16x16xf32>
    %435 = vector.extract_strided_slice %402 {offsets = [0, 144], sizes = [16, 16], strides = [1, 1]} : vector<16x192xf32> to vector<16x16xf32>
    %436 = vector.shape_cast %433 : vector<16x16xf32> to vector<1x16x16xf32>
    %437 = vector.shape_cast %434 : vector<16x16xf32> to vector<1x16x16xf32>
    %438 = vector.shape_cast %435 : vector<16x16xf32> to vector<1x16x16xf32>
    "tpu.trace_start"() <{level = 10 : i32, message = "wtd,wsd->wts"}> : () -> ()
    %cst_188 = arith.constant dense<0.000000e+00> : vector<1x16x16xf32>
    %439 = tpu.matmul %436, %437, %cst_188 {dimension_numbers = #tpu.dot_dimension_numbers<[2], [2], [1], [1], [0, 0, 0, 1, 1, 1], [0], [0]>} : vector<1x16x16xf32>, vector<1x16x16xf32>, vector<1x16x16xf32> -> vector<1x16x16xf32>
    "tpu.trace_stop"() : () -> ()
    %440 = vector.extract_strided_slice %403 {offsets = [1, 0, 0], sizes = [1, 16, 16], strides = [1, 1, 1]} : vector<4x16x16xf32> to vector<1x16x16xf32>
    %441 = vector.shape_cast %440 : vector<1x16x16xf32> to vector<16x16xf32>
    %442 = vector.shape_cast %441 : vector<16x16xf32> to vector<1x16x16xf32>
    %443 = arith.addf %439, %442 : vector<1x16x16xf32>
    %cst_189 = arith.constant dense<0xFF800000> : vector<1x16xf32>
    %444 = vector.multi_reduction <maximumf>, %443, %cst_189 [2] : vector<1x16x16xf32> to vector<1x16xf32>
    %445 = vector.shape_cast %444 : vector<1x16xf32> to vector<1x16x1xf32>
    %446 = vector.broadcast %445 : vector<1x16x1xf32> to vector<1x16x16xf32>
    %447 = arith.subf %443, %446 : vector<1x16x16xf32>
    %448 = math.exp %447 : vector<1x16x16xf32>
    %cst_190 = arith.constant dense<0.000000e+00> : vector<1x16xf32>
    %449 = vector.multi_reduction <add>, %448, %cst_190 [2] : vector<1x16x16xf32> to vector<1x16xf32>
    %450 = vector.shape_cast %449 : vector<1x16xf32> to vector<1x16x1xf32>
    %451 = tpu.reciprocal %450 {approx = true} : vector<1x16x1xf32> -> vector<1x16x1xf32>
    %452 = vector.broadcast %451 : vector<1x16x1xf32> to vector<1x16x16xf32>
    %453 = arith.mulf %448, %452 : vector<1x16x16xf32>
    %454 = arith.truncf %453 : vector<1x16x16xf32> to vector<1x16x16xbf16>
    %455 = arith.truncf %438 : vector<1x16x16xf32> to vector<1x16x16xbf16>
    "tpu.trace_start"() <{level = 10 : i32, message = "wts,wsd->wtd"}> : () -> ()
    %cst_191 = arith.constant dense<0.000000e+00> : vector<1x16x16xf32>
    %456 = tpu.matmul %454, %455, %cst_191 {dimension_numbers = #tpu.dot_dimension_numbers<[2], [1], [1], [2], [0, 0, 0, 1, 1, 2], [0], [0]>} : vector<1x16x16xbf16>, vector<1x16x16xbf16>, vector<1x16x16xf32> -> vector<1x16x16xf32>
    "tpu.trace_stop"() : () -> ()
    %457 = vector.shape_cast %456 : vector<1x16x16xf32> to vector<16x16xf32>
    %458 = vector.extract_strided_slice %402 {offsets = [0, 32], sizes = [16, 16], strides = [1, 1]} : vector<16x192xf32> to vector<16x16xf32>
    %cst_192 = arith.constant 2.500000e-01 : f32
    %459 = vector.broadcast %cst_192 : f32 to vector<16x16xf32>
    %460 = arith.mulf %458, %459 : vector<16x16xf32>
    %461 = vector.extract_strided_slice %402 {offsets = [0, 96], sizes = [16, 16], strides = [1, 1]} : vector<16x192xf32> to vector<16x16xf32>
    %462 = vector.extract_strided_slice %402 {offsets = [0, 160], sizes = [16, 16], strides = [1, 1]} : vector<16x192xf32> to vector<16x16xf32>
    %463 = vector.shape_cast %460 : vector<16x16xf32> to vector<1x16x16xf32>
    %464 = vector.shape_cast %461 : vector<16x16xf32> to vector<1x16x16xf32>
    %465 = vector.shape_cast %462 : vector<16x16xf32> to vector<1x16x16xf32>
    "tpu.trace_start"() <{level = 10 : i32, message = "wtd,wsd->wts"}> : () -> ()
    %cst_193 = arith.constant dense<0.000000e+00> : vector<1x16x16xf32>
    %466 = tpu.matmul %463, %464, %cst_193 {dimension_numbers = #tpu.dot_dimension_numbers<[2], [2], [1], [1], [0, 0, 0, 1, 1, 1], [0], [0]>} : vector<1x16x16xf32>, vector<1x16x16xf32>, vector<1x16x16xf32> -> vector<1x16x16xf32>
    "tpu.trace_stop"() : () -> ()
    %467 = vector.extract_strided_slice %403 {offsets = [2, 0, 0], sizes = [1, 16, 16], strides = [1, 1, 1]} : vector<4x16x16xf32> to vector<1x16x16xf32>
    %468 = vector.shape_cast %467 : vector<1x16x16xf32> to vector<16x16xf32>
    %469 = vector.shape_cast %468 : vector<16x16xf32> to vector<1x16x16xf32>
    %470 = arith.addf %466, %469 : vector<1x16x16xf32>
    %cst_194 = arith.constant dense<0xFF800000> : vector<1x16xf32>
    %471 = vector.multi_reduction <maximumf>, %470, %cst_194 [2] : vector<1x16x16xf32> to vector<1x16xf32>
    %472 = vector.shape_cast %471 : vector<1x16xf32> to vector<1x16x1xf32>
    %473 = vector.broadcast %472 : vector<1x16x1xf32> to vector<1x16x16xf32>
    %474 = arith.subf %470, %473 : vector<1x16x16xf32>
    %475 = math.exp %474 : vector<1x16x16xf32>
    %cst_195 = arith.constant dense<0.000000e+00> : vector<1x16xf32>
    %476 = vector.multi_reduction <add>, %475, %cst_195 [2] : vector<1x16x16xf32> to vector<1x16xf32>
    %477 = vector.shape_cast %476 : vector<1x16xf32> to vector<1x16x1xf32>
    %478 = tpu.reciprocal %477 {approx = true} : vector<1x16x1xf32> -> vector<1x16x1xf32>
    %479 = vector.broadcast %478 : vector<1x16x1xf32> to vector<1x16x16xf32>
    %480 = arith.mulf %475, %479 : vector<1x16x16xf32>
    %481 = arith.truncf %480 : vector<1x16x16xf32> to vector<1x16x16xbf16>
    %482 = arith.truncf %465 : vector<1x16x16xf32> to vector<1x16x16xbf16>
    "tpu.trace_start"() <{level = 10 : i32, message = "wts,wsd->wtd"}> : () -> ()
    %cst_196 = arith.constant dense<0.000000e+00> : vector<1x16x16xf32>
    %483 = tpu.matmul %481, %482, %cst_196 {dimension_numbers = #tpu.dot_dimension_numbers<[2], [1], [1], [2], [0, 0, 0, 1, 1, 2], [0], [0]>} : vector<1x16x16xbf16>, vector<1x16x16xbf16>, vector<1x16x16xf32> -> vector<1x16x16xf32>
    "tpu.trace_stop"() : () -> ()
    %484 = vector.shape_cast %483 : vector<1x16x16xf32> to vector<16x16xf32>
    %485 = vector.extract_strided_slice %402 {offsets = [0, 48], sizes = [16, 16], strides = [1, 1]} : vector<16x192xf32> to vector<16x16xf32>
    %cst_197 = arith.constant 2.500000e-01 : f32
    %486 = vector.broadcast %cst_197 : f32 to vector<16x16xf32>
    %487 = arith.mulf %485, %486 : vector<16x16xf32>
    %488 = vector.extract_strided_slice %402 {offsets = [0, 112], sizes = [16, 16], strides = [1, 1]} : vector<16x192xf32> to vector<16x16xf32>
    %489 = vector.extract_strided_slice %402 {offsets = [0, 176], sizes = [16, 16], strides = [1, 1]} : vector<16x192xf32> to vector<16x16xf32>
    %490 = vector.shape_cast %487 : vector<16x16xf32> to vector<1x16x16xf32>
    %491 = vector.shape_cast %488 : vector<16x16xf32> to vector<1x16x16xf32>
    %492 = vector.shape_cast %489 : vector<16x16xf32> to vector<1x16x16xf32>
    "tpu.trace_start"() <{level = 10 : i32, message = "wtd,wsd->wts"}> : () -> ()
    %cst_198 = arith.constant dense<0.000000e+00> : vector<1x16x16xf32>
    %493 = tpu.matmul %490, %491, %cst_198 {dimension_numbers = #tpu.dot_dimension_numbers<[2], [2], [1], [1], [0, 0, 0, 1, 1, 1], [0], [0]>} : vector<1x16x16xf32>, vector<1x16x16xf32>, vector<1x16x16xf32> -> vector<1x16x16xf32>
    "tpu.trace_stop"() : () -> ()
    %494 = vector.extract_strided_slice %403 {offsets = [3, 0, 0], sizes = [1, 16, 16], strides = [1, 1, 1]} : vector<4x16x16xf32> to vector<1x16x16xf32>
    %495 = vector.shape_cast %494 : vector<1x16x16xf32> to vector<16x16xf32>
    %496 = vector.shape_cast %495 : vector<16x16xf32> to vector<1x16x16xf32>
    %497 = arith.addf %493, %496 : vector<1x16x16xf32>
    %cst_199 = arith.constant dense<0xFF800000> : vector<1x16xf32>
    %498 = vector.multi_reduction <maximumf>, %497, %cst_199 [2] : vector<1x16x16xf32> to vector<1x16xf32>
    %499 = vector.shape_cast %498 : vector<1x16xf32> to vector<1x16x1xf32>
    %500 = vector.broadcast %499 : vector<1x16x1xf32> to vector<1x16x16xf32>
    %501 = arith.subf %497, %500 : vector<1x16x16xf32>
    %502 = math.exp %501 : vector<1x16x16xf32>
    %cst_200 = arith.constant dense<0.000000e+00> : vector<1x16xf32>
    %503 = vector.multi_reduction <add>, %502, %cst_200 [2] : vector<1x16x16xf32> to vector<1x16xf32>
    %504 = vector.shape_cast %503 : vector<1x16xf32> to vector<1x16x1xf32>
    %505 = tpu.reciprocal %504 {approx = true} : vector<1x16x1xf32> -> vector<1x16x1xf32>
    %506 = vector.broadcast %505 : vector<1x16x1xf32> to vector<1x16x16xf32>
    %507 = arith.mulf %502, %506 : vector<1x16x16xf32>
    %508 = arith.truncf %507 : vector<1x16x16xf32> to vector<1x16x16xbf16>
    %509 = arith.truncf %492 : vector<1x16x16xf32> to vector<1x16x16xbf16>
    "tpu.trace_start"() <{level = 10 : i32, message = "wts,wsd->wtd"}> : () -> ()
    %cst_201 = arith.constant dense<0.000000e+00> : vector<1x16x16xf32>
    %510 = tpu.matmul %508, %509, %cst_201 {dimension_numbers = #tpu.dot_dimension_numbers<[2], [1], [1], [2], [0, 0, 0, 1, 1, 2], [0], [0]>} : vector<1x16x16xbf16>, vector<1x16x16xbf16>, vector<1x16x16xf32> -> vector<1x16x16xf32>
    "tpu.trace_stop"() : () -> ()
    %511 = vector.shape_cast %510 : vector<1x16x16xf32> to vector<16x16xf32>
    %512 = tpu.concatenate %430, %457, %484, %511 in 1 : vector<16x16xf32>, vector<16x16xf32>, vector<16x16xf32>, vector<16x16xf32> -> vector<16x64xf32>
    %513 = arith.truncf %512 : vector<16x64xf32> to vector<16x64xbf16>
    %c0_202 = arith.constant 0 : index
    %c0_203 = arith.constant 0 : index
    %514 = vector.load %arg60[%c0_202, %c0_203] : memref<64x64xbf16, #tpu.memory_space<vmem>>, vector<64x64xbf16>
    %cst_204 = arith.constant dense<0.000000e+00> : vector<16x64xf32>
    %515 = tpu.matmul %513, %514, %cst_204 {dimension_numbers = #tpu.dot_dimension_numbers<[1], [0], [0], [1], [0, 0, 1, 1], [], []>} : vector<16x64xbf16>, vector<64x64xbf16>, vector<16x64xf32> -> vector<16x64xf32>
    %516 = arith.addf %372, %515 : vector<16x64xf32>
    %c0_205 = arith.constant 0 : index
    %c0_206 = arith.constant 0 : index
    %517 = vector.load %arg49[%c0_205, %c0_206] : memref<1x64xf32, #tpu.memory_space<vmem>>, vector<1x64xf32>
    %518 = vector.broadcast %517 : vector<1x64xf32> to vector<16x64xf32>
    %519 = arith.addf %516, %518 : vector<16x64xf32>
    %c0_207 = arith.constant 0 : index
    %c0_208 = arith.constant 0 : index
    %520 = vector.load %arg58[%c0_207, %c0_208] : memref<1x64xf32, #tpu.memory_space<vmem>>, vector<1x64xf32>
    %c0_209 = arith.constant 0 : index
    %c0_210 = arith.constant 0 : index
    %521 = vector.load %arg57[%c0_209, %c0_210] : memref<1x64xf32, #tpu.memory_space<vmem>>, vector<1x64xf32>
    %cst_211 = arith.constant dense<0.000000e+00> : vector<16xf32>
    %522 = vector.multi_reduction <add>, %519, %cst_211 [1] : vector<16x64xf32> to vector<16xf32>
    %523 = vector.shape_cast %522 : vector<16xf32> to vector<16x1xf32>
    %cst_212 = arith.constant 6.400000e+01 : f32
    %524 = vector.broadcast %cst_212 : f32 to vector<16x1xf32>
    %525 = arith.divf %523, %524 : vector<16x1xf32>
    %526 = vector.broadcast %525 : vector<16x1xf32> to vector<16x64xf32>
    %527 = arith.subf %519, %526 : vector<16x64xf32>
    %528 = arith.mulf %527, %527 : vector<16x64xf32>
    %cst_213 = arith.constant dense<0.000000e+00> : vector<16xf32>
    %529 = vector.multi_reduction <add>, %528, %cst_213 [1] : vector<16x64xf32> to vector<16xf32>
    %530 = vector.shape_cast %529 : vector<16xf32> to vector<16x1xf32>
    %cst_214 = arith.constant 6.400000e+01 : f32
    %531 = vector.broadcast %cst_214 : f32 to vector<16x1xf32>
    %532 = arith.divf %530, %531 : vector<16x1xf32>
    %533 = vector.broadcast %525 : vector<16x1xf32> to vector<16x64xf32>
    %534 = arith.subf %519, %533 : vector<16x64xf32>
    %cst_215 = arith.constant 9.99999974E-6 : f32
    %535 = vector.broadcast %cst_215 : f32 to vector<16x1xf32>
    %536 = arith.addf %532, %535 : vector<16x1xf32>
    %537 = math.rsqrt %536 : vector<16x1xf32>
    %538 = vector.broadcast %537 : vector<16x1xf32> to vector<16x64xf32>
    %539 = arith.mulf %534, %538 : vector<16x64xf32>
    %540 = vector.broadcast %520 : vector<1x64xf32> to vector<16x64xf32>
    %541 = arith.mulf %539, %540 : vector<16x64xf32>
    %542 = vector.broadcast %521 : vector<1x64xf32> to vector<16x64xf32>
    %543 = arith.addf %541, %542 : vector<16x64xf32>
    %544 = arith.truncf %543 : vector<16x64xf32> to vector<16x64xbf16>
    %c0_216 = arith.constant 0 : index
    %c0_217 = arith.constant 0 : index
    %545 = vector.load %arg52[%c0_216, %c0_217] : memref<64x256xbf16, #tpu.memory_space<vmem>>, vector<64x256xbf16>
    %cst_218 = arith.constant dense<0.000000e+00> : vector<16x256xf32>
    %546 = tpu.matmul %544, %545, %cst_218 {dimension_numbers = #tpu.dot_dimension_numbers<[1], [0], [0], [1], [0, 0, 1, 1], [], []>} : vector<16x64xbf16>, vector<64x256xbf16>, vector<16x256xf32> -> vector<16x256xf32>
    %c0_219 = arith.constant 0 : index
    %c0_220 = arith.constant 0 : index
    %547 = vector.load %arg51[%c0_219, %c0_220] : memref<1x256xf32, #tpu.memory_space<vmem>>, vector<1x256xf32>
    %548 = vector.broadcast %547 : vector<1x256xf32> to vector<16x256xf32>
    %549 = arith.addf %546, %548 : vector<16x256xf32>
    %550 = arith.mulf %549, %549 : vector<16x256xf32>
    %551 = arith.mulf %549, %550 : vector<16x256xf32>
    %cst_221 = arith.constant 4.471500e-02 : f32
    %552 = vector.broadcast %cst_221 : f32 to vector<16x256xf32>
    %553 = arith.mulf %552, %551 : vector<16x256xf32>
    %554 = arith.addf %549, %553 : vector<16x256xf32>
    %cst_222 = arith.constant 0.797884583 : f32
    %555 = vector.broadcast %cst_222 : f32 to vector<16x256xf32>
    %556 = arith.mulf %555, %554 : vector<16x256xf32>
    %557 = math.tanh %556 : vector<16x256xf32>
    %cst_223 = arith.constant 1.000000e+00 : f32
    %558 = vector.broadcast %cst_223 : f32 to vector<16x256xf32>
    %559 = arith.addf %558, %557 : vector<16x256xf32>
    %cst_224 = arith.constant 5.000000e-01 : f32
    %560 = vector.broadcast %cst_224 : f32 to vector<16x256xf32>
    %561 = arith.mulf %560, %559 : vector<16x256xf32>
    %562 = arith.mulf %549, %561 : vector<16x256xf32>
    %563 = arith.truncf %562 : vector<16x256xf32> to vector<16x256xbf16>
    %c0_225 = arith.constant 0 : index
    %c0_226 = arith.constant 0 : index
    %564 = vector.load %arg54[%c0_225, %c0_226] : memref<256x64xbf16, #tpu.memory_space<vmem>>, vector<256x64xbf16>
    %cst_227 = arith.constant dense<0.000000e+00> : vector<16x64xf32>
    %565 = tpu.matmul %563, %564, %cst_227 {dimension_numbers = #tpu.dot_dimension_numbers<[1], [0], [0], [1], [0, 0, 1, 1], [], []>} : vector<16x256xbf16>, vector<256x64xbf16>, vector<16x64xf32> -> vector<16x64xf32>
    %566 = arith.addf %519, %565 : vector<16x64xf32>
    %c0_228 = arith.constant 0 : index
    %c0_229 = arith.constant 0 : index
    %567 = vector.load %arg53[%c0_228, %c0_229] : memref<1x64xf32, #tpu.memory_space<vmem>>, vector<1x64xf32>
    %568 = vector.broadcast %567 : vector<1x64xf32> to vector<16x64xf32>
    %569 = arith.addf %566, %568 : vector<16x64xf32>
    %c0_230 = arith.constant 0 : index
    %c0_231 = arith.constant 0 : index
    %570 = vector.load %arg69[%c0_230, %c0_231] : memref<1x64xf32, #tpu.memory_space<vmem>>, vector<1x64xf32>
    %c0_232 = arith.constant 0 : index
    %c0_233 = arith.constant 0 : index
    %571 = vector.load %arg68[%c0_232, %c0_233] : memref<1x64xf32, #tpu.memory_space<vmem>>, vector<1x64xf32>
    %cst_234 = arith.constant dense<0.000000e+00> : vector<16xf32>
    %572 = vector.multi_reduction <add>, %569, %cst_234 [1] : vector<16x64xf32> to vector<16xf32>
    %573 = vector.shape_cast %572 : vector<16xf32> to vector<16x1xf32>
    %cst_235 = arith.constant 6.400000e+01 : f32
    %574 = vector.broadcast %cst_235 : f32 to vector<16x1xf32>
    %575 = arith.divf %573, %574 : vector<16x1xf32>
    %576 = vector.broadcast %575 : vector<16x1xf32> to vector<16x64xf32>
    %577 = arith.subf %569, %576 : vector<16x64xf32>
    %578 = arith.mulf %577, %577 : vector<16x64xf32>
    %cst_236 = arith.constant dense<0.000000e+00> : vector<16xf32>
    %579 = vector.multi_reduction <add>, %578, %cst_236 [1] : vector<16x64xf32> to vector<16xf32>
    %580 = vector.shape_cast %579 : vector<16xf32> to vector<16x1xf32>
    %cst_237 = arith.constant 6.400000e+01 : f32
    %581 = vector.broadcast %cst_237 : f32 to vector<16x1xf32>
    %582 = arith.divf %580, %581 : vector<16x1xf32>
    %583 = vector.broadcast %575 : vector<16x1xf32> to vector<16x64xf32>
    %584 = arith.subf %569, %583 : vector<16x64xf32>
    %cst_238 = arith.constant 9.99999974E-6 : f32
    %585 = vector.broadcast %cst_238 : f32 to vector<16x1xf32>
    %586 = arith.addf %582, %585 : vector<16x1xf32>
    %587 = math.rsqrt %586 : vector<16x1xf32>
    %588 = vector.broadcast %587 : vector<16x1xf32> to vector<16x64xf32>
    %589 = arith.mulf %584, %588 : vector<16x64xf32>
    %590 = vector.broadcast %570 : vector<1x64xf32> to vector<16x64xf32>
    %591 = arith.mulf %589, %590 : vector<16x64xf32>
    %592 = vector.broadcast %571 : vector<1x64xf32> to vector<16x64xf32>
    %593 = arith.addf %591, %592 : vector<16x64xf32>
    %594 = arith.truncf %593 : vector<16x64xf32> to vector<16x64xbf16>
    %c0_239 = arith.constant 0 : index
    %c0_240 = arith.constant 0 : index
    %595 = vector.load %arg74[%c0_239, %c0_240] : memref<64x192xbf16, #tpu.memory_space<vmem>>, vector<64x192xbf16>
    %cst_241 = arith.constant dense<0.000000e+00> : vector<16x192xf32>
    %596 = tpu.matmul %594, %595, %cst_241 {dimension_numbers = #tpu.dot_dimension_numbers<[1], [0], [0], [1], [0, 0, 1, 1], [], []>} : vector<16x64xbf16>, vector<64x192xbf16>, vector<16x192xf32> -> vector<16x192xf32>
    %c0_242 = arith.constant 0 : index
    %c0_243 = arith.constant 0 : index
    %597 = vector.load %arg63[%c0_242, %c0_243] : memref<1x192xf32, #tpu.memory_space<vmem>>, vector<1x192xf32>
    %598 = vector.broadcast %597 : vector<1x192xf32> to vector<16x192xf32>
    %599 = arith.addf %596, %598 : vector<16x192xf32>
    %c0_244 = arith.constant 0 : index
    %c0_245 = arith.constant 0 : index
    %c0_246 = arith.constant 0 : index
    %600 = vector.load %arg72[%c0_244, %c0_245, %c0_246] : memref<4x16x16xf32, #tpu.memory_space<vmem>>, vector<4x16x16xf32>
    %601 = vector.extract_strided_slice %599 {offsets = [0, 0], sizes = [16, 16], strides = [1, 1]} : vector<16x192xf32> to vector<16x16xf32>
    %cst_247 = arith.constant 2.500000e-01 : f32
    %602 = vector.broadcast %cst_247 : f32 to vector<16x16xf32>
    %603 = arith.mulf %601, %602 : vector<16x16xf32>
    %604 = vector.extract_strided_slice %599 {offsets = [0, 64], sizes = [16, 16], strides = [1, 1]} : vector<16x192xf32> to vector<16x16xf32>
    %605 = vector.extract_strided_slice %599 {offsets = [0, 128], sizes = [16, 16], strides = [1, 1]} : vector<16x192xf32> to vector<16x16xf32>
    %606 = vector.shape_cast %603 : vector<16x16xf32> to vector<1x16x16xf32>
    %607 = vector.shape_cast %604 : vector<16x16xf32> to vector<1x16x16xf32>
    %608 = vector.shape_cast %605 : vector<16x16xf32> to vector<1x16x16xf32>
    "tpu.trace_start"() <{level = 10 : i32, message = "wtd,wsd->wts"}> : () -> ()
    %cst_248 = arith.constant dense<0.000000e+00> : vector<1x16x16xf32>
    %609 = tpu.matmul %606, %607, %cst_248 {dimension_numbers = #tpu.dot_dimension_numbers<[2], [2], [1], [1], [0, 0, 0, 1, 1, 1], [0], [0]>} : vector<1x16x16xf32>, vector<1x16x16xf32>, vector<1x16x16xf32> -> vector<1x16x16xf32>
    "tpu.trace_stop"() : () -> ()
    %610 = vector.extract_strided_slice %600 {offsets = [0, 0, 0], sizes = [1, 16, 16], strides = [1, 1, 1]} : vector<4x16x16xf32> to vector<1x16x16xf32>
    %611 = vector.shape_cast %610 : vector<1x16x16xf32> to vector<16x16xf32>
    %612 = vector.shape_cast %611 : vector<16x16xf32> to vector<1x16x16xf32>
    %613 = arith.addf %609, %612 : vector<1x16x16xf32>
    %cst_249 = arith.constant dense<0xFF800000> : vector<1x16xf32>
    %614 = vector.multi_reduction <maximumf>, %613, %cst_249 [2] : vector<1x16x16xf32> to vector<1x16xf32>
    %615 = vector.shape_cast %614 : vector<1x16xf32> to vector<1x16x1xf32>
    %616 = vector.broadcast %615 : vector<1x16x1xf32> to vector<1x16x16xf32>
    %617 = arith.subf %613, %616 : vector<1x16x16xf32>
    %618 = math.exp %617 : vector<1x16x16xf32>
    %cst_250 = arith.constant dense<0.000000e+00> : vector<1x16xf32>
    %619 = vector.multi_reduction <add>, %618, %cst_250 [2] : vector<1x16x16xf32> to vector<1x16xf32>
    %620 = vector.shape_cast %619 : vector<1x16xf32> to vector<1x16x1xf32>
    %621 = tpu.reciprocal %620 {approx = true} : vector<1x16x1xf32> -> vector<1x16x1xf32>
    %622 = vector.broadcast %621 : vector<1x16x1xf32> to vector<1x16x16xf32>
    %623 = arith.mulf %618, %622 : vector<1x16x16xf32>
    %624 = arith.truncf %623 : vector<1x16x16xf32> to vector<1x16x16xbf16>
    %625 = arith.truncf %608 : vector<1x16x16xf32> to vector<1x16x16xbf16>
    "tpu.trace_start"() <{level = 10 : i32, message = "wts,wsd->wtd"}> : () -> ()
    %cst_251 = arith.constant dense<0.000000e+00> : vector<1x16x16xf32>
    %626 = tpu.matmul %624, %625, %cst_251 {dimension_numbers = #tpu.dot_dimension_numbers<[2], [1], [1], [2], [0, 0, 0, 1, 1, 2], [0], [0]>} : vector<1x16x16xbf16>, vector<1x16x16xbf16>, vector<1x16x16xf32> -> vector<1x16x16xf32>
    "tpu.trace_stop"() : () -> ()
    %627 = vector.shape_cast %626 : vector<1x16x16xf32> to vector<16x16xf32>
    %628 = vector.extract_strided_slice %599 {offsets = [0, 16], sizes = [16, 16], strides = [1, 1]} : vector<16x192xf32> to vector<16x16xf32>
    %cst_252 = arith.constant 2.500000e-01 : f32
    %629 = vector.broadcast %cst_252 : f32 to vector<16x16xf32>
    %630 = arith.mulf %628, %629 : vector<16x16xf32>
    %631 = vector.extract_strided_slice %599 {offsets = [0, 80], sizes = [16, 16], strides = [1, 1]} : vector<16x192xf32> to vector<16x16xf32>
    %632 = vector.extract_strided_slice %599 {offsets = [0, 144], sizes = [16, 16], strides = [1, 1]} : vector<16x192xf32> to vector<16x16xf32>
    %633 = vector.shape_cast %630 : vector<16x16xf32> to vector<1x16x16xf32>
    %634 = vector.shape_cast %631 : vector<16x16xf32> to vector<1x16x16xf32>
    %635 = vector.shape_cast %632 : vector<16x16xf32> to vector<1x16x16xf32>
    "tpu.trace_start"() <{level = 10 : i32, message = "wtd,wsd->wts"}> : () -> ()
    %cst_253 = arith.constant dense<0.000000e+00> : vector<1x16x16xf32>
    %636 = tpu.matmul %633, %634, %cst_253 {dimension_numbers = #tpu.dot_dimension_numbers<[2], [2], [1], [1], [0, 0, 0, 1, 1, 1], [0], [0]>} : vector<1x16x16xf32>, vector<1x16x16xf32>, vector<1x16x16xf32> -> vector<1x16x16xf32>
    "tpu.trace_stop"() : () -> ()
    %637 = vector.extract_strided_slice %600 {offsets = [1, 0, 0], sizes = [1, 16, 16], strides = [1, 1, 1]} : vector<4x16x16xf32> to vector<1x16x16xf32>
    %638 = vector.shape_cast %637 : vector<1x16x16xf32> to vector<16x16xf32>
    %639 = vector.shape_cast %638 : vector<16x16xf32> to vector<1x16x16xf32>
    %640 = arith.addf %636, %639 : vector<1x16x16xf32>
    %cst_254 = arith.constant dense<0xFF800000> : vector<1x16xf32>
    %641 = vector.multi_reduction <maximumf>, %640, %cst_254 [2] : vector<1x16x16xf32> to vector<1x16xf32>
    %642 = vector.shape_cast %641 : vector<1x16xf32> to vector<1x16x1xf32>
    %643 = vector.broadcast %642 : vector<1x16x1xf32> to vector<1x16x16xf32>
    %644 = arith.subf %640, %643 : vector<1x16x16xf32>
    %645 = math.exp %644 : vector<1x16x16xf32>
    %cst_255 = arith.constant dense<0.000000e+00> : vector<1x16xf32>
    %646 = vector.multi_reduction <add>, %645, %cst_255 [2] : vector<1x16x16xf32> to vector<1x16xf32>
    %647 = vector.shape_cast %646 : vector<1x16xf32> to vector<1x16x1xf32>
    %648 = tpu.reciprocal %647 {approx = true} : vector<1x16x1xf32> -> vector<1x16x1xf32>
    %649 = vector.broadcast %648 : vector<1x16x1xf32> to vector<1x16x16xf32>
    %650 = arith.mulf %645, %649 : vector<1x16x16xf32>
    %651 = arith.truncf %650 : vector<1x16x16xf32> to vector<1x16x16xbf16>
    %652 = arith.truncf %635 : vector<1x16x16xf32> to vector<1x16x16xbf16>
    "tpu.trace_start"() <{level = 10 : i32, message = "wts,wsd->wtd"}> : () -> ()
    %cst_256 = arith.constant dense<0.000000e+00> : vector<1x16x16xf32>
    %653 = tpu.matmul %651, %652, %cst_256 {dimension_numbers = #tpu.dot_dimension_numbers<[2], [1], [1], [2], [0, 0, 0, 1, 1, 2], [0], [0]>} : vector<1x16x16xbf16>, vector<1x16x16xbf16>, vector<1x16x16xf32> -> vector<1x16x16xf32>
    "tpu.trace_stop"() : () -> ()
    %654 = vector.shape_cast %653 : vector<1x16x16xf32> to vector<16x16xf32>
    %655 = vector.extract_strided_slice %599 {offsets = [0, 32], sizes = [16, 16], strides = [1, 1]} : vector<16x192xf32> to vector<16x16xf32>
    %cst_257 = arith.constant 2.500000e-01 : f32
    %656 = vector.broadcast %cst_257 : f32 to vector<16x16xf32>
    %657 = arith.mulf %655, %656 : vector<16x16xf32>
    %658 = vector.extract_strided_slice %599 {offsets = [0, 96], sizes = [16, 16], strides = [1, 1]} : vector<16x192xf32> to vector<16x16xf32>
    %659 = vector.extract_strided_slice %599 {offsets = [0, 160], sizes = [16, 16], strides = [1, 1]} : vector<16x192xf32> to vector<16x16xf32>
    %660 = vector.shape_cast %657 : vector<16x16xf32> to vector<1x16x16xf32>
    %661 = vector.shape_cast %658 : vector<16x16xf32> to vector<1x16x16xf32>
    %662 = vector.shape_cast %659 : vector<16x16xf32> to vector<1x16x16xf32>
    "tpu.trace_start"() <{level = 10 : i32, message = "wtd,wsd->wts"}> : () -> ()
    %cst_258 = arith.constant dense<0.000000e+00> : vector<1x16x16xf32>
    %663 = tpu.matmul %660, %661, %cst_258 {dimension_numbers = #tpu.dot_dimension_numbers<[2], [2], [1], [1], [0, 0, 0, 1, 1, 1], [0], [0]>} : vector<1x16x16xf32>, vector<1x16x16xf32>, vector<1x16x16xf32> -> vector<1x16x16xf32>
    "tpu.trace_stop"() : () -> ()
    %664 = vector.extract_strided_slice %600 {offsets = [2, 0, 0], sizes = [1, 16, 16], strides = [1, 1, 1]} : vector<4x16x16xf32> to vector<1x16x16xf32>
    %665 = vector.shape_cast %664 : vector<1x16x16xf32> to vector<16x16xf32>
    %666 = vector.shape_cast %665 : vector<16x16xf32> to vector<1x16x16xf32>
    %667 = arith.addf %663, %666 : vector<1x16x16xf32>
    %cst_259 = arith.constant dense<0xFF800000> : vector<1x16xf32>
    %668 = vector.multi_reduction <maximumf>, %667, %cst_259 [2] : vector<1x16x16xf32> to vector<1x16xf32>
    %669 = vector.shape_cast %668 : vector<1x16xf32> to vector<1x16x1xf32>
    %670 = vector.broadcast %669 : vector<1x16x1xf32> to vector<1x16x16xf32>
    %671 = arith.subf %667, %670 : vector<1x16x16xf32>
    %672 = math.exp %671 : vector<1x16x16xf32>
    %cst_260 = arith.constant dense<0.000000e+00> : vector<1x16xf32>
    %673 = vector.multi_reduction <add>, %672, %cst_260 [2] : vector<1x16x16xf32> to vector<1x16xf32>
    %674 = vector.shape_cast %673 : vector<1x16xf32> to vector<1x16x1xf32>
    %675 = tpu.reciprocal %674 {approx = true} : vector<1x16x1xf32> -> vector<1x16x1xf32>
    %676 = vector.broadcast %675 : vector<1x16x1xf32> to vector<1x16x16xf32>
    %677 = arith.mulf %672, %676 : vector<1x16x16xf32>
    %678 = arith.truncf %677 : vector<1x16x16xf32> to vector<1x16x16xbf16>
    %679 = arith.truncf %662 : vector<1x16x16xf32> to vector<1x16x16xbf16>
    "tpu.trace_start"() <{level = 10 : i32, message = "wts,wsd->wtd"}> : () -> ()
    %cst_261 = arith.constant dense<0.000000e+00> : vector<1x16x16xf32>
    %680 = tpu.matmul %678, %679, %cst_261 {dimension_numbers = #tpu.dot_dimension_numbers<[2], [1], [1], [2], [0, 0, 0, 1, 1, 2], [0], [0]>} : vector<1x16x16xbf16>, vector<1x16x16xbf16>, vector<1x16x16xf32> -> vector<1x16x16xf32>
    "tpu.trace_stop"() : () -> ()
    %681 = vector.shape_cast %680 : vector<1x16x16xf32> to vector<16x16xf32>
    %682 = vector.extract_strided_slice %599 {offsets = [0, 48], sizes = [16, 16], strides = [1, 1]} : vector<16x192xf32> to vector<16x16xf32>
    %cst_262 = arith.constant 2.500000e-01 : f32
    %683 = vector.broadcast %cst_262 : f32 to vector<16x16xf32>
    %684 = arith.mulf %682, %683 : vector<16x16xf32>
    %685 = vector.extract_strided_slice %599 {offsets = [0, 112], sizes = [16, 16], strides = [1, 1]} : vector<16x192xf32> to vector<16x16xf32>
    %686 = vector.extract_strided_slice %599 {offsets = [0, 176], sizes = [16, 16], strides = [1, 1]} : vector<16x192xf32> to vector<16x16xf32>
    %687 = vector.shape_cast %684 : vector<16x16xf32> to vector<1x16x16xf32>
    %688 = vector.shape_cast %685 : vector<16x16xf32> to vector<1x16x16xf32>
    %689 = vector.shape_cast %686 : vector<16x16xf32> to vector<1x16x16xf32>
    "tpu.trace_start"() <{level = 10 : i32, message = "wtd,wsd->wts"}> : () -> ()
    %cst_263 = arith.constant dense<0.000000e+00> : vector<1x16x16xf32>
    %690 = tpu.matmul %687, %688, %cst_263 {dimension_numbers = #tpu.dot_dimension_numbers<[2], [2], [1], [1], [0, 0, 0, 1, 1, 1], [0], [0]>} : vector<1x16x16xf32>, vector<1x16x16xf32>, vector<1x16x16xf32> -> vector<1x16x16xf32>
    "tpu.trace_stop"() : () -> ()
    %691 = vector.extract_strided_slice %600 {offsets = [3, 0, 0], sizes = [1, 16, 16], strides = [1, 1, 1]} : vector<4x16x16xf32> to vector<1x16x16xf32>
    %692 = vector.shape_cast %691 : vector<1x16x16xf32> to vector<16x16xf32>
    %693 = vector.shape_cast %692 : vector<16x16xf32> to vector<1x16x16xf32>
    %694 = arith.addf %690, %693 : vector<1x16x16xf32>
    %cst_264 = arith.constant dense<0xFF800000> : vector<1x16xf32>
    %695 = vector.multi_reduction <maximumf>, %694, %cst_264 [2] : vector<1x16x16xf32> to vector<1x16xf32>
    %696 = vector.shape_cast %695 : vector<1x16xf32> to vector<1x16x1xf32>
    %697 = vector.broadcast %696 : vector<1x16x1xf32> to vector<1x16x16xf32>
    %698 = arith.subf %694, %697 : vector<1x16x16xf32>
    %699 = math.exp %698 : vector<1x16x16xf32>
    %cst_265 = arith.constant dense<0.000000e+00> : vector<1x16xf32>
    %700 = vector.multi_reduction <add>, %699, %cst_265 [2] : vector<1x16x16xf32> to vector<1x16xf32>
    %701 = vector.shape_cast %700 : vector<1x16xf32> to vector<1x16x1xf32>
    %702 = tpu.reciprocal %701 {approx = true} : vector<1x16x1xf32> -> vector<1x16x1xf32>
    %703 = vector.broadcast %702 : vector<1x16x1xf32> to vector<1x16x16xf32>
    %704 = arith.mulf %699, %703 : vector<1x16x16xf32>
    %705 = arith.truncf %704 : vector<1x16x16xf32> to vector<1x16x16xbf16>
    %706 = arith.truncf %689 : vector<1x16x16xf32> to vector<1x16x16xbf16>
    "tpu.trace_start"() <{level = 10 : i32, message = "wts,wsd->wtd"}> : () -> ()
    %cst_266 = arith.constant dense<0.000000e+00> : vector<1x16x16xf32>
    %707 = tpu.matmul %705, %706, %cst_266 {dimension_numbers = #tpu.dot_dimension_numbers<[2], [1], [1], [2], [0, 0, 0, 1, 1, 2], [0], [0]>} : vector<1x16x16xbf16>, vector<1x16x16xbf16>, vector<1x16x16xf32> -> vector<1x16x16xf32>
    "tpu.trace_stop"() : () -> ()
    %708 = vector.shape_cast %707 : vector<1x16x16xf32> to vector<16x16xf32>
    %709 = tpu.concatenate %627, %654, %681, %708 in 1 : vector<16x16xf32>, vector<16x16xf32>, vector<16x16xf32>, vector<16x16xf32> -> vector<16x64xf32>
    %710 = arith.truncf %709 : vector<16x64xf32> to vector<16x64xbf16>
    %c0_267 = arith.constant 0 : index
    %c0_268 = arith.constant 0 : index
    %711 = vector.load %arg73[%c0_267, %c0_268] : memref<64x64xbf16, #tpu.memory_space<vmem>>, vector<64x64xbf16>
    %cst_269 = arith.constant dense<0.000000e+00> : vector<16x64xf32>
    %712 = tpu.matmul %710, %711, %cst_269 {dimension_numbers = #tpu.dot_dimension_numbers<[1], [0], [0], [1], [0, 0, 1, 1], [], []>} : vector<16x64xbf16>, vector<64x64xbf16>, vector<16x64xf32> -> vector<16x64xf32>
    %713 = arith.addf %569, %712 : vector<16x64xf32>
    %c0_270 = arith.constant 0 : index
    %c0_271 = arith.constant 0 : index
    %714 = vector.load %arg62[%c0_270, %c0_271] : memref<1x64xf32, #tpu.memory_space<vmem>>, vector<1x64xf32>
    %715 = vector.broadcast %714 : vector<1x64xf32> to vector<16x64xf32>
    %716 = arith.addf %713, %715 : vector<16x64xf32>
    %c0_272 = arith.constant 0 : index
    %c0_273 = arith.constant 0 : index
    %717 = vector.load %arg71[%c0_272, %c0_273] : memref<1x64xf32, #tpu.memory_space<vmem>>, vector<1x64xf32>
    %c0_274 = arith.constant 0 : index
    %c0_275 = arith.constant 0 : index
    %718 = vector.load %arg70[%c0_274, %c0_275] : memref<1x64xf32, #tpu.memory_space<vmem>>, vector<1x64xf32>
    %cst_276 = arith.constant dense<0.000000e+00> : vector<16xf32>
    %719 = vector.multi_reduction <add>, %716, %cst_276 [1] : vector<16x64xf32> to vector<16xf32>
    %720 = vector.shape_cast %719 : vector<16xf32> to vector<16x1xf32>
    %cst_277 = arith.constant 6.400000e+01 : f32
    %721 = vector.broadcast %cst_277 : f32 to vector<16x1xf32>
    %722 = arith.divf %720, %721 : vector<16x1xf32>
    %723 = vector.broadcast %722 : vector<16x1xf32> to vector<16x64xf32>
    %724 = arith.subf %716, %723 : vector<16x64xf32>
    %725 = arith.mulf %724, %724 : vector<16x64xf32>
    %cst_278 = arith.constant dense<0.000000e+00> : vector<16xf32>
    %726 = vector.multi_reduction <add>, %725, %cst_278 [1] : vector<16x64xf32> to vector<16xf32>
    %727 = vector.shape_cast %726 : vector<16xf32> to vector<16x1xf32>
    %cst_279 = arith.constant 6.400000e+01 : f32
    %728 = vector.broadcast %cst_279 : f32 to vector<16x1xf32>
    %729 = arith.divf %727, %728 : vector<16x1xf32>
    %730 = vector.broadcast %722 : vector<16x1xf32> to vector<16x64xf32>
    %731 = arith.subf %716, %730 : vector<16x64xf32>
    %cst_280 = arith.constant 9.99999974E-6 : f32
    %732 = vector.broadcast %cst_280 : f32 to vector<16x1xf32>
    %733 = arith.addf %729, %732 : vector<16x1xf32>
    %734 = math.rsqrt %733 : vector<16x1xf32>
    %735 = vector.broadcast %734 : vector<16x1xf32> to vector<16x64xf32>
    %736 = arith.mulf %731, %735 : vector<16x64xf32>
    %737 = vector.broadcast %717 : vector<1x64xf32> to vector<16x64xf32>
    %738 = arith.mulf %736, %737 : vector<16x64xf32>
    %739 = vector.broadcast %718 : vector<1x64xf32> to vector<16x64xf32>
    %740 = arith.addf %738, %739 : vector<16x64xf32>
    %741 = arith.truncf %740 : vector<16x64xf32> to vector<16x64xbf16>
    %c0_281 = arith.constant 0 : index
    %c0_282 = arith.constant 0 : index
    %742 = vector.load %arg65[%c0_281, %c0_282] : memref<64x256xbf16, #tpu.memory_space<vmem>>, vector<64x256xbf16>
    %cst_283 = arith.constant dense<0.000000e+00> : vector<16x256xf32>
    %743 = tpu.matmul %741, %742, %cst_283 {dimension_numbers = #tpu.dot_dimension_numbers<[1], [0], [0], [1], [0, 0, 1, 1], [], []>} : vector<16x64xbf16>, vector<64x256xbf16>, vector<16x256xf32> -> vector<16x256xf32>
    %c0_284 = arith.constant 0 : index
    %c0_285 = arith.constant 0 : index
    %744 = vector.load %arg64[%c0_284, %c0_285] : memref<1x256xf32, #tpu.memory_space<vmem>>, vector<1x256xf32>
    %745 = vector.broadcast %744 : vector<1x256xf32> to vector<16x256xf32>
    %746 = arith.addf %743, %745 : vector<16x256xf32>
    %747 = arith.mulf %746, %746 : vector<16x256xf32>
    %748 = arith.mulf %746, %747 : vector<16x256xf32>
    %cst_286 = arith.constant 4.471500e-02 : f32
    %749 = vector.broadcast %cst_286 : f32 to vector<16x256xf32>
    %750 = arith.mulf %749, %748 : vector<16x256xf32>
    %751 = arith.addf %746, %750 : vector<16x256xf32>
    %cst_287 = arith.constant 0.797884583 : f32
    %752 = vector.broadcast %cst_287 : f32 to vector<16x256xf32>
    %753 = arith.mulf %752, %751 : vector<16x256xf32>
    %754 = math.tanh %753 : vector<16x256xf32>
    %cst_288 = arith.constant 1.000000e+00 : f32
    %755 = vector.broadcast %cst_288 : f32 to vector<16x256xf32>
    %756 = arith.addf %755, %754 : vector<16x256xf32>
    %cst_289 = arith.constant 5.000000e-01 : f32
    %757 = vector.broadcast %cst_289 : f32 to vector<16x256xf32>
    %758 = arith.mulf %757, %756 : vector<16x256xf32>
    %759 = arith.mulf %746, %758 : vector<16x256xf32>
    %760 = arith.truncf %759 : vector<16x256xf32> to vector<16x256xbf16>
    %c0_290 = arith.constant 0 : index
    %c0_291 = arith.constant 0 : index
    %761 = vector.load %arg67[%c0_290, %c0_291] : memref<256x64xbf16, #tpu.memory_space<vmem>>, vector<256x64xbf16>
    %cst_292 = arith.constant dense<0.000000e+00> : vector<16x64xf32>
    %762 = tpu.matmul %760, %761, %cst_292 {dimension_numbers = #tpu.dot_dimension_numbers<[1], [0], [0], [1], [0, 0, 1, 1], [], []>} : vector<16x256xbf16>, vector<256x64xbf16>, vector<16x64xf32> -> vector<16x64xf32>
    %763 = arith.addf %716, %762 : vector<16x64xf32>
    %c0_293 = arith.constant 0 : index
    %c0_294 = arith.constant 0 : index
    %764 = vector.load %arg66[%c0_293, %c0_294] : memref<1x64xf32, #tpu.memory_space<vmem>>, vector<1x64xf32>
    %765 = vector.broadcast %764 : vector<1x64xf32> to vector<16x64xf32>
    %766 = arith.addf %763, %765 : vector<16x64xf32>
    %c0_295 = arith.constant 0 : index
    %c0_296 = arith.constant 0 : index
    %767 = vector.load %arg9[%c0_295, %c0_296] : memref<1x64xf32, #tpu.memory_space<vmem>>, vector<1x64xf32>
    %c0_297 = arith.constant 0 : index
    %c0_298 = arith.constant 0 : index
    %768 = vector.load %arg8[%c0_297, %c0_298] : memref<1x64xf32, #tpu.memory_space<vmem>>, vector<1x64xf32>
    %cst_299 = arith.constant dense<0.000000e+00> : vector<16xf32>
    %769 = vector.multi_reduction <add>, %766, %cst_299 [1] : vector<16x64xf32> to vector<16xf32>
    %770 = vector.shape_cast %769 : vector<16xf32> to vector<16x1xf32>
    %cst_300 = arith.constant 6.400000e+01 : f32
    %771 = vector.broadcast %cst_300 : f32 to vector<16x1xf32>
    %772 = arith.divf %770, %771 : vector<16x1xf32>
    %773 = vector.broadcast %772 : vector<16x1xf32> to vector<16x64xf32>
    %774 = arith.subf %766, %773 : vector<16x64xf32>
    %775 = arith.mulf %774, %774 : vector<16x64xf32>
    %cst_301 = arith.constant dense<0.000000e+00> : vector<16xf32>
    %776 = vector.multi_reduction <add>, %775, %cst_301 [1] : vector<16x64xf32> to vector<16xf32>
    %777 = vector.shape_cast %776 : vector<16xf32> to vector<16x1xf32>
    %cst_302 = arith.constant 6.400000e+01 : f32
    %778 = vector.broadcast %cst_302 : f32 to vector<16x1xf32>
    %779 = arith.divf %777, %778 : vector<16x1xf32>
    %780 = vector.broadcast %772 : vector<16x1xf32> to vector<16x64xf32>
    %781 = arith.subf %766, %780 : vector<16x64xf32>
    %cst_303 = arith.constant 9.99999974E-6 : f32
    %782 = vector.broadcast %cst_303 : f32 to vector<16x1xf32>
    %783 = arith.addf %779, %782 : vector<16x1xf32>
    %784 = math.rsqrt %783 : vector<16x1xf32>
    %785 = vector.broadcast %784 : vector<16x1xf32> to vector<16x64xf32>
    %786 = arith.mulf %781, %785 : vector<16x64xf32>
    %787 = vector.broadcast %767 : vector<1x64xf32> to vector<16x64xf32>
    %788 = arith.mulf %786, %787 : vector<16x64xf32>
    %789 = vector.broadcast %768 : vector<1x64xf32> to vector<16x64xf32>
    %790 = arith.addf %788, %789 : vector<16x64xf32>
    %cst_304 = arith.constant dense<0.000000e+00> : vector<64xf32>
    %791 = vector.multi_reduction <add>, %790, %cst_304 [0] : vector<16x64xf32> to vector<64xf32>
    %792 = vector.shape_cast %791 : vector<64xf32> to vector<1x64xf32>
    %cst_305 = arith.constant 1.600000e+01 : f32
    %793 = vector.broadcast %cst_305 : f32 to vector<1x64xf32>
    %794 = arith.divf %792, %793 : vector<1x64xf32>
    %c0_306 = arith.constant 0 : index
    %c0_307 = arith.constant 0 : index
    %795 = vector.load %arg3[%c0_306, %c0_307] : memref<64x32xf32, #tpu.memory_space<vmem>>, vector<64x32xf32>
    %cst_308 = arith.constant dense<0.000000e+00> : vector<1x32xf32>
    %796 = tpu.matmul %794, %795, %cst_308 {dimension_numbers = #tpu.dot_dimension_numbers<[1], [0], [0], [1], [0, 0, 1, 1], [], []>} : vector<1x64xf32>, vector<64x32xf32>, vector<1x32xf32> -> vector<1x32xf32>
    %c0_309 = arith.constant 0 : index
    %c0_310 = arith.constant 0 : index
    %797 = vector.load %arg2[%c0_309, %c0_310] : memref<1x32xf32, #tpu.memory_space<vmem>>, vector<1x32xf32>
    %798 = arith.addf %796, %797 : vector<1x32xf32>
    %c0_311 = arith.constant 0 : index
    %c0_312 = arith.constant 0 : index
    %799 = vector.load %arg4[%c0_311, %c0_312] : memref<1x32xf32, #tpu.memory_space<vmem>>, vector<1x32xf32>
    %800 = arith.mulf %798, %799 : vector<1x32xf32>
    %c0_313 = arith.constant 0 : index
    %c0_314 = arith.constant 0 : index
    %801 = vector.load %arg5[%c0_313, %c0_314] : memref<1x32xf32, #tpu.memory_space<vmem>>, vector<1x32xf32>
    %802 = arith.addf %800, %801 : vector<1x32xf32>
    %c0_315 = arith.constant 0 : index
    %c0_316 = arith.constant 0 : index
    %803 = vector.load %arg7[%c0_315, %c0_316] : memref<32x10xf32, #tpu.memory_space<vmem>>, vector<32x10xf32>
    %cst_317 = arith.constant dense<0.000000e+00> : vector<1x10xf32>
    %804 = tpu.matmul %802, %803, %cst_317 {dimension_numbers = #tpu.dot_dimension_numbers<[1], [0], [0], [1], [0, 0, 1, 1], [], []>} : vector<1x32xf32>, vector<32x10xf32>, vector<1x10xf32> -> vector<1x10xf32>
    %c0_318 = arith.constant 0 : index
    %c0_319 = arith.constant 0 : index
    %805 = vector.load %arg6[%c0_318, %c0_319] : memref<1x10xf32, #tpu.memory_space<vmem>>, vector<1x10xf32>
    %806 = arith.addf %804, %805 : vector<1x10xf32>
    %c0_320 = arith.constant 0 : index
    %c0_321 = arith.constant 0 : index
    %c0_322 = arith.constant 0 : index
    %807 = vector.load %arg75[%c0_320, %c0_321, %c0_322] : memref<1x1x10xf32, #tpu.memory_space<vmem>>, vector<1x1x10xf32>
    %808 = vector.shape_cast %807 : vector<1x1x10xf32> to vector<1x10xf32>
    %809 = vector.shape_cast %806 : vector<1x10xf32> to vector<1x1x10xf32>
    tpu.vector_store %arg75[%c0_320, %c0_321, %c0_322], %809 {strides = array<i32>} : memref<1x1x10xf32, #tpu.memory_space<vmem>>, vector<1x1x10xf32>,
    return
  }
  func.func @transform_0(%arg0: i32) -> (i32, i32, i32) {
    %c0_i32 = arith.constant 0 : i32
    %c0_i32_0 = arith.constant 0 : i32
    %c0_i32_1 = arith.constant 0 : i32
    return %arg0, %c0_i32, %c0_i32_0 : i32, i32, i32
  }
  func.func @transform_1(%arg0: i32) -> (i32, i32) {
    %c0_i32 = arith.constant 0 : i32
    %c0_i32_0 = arith.constant 0 : i32
    %c0_i32_1 = arith.constant 0 : i32
    return %c0_i32, %c0_i32_0 : i32, i32
  }
  func.func @transform_2(%arg0: i32) -> (i32, i32) {
    %c0_i32 = arith.constant 0 : i32
    %c0_i32_0 = arith.constant 0 : i32
    %c0_i32_1 = arith.constant 0 : i32
    return %c0_i32, %c0_i32_0 : i32, i32
  }
  func.func @transform_3(%arg0: i32) -> (i32, i32) {
    %c0_i32 = arith.constant 0 : i32
    %c0_i32_0 = arith.constant 0 : i32
    %c0_i32_1 = arith.constant 0 : i32
    return %c0_i32, %c0_i32_0 : i32, i32
  }
  func.func @transform_4(%arg0: i32) -> (i32, i32) {
    %c0_i32 = arith.constant 0 : i32
    %c0_i32_0 = arith.constant 0 : i32
    %c0_i32_1 = arith.constant 0 : i32
    return %c0_i32, %c0_i32_0 : i32, i32
  }
  func.func @transform_5(%arg0: i32) -> (i32, i32) {
    %c0_i32 = arith.constant 0 : i32
    %c0_i32_0 = arith.constant 0 : i32
    %c0_i32_1 = arith.constant 0 : i32
    return %c0_i32, %c0_i32_0 : i32, i32
  }
  func.func @transform_6(%arg0: i32) -> (i32, i32) {
    %c0_i32 = arith.constant 0 : i32
    %c0_i32_0 = arith.constant 0 : i32
    %c0_i32_1 = arith.constant 0 : i32
    return %c0_i32, %c0_i32_0 : i32, i32
  }
  func.func @transform_7(%arg0: i32) -> (i32, i32) {
    %c0_i32 = arith.constant 0 : i32
    %c0_i32_0 = arith.constant 0 : i32
    %c0_i32_1 = arith.constant 0 : i32
    return %c0_i32, %c0_i32_0 : i32, i32
  }
  func.func @transform_8(%arg0: i32) -> (i32, i32) {
    %c0_i32 = arith.constant 0 : i32
    %c0_i32_0 = arith.constant 0 : i32
    %c0_i32_1 = arith.constant 0 : i32
    return %c0_i32, %c0_i32_0 : i32, i32
  }
  func.func @transform_9(%arg0: i32) -> (i32, i32) {
    %c0_i32 = arith.constant 0 : i32
    %c0_i32_0 = arith.constant 0 : i32
    %c0_i32_1 = arith.constant 0 : i32
    return %c0_i32, %c0_i32_0 : i32, i32
  }
  func.func @transform_10(%arg0: i32) -> (i32, i32) {
    %c0_i32 = arith.constant 0 : i32
    %c0_i32_0 = arith.constant 0 : i32
    %c0_i32_1 = arith.constant 0 : i32
    return %c0_i32, %c0_i32_0 : i32, i32
  }
  func.func @transform_11(%arg0: i32) -> (i32, i32) {
    %c0_i32 = arith.constant 0 : i32
    %c0_i32_0 = arith.constant 0 : i32
    %c0_i32_1 = arith.constant 0 : i32
    return %c0_i32, %c0_i32_0 : i32, i32
  }
  func.func @transform_12(%arg0: i32) -> (i32, i32) {
    %c0_i32 = arith.constant 0 : i32
    %c0_i32_0 = arith.constant 0 : i32
    %c0_i32_1 = arith.constant 0 : i32
    return %c0_i32, %c0_i32_0 : i32, i32
  }
  func.func @transform_13(%arg0: i32) -> (i32, i32) {
    %c0_i32 = arith.constant 0 : i32
    %c0_i32_0 = arith.constant 0 : i32
    %c0_i32_1 = arith.constant 0 : i32
    return %c0_i32, %c0_i32_0 : i32, i32
  }
  func.func @transform_14(%arg0: i32) -> (i32, i32) {
    %c0_i32 = arith.constant 0 : i32
    %c0_i32_0 = arith.constant 0 : i32
    %c0_i32_1 = arith.constant 0 : i32
    return %c0_i32, %c0_i32_0 : i32, i32
  }
  func.func @transform_15(%arg0: i32) -> (i32, i32) {
    %c0_i32 = arith.constant 0 : i32
    %c0_i32_0 = arith.constant 0 : i32
    %c0_i32_1 = arith.constant 0 : i32
    return %c0_i32, %c0_i32_0 : i32, i32
  }
  func.func @transform_16(%arg0: i32) -> (i32, i32) {
    %c0_i32 = arith.constant 0 : i32
    %c0_i32_0 = arith.constant 0 : i32
    %c0_i32_1 = arith.constant 0 : i32
    return %c0_i32, %c0_i32_0 : i32, i32
  }
  func.func @transform_17(%arg0: i32) -> (i32, i32) {
    %c0_i32 = arith.constant 0 : i32
    %c0_i32_0 = arith.constant 0 : i32
    %c0_i32_1 = arith.constant 0 : i32
    return %c0_i32, %c0_i32_0 : i32, i32
  }
  func.func @transform_18(%arg0: i32) -> (i32, i32) {
    %c0_i32 = arith.constant 0 : i32
    %c0_i32_0 = arith.constant 0 : i32
    %c0_i32_1 = arith.constant 0 : i32
    return %c0_i32, %c0_i32_0 : i32, i32
  }
  func.func @transform_19(%arg0: i32) -> (i32, i32) {
    %c0_i32 = arith.constant 0 : i32
    %c0_i32_0 = arith.constant 0 : i32
    %c0_i32_1 = arith.constant 0 : i32
    return %c0_i32, %c0_i32_0 : i32, i32
  }
  func.func @transform_20(%arg0: i32) -> (i32, i32) {
    %c0_i32 = arith.constant 0 : i32
    %c0_i32_0 = arith.constant 0 : i32
    %c0_i32_1 = arith.constant 0 : i32
    return %c0_i32, %c0_i32_0 : i32, i32
  }
  func.func @transform_21(%arg0: i32) -> (i32, i32) {
    %c0_i32 = arith.constant 0 : i32
    %c0_i32_0 = arith.constant 0 : i32
    %c0_i32_1 = arith.constant 0 : i32
    return %c0_i32, %c0_i32_0 : i32, i32
  }
  func.func @transform_22(%arg0: i32) -> (i32, i32) {
    %c0_i32 = arith.constant 0 : i32
    %c0_i32_0 = arith.constant 0 : i32
    %c0_i32_1 = arith.constant 0 : i32
    return %c0_i32, %c0_i32_0 : i32, i32
  }
  func.func @transform_23(%arg0: i32) -> (i32, i32) {
    %c0_i32 = arith.constant 0 : i32
    %c0_i32_0 = arith.constant 0 : i32
    %c0_i32_1 = arith.constant 0 : i32
    return %c0_i32, %c0_i32_0 : i32, i32
  }
  func.func @transform_24(%arg0: i32) -> (i32, i32) {
    %c0_i32 = arith.constant 0 : i32
    %c0_i32_0 = arith.constant 0 : i32
    %c0_i32_1 = arith.constant 0 : i32
    return %c0_i32, %c0_i32_0 : i32, i32
  }
  func.func @transform_25(%arg0: i32) -> (i32, i32, i32) {
    %c0_i32 = arith.constant 0 : i32
    %c0_i32_0 = arith.constant 0 : i32
    %c0_i32_1 = arith.constant 0 : i32
    %c0_i32_2 = arith.constant 0 : i32
    return %c0_i32, %c0_i32_0, %c0_i32_1 : i32, i32, i32
  }
  func.func @transform_26(%arg0: i32) -> (i32, i32) {
    %c0_i32 = arith.constant 0 : i32
    %c0_i32_0 = arith.constant 0 : i32
    %c0_i32_1 = arith.constant 0 : i32
    return %c0_i32, %c0_i32_0 : i32, i32
  }
  func.func @transform_27(%arg0: i32) -> (i32, i32) {
    %c0_i32 = arith.constant 0 : i32
    %c0_i32_0 = arith.constant 0 : i32
    %c0_i32_1 = arith.constant 0 : i32
    return %c0_i32, %c0_i32_0 : i32, i32
  }
  func.func @transform_28(%arg0: i32) -> (i32, i32) {
    %c0_i32 = arith.constant 0 : i32
    %c0_i32_0 = arith.constant 0 : i32
    %c0_i32_1 = arith.constant 0 : i32
    return %c0_i32, %c0_i32_0 : i32, i32
  }
  func.func @transform_29(%arg0: i32) -> (i32, i32) {
    %c0_i32 = arith.constant 0 : i32
    %c0_i32_0 = arith.constant 0 : i32
    %c0_i32_1 = arith.constant 0 : i32
    return %c0_i32, %c0_i32_0 : i32, i32
  }
  func.func @transform_30(%arg0: i32) -> (i32, i32) {
    %c0_i32 = arith.constant 0 : i32
    %c0_i32_0 = arith.constant 0 : i32
    %c0_i32_1 = arith.constant 0 : i32
    return %c0_i32, %c0_i32_0 : i32, i32
  }
  func.func @transform_31(%arg0: i32) -> (i32, i32) {
    %c0_i32 = arith.constant 0 : i32
    %c0_i32_0 = arith.constant 0 : i32
    %c0_i32_1 = arith.constant 0 : i32
    return %c0_i32, %c0_i32_0 : i32, i32
  }
  func.func @transform_32(%arg0: i32) -> (i32, i32) {
    %c0_i32 = arith.constant 0 : i32
    %c0_i32_0 = arith.constant 0 : i32
    %c0_i32_1 = arith.constant 0 : i32
    return %c0_i32, %c0_i32_0 : i32, i32
  }
  func.func @transform_33(%arg0: i32) -> (i32, i32) {
    %c0_i32 = arith.constant 0 : i32
    %c0_i32_0 = arith.constant 0 : i32
    %c0_i32_1 = arith.constant 0 : i32
    return %c0_i32, %c0_i32_0 : i32, i32
  }
  func.func @transform_34(%arg0: i32) -> (i32, i32, i32) {
    %c0_i32 = arith.constant 0 : i32
    %c0_i32_0 = arith.constant 0 : i32
    %c0_i32_1 = arith.constant 0 : i32
    %c0_i32_2 = arith.constant 0 : i32
    return %c0_i32, %c0_i32_0, %c0_i32_1 : i32, i32, i32
  }
  func.func @transform_35(%arg0: i32) -> (i32, i32) {
    %c0_i32 = arith.constant 0 : i32
    %c0_i32_0 = arith.constant 0 : i32
    %c0_i32_1 = arith.constant 0 : i32
    return %c0_i32, %c0_i32_0 : i32, i32
  }
  func.func @transform_36(%arg0: i32) -> (i32, i32) {
    %c0_i32 = arith.constant 0 : i32
    %c0_i32_0 = arith.constant 0 : i32
    %c0_i32_1 = arith.constant 0 : i32
    return %c0_i32, %c0_i32_0 : i32, i32
  }
  func.func @transform_37(%arg0: i32) -> (i32, i32) {
    %c0_i32 = arith.constant 0 : i32
    %c0_i32_0 = arith.constant 0 : i32
    %c0_i32_1 = arith.constant 0 : i32
    return %c0_i32, %c0_i32_0 : i32, i32
  }
  func.func @transform_38(%arg0: i32) -> (i32, i32) {
    %c0_i32 = arith.constant 0 : i32
    %c0_i32_0 = arith.constant 0 : i32
    %c0_i32_1 = arith.constant 0 : i32
    return %c0_i32, %c0_i32_0 : i32, i32
  }
  func.func @transform_39(%arg0: i32) -> (i32, i32) {
    %c0_i32 = arith.constant 0 : i32
    %c0_i32_0 = arith.constant 0 : i32
    %c0_i32_1 = arith.constant 0 : i32
    return %c0_i32, %c0_i32_0 : i32, i32
  }
  func.func @transform_40(%arg0: i32) -> (i32, i32) {
    %c0_i32 = arith.constant 0 : i32
    %c0_i32_0 = arith.constant 0 : i32
    %c0_i32_1 = arith.constant 0 : i32
    return %c0_i32, %c0_i32_0 : i32, i32
  }
  func.func @transform_41(%arg0: i32) -> (i32, i32, i32) {
    %c0_i32 = arith.constant 0 : i32
    %c0_i32_0 = arith.constant 0 : i32
    %c0_i32_1 = arith.constant 0 : i32
    %c0_i32_2 = arith.constant 0 : i32
    return %c0_i32, %c0_i32_0, %c0_i32_1 : i32, i32, i32
  }
  func.func @transform_42(%arg0: i32) -> (i32, i32) {
    %c0_i32 = arith.constant 0 : i32
    %c0_i32_0 = arith.constant 0 : i32
    %c0_i32_1 = arith.constant 0 : i32
    return %c0_i32, %c0_i32_0 : i32, i32
  }
  func.func @transform_43(%arg0: i32) -> (i32, i32) {
    %c0_i32 = arith.constant 0 : i32
    %c0_i32_0 = arith.constant 0 : i32
    %c0_i32_1 = arith.constant 0 : i32
    return %c0_i32, %c0_i32_0 : i32, i32
  }
  func.func @transform_44(%arg0: i32) -> (i32, i32) {
    %c0_i32 = arith.constant 0 : i32
    %c0_i32_0 = arith.constant 0 : i32
    %c0_i32_1 = arith.constant 0 : i32
    return %c0_i32, %c0_i32_0 : i32, i32
  }
  func.func @transform_45(%arg0: i32) -> (i32, i32) {
    %c0_i32 = arith.constant 0 : i32
    %c0_i32_0 = arith.constant 0 : i32
    %c0_i32_1 = arith.constant 0 : i32
    return %c0_i32, %c0_i32_0 : i32, i32
  }
  func.func @transform_46(%arg0: i32) -> (i32, i32) {
    %c0_i32 = arith.constant 0 : i32
    %c0_i32_0 = arith.constant 0 : i32
    %c0_i32_1 = arith.constant 0 : i32
    return %c0_i32, %c0_i32_0 : i32, i32
  }
  func.func @transform_47(%arg0: i32) -> (i32, i32, i32) {
    %c0_i32 = arith.constant 0 : i32
    %c0_i32_0 = arith.constant 0 : i32
    %c0_i32_1 = arith.constant 0 : i32
    %c0_i32_2 = arith.constant 0 : i32
    return %c0_i32, %c0_i32_0, %c0_i32_1 : i32, i32, i32
  }
  func.func @transform_48(%arg0: i32) -> (i32, i32) {
    %c0_i32 = arith.constant 0 : i32
    %c0_i32_0 = arith.constant 0 : i32
    %c0_i32_1 = arith.constant 0 : i32
    return %c0_i32, %c0_i32_0 : i32, i32
  }
  func.func @transform_49(%arg0: i32) -> (i32, i32) {
    %c0_i32 = arith.constant 0 : i32
    %c0_i32_0 = arith.constant 0 : i32
    %c0_i32_1 = arith.constant 0 : i32
    return %c0_i32, %c0_i32_0 : i32, i32
  }
  func.func @transform_50(%arg0: i32) -> (i32, i32) {
    %c0_i32 = arith.constant 0 : i32
    %c0_i32_0 = arith.constant 0 : i32
    %c0_i32_1 = arith.constant 0 : i32
    return %c0_i32, %c0_i32_0 : i32, i32
  }
  func.func @transform_51(%arg0: i32) -> (i32, i32) {
    %c0_i32 = arith.constant 0 : i32
    %c0_i32_0 = arith.constant 0 : i32
    %c0_i32_1 = arith.constant 0 : i32
    return %c0_i32, %c0_i32_0 : i32, i32
  }
  func.func @transform_52(%arg0: i32) -> (i32, i32) {
    %c0_i32 = arith.constant 0 : i32
    %c0_i32_0 = arith.constant 0 : i32
    %c0_i32_1 = arith.constant 0 : i32
    return %c0_i32, %c0_i32_0 : i32, i32
  }
  func.func @transform_53(%arg0: i32) -> (i32, i32) {
    %c0_i32 = arith.constant 0 : i32
    %c0_i32_0 = arith.constant 0 : i32
    %c0_i32_1 = arith.constant 0 : i32
    return %c0_i32, %c0_i32_0 : i32, i32
  }
  func.func @transform_54(%arg0: i32) -> (i32, i32) {
    %c0_i32 = arith.constant 0 : i32
    %c0_i32_0 = arith.constant 0 : i32
    %c0_i32_1 = arith.constant 0 : i32
    return %c0_i32, %c0_i32_0 : i32, i32
  }
  func.func @transform_55(%arg0: i32) -> (i32, i32) {
    %c0_i32 = arith.constant 0 : i32
    %c0_i32_0 = arith.constant 0 : i32
    %c0_i32_1 = arith.constant 0 : i32
    return %c0_i32, %c0_i32_0 : i32, i32
  }
  func.func @transform_56(%arg0: i32) -> (i32, i32) {
    %c0_i32 = arith.constant 0 : i32
    %c0_i32_0 = arith.constant 0 : i32
    %c0_i32_1 = arith.constant 0 : i32
    return %c0_i32, %c0_i32_0 : i32, i32
  }
  func.func @transform_57(%arg0: i32) -> (i32, i32) {
    %c0_i32 = arith.constant 0 : i32
    %c0_i32_0 = arith.constant 0 : i32
    %c0_i32_1 = arith.constant 0 : i32
    return %c0_i32, %c0_i32_0 : i32, i32
  }
  func.func @transform_58(%arg0: i32) -> (i32, i32, i32) {
    %c0_i32 = arith.constant 0 : i32
    %c0_i32_0 = arith.constant 0 : i32
    %c0_i32_1 = arith.constant 0 : i32
    %c0_i32_2 = arith.constant 0 : i32
    return %c0_i32, %c0_i32_0, %c0_i32_1 : i32, i32, i32
  }
  func.func @transform_59(%arg0: i32) -> (i32, i32) {
    %c0_i32 = arith.constant 0 : i32
    %c0_i32_0 = arith.constant 0 : i32
    %c0_i32_1 = arith.constant 0 : i32
    return %c0_i32, %c0_i32_0 : i32, i32
  }
  func.func @transform_60(%arg0: i32) -> (i32, i32) {
    %c0_i32 = arith.constant 0 : i32
    %c0_i32_0 = arith.constant 0 : i32
    %c0_i32_1 = arith.constant 0 : i32
    return %c0_i32, %c0_i32_0 : i32, i32
  }
  func.func @transform_61(%arg0: i32) -> (i32, i32) {
    %c0_i32 = arith.constant 0 : i32
    %c0_i32_0 = arith.constant 0 : i32
    %c0_i32_1 = arith.constant 0 : i32
    return %c0_i32, %c0_i32_0 : i32, i32
  }
  func.func @transform_62(%arg0: i32) -> (i32, i32) {
    %c0_i32 = arith.constant 0 : i32
    %c0_i32_0 = arith.constant 0 : i32
    %c0_i32_1 = arith.constant 0 : i32
    return %c0_i32, %c0_i32_0 : i32, i32
  }
  func.func @transform_63(%arg0: i32) -> (i32, i32) {
    %c0_i32 = arith.constant 0 : i32
    %c0_i32_0 = arith.constant 0 : i32
    %c0_i32_1 = arith.constant 0 : i32
    return %c0_i32, %c0_i32_0 : i32, i32
  }
  func.func @transform_64(%arg0: i32) -> (i32, i32) {
    %c0_i32 = arith.constant 0 : i32
    %c0_i32_0 = arith.constant 0 : i32
    %c0_i32_1 = arith.constant 0 : i32
    return %c0_i32, %c0_i32_0 : i32, i32
  }
  func.func @transform_65(%arg0: i32) -> (i32, i32) {
    %c0_i32 = arith.constant 0 : i32
    %c0_i32_0 = arith.constant 0 : i32
    %c0_i32_1 = arith.constant 0 : i32
    return %c0_i32, %c0_i32_0 : i32, i32
  }
  func.func @transform_66(%arg0: i32) -> (i32, i32) {
    %c0_i32 = arith.constant 0 : i32
    %c0_i32_0 = arith.constant 0 : i32
    %c0_i32_1 = arith.constant 0 : i32
    return %c0_i32, %c0_i32_0 : i32, i32
  }
  func.func @transform_67(%arg0: i32) -> (i32, i32) {
    %c0_i32 = arith.constant 0 : i32
    %c0_i32_0 = arith.constant 0 : i32
    %c0_i32_1 = arith.constant 0 : i32
    return %c0_i32, %c0_i32_0 : i32, i32
  }
  func.func @transform_68(%arg0: i32) -> (i32, i32) {
    %c0_i32 = arith.constant 0 : i32
    %c0_i32_0 = arith.constant 0 : i32
    %c0_i32_1 = arith.constant 0 : i32
    return %c0_i32, %c0_i32_0 : i32, i32
  }
  func.func @transform_69(%arg0: i32) -> (i32, i32) {
    %c0_i32 = arith.constant 0 : i32
    %c0_i32_0 = arith.constant 0 : i32
    %c0_i32_1 = arith.constant 0 : i32
    return %c0_i32, %c0_i32_0 : i32, i32
  }
  func.func @transform_70(%arg0: i32) -> (i32, i32) {
    %c0_i32 = arith.constant 0 : i32
    %c0_i32_0 = arith.constant 0 : i32
    %c0_i32_1 = arith.constant 0 : i32
    return %c0_i32, %c0_i32_0 : i32, i32
  }
  func.func @transform_71(%arg0: i32) -> (i32, i32, i32) {
    %c0_i32 = arith.constant 0 : i32
    %c0_i32_0 = arith.constant 0 : i32
    %c0_i32_1 = arith.constant 0 : i32
    %c0_i32_2 = arith.constant 0 : i32
    return %c0_i32, %c0_i32_0, %c0_i32_1 : i32, i32, i32
  }
  func.func @transform_72(%arg0: i32) -> (i32, i32) {
    %c0_i32 = arith.constant 0 : i32
    %c0_i32_0 = arith.constant 0 : i32
    %c0_i32_1 = arith.constant 0 : i32
    return %c0_i32, %c0_i32_0 : i32, i32
  }
  func.func @transform_73(%arg0: i32) -> (i32, i32) {
    %c0_i32 = arith.constant 0 : i32
    %c0_i32_0 = arith.constant 0 : i32
    %c0_i32_1 = arith.constant 0 : i32
    return %c0_i32, %c0_i32_0 : i32, i32
  }
  func.func @transform_74(%arg0: i32) -> (i32, i32, i32) {
    %c0_i32 = arith.constant 0 : i32
    %c0_i32_0 = arith.constant 0 : i32
    %c0_i32_1 = arith.constant 0 : i32
    return %arg0, %c0_i32, %c0_i32_0 : i32, i32, i32
  }
}

</mosaic_0001>

<bundles_post_ra>
// kernel: ft_net_swin_forward.1
= control target key start
LH: loop header
LB: loop body
LE: loop exit
PB: predicated region body
PF: predicated region fallthrough
CT: control target
= control target key end

     0   :  { %s11904_s6 = smov 1   ;;  %s11905_s10 = smov 2   ;;  %s14826_s0 = inlined_call_operand.smem [shape: u32[75], index: -1, kind: input, shape index: {}] }
   0x1   :  { %s12030_s5 = sld [smem:[%s14826_s0]]   ;;  %s11906_s14 = smov 3  }
   0x2   :  { %s12035_s9 = sld [smem:[%s14826_s0 + %s11904_s6]]   ;;  %s11907_s18 = smov 4  }
   0x3   :  { %s12040_s13 = sld [smem:[%s14826_s0 + %s11905_s10]]   ;;  %s11908_s22 = smov 5  }
   0x4   :  { %s12045_s17 = sld [smem:[%s14826_s0 + %s11906_s14]]   ;;  %s11909_s26 = smov 6  }
   0x5   :  { %s12050_s21 = sld [smem:[%s14826_s0 + %s11907_s18]]   ;;  %s11910_s30 = smov 7  }
   0x6   :  { %s12055_s25 = sld [smem:[%s14826_s0 + %s11908_s22]]   ;;  %s11911_s4 = smov 8  }
   0x7   :  { %14941 = sst [smem:[#allocation72_spill]] %s12030_s5  ;;  %s11912_s10 = smov 9  }
   0x8   :  { %14942 = sst [smem:[#allocation73_spill]] %s12035_s9  ;;  %s11913_s15 = smov 10  }
   0x9   :  { %14943 = sst [smem:[#allocation74_spill]] %s12040_s13  ;;  %s11914_s20 = smov 11  }
   0xa   :  { %14944 = sst [smem:[#allocation75_spill]] %s12045_s17  ;;  %s11916_s1 = smov 13  }
   0xb   :  { %14945 = sst [smem:[#allocation76_spill]] %s12050_s21  ;;  %s11917_s7 = smov 14  }
   0xc   :  { %14946 = sst [smem:[#allocation77_spill]] %s12055_s25  ;;  %s11919_s22 = smov 16  }
   0xd   :  { %s12060_s29 = sld [smem:[%s14826_s0 + %s11909_s26]]   ;;  %s11915_s26 = smov 12  }
   0xe   :  { %s12065_s3 = sld [smem:[%s14826_s0 + %s11910_s30]]   ;;  %s11920_s28 = smov 17  }
   0xf   :  { %s12070_s8 = sld [smem:[%s14826_s0 + %s11911_s4]]  }
  0x10   :  { %s12075_s14 = sld [smem:[%s14826_s0 + %s11912_s10]]  }
  0x11   :  { %s12080_s19 = sld [smem:[%s14826_s0 + %s11913_s15]]   ;;  %s11918_s15 = smov 15  }
  0x12   :  { %s12085_s24 = sld [smem:[%s14826_s0 + %s11914_s20]]  }
  0x13   :  { %14947 = sst [smem:[#allocation78_spill]] %s12060_s29 }
  0x14   :  { %14948 = sst [smem:[#allocation79_spill]] %s12065_s3 }
  0x15   :  { %14949 = sst [smem:[#allocation80_spill]] %s12070_s8 }
  0x16   :  { %14950 = sst [smem:[#allocation81_spill]] %s12075_s14 }
  0x17   :  { %s12090_s30 = sld [smem:[%s14826_s0 + %s11915_s26]]  }
  0x18   :  { %14951 = sst [smem:[#allocation82_spill]] %s12085_s24 }
  0x19   :  { %s12095_s6 = sld [smem:[%s14826_s0 + %s11916_s1]]  }
  0x1a   :  { %s12100_s12 = sld [smem:[%s14826_s0 + %s11917_s7]]   ;;  %s11921_s7 = smov 18  }
  0x1b   :  { %s12105_s20 = sld [smem:[%s14826_s0 + %s11918_s15]]   ;;  %s11922_s15 = smov 19  }
  0x1c   :  { %s12110_s27 = sld [smem:[%s14826_s0 + %s11919_s22]]   ;;  %s11923_s22 = smov 20  }
  0x1d   :  { %14952 = sst [smem:[#allocation83_spill]] %s12090_s30 }
  0x1e   :  { %s12115_s4 = sld [smem:[%s14826_s0 + %s11920_s28]]   ;;  %s11924_s28 = smov 21  }
  0x1f   :  { %14953 = sst [smem:[#allocation84_spill]] %s12095_s6 }
  0x20   :  { %14954 = sst [smem:[#allocation85_spill]] %s12100_s12 }
  0x21   :  { %s12120_s25 = sld [smem:[%s14826_s0 + %s11921_s7]]   ;;  %s11925_s7 = smov 22  }
  0x22   :  { %14955 = sst [smem:[#allocation86_spill]] %s12110_s27 }
  0x23   :  { %s12125_s21 = sld [smem:[%s14826_s0 + %s11922_s15]]   ;;  %s11926_s15 = smov 23  }
  0x24   :  { %14956 = sst [smem:[#allocation87_spill]] %s12115_s4 }
  0x25   :  { %s12130_s17 = sld [smem:[%s14826_s0 + %s11923_s22]]   ;;  %s11927_s22 = smov 24  }
  0x26   :  { %s12135_s9 = sld [smem:[%s14826_s0 + %s11924_s28]]   ;;  %s11928_s28 = smov 25  }
  0x27   :  { %14957 = sst [smem:[#allocation88_spill]] %s12120_s25 }
  0x28   :  { %s12140_s29 = sld [smem:[%s14826_s0 + %s11925_s7]]   ;;  %s11929_s7 = smov 26  }
  0x29   :  { %s12145_s3 = sld [smem:[%s14826_s0 + %s11926_s15]]   ;;  %s11930_s15 = smov 27  }
  0x2a   :  { %s12150_s8 = sld [smem:[%s14826_s0 + %s11927_s22]]   ;;  %s11931_s22 = smov 28  }
  0x2b   :  { %14958 = sst [smem:[#allocation89_spill]] %s12130_s17 }
  0x2c   :  { %14959 = sst [smem:[#allocation90_spill]] %s12135_s9 }
  0x2d   :  { %s12155_s13 = sld [smem:[%s14826_s0 + %s11928_s28]]   ;;  %s11932_s28 = smov 29  }
  0x2e   :  { %14960 = sst [smem:[#allocation91_spill]] %s12140_s29 }
  0x2f   :  { %14961 = sst [smem:[#allocation92_spill]] %s12145_s3 }
  0x30   :  { %14962 = sst [smem:[#allocation93_spill]] %s12150_s8 }
  0x31   :  { %s12160_s25 = sld [smem:[%s14826_s0 + %s11929_s7]]   ;;  %s11933_s7 = smov 30  }
  0x32   :  { %s12165_s27 = sld [smem:[%s14826_s0 + %s11930_s15]]   ;;  %s11934_s15 = smov 31  }
  0x33   :  { %14963 = sst [smem:[#allocation94_spill]] %s12155_s13 }
  0x34   :  { %s12170_s8 = sld [smem:[%s14826_s0 + %s11931_s22]]   ;;  %s11935_s22 = smov 32  }
  0x35   :  { %s12175_s13 = sld [smem:[%s14826_s0 + %s11932_s28]]   ;;  %s11936_s28 = smov 33  }
  0x36   :  { %s12190_s3 = sld [smem:[%s14826_s0 + %s11935_s22]]   ;;  %s11939_s22 = smov 36  }
  0x37   :  { %14964 = sst [smem:[#allocation95_spill]] %s12160_s25 }
  0x38   :  { %14965 = sst [smem:[#allocation96_spill]] %s12165_s27 }
  0x39   :  { %s12180_s25 = sld [smem:[%s14826_s0 + %s11933_s7]]   ;;  %s11937_s7 = smov 34  }
  0x3a   :  { %14966 = sst [smem:[#allocation97_spill]] %s12170_s8 }
  0x3b   :  { %14967 = sst [smem:[#allocation98_spill]] %s12175_s13 }
  0x3c   :  { %s12185_s27 = sld [smem:[%s14826_s0 + %s11934_s15]]   ;;  %s11938_s15 = smov 35  }
  0x3d   :  { %14969 = sst [smem:[#allocation100_spill]] %s12190_s3 }
  0x3e   :  { %s12195_s5 = sld [smem:[%s14826_s0 + %s11936_s28]]   ;;  %s11940_s28 = smov 37  }
  0x3f   :  { %s12200_s30 = sld [smem:[%s14826_s0 + %s11937_s7]]   ;;  %s11941_s7 = smov 38  }
  0x40   :  { %s12210_s3 = sld [smem:[%s14826_s0 + %s11939_s22]]   ;;  %s11943_s22 = smov 40  }
  0x42   :  { %14968 = sst [smem:[#allocation99_spill]] %s12185_s27 }
  0x43   :  { %s12205_s27 = sld [smem:[%s14826_s0 + %s11938_s15]]   ;;  %s11942_s15 = smov 39  }
  0x44   :  { %14970 = sst [smem:[#allocation101_spill]] %s12195_s5 }
  0x45   :  { %14971 = sst [smem:[#allocation102_spill]] %s12200_s30 }
  0x46   :  { %14972 = sst [smem:[#allocation103_spill]] %s12210_s3 }
  0x47   :  { %s12215_s5 = sld [smem:[%s14826_s0 + %s11940_s28]]   ;;  %s11944_s28 = smov 41  }
  0x48   :  { %s12220_s30 = sld [smem:[%s14826_s0 + %s11941_s7]]   ;;  %s11945_s7 = smov 42  }
  0x49   :  { %s12225_s13 = sld [smem:[%s14826_s0 + %s11942_s15]]   ;;  %s11946_s15 = smov 43  }
  0x4a   :  { %s12230_s3 = sld [smem:[%s14826_s0 + %s11943_s22]]   ;;  %s11947_s22 = smov 44  }
  0x4b   :  { %s12235_s29 = sld [smem:[%s14826_s0 + %s11944_s28]]   ;;  %s11948_s28 = smov 45  }
  0x4d   :  { %14973 = sst [smem:[#allocation104_spill]] %s12215_s5 }
  0x4e   :  { %14974 = sst [smem:[#allocation105_spill]] %s12220_s30 }
  0x4f   :  { %14975 = sst [smem:[#allocation106_spill]] %s12225_s13 }
  0x50   :  { %14976 = sst [smem:[#allocation107_spill]] %s12230_s3 }
  0x51   :  { %14977 = sst [smem:[#allocation108_spill]] %s12235_s29 }
  0x52   :  { %s12240_s30 = sld [smem:[%s14826_s0 + %s11945_s7]]   ;;  %s11949_s7 = smov 46  }
  0x53   :  { %s12245_s13 = sld [smem:[%s14826_s0 + %s11946_s15]]   ;;  %s11950_s15 = smov 47  }
  0x54   :  { %s12250_s3 = sld [smem:[%s14826_s0 + %s11947_s22]]   ;;  %s11951_s22 = smov 48  }
  0x55   :  { %s12255_s29 = sld [smem:[%s14826_s0 + %s11948_s28]]   ;;  %s11952_s28 = smov 49  }
  0x56   :  { %s12270_s17 = sld [smem:[%s14826_s0 + %s11951_s22]]   ;;  %s11955_s22 = smov 52  }
  0x57   :  { %s12290_s4 = sld [smem:[%s14826_s0 + %s11955_s22]]   ;;  %s11959_s22 = smov 56  }
  0x58   :  { %14978 = sst [smem:[#allocation109_spill]] %s12240_s30 }
  0x59   :  { %14979 = sst [smem:[#allocation110_spill]] %s12245_s13 }
  0x5a   :  { %14980 = sst [smem:[#allocation111_spill]] %s12250_s3 }
  0x5b   :  { %14981 = sst [smem:[#allocation112_spill]] %s12255_s29 }
  0x5c   :  { %s12260_s30 = sld [smem:[%s14826_s0 + %s11949_s7]]   ;;  %s11953_s7 = smov 50  }
  0x5d   :  { %s12265_s13 = sld [smem:[%s14826_s0 + %s11950_s15]]   ;;  %s11954_s15 = smov 51  }
  0x5e   :  { %s12275_s29 = sld [smem:[%s14826_s0 + %s11952_s28]]   ;;  %s11956_s28 = smov 53  }
  0x5f   :  { %14987 = sst [smem:[#allocation118_spill]] %s12290_s4 }
  0x60   :  { %s12310_s4 = sld [smem:[%s14826_s0 + %s11959_s22]]   ;;  %s11963_s22 = smov 60  }
  0x61   :  { %s12330_s24 = sld [smem:[%s14826_s0 + %s11963_s22]]   ;;  %s11967_s22 = smov 64  }
  0x62   :  { %14982 = sst [smem:[#allocation113_spill]] %s12260_s30 }
  0x63   :  { %14983 = sst [smem:[#allocation114_spill]] %s12265_s13 }
  0x64   :  { %14984 = sst [smem:[#allocation115_spill]] %s12275_s29 }
  0x65   :  { %s12280_s30 = sld [smem:[%s14826_s0 + %s11953_s7]]   ;;  %s11957_s7 = smov 54  }
  0x66   :  { %s12285_s13 = sld [smem:[%s14826_s0 + %s11954_s15]]   ;;  %s11958_s15 = smov 55  }
  0x67   :  { %s12295_s29 = sld [smem:[%s14826_s0 + %s11956_s28]]   ;;  %s11960_s28 = smov 57  }
  0x68   :  { %14990 = sst [smem:[#allocation121_spill]] %s12310_s4 }
  0x69   :  { %14994 = sst [smem:[#allocation125_spill]] %s12330_s24 }
  0x6a   :  { %s12350_s24 = sld [smem:[%s14826_s0 + %s11967_s22]]   ;;  %s11971_s22 = smov 68  }
  0x6b   :  { %14985 = sst [smem:[#allocation116_spill]] %s12280_s30 }
  0x6c   :  { %14986 = sst [smem:[#allocation117_spill]] %s12285_s13 }
  0x6d   :  { %14988 = sst [smem:[#allocation119_spill]] %s12295_s29 }
  0x6e   :  { %s12300_s30 = sld [smem:[%s14826_s0 + %s11957_s7]]   ;;  %s11961_s7 = smov 58  }
  0x6f   :  { %s12305_s13 = sld [smem:[%s14826_s0 + %s11958_s15]]   ;;  %s11962_s15 = smov 59  }
  0x70   :  { %s12315_s29 = sld [smem:[%s14826_s0 + %s11960_s28]]   ;;  %s11964_s28 = smov 61  }
  0x71   :  { %s12320_s12 = sld [smem:[%s14826_s0 + %s11961_s7]]   ;;  %s11965_s7 = smov 62  }
  0x72   :  { %14997 = sst [smem:[#allocation128_spill]] %s12350_s24 }
  0x73   :  { %s12370_s24 = sld [smem:[%s14826_s0 + %s11971_s22]]   ;;  %s11975_s22 = smov 72  }
  0x75   :  { %14989 = sst [smem:[#allocation120_spill]] %s12305_s13 }
  0x76   :  { %14991 = sst [smem:[#allocation122_spill]] %s12315_s29 }
  0x77   :  { %14992 = sst [smem:[#allocation123_spill]] %s12320_s12 }
  0x78   :  { %s12325_s13 = sld [smem:[%s14826_s0 + %s11962_s15]]   ;;  %s11966_s15 = smov 63  }
  0x79   :  { %s12335_s29 = sld [smem:[%s14826_s0 + %s11964_s28]]   ;;  %s11968_s28 = smov 65  }
  0x7a   :  { %s12340_s12 = sld [smem:[%s14826_s0 + %s11965_s7]]   ;;  %s11969_s7 = smov 66  }
  0x7b   :  { %s12355_s14 = sld [smem:[%s14826_s0 + %s11968_s28]]   ;;  %s11972_s28 = smov 69  }
  0x7c   :  { %15001 = sst [smem:[#allocation132_spill]] %s12370_s24 }
  0x7d   :  { %s12390_s24 = sld [smem:[%s14826_s0 + %s11975_s22]]  }
  0x7e   :  { %14993 = sst [smem:[#allocation124_spill]] %s12325_s13 }
  0x7f   :  { %s12345_s13 = sld [smem:[%s14826_s0 + %s11966_s15]]   ;;  %s11970_s15 = smov 67  }
  0x80   :  { %14995 = sst [smem:[#allocation126_spill]] %s12340_s12 }
  0x81   :  { %14998 = sst [smem:[#allocation129_spill]] %s12355_s14 }
  0x82   :  { %s12360_s12 = sld [smem:[%s14826_s0 + %s11969_s7]]   ;;  %s11973_s7 = smov 70  }
  0x83   :  { %s12375_s14 = sld [smem:[%s14826_s0 + %s11972_s28]]   ;;  %s11976_s28 = smov 73  }
  0x85   :  { %14996 = sst [smem:[#allocation127_spill]] %s12345_s13 }
  0x86   :  { %s12365_s13 = sld [smem:[%s14826_s0 + %s11970_s15]]   ;;  %s11974_s15 = smov 71  }
  0x88   :  { %14999 = sst [smem:[#allocation130_spill]] %s12360_s12 }
  0x89   :  { %15002 = sst [smem:[#allocation133_spill]] %s12375_s14 }
  0x8a   :  { %s12380_s12 = sld [smem:[%s14826_s0 + %s11973_s7]]   ;;  %s11977_s7 = smov 74  }
  0x8b   :  { %s12395_s14 = sld [smem:[%s14826_s0 + %s11976_s28]]  }
  0x8c   :  { %15000 = sst [smem:[#allocation131_spill]] %s12365_s13 }
  0x8d   :  { %s12385_s13 = sld [smem:[%s14826_s0 + %s11974_s15]]  }
  0x90   :  { %15003 = sst [smem:[#allocation134_spill]] %s12380_s12 }
  0x91   :  { %s12400_s12 = sld [smem:[%s14826_s0 + %s11977_s7]]  }
  0x92   :  { %154 = vsyncpa [#allocation3], 0 }
  0x93   :  { %155 = vsyncpa [#allocation6], 0 }
  0x94   :  { %156 = vsyncpa [#allocation9], 0 }
  0x95   :  { %157 = vsyncpa [#allocation12], 0 }
  0x96   :  { %158 = vsyncpa [#allocation15], 0 }
  0x97   :  { %159 = vsyncpa [#allocation18], 0 }
  0x98   :  { %160 = vsyncpa [#allocation21], 0 }
  0x99   :  { %161 = vsyncpa [#allocation24], 0 }
  0x9a   :  { %162 = vsyncpa [#allocation27], 0 }
  0x9b   :  { %163 = vsyncpa [#allocation30], 0 }
  0x9c   :  { %164 = vsyncpa [#allocation33], 0 }
  0x9d   :  { %165 = vsyncpa [#allocation36], 0 }
  0x9e   :  { %166 = vsyncpa [#allocation39], 0 }
  0x9f   :  { %167 = vsyncpa [#allocation42], 0 }
  0xa0   :  { %168 = vsyncpa [#allocation45], 0 }
  0xa1   :  { %169 = vsyncpa [#allocation48], 0 }
  0xa2   :  { %170 = vsyncpa [#allocation51], 0 }
  0xa3   :  { %171 = vsyncpa [#allocation4], 0 }
  0xa4   :  { %173 = vsyncpa [#allocation4 + $0x1], 0  ;;  %s12402_s0 = smov 0   ;;  %s12404_s15 = smov 0  }
  0xa5   :  { %s12406_s16 = smov 0   ;;  %s12408_s18 = smov 0  }
  0xa6   :  { %15004 = sst [smem:[#allocation135_spill]] %s12408_s18 }
  0xa7 LB: > { %s15006_s9 = sld [smem:[#allocation90_spill]]  ;;  %s1745_s28 = sadd.s32 1, %s11898_s16  ;;  %s11894_s15 = sphi %s12404_s15, %s15117_s15   ;;  %s11890_s0 = sphi %s12402_s0, %s15116_s0   ;;  %s11898_s16 = sphi %s12406_s16, %s15115_s16  }
  0xa8   : > { %s15007_s8 = sld [smem:[#allocation97_spill]]  ;;  %p1755_p0 = scmp.ne.s32.totalorder %s11898_s16, %s11894_s15 }
  0xa9   : > { %s15008_s6 = sld [smem:[#allocation84_spill]]  ;;  %p1761_p3 = scmp.ne.s32.totalorder %s11894_s15, %s11890_s0 }
  0xaa   : > { %s15009_s5 = sld [smem:[#allocation104_spill]] }
  0xab   : > { %s15010_s4 = sld [smem:[#allocation121_spill]] }
  0xac   : > { %s15011_s3 = sld [smem:[#allocation111_spill]] }
  0xad   : > { %s15012_s18 = sld [smem:[#allocation135_spill]] }
  0xae   : > { %15013 = sst [smem:[#allocation135_spill]] %s11890_s0 }
  0xaf   : > { %15014 = sst [smem:[#allocation136_spill]] %s11898_s16 }
  0xb3   : > { %15015 = sst [smem:[#allocation137_spill]] %s15012_s18  ;;  %s12423_s22 = sadd.s32 4294967295, %s15012_s18  }
  0xb4   : > { %s9198_s23 = sadd.s32 4294967294, %s15012_s18   ;;  %s12427_s26 = sadd.s32 1, %s15012_s18  }
  0xb5   : > { %15016 = sst [smem:[#allocation138_spill]] %s12427_s26  ;;  %s1742_s1 = ssub.s32 %s15012_s18, %s12427_s26 }
  0xb6   : > { %p1743_p1 = scmp.eq.s32.totalorder %s1742_s1, 0  ;;  %p1756_p2 = scmp.eq.s32.totalorder %s12423_s22, 1 }
  0xb7   : > { %p1762_p4 = scmp.eq.s32.totalorder %s9198_s23, 1  ;;  %p9199_p7 = scmp.ge.s32.totalorder %s15012_s18, 1 }
  0xb8   : > { %s12438_s2 = scalar_select %p1743_p1, %s11898_s16, %s1745_s28  }
  0xb9   : > { %p12440_p5 = por %p1756_p2, %p1755_p0  ;;  %p12444_p6 = por %p1762_p4, %p1761_p3 }
  0xba   : > { %15017 = sst [smem:[#allocation139_spill]] %s12438_s2  ;;  %p1769_p8 = scmp.lt.s32.totalorder %s15012_s18, 3 }
  0xbb   : > { %s15018_s7 = scalar_select %p12440_p5, 1, 0 }
  0xbc   : > { %s15020_s10 = scalar_select %p12444_p6, 1, 0 }
  0xbd   : > { %15019 = sst [smem:[#allocation140_spill]] %s15018_s7  ;;  %p12450_p9 = pnand %p9199_p7, %p1769_p8 }
  0xbe   : > { %15021 = sst [smem:[#allocation141_spill]] %s15020_s10  ;;  %p10174_p10 = scmp.eq.s32.totalorder (!%p12450_p9), %s12423_s22, 0 }
  0xbf   : > { %1773 = sbr.rel (%p12450_p9) target bundleno = 622 (0x26e), region = 12  ;;  %s1817_s23 = sshll.u32 (!%p12450_p9), %s12080_s19, 4  ;;  %s1818_s23 = int_to_ptr.hbm [resolvable:$true] %s1817_s23 }
  0xc0   : > { %s11978_s28 = smov (!%p12450_p9), [#allocation5]   ;;  %s1844_s2 = sshll.u32 (!%p12450_p9), %s15008_s6, 4  ;;  %s12459_s2 = int_to_ptr.hbm [resolvable:$true] %s1844_s2 }
  0xc1   : > { %s1819_s1 = sshll.u32 (!%p12450_p9), %s11978_s28, 4  ;;  %s10848_s16 = sshra.s32 (!%p12450_p9), %s1818_s23, 4  ;;  %s1820_s1 = int_to_ptr.vmem [resolvable:$true] %s1819_s1  ;;  %s10849_s16 = int_to_ptr.hbm [resolvable:$true] %s10848_s16 }
  0xc2   : > { %s10850_s26 = scalar_lea.hbm (!%p12450_p9), %s10849_s16, 1  ;;  %s10854_s10 = scalar_lea.hbm (!%p12450_p9), %s12080_s19, 1 }
  0xc3   : > { %p10851_p11 = scmp.ne.s32.totalorder (!%p12450_p9), %s10849_s16, %s10850_s26  ;;  %p10855_p0 = scmp.lt.s32.totalorder (!%p12450_p9), %s10849_s16, %s12080_s19 }
  0xc4   : > { %p10856_p1 = scmp.lt.s32.totalorder %s10854_s10, %s10850_s26 }
  0xc5   : > { %p10852_p12 = pnand %p10851_p11, %p10174_p10 }
  0xc6   : > { %p10857_p2 = por %p10856_p1, %p10855_p0 }
  0xc7   : > { %p10853_p13 = pneg %p10852_p12 }
  0xc9   : > { %p10858_p3 = pnand %p10857_p2, %p10853_p13 }
  0xcb   : > { %10861 = shalt.err (!%p10858_p3)
}
  0xcc   : > { %10039 = dma.hbm_to_vmem [thread:$0]  (%p10174_p10), %s1818_s23, 16, %s1820_s1, [#allocation6]  }
  0xcd   : > { %s1868_s28 = sshll.u32 %s12105_s20, 4  ;;  %s11979_s0 = smov [#allocation8]   ;;  %s12468_s28 = int_to_ptr.hbm [resolvable:$true] %s1868_s28 }
  0xce   : > { %s1846_s18 = sshll.u32 %s11979_s0, 4  ;;  %s10876_s7 = sshra.s32 %s12459_s2, 4  ;;  %s1847_s18 = int_to_ptr.vmem [resolvable:$true] %s1846_s18  ;;  %s10877_s7 = int_to_ptr.hbm [resolvable:$true] %s10876_s7 }
  0xcf   : > { %s10878_s16 = scalar_lea.hbm %s10877_s7, 1  ;;  %s10882_s26 = scalar_lea.hbm %s15008_s6, 1 }
  0xd0   : > { %p10879_p4 = scmp.ne.s32.totalorder %s10877_s7, %s10878_s16  ;;  %p10883_p11 = scmp.lt.s32.totalorder %s10877_s7, %s15008_s6 }
  0xd1   : > { %p10884_p12 = scmp.lt.s32.totalorder %s10882_s26, %s10878_s16 }
  0xd2   : > { %p10880_p7 = pnand %p10879_p4, %p10174_p10 }
  0xd3   : > { %p10885_p13 = por %p10884_p12, %p10883_p11 }
  0xd4   : > { %p10881_p8 = pneg %p10880_p7 }
  0xd6   : > { %p10886_p0 = pnand %p10885_p13, %p10881_p8 }
  0xd8   : > { %10889 = shalt.err (!%p10886_p0)
}
  0xd9   : > { %10043 = dma.hbm_to_vmem [thread:$0]  (%p10174_p10), %s12459_s2, 16, %s1847_s18, [#allocation9]  }
  0xda   : > { %s11980_s0 = smov [#allocation11]   ;;  %s1898_s23 = sshll.u32 %s12125_s21, 4  ;;  %s12479_s23 = int_to_ptr.hbm [resolvable:$true] %s1898_s23 }
  0xdb   : > { %s1870_s10 = sshll.u32 %s11980_s0, 4  ;;  %s10904_s7 = sshra.s32 %s12468_s28, 4  ;;  %s1871_s10 = int_to_ptr.vmem [resolvable:$true] %s1870_s10  ;;  %s10905_s7 = int_to_ptr.hbm [resolvable:$true] %s10904_s7 }
  0xdc   : > { %s10906_s1 = scalar_lea.hbm %s10905_s7, 1  ;;  %s10910_s16 = scalar_lea.hbm %s12105_s20, 1 }
  0xdd   : > { %p10907_p1 = scmp.ne.s32.totalorder %s10905_s7, %s10906_s1  ;;  %p10911_p4 = scmp.lt.s32.totalorder %s10905_s7, %s12105_s20 }
  0xde   : > { %p10912_p7 = scmp.lt.s32.totalorder %s10910_s16, %s10906_s1 }
  0xdf   : > { %p10908_p2 = pnand %p10907_p1, %p10174_p10 }
  0xe0   : > { %p10913_p8 = por %p10912_p7, %p10911_p4 }
  0xe1   : > { %p10909_p3 = pneg %p10908_p2 }
  0xe3   : > { %p10914_p11 = pnand %p10913_p8, %p10909_p3 }
  0xe5   : > { %10917 = shalt.err (!%p10914_p11)
}
  0xe6   : > { %10047 = dma.hbm_to_vmem [thread:$0]  (%p10174_p10), %s12468_s28, 16, %s1871_s10, [#allocation12]  }
  0xe7   : > { %s1922_s18 = sshll.u32 %s15006_s9, 4  ;;  %s11981_s2 = smov [#allocation14]   ;;  %s12490_s18 = int_to_ptr.hbm [resolvable:$true] %s1922_s18 }
  0xe8   : > { %s1900_s26 = sshll.u32 %s11981_s2, 4  ;;  %s10932_s0 = sshra.s32 %s12479_s23, 4  ;;  %s1901_s26 = int_to_ptr.vmem [resolvable:$true] %s1900_s26  ;;  %s10933_s0 = int_to_ptr.hbm [resolvable:$true] %s10932_s0 }
  0xe9   : > { %s10934_s7 = scalar_lea.hbm %s10933_s0, 1  ;;  %s10938_s1 = scalar_lea.hbm %s12125_s21, 1 }
  0xea   : > { %p10935_p12 = scmp.ne.s32.totalorder %s10933_s0, %s10934_s7  ;;  %p10939_p1 = scmp.lt.s32.totalorder %s10933_s0, %s12125_s21 }
  0xeb   : > { %p10940_p2 = scmp.lt.s32.totalorder %s10938_s1, %s10934_s7 }
  0xec   : > { %p10936_p13 = pnand %p10935_p12, %p10174_p10 }
  0xed   : > { %p10941_p3 = por %p10940_p2, %p10939_p1 }
  0xee   : > { %p10937_p0 = pneg %p10936_p13 }
  0xf0   : > { %p10942_p4 = pnand %p10941_p3, %p10937_p0 }
  0xf2   : > { %10945 = shalt.err (!%p10942_p4)
}
  0xf3   : > { %10051 = dma.hbm_to_vmem [thread:$0]  (%p10174_p10), %s12479_s23, 16, %s1901_s26, [#allocation15]  }
  0xf4   : > { %s11982_s28 = smov [#allocation17]   ;;  %s1961_s16 = sshll.u32 %s15007_s8, 4  ;;  %s12501_s16 = int_to_ptr.hbm [resolvable:$true] %s1961_s16 }
  0xf5   : > { %s1924_s10 = sshll.u32 %s11982_s28, 4  ;;  %s10960_s2 = sshra.s32 %s12490_s18, 4  ;;  %s1925_s10 = int_to_ptr.vmem [resolvable:$true] %s1924_s10  ;;  %s10961_s2 = int_to_ptr.hbm [resolvable:$true] %s10960_s2 }
  0xf6   : > { %s10962_s0 = scalar_lea.hbm %s10961_s2, 1  ;;  %s10966_s7 = scalar_lea.hbm %s15006_s9, 1 }
  0xf7   : > { %p10963_p7 = scmp.ne.s32.totalorder %s10961_s2, %s10962_s0  ;;  %p10967_p12 = scmp.lt.s32.totalorder %s10961_s2, %s15006_s9 }
  0xf8   : > { %p10968_p13 = scmp.lt.s32.totalorder %s10966_s7, %s10962_s0 }
  0xf9   : > { %p10964_p8 = pnand %p10963_p7, %p10174_p10 }
  0xfa   : > { %p10969_p0 = por %p10968_p13, %p10967_p12 }
  0xfb   : > { %p10965_p11 = pneg %p10964_p8 }
  0xfd   : > { %p10970_p1 = pnand %p10969_p0, %p10965_p11 }
  0xff   : > { %10973 = shalt.err (!%p10970_p1)
}
 0x100   : > { %10055 = dma.hbm_to_vmem [thread:$0]  (%p10174_p10), %s12490_s18, 16, %s1925_s10, [#allocation18]  }
 0x101   : > { %s1985_s23 = sshll.u32 %s12180_s25, 4  ;;  %s11983_s26 = smov [#allocation20]   ;;  %s12512_s23 = int_to_ptr.hbm [resolvable:$true] %s1985_s23 }
 0x102   : > { %s1963_s1 = sshll.u32 %s11983_s26, 4  ;;  %s10988_s28 = sshra.s32 %s12501_s16, 4  ;;  %s1964_s1 = int_to_ptr.vmem [resolvable:$true] %s1963_s1  ;;  %s10989_s28 = int_to_ptr.hbm [resolvable:$true] %s10988_s28 }
 0x103   : > { %s10990_s2 = scalar_lea.hbm %s10989_s28, 1  ;;  %s10994_s0 = scalar_lea.hbm %s15007_s8, 1 }
 0x104   : > { %p10991_p2 = scmp.ne.s32.totalorder %s10989_s28, %s10990_s2  ;;  %p10995_p7 = scmp.lt.s32.totalorder %s10989_s28, %s15007_s8 }
 0x105   : > { %p10996_p8 = scmp.lt.s32.totalorder %s10994_s0, %s10990_s2 }
 0x106   : > { %p10992_p3 = pnand %p10991_p2, %p10174_p10 }
 0x107   : > { %p10997_p11 = por %p10996_p8, %p10995_p7 }
 0x108   : > { %p10993_p4 = pneg %p10992_p3 }
 0x10a   : > { %p10998_p12 = pnand %p10997_p11, %p10993_p4 }
 0x10c   : > { %11001 = shalt.err (!%p10998_p12)
}
 0x10d   : > { %10059 = dma.hbm_to_vmem [thread:$0]  (%p10174_p10), %s12501_s16, 16, %s1964_s1, [#allocation21]  }
 0x10e   : > { %s11984_s18 = smov [#allocation23]   ;;  %s2018_s7 = sshll.u32 %s12205_s27, 4  ;;  %s12523_s7 = int_to_ptr.hbm [resolvable:$true] %s2018_s7 }
 0x10f   : > { %s1987_s10 = sshll.u32 %s11984_s18, 4  ;;  %s11016_s26 = sshra.s32 %s12512_s23, 4  ;;  %s1988_s10 = int_to_ptr.vmem [resolvable:$true] %s1987_s10  ;;  %s11017_s26 = int_to_ptr.hbm [resolvable:$true] %s11016_s26 }
 0x110   : > { %s11018_s28 = scalar_lea.hbm %s11017_s26, 1  ;;  %s11022_s2 = scalar_lea.hbm %s12180_s25, 1 }
 0x111   : > { %p11019_p13 = scmp.ne.s32.totalorder %s11017_s26, %s11018_s28  ;;  %p11023_p2 = scmp.lt.s32.totalorder %s11017_s26, %s12180_s25 }
 0x112   : > { %p11024_p3 = scmp.lt.s32.totalorder %s11022_s2, %s11018_s28 }
 0x113   : > { %p11020_p0 = pnand %p11019_p13, %p10174_p10 }
 0x114   : > { %p11025_p4 = por %p11024_p3, %p11023_p2 }
 0x115   : > { %p11021_p1 = pneg %p11020_p0 }
 0x117   : > { %p11026_p7 = pnand %p11025_p4, %p11021_p1 }
 0x119   : > { %11029 = shalt.err (!%p11026_p7)
}
 0x11a   : > { %10063 = dma.hbm_to_vmem [thread:$0]  (%p10174_p10), %s12512_s23, 16, %s1988_s10, [#allocation24]  }
 0x11b   : > { %s2042_s16 = sshll.u32 %s15009_s5, 4  ;;  %s11985_s1 = smov [#allocation26]   ;;  %s12534_s16 = int_to_ptr.hbm [resolvable:$true] %s2042_s16 }
 0x11c   : > { %s2020_s0 = sshll.u32 %s11985_s1, 4  ;;  %s11044_s18 = sshra.s32 %s12523_s7, 4  ;;  %s2021_s0 = int_to_ptr.vmem [resolvable:$true] %s2020_s0  ;;  %s11045_s18 = int_to_ptr.hbm [resolvable:$true] %s11044_s18 }
 0x11d   : > { %s11046_s26 = scalar_lea.hbm %s11045_s18, 1  ;;  %s11050_s28 = scalar_lea.hbm %s12205_s27, 1 }
 0x11e   : > { %p11047_p8 = scmp.ne.s32.totalorder %s11045_s18, %s11046_s26  ;;  %p11051_p13 = scmp.lt.s32.totalorder %s11045_s18, %s12205_s27 }
 0x11f   : > { %p11052_p0 = scmp.lt.s32.totalorder %s11050_s28, %s11046_s26 }
 0x120   : > { %p11048_p11 = pnand %p11047_p8, %p10174_p10 }
 0x121   : > { %p11053_p1 = por %p11052_p0, %p11051_p13 }
 0x122   : > { %p11049_p12 = pneg %p11048_p11 }
 0x124   : > { %p11054_p2 = pnand %p11053_p1, %p11049_p12 }
 0x126   : > { %11057 = shalt.err (!%p11054_p2)
}
 0x127   : > { %10067 = dma.hbm_to_vmem [thread:$0]  (%p10174_p10), %s12523_s7, 16, %s2021_s0, [#allocation27]  }
 0x128   : > { %s11986_s23 = smov [#allocation29]   ;;  %s2081_s2 = sshll.u32 %s15011_s3, 4  ;;  %s12545_s2 = int_to_ptr.hbm [resolvable:$true] %s2081_s2 }
 0x129   : > { %s2044_s10 = sshll.u32 %s11986_s23, 4  ;;  %s11072_s1 = sshra.s32 %s12534_s16, 4  ;;  %s2045_s10 = int_to_ptr.vmem [resolvable:$true] %s2044_s10  ;;  %s11073_s1 = int_to_ptr.hbm [resolvable:$true] %s11072_s1 }
 0x12a   : > { %s11074_s18 = scalar_lea.hbm %s11073_s1, 1  ;;  %s11078_s26 = scalar_lea.hbm %s15009_s5, 1 }
 0x12b   : > { %p11075_p3 = scmp.ne.s32.totalorder %s11073_s1, %s11074_s18  ;;  %p11079_p8 = scmp.lt.s32.totalorder %s11073_s1, %s15009_s5 }
 0x12c   : > { %p11080_p11 = scmp.lt.s32.totalorder %s11078_s26, %s11074_s18 }
 0x12d   : > { %p11076_p4 = pnand %p11075_p3, %p10174_p10 }
 0x12e   : > { %p11081_p12 = por %p11080_p11, %p11079_p8 }
 0x12f   : > { %p11077_p7 = pneg %p11076_p4 }
 0x131   : > { %p11082_p13 = pnand %p11081_p12, %p11077_p7 }
 0x133   : > { %11085 = shalt.err (!%p11082_p13)
}
 0x134   : > { %10071 = dma.hbm_to_vmem [thread:$0]  (%p10174_p10), %s12534_s16, 16, %s2045_s10, [#allocation30]  }
 0x135   : > { %s2111_s7 = sshll.u32 %s12270_s17, 4  ;;  %s11987_s0 = smov [#allocation32]   ;;  %s12556_s7 = int_to_ptr.hbm [resolvable:$true] %s2111_s7 }
 0x136   : > { %s2083_s28 = sshll.u32 %s11987_s0, 4  ;;  %s11100_s23 = sshra.s32 %s12545_s2, 4  ;;  %s2084_s28 = int_to_ptr.vmem [resolvable:$true] %s2083_s28  ;;  %s11101_s23 = int_to_ptr.hbm [resolvable:$true] %s11100_s23 }
 0x137   : > { %s11102_s1 = scalar_lea.hbm %s11101_s23, 1  ;;  %s11106_s18 = scalar_lea.hbm %s15011_s3, 1 }
 0x138   : > { %p11103_p0 = scmp.ne.s32.totalorder %s11101_s23, %s11102_s1  ;;  %p11107_p3 = scmp.lt.s32.totalorder %s11101_s23, %s15011_s3 }
 0x139   : > { %p11108_p4 = scmp.lt.s32.totalorder %s11106_s18, %s11102_s1 }
 0x13a   : > { %p11104_p1 = pnand %p11103_p0, %p10174_p10 }
 0x13b   : > { %p11109_p7 = por %p11108_p4, %p11107_p3 }
 0x13c   : > { %p11105_p2 = pneg %p11104_p1 }
 0x13e   : > { %p11110_p8 = pnand %p11109_p7, %p11105_p2 }
 0x140   : > { %11113 = shalt.err (!%p11110_p8)
}
 0x141   : > { %10075 = dma.hbm_to_vmem [thread:$0]  (%p10174_p10), %s12545_s2, 16, %s2084_s28, [#allocation33]  }
 0x142   : > { %s11988_s16 = smov [#allocation35]   ;;  %s2147_s26 = sshll.u32 %s12300_s30, 4  ;;  %s12567_s26 = int_to_ptr.hbm [resolvable:$true] %s2147_s26 }
 0x143   : > { %s2113_s10 = sshll.u32 %s11988_s16, 4  ;;  %s11128_s0 = sshra.s32 %s12556_s7, 4  ;;  %s2114_s10 = int_to_ptr.vmem [resolvable:$true] %s2113_s10  ;;  %s11129_s0 = int_to_ptr.hbm [resolvable:$true] %s11128_s0 }
 0x144   : > { %s11130_s23 = scalar_lea.hbm %s11129_s0, 1  ;;  %s11134_s1 = scalar_lea.hbm %s12270_s17, 1 }
 0x145   : > { %p11131_p11 = scmp.ne.s32.totalorder %s11129_s0, %s11130_s23  ;;  %p11135_p0 = scmp.lt.s32.totalorder %s11129_s0, %s12270_s17 }
 0x146   : > { %p11136_p1 = scmp.lt.s32.totalorder %s11134_s1, %s11130_s23 }
 0x147   : > { %p11132_p12 = pnand %p11131_p11, %p10174_p10 }
 0x148   : > { %p11137_p2 = por %p11136_p1, %p11135_p0 }
 0x149   : > { %p11133_p13 = pneg %p11132_p12 }
 0x14b   : > { %p11138_p3 = pnand %p11137_p2, %p11133_p13 }
 0x14d   : > { %11141 = shalt.err (!%p11138_p3)
}
 0x14e   : > { %10079 = dma.hbm_to_vmem [thread:$0]  (%p10174_p10), %s12556_s7, 16, %s2114_s10, [#allocation36]  }
 0x14f   : > { %s2171_s2 = sshll.u32 %s15010_s4, 4  ;;  %s11989_s28 = smov [#allocation38]   ;;  %s12578_s2 = int_to_ptr.hbm [resolvable:$true] %s2171_s2 }
 0x150   : > { %s2149_s18 = sshll.u32 %s11989_s28, 4  ;;  %s11156_s16 = sshra.s32 %s12567_s26, 4  ;;  %s2150_s18 = int_to_ptr.vmem [resolvable:$true] %s2149_s18  ;;  %s11157_s16 = int_to_ptr.hbm [resolvable:$true] %s11156_s16 }
 0x151   : > { %s11158_s0 = scalar_lea.hbm %s11157_s16, 1  ;;  %s11162_s23 = scalar_lea.hbm %s12300_s30, 1 }
 0x152   : > { %p11159_p4 = scmp.ne.s32.totalorder %s11157_s16, %s11158_s0  ;;  %p11163_p11 = scmp.lt.s32.totalorder %s11157_s16, %s12300_s30 }
 0x153   : > { %p11164_p12 = scmp.lt.s32.totalorder %s11162_s23, %s11158_s0 }
 0x154   : > { %p11160_p7 = pnand %p11159_p4, %p10174_p10 }
 0x155   : > { %p11165_p13 = por %p11164_p12, %p11163_p11 }
 0x156   : > { %p11161_p8 = pneg %p11160_p7 }
 0x158   : > { %p11166_p0 = pnand %p11165_p13, %p11161_p8 }
 0x15a   : > { %11169 = shalt.err (!%p11166_p0)
}
 0x15b   : > { %10083 = dma.hbm_to_vmem [thread:$0]  (%p10174_p10), %s12567_s26, 16, %s2150_s18, [#allocation39]  }
 0x15c   : > { %s11990_s7 = smov [#allocation41]   ;;  %s2204_s1 = sshll.u32 %s12335_s29, 4  ;;  %s12589_s1 = int_to_ptr.hbm [resolvable:$true] %s2204_s1 }
 0x15d   : > { %s2173_s10 = sshll.u32 %s11990_s7, 4  ;;  %s11184_s28 = sshra.s32 %s12578_s2, 4  ;;  %s2174_s10 = int_to_ptr.vmem [resolvable:$true] %s2173_s10  ;;  %s11185_s28 = int_to_ptr.hbm [resolvable:$true] %s11184_s28 }
 0x15e   : > { %s11186_s16 = scalar_lea.hbm %s11185_s28, 1  ;;  %s11190_s0 = scalar_lea.hbm %s15010_s4, 1 }
 0x15f   : > { %p11187_p1 = scmp.ne.s32.totalorder %s11185_s28, %s11186_s16  ;;  %p11191_p4 = scmp.lt.s32.totalorder %s11185_s28, %s15010_s4 }
 0x160   : > { %p11192_p7 = scmp.lt.s32.totalorder %s11190_s0, %s11186_s16 }
 0x161   : > { %p11188_p2 = pnand %p11187_p1, %p10174_p10 }
 0x162   : > { %p11193_p8 = por %p11192_p7, %p11191_p4 }
 0x163   : > { %p11189_p3 = pneg %p11188_p2 }
 0x165   : > { %p11194_p11 = pnand %p11193_p8, %p11189_p3 }
 0x167   : > { %11197 = shalt.err (!%p11194_p11)
}
 0x168   : > { %s15023_s26 = sld [smem:[#allocation131_spill]]  ;;  %s11991_s23 = smov [#allocation44]  }
 0x169   : > { %10087 = dma.hbm_to_vmem [thread:$0]  (%p10174_p10), %s12578_s2, 16, %s2174_s10, [#allocation42]  }
 0x16a   : > { %s2206_s7 = sshll.u32 %s11991_s23, 4  ;;  %s11212_s28 = sshra.s32 %s12589_s1, 4  ;;  %s2207_s7 = int_to_ptr.vmem [resolvable:$true] %s2206_s7  ;;  %s11213_s28 = int_to_ptr.hbm [resolvable:$true] %s11212_s28 }
 0x16b   : > { %s11214_s16 = scalar_lea.hbm %s11213_s28, 1  ;;  %s11218_s0 = scalar_lea.hbm %s12335_s29, 1 }
 0x16c   : > { %p11215_p12 = scmp.ne.s32.totalorder %s11213_s28, %s11214_s16  ;;  %p11219_p1 = scmp.lt.s32.totalorder %s11213_s28, %s12335_s29 }
 0x16d   : > { %p11220_p2 = scmp.lt.s32.totalorder %s11218_s0, %s11214_s16 }
 0x16e   : > { %s2240_s18 = sshll.u32 %s15023_s26, 4  ;;  %p11216_p13 = pnand %p11215_p12, %p10174_p10  ;;  %s12600_s18 = int_to_ptr.hbm [resolvable:$true] %s2240_s18 }
 0x16f   : > { %p11221_p3 = por %p11220_p2, %p11219_p1 }
 0x170   : > { %p11217_p0 = pneg %p11216_p13 }
 0x172   : > { %p11222_p4 = pnand %p11221_p3, %p11217_p0 }
 0x174   : > { %11225 = shalt.err (!%p11222_p4)
}
 0x175   : > { %s15024_s2 = sld [smem:[#allocation133_spill]]  ;;  %s11992_s10 = smov [#allocation47]  }
 0x176   : > { %10091 = dma.hbm_to_vmem [thread:$0]  (%p10174_p10), %s12589_s1, 16, %s2207_s7, [#allocation45]  }
 0x177   : > { %s2242_s23 = sshll.u32 %s11992_s10, 4  ;;  %s11240_s28 = sshra.s32 %s12600_s18, 4  ;;  %s2243_s23 = int_to_ptr.vmem [resolvable:$true] %s2242_s23  ;;  %s11241_s28 = int_to_ptr.hbm [resolvable:$true] %s11240_s28 }
 0x178   : > { %s11242_s16 = scalar_lea.hbm %s11241_s28, 1  ;;  %s11246_s0 = scalar_lea.hbm %s15023_s26, 1 }
 0x179   : > { %p11243_p7 = scmp.ne.s32.totalorder %s11241_s28, %s11242_s16  ;;  %p11247_p12 = scmp.lt.s32.totalorder %s11241_s28, %s15023_s26 }
 0x17a   : > { %p11248_p13 = scmp.lt.s32.totalorder %s11246_s0, %s11242_s16 }
 0x17b   : > { %s2264_s3 = sshll.u32 %s15024_s2, 4  ;;  %p11244_p8 = pnand %p11243_p7, %p10174_p10  ;;  %s12611_s3 = int_to_ptr.hbm [resolvable:$true] %s2264_s3 }
 0x17c   : > { %p11249_p0 = por %p11248_p13, %p11247_p12 }
 0x17d   : > { %p11245_p11 = pneg %p11244_p8 }
 0x17f   : > { %p11250_p1 = pnand %p11249_p0, %p11245_p11 }
 0x181   : > { %11253 = shalt.err (!%p11250_p1)
}
 0x182   : > { %s15025_s1 = sld [smem:[#allocation81_spill]]  ;;  %s11993_s7 = smov [#allocation50]  }
 0x183   : > { %10095 = dma.hbm_to_vmem [thread:$0]  (%p10174_p10), %s12600_s18, 16, %s2243_s23, [#allocation48]  }
 0x184   : > { %s2266_s10 = sshll.u32 %s11993_s7, 4  ;;  %s11268_s28 = sshra.s32 %s12611_s3, 4  ;;  %s2267_s10 = int_to_ptr.vmem [resolvable:$true] %s2266_s10  ;;  %s11269_s28 = int_to_ptr.hbm [resolvable:$true] %s11268_s28 }
 0x185   : > { %s11270_s16 = scalar_lea.hbm %s11269_s28, 1  ;;  %s11274_s0 = scalar_lea.hbm %s15024_s2, 1 }
 0x186   : > { %p11271_p2 = scmp.ne.s32.totalorder %s11269_s28, %s11270_s16  ;;  %p11275_p7 = scmp.lt.s32.totalorder %s11269_s28, %s15024_s2 }
 0x187   : > { %p11276_p8 = scmp.lt.s32.totalorder %s11274_s0, %s11270_s16 }
 0x188   : > { %s1805_s4 = sshll.u32 %s15025_s1, 4  ;;  %p11272_p3 = pnand %p11271_p2, %p10174_p10  ;;  %s12622_s4 = int_to_ptr.hbm [resolvable:$true] %s1805_s4 }
 0x189   : > { %p11277_p11 = por %p11276_p8, %p11275_p7 }
 0x18a   : > { %p11273_p4 = pneg %p11272_p3 }
 0x18c   : > { %p11278_p12 = pnand %p11277_p11, %p11273_p4 }
 0x18e   : > { %11281 = shalt.err (!%p11278_p12)
}
 0x18f   : > { %s15026_s18 = sld [smem:[#allocation82_spill]]  ;;  %s11994_s5 = smov [#allocation2]  }
 0x190   : > { %10099 = dma.hbm_to_vmem [thread:$0]  (%p10174_p10), %s12611_s3, 16, %s2267_s10, [#allocation51]  }
 0x191   : > { %s1807_s6 = sshll.u32 %s11994_s5, 4  ;;  %s11296_s28 = sshra.s32 %s12622_s4, 4  ;;  %s1808_s6 = int_to_ptr.vmem [resolvable:$true] %s1807_s6  ;;  %s11297_s28 = int_to_ptr.hbm [resolvable:$true] %s11296_s28 }
 0x192   : > { %s11298_s16 = scalar_lea.hbm %s11297_s28, 1  ;;  %s11302_s0 = scalar_lea.hbm %s15025_s1, 1 }
 0x193   : > { %p11299_p13 = scmp.ne.s32.totalorder %s11297_s28, %s11298_s16  ;;  %p11303_p2 = scmp.lt.s32.totalorder %s11297_s28, %s15025_s1 }
 0x194   : > { %p11304_p3 = scmp.lt.s32.totalorder %s11302_s0, %s11298_s16 }
 0x195   : > { %s15027_s23 = smov %s15026_s18  ;;  %s1829_s7 = sshll.u32 %s15026_s18, 4  ;;  %s12633_s7 = int_to_ptr.hbm [resolvable:$true] %s1829_s7 }
 0x196   : > { %p11300_p0 = pnand %p11299_p13, %p10174_p10  ;;  %p11305_p4 = por %p11304_p3, %p11303_p2 }
 0x198   : > { %p11301_p1 = pneg %p11300_p0 }
 0x19a   : > { %p11306_p7 = pnand %p11305_p4, %p11301_p1 }
 0x19c   : > { %11309 = shalt.err (!%p11306_p7)
}
 0x19d   : > { %s15028_s5 = sld [smem:[#allocation85_spill]]  ;;  %s11995_s3 = smov [#allocation7]  }
 0x19e   : > { %10037 = dma.hbm_to_vmem [thread:$0]  (%p10174_p10), %s12622_s4, 16, %s1808_s6, [#allocation3]  }
 0x19f   : > { %s1831_s10 = sshll.u32 %s11995_s3, 4  ;;  %s11324_s28 = sshra.s32 %s12633_s7, 4  ;;  %s1832_s10 = int_to_ptr.vmem [resolvable:$true] %s1831_s10  ;;  %s11325_s28 = int_to_ptr.hbm [resolvable:$true] %s11324_s28 }
 0x1a0   : > { %s11326_s16 = scalar_lea.hbm %s11325_s28, 1  ;;  %s11330_s0 = scalar_lea.hbm %s15027_s23, 1 }
 0x1a1   : > { %p11327_p8 = scmp.ne.s32.totalorder %s11325_s28, %s11326_s16  ;;  %p11331_p13 = scmp.lt.s32.totalorder %s11325_s28, %s15027_s23 }
 0x1a2   : > { %p11332_p0 = scmp.lt.s32.totalorder %s11330_s0, %s11326_s16 }
 0x1a3   : > { %s1856_s18 = sshll.u32 %s15028_s5, 4  ;;  %p11328_p11 = pnand %p11327_p8, %p10174_p10  ;;  %s12644_s18 = int_to_ptr.hbm [resolvable:$true] %s1856_s18 }
 0x1a4   : > { %p11333_p1 = por %p11332_p0, %p11331_p13 }
 0x1a5   : > { %p11329_p12 = pneg %p11328_p11 }
 0x1a7   : > { %p11334_p2 = pnand %p11333_p1, %p11329_p12 }
 0x1a9   : > { %11337 = shalt.err (!%p11334_p2)
}
 0x1aa   : > { %s15029_s6 = sld [smem:[#allocation87_spill]]  ;;  %s11996_s3 = smov [#allocation10]  }
 0x1ab   : > { %10041 = dma.hbm_to_vmem [thread:$0]  (%p10174_p10), %s12633_s7, 16, %s1832_s10, [#allocation6]  }
 0x1ac   : > { %s1858_s1 = sshll.u32 %s11996_s3, 4  ;;  %s11352_s28 = sshra.s32 %s12644_s18, 4  ;;  %s1859_s1 = int_to_ptr.vmem [resolvable:$true] %s1858_s1  ;;  %s11353_s28 = int_to_ptr.hbm [resolvable:$true] %s11352_s28 }
 0x1ad   : > { %s11354_s16 = scalar_lea.hbm %s11353_s28, 1  ;;  %s11358_s0 = scalar_lea.hbm %s15028_s5, 1 }
 0x1ae   : > { %p11355_p3 = scmp.ne.s32.totalorder %s11353_s28, %s11354_s16  ;;  %p11359_p8 = scmp.lt.s32.totalorder %s11353_s28, %s15028_s5 }
 0x1af   : > { %p11360_p11 = scmp.lt.s32.totalorder %s11358_s0, %s11354_s16 }
 0x1b0   : > { %s1883_s4 = sshll.u32 %s15029_s6, 4  ;;  %p11356_p4 = pnand %p11355_p3, %p10174_p10  ;;  %s12655_s4 = int_to_ptr.hbm [resolvable:$true] %s1883_s4 }
 0x1b1   : > { %p11361_p12 = por %p11360_p11, %p11359_p8 }
 0x1b2   : > { %p11357_p7 = pneg %p11356_p4 }
 0x1b4   : > { %p11362_p13 = pnand %p11361_p12, %p11357_p7 }
 0x1b6   : > { %11365 = shalt.err (!%p11362_p13)
}
 0x1b7   : > { %s15030_s7 = sld [smem:[#allocation89_spill]]  ;;  %s11997_s10 = smov [#allocation13]  }
 0x1b8   : > { %10045 = dma.hbm_to_vmem [thread:$0]  (%p10174_p10), %s12644_s18, 16, %s1859_s1, [#allocation9]  }
 0x1b9   : > { %s1885_s3 = sshll.u32 %s11997_s10, 4  ;;  %s11380_s28 = sshra.s32 %s12655_s4, 4  ;;  %s1886_s3 = int_to_ptr.vmem [resolvable:$true] %s1885_s3  ;;  %s11381_s28 = int_to_ptr.hbm [resolvable:$true] %s11380_s28 }
 0x1ba   : > { %s11382_s16 = scalar_lea.hbm %s11381_s28, 1  ;;  %s11386_s0 = scalar_lea.hbm %s15029_s6, 1 }
 0x1bb   : > { %p11383_p0 = scmp.ne.s32.totalorder %s11381_s28, %s11382_s16  ;;  %p11387_p3 = scmp.lt.s32.totalorder %s11381_s28, %s15029_s6 }
 0x1bc   : > { %p11388_p4 = scmp.lt.s32.totalorder %s11386_s0, %s11382_s16 }
 0x1bd   : > { %s1910_s2 = sshll.u32 %s15030_s7, 4  ;;  %p11384_p1 = pnand %p11383_p0, %p10174_p10  ;;  %s12666_s2 = int_to_ptr.hbm [resolvable:$true] %s1910_s2 }
 0x1be   : > { %p11389_p7 = por %p11388_p4, %p11387_p3 }
 0x1bf   : > { %p11385_p2 = pneg %p11384_p1 }
 0x1c1   : > { %p11390_p8 = pnand %p11389_p7, %p11385_p2 }
 0x1c3   : > { %11393 = shalt.err (!%p11390_p8)
}
 0x1c4   : > { %s15031_s1 = sld [smem:[#allocation91_spill]]  ;;  %s11998_s10 = smov [#allocation16]  }
 0x1c5   : > { %10049 = dma.hbm_to_vmem [thread:$0]  (%p10174_p10), %s12655_s4, 16, %s1886_s3, [#allocation12]  }
 0x1c6   : > { %s1912_s5 = sshll.u32 %s11998_s10, 4  ;;  %s11408_s28 = sshra.s32 %s12666_s2, 4  ;;  %s1913_s5 = int_to_ptr.vmem [resolvable:$true] %s1912_s5  ;;  %s11409_s28 = int_to_ptr.hbm [resolvable:$true] %s11408_s28 }
 0x1c7   : > { %s11410_s16 = scalar_lea.hbm %s11409_s28, 1  ;;  %s11414_s0 = scalar_lea.hbm %s15030_s7, 1 }
 0x1c8   : > { %p11411_p11 = scmp.ne.s32.totalorder %s11409_s28, %s11410_s16  ;;  %p11415_p0 = scmp.lt.s32.totalorder %s11409_s28, %s15030_s7 }
 0x1c9   : > { %p11416_p1 = scmp.lt.s32.totalorder %s11414_s0, %s11410_s16 }
 0x1ca   : > { %s1934_s18 = sshll.u32 %s15031_s1, 4  ;;  %p11412_p12 = pnand %p11411_p11, %p10174_p10  ;;  %s12677_s18 = int_to_ptr.hbm [resolvable:$true] %s1934_s18 }
 0x1cb   : > { %p11417_p2 = por %p11416_p1, %p11415_p0 }
 0x1cc   : > { %p11413_p13 = pneg %p11412_p12 }
 0x1ce   : > { %p11418_p3 = pnand %p11417_p2, %p11413_p13 }
 0x1d0   : > { %11421 = shalt.err (!%p11418_p3)
}
 0x1d1   : > { %s15032_s4 = sld [smem:[#allocation98_spill]]  ;;  %s11999_s3 = smov [#allocation19]  }
 0x1d2   : > { %10053 = dma.hbm_to_vmem [thread:$0]  (%p10174_p10), %s12666_s2, 16, %s1913_s5, [#allocation15]  }
 0x1d3   : > { %s1936_s10 = sshll.u32 %s11999_s3, 4  ;;  %s11436_s28 = sshra.s32 %s12677_s18, 4  ;;  %s1937_s10 = int_to_ptr.vmem [resolvable:$true] %s1936_s10  ;;  %s11437_s28 = int_to_ptr.hbm [resolvable:$true] %s11436_s28 }
 0x1d4   : > { %s11438_s16 = scalar_lea.hbm %s11437_s28, 1  ;;  %s11442_s0 = scalar_lea.hbm %s15031_s1, 1 }
 0x1d5   : > { %p11439_p4 = scmp.ne.s32.totalorder %s11437_s28, %s11438_s16  ;;  %p11443_p11 = scmp.lt.s32.totalorder %s11437_s28, %s15031_s1 }
 0x1d6   : > { %p11444_p12 = scmp.lt.s32.totalorder %s11442_s0, %s11438_s16 }
 0x1d7   : > { %s1973_s6 = sshll.u32 %s15032_s4, 4  ;;  %p11440_p7 = pnand %p11439_p4, %p10174_p10  ;;  %s12688_s6 = int_to_ptr.hbm [resolvable:$true] %s1973_s6 }
 0x1d8   : > { %p11445_p13 = por %p11444_p12, %p11443_p11 }
 0x1d9   : > { %p11441_p8 = pneg %p11440_p7 }
 0x1db   : > { %p11446_p0 = pnand %p11445_p13, %p11441_p8 }
 0x1dd   : > { %11449 = shalt.err (!%p11446_p0)
}
 0x1de   : > { %s15033_s2 = sld [smem:[#allocation100_spill]]  ;;  %s12000_s3 = smov [#allocation22]  }
 0x1df   : > { %10057 = dma.hbm_to_vmem [thread:$0]  (%p10174_p10), %s12677_s18, 16, %s1937_s10, [#allocation18]  }
 0x1e0   : > { %s1975_s7 = sshll.u32 %s12000_s3, 4  ;;  %s11464_s28 = sshra.s32 %s12688_s6, 4  ;;  %s1976_s7 = int_to_ptr.vmem [resolvable:$true] %s1975_s7  ;;  %s11465_s28 = int_to_ptr.hbm [resolvable:$true] %s11464_s28 }
 0x1e1   : > { %s11466_s16 = scalar_lea.hbm %s11465_s28, 1  ;;  %s11470_s0 = scalar_lea.hbm %s15032_s4, 1 }
 0x1e2   : > { %p11467_p1 = scmp.ne.s32.totalorder %s11465_s28, %s11466_s16  ;;  %p11471_p4 = scmp.lt.s32.totalorder %s11465_s28, %s15032_s4 }
 0x1e3   : > { %p11472_p7 = scmp.lt.s32.totalorder %s11470_s0, %s11466_s16 }
 0x1e4   : > { %s2000_s5 = sshll.u32 %s15033_s2, 4  ;;  %p11468_p2 = pnand %p11467_p1, %p10174_p10  ;;  %s12699_s5 = int_to_ptr.hbm [resolvable:$true] %s2000_s5 }
 0x1e5   : > { %p11473_p8 = por %p11472_p7, %p11471_p4 }
 0x1e6   : > { %p11469_p3 = pneg %p11468_p2 }
 0x1e8   : > { %p11474_p11 = pnand %p11473_p8, %p11469_p3 }
 0x1ea   : > { %11477 = shalt.err (!%p11474_p11)
}
 0x1eb   : > { %s15034_s18 = sld [smem:[#allocation103_spill]]  ;;  %s12001_s3 = smov [#allocation25]  }
 0x1ec   : > { %10061 = dma.hbm_to_vmem [thread:$0]  (%p10174_p10), %s12688_s6, 16, %s1976_s7, [#allocation21]  }
 0x1ed   : > { %s2002_s1 = sshll.u32 %s12001_s3, 4  ;;  %s11492_s28 = sshra.s32 %s12699_s5, 4  ;;  %s2003_s1 = int_to_ptr.vmem [resolvable:$true] %s2002_s1  ;;  %s11493_s28 = int_to_ptr.hbm [resolvable:$true] %s11492_s28 }
 0x1ee   : > { %s11494_s16 = scalar_lea.hbm %s11493_s28, 1  ;;  %s11498_s0 = scalar_lea.hbm %s15033_s2, 1 }
 0x1ef   : > { %p11495_p12 = scmp.ne.s32.totalorder %s11493_s28, %s11494_s16  ;;  %p11499_p1 = scmp.lt.s32.totalorder %s11493_s28, %s15033_s2 }
 0x1f0   : > { %p11500_p2 = scmp.lt.s32.totalorder %s11498_s0, %s11494_s16 }
 0x1f1   : > { %s15035_s10 = smov %s15034_s18  ;;  %s2030_s8 = sshll.u32 %s15034_s18, 4  ;;  %s12710_s8 = int_to_ptr.hbm [resolvable:$true] %s2030_s8 }
 0x1f2   : > { %p11496_p13 = pnand %p11495_p12, %p10174_p10  ;;  %p11501_p3 = por %p11500_p2, %p11499_p1 }
 0x1f4   : > { %p11497_p0 = pneg %p11496_p13 }
 0x1f6   : > { %p11502_p4 = pnand %p11501_p3, %p11497_p0 }
 0x1f8   : > { %11505 = shalt.err (!%p11502_p4)
}
 0x1f9   : > { %s15036_s6 = sld [smem:[#allocation105_spill]]  ;;  %s12002_s18 = smov [#allocation28]  }
 0x1fa   : > { %10065 = dma.hbm_to_vmem [thread:$0]  (%p10174_p10), %s12699_s5, 16, %s2003_s1, [#allocation24]  }
 0x1fb   : > { %s2032_s3 = sshll.u32 %s12002_s18, 4  ;;  %s11520_s28 = sshra.s32 %s12710_s8, 4  ;;  %s2033_s3 = int_to_ptr.vmem [resolvable:$true] %s2032_s3  ;;  %s11521_s28 = int_to_ptr.hbm [resolvable:$true] %s11520_s28 }
 0x1fc   : > { %s11522_s16 = scalar_lea.hbm %s11521_s28, 1  ;;  %s11526_s0 = scalar_lea.hbm %s15035_s10, 1 }
 0x1fd   : > { %p11523_p7 = scmp.ne.s32.totalorder %s11521_s28, %s11522_s16  ;;  %p11527_p12 = scmp.lt.s32.totalorder %s11521_s28, %s15035_s10 }
 0x1fe   : > { %p11528_p13 = scmp.lt.s32.totalorder %s11526_s0, %s11522_s16 }
 0x1ff   : > { %s2054_s7 = sshll.u32 %s15036_s6, 4  ;;  %p11524_p8 = pnand %p11523_p7, %p10174_p10  ;;  %s12721_s7 = int_to_ptr.hbm [resolvable:$true] %s2054_s7 }
 0x200   : > { %p11529_p0 = por %p11528_p13, %p11527_p12 }
 0x201   : > { %p11525_p11 = pneg %p11524_p8 }
 0x203   : > { %p11530_p1 = pnand %p11529_p0, %p11525_p11 }
 0x205   : > { %11533 = shalt.err (!%p11530_p1)
}
 0x206   : > { %s15037_s1 = sld [smem:[#allocation112_spill]]  ;;  %s12003_s5 = smov [#allocation31]  }
 0x207   : > { %10069 = dma.hbm_to_vmem [thread:$0]  (%p10174_p10), %s12710_s8, 16, %s2033_s3, [#allocation27]  }
 0x208   : > { %s2056_s18 = sshll.u32 %s12003_s5, 4  ;;  %s11548_s28 = sshra.s32 %s12721_s7, 4  ;;  %s2057_s18 = int_to_ptr.vmem [resolvable:$true] %s2056_s18  ;;  %s11549_s28 = int_to_ptr.hbm [resolvable:$true] %s11548_s28 }
 0x209   : > { %s11550_s16 = scalar_lea.hbm %s11549_s28, 1  ;;  %s11554_s0 = scalar_lea.hbm %s15036_s6, 1 }
 0x20a   : > { %p11551_p2 = scmp.ne.s32.totalorder %s11549_s28, %s11550_s16  ;;  %p11555_p7 = scmp.lt.s32.totalorder %s11549_s28, %s15036_s6 }
 0x20b   : > { %p11556_p8 = scmp.lt.s32.totalorder %s11554_s0, %s11550_s16 }
 0x20c   : > { %s2093_s2 = sshll.u32 %s15037_s1, 4  ;;  %p11552_p3 = pnand %p11551_p2, %p10174_p10  ;;  %s12732_s2 = int_to_ptr.hbm [resolvable:$true] %s2093_s2 }
 0x20d   : > { %p11557_p11 = por %p11556_p8, %p11555_p7 }
 0x20e   : > { %p11553_p4 = pneg %p11552_p3 }
 0x210   : > { %p11558_p12 = pnand %p11557_p11, %p11553_p4 }
 0x212   : > { %11561 = shalt.err (!%p11558_p12)
}
 0x213   : > { %s15038_s8 = sld [smem:[#allocation118_spill]]  ;;  %s12004_s5 = smov [#allocation34]  }
 0x214   : > { %10073 = dma.hbm_to_vmem [thread:$0]  (%p10174_p10), %s12721_s7, 16, %s2057_s18, [#allocation30]  }
 0x215   : > { %s2095_s4 = sshll.u32 %s12004_s5, 4  ;;  %s11576_s28 = sshra.s32 %s12732_s2, 4  ;;  %s2096_s4 = int_to_ptr.vmem [resolvable:$true] %s2095_s4  ;;  %s11577_s28 = int_to_ptr.hbm [resolvable:$true] %s11576_s28 }
 0x216   : > { %s11578_s16 = scalar_lea.hbm %s11577_s28, 1  ;;  %s11582_s0 = scalar_lea.hbm %s15037_s1, 1 }
 0x217   : > { %p11579_p13 = scmp.ne.s32.totalorder %s11577_s28, %s11578_s16  ;;  %p11583_p2 = scmp.lt.s32.totalorder %s11577_s28, %s15037_s1 }
 0x218   : > { %p11584_p3 = scmp.lt.s32.totalorder %s11582_s0, %s11578_s16 }
 0x219   : > { %s2132_s3 = sshll.u32 %s15038_s8, 4  ;;  %p11580_p0 = pnand %p11579_p13, %p10174_p10  ;;  %s12743_s3 = int_to_ptr.hbm [resolvable:$true] %s2132_s3 }
 0x21a   : > { %p11585_p4 = por %p11584_p3, %p11583_p2 }
 0x21b   : > { %p11581_p1 = pneg %p11580_p0 }
 0x21d   : > { %p11586_p7 = pnand %p11585_p4, %p11581_p1 }
 0x21f   : > { %11589 = shalt.err (!%p11586_p7)
}
 0x220   : > { %s15039_s7 = sld [smem:[#allocation120_spill]]  ;;  %s12005_s18 = smov [#allocation37]  }
 0x221   : > { %10077 = dma.hbm_to_vmem [thread:$0]  (%p10174_p10), %s12732_s2, 16, %s2096_s4, [#allocation33]  }
 0x222   : > { %s2134_s5 = sshll.u32 %s12005_s18, 4  ;;  %s11604_s28 = sshra.s32 %s12743_s3, 4  ;;  %s2135_s5 = int_to_ptr.vmem [resolvable:$true] %s2134_s5  ;;  %s11605_s28 = int_to_ptr.hbm [resolvable:$true] %s11604_s28 }
 0x223   : > { %s11606_s16 = scalar_lea.hbm %s11605_s28, 1  ;;  %s11610_s0 = scalar_lea.hbm %s15038_s8, 1 }
 0x224   : > { %p11607_p8 = scmp.ne.s32.totalorder %s11605_s28, %s11606_s16  ;;  %p11611_p13 = scmp.lt.s32.totalorder %s11605_s28, %s15038_s8 }
 0x225   : > { %p11612_p0 = scmp.lt.s32.totalorder %s11610_s0, %s11606_s16 }
 0x226   : > { %s2159_s6 = sshll.u32 %s15039_s7, 4  ;;  %p11608_p11 = pnand %p11607_p8, %p10174_p10  ;;  %s12754_s6 = int_to_ptr.hbm [resolvable:$true] %s2159_s6 }
 0x227   : > { %p11613_p1 = por %p11612_p0, %p11611_p13 }
 0x228   : > { %p11609_p12 = pneg %p11608_p11 }
 0x22a   : > { %p11614_p2 = pnand %p11613_p1, %p11609_p12 }
 0x22c   : > { %11617 = shalt.err (!%p11614_p2)
}
 0x22d   : > { %s15040_s4 = sld [smem:[#allocation122_spill]]  ;;  %s12006_s18 = smov [#allocation40]  }
 0x22e   : > { %10081 = dma.hbm_to_vmem [thread:$0]  (%p10174_p10), %s12743_s3, 16, %s2135_s5, [#allocation36]  }
 0x22f   : > { %s2161_s1 = sshll.u32 %s12006_s18, 4  ;;  %s11632_s28 = sshra.s32 %s12754_s6, 4  ;;  %s2162_s1 = int_to_ptr.vmem [resolvable:$true] %s2161_s1  ;;  %s11633_s28 = int_to_ptr.hbm [resolvable:$true] %s11632_s28 }
 0x230   : > { %s11634_s16 = scalar_lea.hbm %s11633_s28, 1  ;;  %s11638_s0 = scalar_lea.hbm %s15039_s7, 1 }
 0x231   : > { %p11635_p3 = scmp.ne.s32.totalorder %s11633_s28, %s11634_s16  ;;  %p11639_p8 = scmp.lt.s32.totalorder %s11633_s28, %s15039_s7 }
 0x232   : > { %p11640_p11 = scmp.lt.s32.totalorder %s11638_s0, %s11634_s16 }
 0x233   : > { %s2183_s2 = sshll.u32 %s15040_s4, 4  ;;  %p11636_p4 = pnand %p11635_p3, %p10174_p10  ;;  %s12765_s2 = int_to_ptr.hbm [resolvable:$true] %s2183_s2 }
 0x234   : > { %p11641_p12 = por %p11640_p11, %p11639_p8 }
 0x235   : > { %p11637_p7 = pneg %p11636_p4 }
 0x237   : > { %p11642_p13 = pnand %p11641_p12, %p11637_p7 }
 0x239   : > { %11645 = shalt.err (!%p11642_p13)
}
 0x23a   : > { %s15041_s3 = sld [smem:[#allocation129_spill]]  ;;  %s12007_s5 = smov [#allocation43]  }
 0x23b   : > { %10085 = dma.hbm_to_vmem [thread:$0]  (%p10174_p10), %s12754_s6, 16, %s2162_s1, [#allocation39]  }
 0x23c   : > { %s2185_s18 = sshll.u32 %s12007_s5, 4  ;;  %s11660_s28 = sshra.s32 %s12765_s2, 4  ;;  %s2186_s18 = int_to_ptr.vmem [resolvable:$true] %s2185_s18  ;;  %s11661_s28 = int_to_ptr.hbm [resolvable:$true] %s11660_s28 }
 0x23d   : > { %s11662_s16 = scalar_lea.hbm %s11661_s28, 1  ;;  %s11666_s0 = scalar_lea.hbm %s15040_s4, 1 }
 0x23e   : > { %p11663_p0 = scmp.ne.s32.totalorder %s11661_s28, %s11662_s16  ;;  %p11667_p3 = scmp.lt.s32.totalorder %s11661_s28, %s15040_s4 }
 0x23f   : > { %p11668_p4 = scmp.lt.s32.totalorder %s11666_s0, %s11662_s16 }
 0x240   : > { %s2225_s8 = sshll.u32 %s15041_s3, 4  ;;  %p11664_p1 = pnand %p11663_p0, %p10174_p10  ;;  %s12776_s8 = int_to_ptr.hbm [resolvable:$true] %s2225_s8 }
 0x241   : > { %p11669_p7 = por %p11668_p4, %p11667_p3 }
 0x242   : > { %p11665_p2 = pneg %p11664_p1 }
 0x244   : > { %p11670_p8 = pnand %p11669_p7, %p11665_p2 }
 0x246   : > { %11673 = shalt.err (!%p11670_p8)
}
 0x247   : > { %s15042_s6 = sld [smem:[#allocation132_spill]]  ;;  %s12008_s5 = smov [#allocation46]  }
 0x248   : > { %10089 = dma.hbm_to_vmem [thread:$0]  (%p10174_p10), %s12765_s2, 16, %s2186_s18, [#allocation42]  }
 0x249   : > { %s2227_s7 = sshll.u32 %s12008_s5, 4  ;;  %s11688_s28 = sshra.s32 %s12776_s8, 4  ;;  %s2228_s7 = int_to_ptr.vmem [resolvable:$true] %s2227_s7  ;;  %s11689_s28 = int_to_ptr.hbm [resolvable:$true] %s11688_s28 }
 0x24a   : > { %s11690_s16 = scalar_lea.hbm %s11689_s28, 1  ;;  %s11694_s0 = scalar_lea.hbm %s15041_s3, 1 }
 0x24b   : > { %p11691_p11 = scmp.ne.s32.totalorder %s11689_s28, %s11690_s16  ;;  %p11695_p0 = scmp.lt.s32.totalorder %s11689_s28, %s15041_s3 }
 0x24c   : > { %p11696_p1 = scmp.lt.s32.totalorder %s11694_s0, %s11690_s16 }
 0x24d   : > { %s2252_s1 = sshll.u32 %s15042_s6, 4  ;;  %p11692_p12 = pnand %p11691_p11, %p10174_p10  ;;  %s12787_s1 = int_to_ptr.hbm [resolvable:$true] %s2252_s1 }
 0x24e   : > { %p11697_p2 = por %p11696_p1, %p11695_p0 }
 0x24f   : > { %p11693_p13 = pneg %p11692_p12 }
 0x251   : > { %p11698_p3 = pnand %p11697_p2, %p11693_p13 }
 0x253   : > { %11701 = shalt.err (!%p11698_p3)
}
 0x254   : > { %s15043_s2 = sld [smem:[#allocation134_spill]]  ;;  %s12009_s18 = smov [#allocation49]  }
 0x255   : > { %10093 = dma.hbm_to_vmem [thread:$0]  (%p10174_p10), %s12776_s8, 16, %s2228_s7, [#allocation45]  }
 0x256   : > { %s2254_s5 = sshll.u32 %s12009_s18, 4  ;;  %s11716_s9 = sshra.s32 %s12787_s1, 4  ;;  %s2255_s5 = int_to_ptr.vmem [resolvable:$true] %s2254_s5  ;;  %s11717_s9 = int_to_ptr.hbm [resolvable:$true] %s11716_s9 }
 0x257   : > { %s11718_s28 = scalar_lea.hbm %s11717_s9, 1  ;;  %s11722_s16 = scalar_lea.hbm %s15042_s6, 1 }
 0x258   : > { %p11719_p4 = scmp.ne.s32.totalorder %s11717_s9, %s11718_s28  ;;  %p11723_p11 = scmp.lt.s32.totalorder %s11717_s9, %s15042_s6 }
 0x259   : > { %p11724_p12 = scmp.lt.s32.totalorder %s11722_s16, %s11718_s28 }
 0x25a   : > { %s2276_s4 = sshll.u32 %s15043_s2, 4  ;;  %p11720_p7 = pnand %p11719_p4, %p10174_p10  ;;  %s2277_s4 = int_to_ptr.hbm [resolvable:$true] %s2276_s4 }
 0x25b   : > { %p11725_p13 = por %p11724_p12, %p11723_p11 }
 0x25c   : > { %p11721_p8 = pneg %p11720_p7 }
 0x25e   : > { %p11726_p0 = pnand %p11725_p13, %p11721_p8 }
 0x260   : > { %11729 = shalt.err (!%p11726_p0)
}
 0x261   : > { %10097 = dma.hbm_to_vmem [thread:$0]  (%p10174_p10), %s12787_s1, 16, %s2255_s5, [#allocation48]  }
 0x262   : > { %s12010_s8 = smov [#allocation52]   ;;  %s11744_s0 = sshra.s32 %s2277_s4, 4  ;;  %s11745_s0 = int_to_ptr.hbm [resolvable:$true] %s11744_s0 }
 0x263   : > { %s2278_s7 = sshll.u32 %s12010_s8, 4  ;;  %s11746_s18 = scalar_lea.hbm %s11745_s0, 1  ;;  %s2279_s7 = int_to_ptr.vmem [resolvable:$true] %s2278_s7 }
 0x264   : > { %p11747_p1 = scmp.ne.s32.totalorder %s11745_s0, %s11746_s18  ;;  %s11750_s9 = scalar_lea.hbm %s15043_s2, 1 }
 0x265   : > { %p11751_p4 = scmp.lt.s32.totalorder %s11745_s0, %s15043_s2  ;;  %p11752_p7 = scmp.lt.s32.totalorder %s11750_s9, %s11746_s18 }
 0x266   : > { %p11748_p2 = pnand %p11747_p1, %p10174_p10 }
 0x267   : > { %p11753_p8 = por %p11752_p7, %p11751_p4 }
 0x268   : > { %p11749_p3 = pneg %p11748_p2 }
 0x26a   : > { %p11754_p11 = pnand %p11753_p8, %p11749_p3 }
 0x26c   : > { %11757 = shalt.err (!%p11754_p11)
}
 0x26d   : > { %10101 = dma.hbm_to_vmem [thread:$0]  (%p10174_p10), %s2277_s4, 16, %s2279_s7, [#allocation51]  }
 0x26e PF: > { %2308 = sbr.rel (%p12450_p9) target bundleno = 11909 (0x2e85), region = 316  ;;  %p10207_p12 = scmp.eq.s32.totalorder (!%p12450_p9), %s12423_s22, 0 }
 0x273   : > { %11817 = dma.done.wait (%p10207_p12), [#allocation3], 16  }
 0x274   : > { %11819 = vsyncadd (%p10207_p12), [#allocation3], 4294967280 }
 0x275   : > { %11821 = dma.done.wait (%p10207_p12), [#allocation6], 32  }
 0x276   : > { %11823 = vsyncadd (%p10207_p12), [#allocation6], 4294967264 }
 0x277   : > { %11825 = dma.done.wait (%p10207_p12), [#allocation9], 32  }
 0x278   : > { %11827 = vsyncadd (%p10207_p12), [#allocation9], 4294967264 }
 0x279   : > { %11829 = dma.done.wait (%p10207_p12), [#allocation12], 32  }
 0x27a   : > { %11831 = vsyncadd (%p10207_p12), [#allocation12], 4294967264 }
 0x27b   : > { %11833 = dma.done.wait (%p10207_p12), [#allocation15], 32  }
 0x27c   : > { %11835 = vsyncadd (%p10207_p12), [#allocation15], 4294967264 }
 0x27d   : > { %11837 = dma.done.wait (%p10207_p12), [#allocation18], 32  }
 0x27e   : > { %11839 = vsyncadd (%p10207_p12), [#allocation18], 4294967264 }
 0x27f   : > { %11841 = dma.done.wait (%p10207_p12), [#allocation21], 32  }
 0x280   : > { %11843 = vsyncadd (%p10207_p12), [#allocation21], 4294967264 }
 0x281   : > { %11845 = dma.done.wait (%p10207_p12), [#allocation24], 32  }
 0x282   : > { %11847 = vsyncadd (%p10207_p12), [#allocation24], 4294967264 }
 0x283   : > { %11849 = dma.done.wait (%p10207_p12), [#allocation27], 32  }
 0x284   : > { %11851 = vsyncadd (%p10207_p12), [#allocation27], 4294967264 }
 0x285   : > { %11853 = dma.done.wait (%p10207_p12), [#allocation30], 32  }
 0x286   : > { %11855 = vsyncadd (%p10207_p12), [#allocation30], 4294967264 }
 0x287   : > { %11857 = dma.done.wait (%p10207_p12), [#allocation33], 32  }
 0x288   : > { %11859 = vsyncadd (%p10207_p12), [#allocation33], 4294967264 }
 0x289   : > { %11861 = dma.done.wait (%p10207_p12), [#allocation36], 32  }
 0x28a   : > { %11863 = vsyncadd (%p10207_p12), [#allocation36], 4294967264 }
 0x28b   : > { %11865 = dma.done.wait (%p10207_p12), [#allocation39], 32  }
 0x28c   : > { %11867 = vsyncadd (%p10207_p12), [#allocation39], 4294967264 }
 0x28d   : > { %11869 = dma.done.wait (%p10207_p12), [#allocation42], 32  }
 0x28e   : > { %11871 = vsyncadd (%p10207_p12), [#allocation42], 4294967264 }
 0x28f   : > { %11873 = dma.done.wait (%p10207_p12), [#allocation45], 32  }
 0x290   : > { %11875 = vsyncadd (%p10207_p12), [#allocation45], 4294967264 }
 0x291   : > { %11877 = dma.done.wait (%p10207_p12), [#allocation48], 32  }
 0x292   : > { %11879 = vsyncadd (%p10207_p12), [#allocation48], 4294967264 }
 0x293   : > { %11881 = dma.done.wait (%p10207_p12), [#allocation51], 32  }
 0x294   : > { %11883 = vsyncadd (%p10207_p12), [#allocation51], 4294967264  ;;  %s15044_s11 = sld [smem:[#allocation83_spill]]  ;;  %p2634_p9 = scmp.lt.s32.totalorder %s12423_s22, 1  ;;  %vm2680_vm0 = vcmask 392192   ;;  %vm2724_vm1 = vcmask 261120  }
 0x295   : > { %s15045_s4 = sld [smem:[#allocation72_spill]]  ;;  %v10461_v18 = vld [vmem:[#allocation7] ss:$0 sm:$0xff]  ;;  %v12011_v40 = vmov 32.0   ;;  %s14910_s0 = smov 96  }
 0x296   : > { %s2635_s1 = scalar_select %p2634_p9, %s12423_s22, 1  ;;  %10496 = vrcp.f32 %v12011_v40  ;;  %v12958_v40 = vld [vmem:[#allocation5] ss:$0 sm:$0xff] }
 0x297   : > { %s15052_s16 = sld [smem:[#allocation92_spill]]  ;;  %s14908_s18 = smov 64  }
 0x298   : > { %s9922_s5 = sshll.u32 %s2635_s1, 6  ;;  %s15054_s7 = sld [smem:[#allocation96_spill]] }
 0x299   : > { %s14906_s9 = smov 80   ;;  %s15055_s1 = sld [smem:[#allocation94_spill]] }
 0x29a   : > { %v9925_v0 = vld [vmem:[%s15044_s11 + $0x10] sm:$0xff]  ;;  %v9924_v1 = vld [vmem:[%s15044_s11 + $0x8] sm:$0xff]  ;;  %v9923_v2 = vld [vmem:[%s15044_s11] sm:$0xff]  ;;  %s15078_s2 = smov 64   ;;  %s15079_s3 = sld [smem:[#allocation108_spill]] }
 0x29b   : > { %s2638_s28 = scalar_lea.vmem %s15045_s4, %s9922_s5  ;;  %2698 = vmatpush.bf16.msra.mxu0 %v9925_v0  ;;  %s14904_s4 = smov 112  }
 0x29c   : > { %v2640_v3 = vld [vmem:[%s2638_s28] sm:$0xff]  ;;  %v2641_v4 = vld [vmem:[%s2638_s28 + $0x8] sm:$0xff]  ;;  %v2642_v6 = vld [vmem:[%s2638_s28 + $0x10] sm:$0xff]  ;;  %v10497_v41 = vpop.eup %10496  ;;  %s14902_s5 = smov 48   ;;  %s14925_s6 = smov 32  }
 0x29d   : > { %v2648_v5 = vpack.c.bf16 %v2641_v4, %v2640_v3  ;;  %v2643_v7 = vld [vmem:[%s2638_s28 + $0x18] sm:$0xff]  ;;  %v2644_v9 = vld [vmem:[%s2638_s28 + $0x20] sm:$0xff]  ;;  %v2645_v10 = vld [vmem:[%s2638_s28 + $0x28] sm:$0xff]  ;;  %v2750_v42 = vmul.f32 32.0, %v10497_v41  ;;  %vm2754_vm2 = vweird.f32 %v10497_v41  ;;  %s15053_s8 = smov %s15052_s16 }
 0x29e   : > { %v2649_v8 = vpack.c.bf16 %v2643_v7, %v2642_v6  ;;  %v2650_v11 = vpack.c.bf16 %v2645_v10, %v2644_v9  ;;  %v2646_v12 = vld [vmem:[%s2638_s28 + $0x30] sm:$0xff]  ;;  %v2647_v13 = vld [vmem:[%s2638_s28 + $0x38] sm:$0xff]  ;;  %s15056_s28 = sld [smem:[#allocation95_spill]] }
 0x29f   : > { %2699 = vmatpush.bf16.msra.mxu0 %v9924_v1  ;;  %v2651_v14 = vpack.c.bf16 %v2647_v13, %v2646_v12  ;;  %v2751_v43 = vsub.f32 1.0, %v2750_v42 }
 0x2a1   : > { %v2752_v45 = vmul.f32 %v10497_v41, %v2751_v43 }
 0x2a3   : > { %2700 = vmatpush.bf16.msra.mxu0 %v9923_v2  ;;  %v2753_v46 = vadd.f32 %v10497_v41, %v2752_v45 }
 0x2a5   : > { %v12904_v47 = vsel %vm2754_vm2, %v10497_v41, %v2753_v46 }
 0x2a6   : > { %9282 = vmatmul.msk.bf16.vlgmr.msra.gmra.mxu0 %vm2680_vm0, %v2648_v5 }
 0x2b6   : > { %9283 = vmatmul.msk.bf16.gmra.mxu0 %vm2680_vm0, %v2649_v8 }
 0x2c6   : > { %9284 = vmatmul.msk.bf16.gmra.mxu0 %vm2680_vm0, %v2650_v11 }
 0x2d6   : > { %9285 = vmatmul.msk.bf16.gmra.mxu0 %vm2680_vm0, %v2651_v14 }
 0x323   : > { %v2702_v15 = vpop.f32.mrf.mxu0 }
 0x324   : > { %v2703_v31 = vadd.f32 %v10461_v18, %v2702_v15 }
 0x326   : > { %v2725_v35 = vsel %vm2724_vm1, %v2703_v31, 0.0 }
 0x32b   : > { %v2704_v16 = vpop.f32.mrf.mxu0 }
 0x32c   : > { %v2705_v38 = vadd.f32 %v10461_v18, %v2704_v16 }
 0x32e   : > { %v2728_v39 = vsel %vm2724_vm1, %v2705_v38, 0.0 }
 0x333   : > { %v2707_v17 = vpop.f32.mrf.mxu0 }
 0x334   : > { %v2708_v22 = vadd.f32 %v10461_v18, %v2707_v17 }
 0x336   : > { %v2731_v24 = vsel %vm2724_vm1, %v2708_v22, 0.0 }
 0x33b   : > { %v2709_v19 = vpop.f32.mrf.mxu0 }
 0x33c   : > { %v12893_v20 = vadd.f32 %v10461_v18, %v2709_v19 }
 0x33e   : > { %v2734_v21 = vsel %vm2724_vm1, %v12893_v20, 0.0 }
 0x33f   : > { %2735 = vadd.xlane.f32.xlu2 %v2734_v21 }
 0x343   : > { %v2712_v23 = vpop.f32.mrf.mxu0 }
 0x344   : > { %v2713_v28 = vadd.f32 %v10461_v18, %v2712_v23 }
 0x346   : > { %v2737_v30 = vsel %vm2724_vm1, %v2713_v28, 0.0 }
 0x347   : > { %2732 = vadd.xlane.f32.xlu2 %v2731_v24 }
 0x34b   : > { %v2714_v25 = vpop.f32.mrf.mxu0 }
 0x34c   : > { %v2715_v26 = vadd.f32 %v10461_v18, %v2714_v25 }
 0x34e   : > { %v2740_v27 = vsel %vm2724_vm1, %v2715_v26, 0.0 }
 0x34f   : > { %2741 = vadd.xlane.f32.xlu1 %v2740_v27 }
 0x353   : > { %v2717_v29 = vpop.f32.mrf.mxu0 }
 0x354   : > { %v2718_v36 = vadd.f32 %v10461_v18, %v2717_v29 }
 0x356   : > { %v2743_v37 = vsel %vm2724_vm1, %v2718_v36, 0.0 }
 0x357   : > { %2738 = vadd.xlane.f32.xlu1 %v2737_v30 }
 0x35b   : > { %v2719_v32 = vpop.f32.mrf.mxu0 }
 0x35c   : > { %v2720_v33 = vadd.f32 %v10461_v18, %v2719_v32 }
 0x35e   : > { %v2746_v34 = vsel %vm2724_vm1, %v2720_v33, 0.0 }
 0x35f   : > { %2747 = vadd.xlane.f32.xlu0 %v2746_v34  ;;  %2726 = vadd.xlane.f32.xlu1 %v2725_v35 }
 0x367   : > { %2744 = vadd.xlane.f32.xlu0 %v2743_v37 }
 0x36f   : > { %2729 = vadd.xlane.f32.xlu0 %v2728_v39 }
 0x3b2   : > { %v2736_v44 = vpop.xlane.xlu2 %2735 }
 0x3b3   : > { %v2759_v4 = vmul.f32 %v12904_v47, %v2736_v44  ;;  %v12961_v44 = vld [vmem:[#allocation2] ss:$0 sm:$0xff] }
 0x3b5   : > { %v12936_v8 = vsub.f32 %v12893_v20, %v2759_v4 }
 0x3b7   : > { %v2775_v16 = vmul.f32 %v12936_v8, %v12936_v8 }
 0x3b9   : > { %v2789_v19 = vsel %vm2724_vm1, %v2775_v16, 0.0 }
 0x3ba   : > { %v2733_v48 = vpop.xlane.xlu2 %2732 }
 0x3bb   : > { %v2758_v51 = vmul.f32 %v12904_v47, %v2733_v48 }
 0x3bd   : > { %v12912_v54 = vsub.f32 %v2708_v22, %v2758_v51 }
 0x3bf   : > { %v2774_v56 = vmul.f32 %v12912_v54, %v12912_v54 }
 0x3c1   : > { %v2786_v57 = vsel %vm2724_vm1, %v2774_v56, 0.0 }
 0x3c2   : > { %v2742_v49 = vpop.xlane.xlu1 %2741 }
 0x3c3   : > { %v2761_v50 = vmul.f32 %v12904_v47, %v2742_v49 }
 0x3c5   : > { %v12908_v52 = vsub.f32 %v2715_v26, %v2761_v50 }
 0x3c7   : > { %v2777_v53 = vmul.f32 %v12908_v52, %v12908_v52 }
 0x3c9   : > { %v2795_v55 = vsel %vm2724_vm1, %v2777_v53, 0.0 }
 0x3ca   : > { %2796 = vadd.xlane.f32.xlu1 %v2795_v55  ;;  %v2739_v58 = vpop.xlane.xlu1 %2738 }
 0x3cb   : > { %v2760_v61 = vmul.f32 %v12904_v47, %v2739_v58 }
 0x3cd   : > { %v12924_v0 = vsub.f32 %v2713_v28, %v2760_v61 }
 0x3cf   : > { %v2776_v6 = vmul.f32 %v12924_v0, %v12924_v0 }
 0x3d1   : > { %v2792_v9 = vsel %vm2724_vm1, %v2776_v6, 0.0 }
 0x3d2   : > { %v2748_v59 = vpop.xlane.xlu0 %2747  ;;  %2787 = vadd.xlane.f32.xlu1 %v2786_v57  ;;  %v2727_v11 = vpop.xlane.xlu1 %2726 }
 0x3d3   : > { %v2763_v60 = vmul.f32 %v12904_v47, %v2748_v59  ;;  %v2756_v14 = vmul.f32 %v12904_v47, %v2727_v11 }
 0x3d5   : > { %v12920_v62 = vsub.f32 %v2720_v33, %v2763_v60  ;;  %v12948_v18 = vsub.f32 %v2703_v31, %v2756_v14 }
 0x3d7   : > { %v2779_v63 = vmul.f32 %v12920_v62, %v12920_v62  ;;  %v2772_v21 = vmul.f32 %v12948_v18, %v12948_v18 }
 0x3d9   : > { %v2801_v1 = vsel %vm2724_vm1, %v2779_v63, 0.0  ;;  %v2780_v22 = vsel %vm2724_vm1, %v2772_v21, 0.0 }
 0x3da   : > { %v2745_v2 = vpop.xlane.xlu0 %2744  ;;  %2802 = vadd.xlane.f32.xlu2 %v2801_v1 }
 0x3db   : > { %v2762_v3 = vmul.f32 %v12904_v47, %v2745_v2 }
 0x3dd   : > { %v12929_v5 = vsub.f32 %v2718_v36, %v2762_v3 }
 0x3df   : > { %v2778_v7 = vmul.f32 %v12929_v5, %v12929_v5 }
 0x3e1   : > { %v2798_v10 = vsel %vm2724_vm1, %v2778_v7, 0.0 }
 0x3e2   : > { %2793 = vadd.xlane.f32.xlu2 %v2792_v9  ;;  %2799 = vadd.xlane.f32.xlu0 %v2798_v10  ;;  %v2730_v12 = vpop.xlane.xlu0 %2729 }
 0x3e3   : > { %v2757_v13 = vmul.f32 %v12904_v47, %v2730_v12 }
 0x3e5   : > { %v12942_v15 = vsub.f32 %v2705_v38, %v2757_v13 }
 0x3e7   : > { %v2773_v17 = vmul.f32 %v12942_v15, %v12942_v15 }
 0x3e9   : > { %v2783_v20 = vsel %vm2724_vm1, %v2773_v17, 0.0 }
 0x3ea   : > { %2790 = vadd.xlane.f32.xlu0 %v2789_v19  ;;  %2784 = vadd.xlane.f32.xlu2 %v2783_v20 }
 0x3f2   : > { %2781 = vadd.xlane.f32.xlu0 %v2780_v22 }
 0x43d   : > { %v2797_v23 = vpop.xlane.xlu1 %2796 }
 0x43e   : > { %v2809_v24 = vmul.f32 %v2797_v23, %v12904_v47 }
 0x440   : > { %v2817_v25 = vadd.f32 1e-05, %v2809_v24 }
 0x442   : > { %10498 = vrsqrt.f32 %v2817_v25  ;;  %vm2876_vm4 = vweird.f32 %v2817_v25 }
 0x445   : > { %v2788_v26 = vpop.xlane.xlu1 %2787 }
 0x446   : > { %v2806_v27 = vmul.f32 %v2788_v26, %v12904_v47 }
 0x448   : > { %v10499_v28 = vpop.eup %10498  ;;  %v2814_v29 = vadd.f32 1e-05, %v2806_v27 }
 0x449   : > { %v2871_v30 = vmul.f32 %v10499_v28, %v2817_v25  ;;  %vm2877_vm3 = vweird.f32 %v10499_v28 }
 0x44a   : > { %10500 = vrsqrt.f32 %v2814_v29  ;;  %vm2878_vm5 = vmor %vm2876_vm4, %vm2877_vm3  ;;  %vm2846_vm7 = vweird.f32 %v2814_v29 }
 0x44b   : > { %v2872_v31 = vmul.f32 %v10499_v28, %v2871_v30 }
 0x44d   : > { %v2873_v32 = vmul.f32 0.5, %v2872_v31  ;;  %v2803_v33 = vpop.xlane.xlu2 %2802 }
 0x44e   : > { %v2811_v34 = vmul.f32 %v2803_v33, %v12904_v47 }
 0x44f   : > { %v2874_v35 = vsub.f32 1.5, %v2873_v32 }
 0x450   : > { %v10501_v36 = vpop.eup %10500  ;;  %v2819_v37 = vadd.f32 1e-05, %v2811_v34 }
 0x451   : > { %v2875_v38 = vmul.f32 %v10499_v28, %v2874_v35  ;;  %v2841_v39 = vmul.f32 %v10501_v36, %v2814_v29  ;;  %vm2847_vm6 = vweird.f32 %v10501_v36 }
 0x452   : > { %10502 = vrsqrt.f32 %v2819_v37  ;;  %vm2848_vm8 = vmor %vm2846_vm7, %vm2847_vm6  ;;  %vm2896_vm10 = vweird.f32 %v2819_v37 }
 0x453   : > { %v2842_v41 = vmul.f32 %v10501_v36, %v2841_v39  ;;  %v2879_v42 = vsel %vm2878_vm5, %v10499_v28, %v2875_v38 }
 0x454   : > { %v2905_v43 = vmul.f32 %v2879_v42, %v12908_v52 }
 0x455   : > { %v2843_v45 = vmul.f32 0.5, %v2842_v41  ;;  %v2794_v46 = vpop.xlane.xlu2 %2793  ;;  %v2800_v48 = vpop.xlane.xlu0 %2799 }
 0x456   : > { %v2808_v49 = vmul.f32 %v2794_v46, %v12904_v47  ;;  %v2810_v50 = vmul.f32 %v2800_v48, %v12904_v47  ;;  %v2916_v51 = vmul.f32 %v12958_v40, %v2905_v43 }
 0x457   : > { %v2844_v53 = vsub.f32 1.5, %v2843_v45 }
 0x458   : > { %v10503_v55 = vpop.eup %10502  ;;  %v2816_v56 = vadd.f32 1e-05, %v2808_v49  ;;  %v2818_v57 = vadd.f32 1e-05, %v2810_v50  ;;  %v12967_v58 = vadd.f32 %v12961_v44, %v2916_v51 }
 0x459   : > { %v2845_v52 = vmul.f32 %v10501_v36, %v2844_v53  ;;  %v2891_v59 = vmul.f32 %v10503_v55, %v2819_v37  ;;  %vm2897_vm9 = vweird.f32 %v10503_v55 }
 0x45a   : > { %10504 = vrsqrt.f32 %v2816_v56  ;;  %v2947_v60 = vsel %vm2724_vm1, %v12967_v58, 0.0  ;;  %vm2898_vm11 = vmor %vm2896_vm10, %vm2897_vm9  ;;  %vm2866_vm14 = vweird.f32 %v2816_v56  ;;  %vm2886_vm2 = vweird.f32 %v2818_v57 }
 0x45b   : > { %v2892_v61 = vmul.f32 %v10503_v55, %v2891_v59  ;;  %10506 = vrsqrt.f32 %v2818_v57  ;;  %2948 = vadd.xlane.f32.xlu0 %v2947_v60  ;;  %v2849_v63 = vsel %vm2848_vm8, %v10501_v36, %v2845_v52 }
 0x45c   : > { %v2902_v1 = vmul.f32 %v2849_v63, %v12912_v54 }
 0x45d   : > { %v2893_v2 = vmul.f32 0.5, %v2892_v61  ;;  %v2785_v3 = vpop.xlane.xlu2 %2784  ;;  %v2791_v4 = vpop.xlane.xlu0 %2790 }
 0x45e   : > { %v2805_v6 = vmul.f32 %v2785_v3, %v12904_v47  ;;  %v2807_v7 = vmul.f32 %v2791_v4, %v12904_v47  ;;  %v2913_v9 = vmul.f32 %v12958_v40, %v2902_v1 }
 0x45f   : > { %v2894_v10 = vsub.f32 1.5, %v2893_v2 }
 0x460   : > { %v10505_v11 = vpop.eup %10504  ;;  %v2813_v12 = vadd.f32 1e-05, %v2805_v6  ;;  %v12975_v13 = vadd.f32 1e-05, %v2807_v7  ;;  %v12978_v14 = vadd.f32 %v12961_v44, %v2913_v9 }
 0x461   : > { %v10507_v16 = vpop.eup %10506  ;;  %v2895_v54 = vmul.f32 %v10503_v55, %v2894_v10  ;;  %v2861_v17 = vmul.f32 %v10505_v11, %v2816_v56  ;;  %vm2867_vm12 = vweird.f32 %v10505_v11 }
 0x462   : > { %v2881_v19 = vmul.f32 %v10507_v16, %v2818_v57  ;;  %10508 = vrsqrt.f32 %v2813_v12  ;;  %v2938_v21 = vsel %vm2724_vm1, %v12978_v14, 0.0  ;;  %vm2887_vm13 = vweird.f32 %v10507_v16  ;;  %vm2868_vm15 = vmor %vm2866_vm14, %vm2867_vm12 }
 0x463   : > { %v2862_v20 = vmul.f32 %v10505_v11, %v2861_v17  ;;  %10510 = vrsqrt.f32 %v12975_v13  ;;  %2939 = vadd.xlane.f32.xlu0 %v2938_v21  ;;  %v2899_v23 = vsel %vm2898_vm11, %v10503_v55, %v2895_v54  ;;  %vm2888_vm3 = vmor %vm2886_vm2, %vm2887_vm13  ;;  %vm2836_vm6 = vweird.f32 %v2813_v12 }
 0x464   : > { %v2882_v22 = vmul.f32 %v10507_v16, %v2881_v19  ;;  %v2907_v26 = vmul.f32 %v2899_v23, %v12920_v62  ;;  %vm2856_vm8 = vweird.f32 %v12975_v13 }
 0x465   : > { %v2863_v24 = vmul.f32 0.5, %v2862_v20  ;;  %v2782_v25 = vpop.xlane.xlu0 %2781 }
 0x466   : > { %v2883_v27 = vmul.f32 0.5, %v2882_v22  ;;  %v2804_v28 = vmul.f32 %v2782_v25, %v12904_v47  ;;  %v2918_v30 = vmul.f32 %v12958_v40, %v2907_v26 }
 0x467   : > { %v2864_v29 = vsub.f32 1.5, %v2863_v24 }
 0x468   : > { %v10509_v31 = vpop.eup %10508  ;;  %v2884_v32 = vsub.f32 1.5, %v2883_v27  ;;  %v2812_v33 = vadd.f32 1e-05, %v2804_v28  ;;  %v12987_v37 = vadd.f32 %v12961_v44, %v2918_v30 }
 0x469   : > { %v10511_v34 = vpop.eup %10510  ;;  %v2865_v35 = vmul.f32 %v10505_v11, %v2864_v29  ;;  %v2831_v36 = vmul.f32 %v10509_v31, %v2813_v12  ;;  %vm2837_vm4 = vweird.f32 %v10509_v31 }
 0x46a   : > { %v2885_v62 = vmul.f32 %v10507_v16, %v2884_v32  ;;  %v2851_v38 = vmul.f32 %v10511_v34, %v12975_v13  ;;  %10512 = vrsqrt.f32 %v2812_v33  ;;  %v2953_v41 = vsel %vm2724_vm1, %v12987_v37, 0.0  ;;  %vm2838_vm7 = vmor %vm2836_vm6, %vm2837_vm4 }
 0x46b   : > { %v2832_v39 = vmul.f32 %v10509_v31, %v2831_v36  ;;  %v2869_v42 = vsel %vm2868_vm15, %v10505_v11, %v2865_v35  ;;  %2954 = vadd.xlane.f32.xlu1 %v2953_v41  ;;  %vm2857_vm5 = vweird.f32 %v10511_v34  ;;  %vm2826_vm11 = vweird.f32 %v2812_v33 }
 0x46c   : > { %v2852_v43 = vmul.f32 %v10511_v34, %v2851_v38  ;;  %v2889_v45 = vsel %vm2888_vm3, %v10507_v16, %v2885_v62  ;;  %v2904_v46 = vmul.f32 %v2869_v42, %v12924_v0  ;;  %vm2858_vm9 = vmor %vm2856_vm8, %vm2857_vm5 }
 0x46d   : > { %v2833_v48 = vmul.f32 0.5, %v2832_v39  ;;  %v2906_v49 = vmul.f32 %v2889_v45, %v12929_v5 }
 0x46e   : > { %v2853_v50 = vmul.f32 0.5, %v2852_v43  ;;  %v2915_v51 = vmul.f32 %v12958_v40, %v2904_v46 }
 0x46f   : > { %v2834_v53 = vsub.f32 1.5, %v2833_v48  ;;  %v2917_v55 = vmul.f32 %v12958_v40, %v2906_v49 }
 0x470   : > { %v10513_v56 = vpop.eup %10512  ;;  %v2854_v57 = vsub.f32 1.5, %v2853_v50  ;;  %v12997_v52 = vadd.f32 %v12961_v44, %v2915_v51 }
 0x471   : > { %v2835_v59 = vmul.f32 %v10509_v31, %v2834_v53  ;;  %v2821_v60 = vmul.f32 %v10513_v56, %v2812_v33  ;;  %v13000_v0 = vadd.f32 %v12961_v44, %v2917_v55  ;;  %vm2827_vm10 = vweird.f32 %v10513_v56 }
 0x472   : > { %v2855_v5 = vmul.f32 %v10511_v34, %v2854_v57  ;;  %v2944_v61 = vsel %vm2724_vm1, %v12997_v52, 0.0  ;;  %vm2828_vm12 = vmor %vm2826_vm11, %vm2827_vm10 }
 0x473   : > { %v2822_v63 = vmul.f32 %v10513_v56, %v2821_v60  ;;  %v2950_v1 = vsel %vm2724_vm1, %v13000_v0, 0.0  ;;  %v2839_v2 = vsel %vm2838_vm7, %v10509_v31, %v2835_v59  ;;  %2945 = vadd.xlane.f32.xlu1 %v2944_v61 }
 0x474   : > { %2951 = vadd.xlane.f32.xlu2 %v2950_v1  ;;  %v2859_v3 = vsel %vm2858_vm9, %v10511_v34, %v2855_v5  ;;  %v2901_v4 = vmul.f32 %v2839_v2, %v12942_v15 }
 0x475   : > { %v2823_v6 = vmul.f32 0.5, %v2822_v63  ;;  %v2903_v7 = vmul.f32 %v2859_v3, %v12936_v8 }
 0x476   : > { %v2912_v9 = vmul.f32 %v12958_v40, %v2901_v4 }
 0x477   : > { %v2824_v10 = vsub.f32 1.5, %v2823_v6  ;;  %v2914_v11 = vmul.f32 %v12958_v40, %v2903_v7 }
 0x478   : > { %v13012_v12 = vadd.f32 %v12961_v44, %v2912_v9 }
 0x479   : > { %v2825_v13 = vmul.f32 %v10513_v56, %v2824_v10  ;;  %v13015_v16 = vadd.f32 %v12961_v44, %v2914_v11 }
 0x47a   : > { %v2935_v15 = vsel %vm2724_vm1, %v13012_v12, 0.0 }
 0x47b   : > { %v2941_v8 = vsel %vm2724_vm1, %v13015_v16, 0.0  ;;  %v2829_v54 = vsel %vm2828_vm12, %v10513_v56, %v2825_v13  ;;  %2936 = vadd.xlane.f32.xlu1 %v2935_v15 }
 0x47c   : > { %2942 = vadd.xlane.f32.xlu2 %v2941_v8  ;;  %v2900_v17 = vmul.f32 %v2829_v54, %v12948_v18 }
 0x47e   : > { %v2911_v19 = vmul.f32 %v12958_v40, %v2900_v17 }
 0x480   : > { %v13024_v20 = vadd.f32 %v12961_v44, %v2911_v19 }
 0x482   : > { %v2932_v21 = vsel %vm2724_vm1, %v13024_v20, 0.0 }
 0x484   : > { %2933 = vadd.xlane.f32.xlu2 %v2932_v21 }
 0x4ce   : > { %v2949_v22 = vpop.xlane.xlu0 %2948 }
 0x4cf   : > { %v2961_v23 = vmul.f32 %v2949_v22, %v12904_v47 }
 0x4d1   : > { %v13030_v24 = vsub.f32 %v12967_v58, %v2961_v23 }
 0x4d3   : > { %v2977_v25 = vmul.f32 %v13030_v24, %v13030_v24 }
 0x4d5   : > { %v2995_v18 = vsel %vm2724_vm1, %v2977_v25, 0.0 }
 0x4d6   : > { %2996 = vadd.xlane.f32.xlu2 %v2995_v18  ;;  %v2940_v40 = vpop.xlane.xlu0 %2939 }
 0x4d7   : > { %v2958_v44 = vmul.f32 %v2940_v40, %v12904_v47 }
 0x4d9   : > { %v13037_v26 = vsub.f32 %v12978_v14, %v2958_v44 }
 0x4db   : > { %v2974_v27 = vmul.f32 %v13037_v26, %v13037_v26 }
 0x4dd   : > { %v2986_v28 = vsel %vm2724_vm1, %v2974_v27, 0.0 }
 0x4de   : > { %2987 = vadd.xlane.f32.xlu2 %v2986_v28  ;;  %v2955_v29 = vpop.xlane.xlu1 %2954 }
 0x4df   : > { %v2963_v30 = vmul.f32 %v2955_v29, %v12904_v47 }
 0x4e1   : > { %v13044_v31 = vsub.f32 %v12987_v37, %v2963_v30 }
 0x4e3   : > { %v2979_v32 = vmul.f32 %v13044_v31, %v13044_v31 }
 0x4e5   : > { %v3001_v33 = vsel %vm2724_vm1, %v2979_v32, 0.0 }
 0x4e6   : > { %3002 = vadd.xlane.f32.xlu0 %v3001_v33  ;;  %v2946_v35 = vpop.xlane.xlu1 %2945 }
 0x4e7   : > { %v2952_v34 = vpop.xlane.xlu2 %2951  ;;  %v2960_v62 = vmul.f32 %v2946_v35, %v12904_v47 }
 0x4e8   : > { %v2962_v36 = vmul.f32 %v2952_v34, %v12904_v47 }
 0x4e9   : > { %v13055_v39 = vsub.f32 %v12997_v52, %v2960_v62 }
 0x4ea   : > { %v13052_v38 = vsub.f32 %v13000_v0, %v2962_v36 }
 0x4eb   : > { %v2976_v42 = vmul.f32 %v13055_v39, %v13055_v39 }
 0x4ec   : > { %v2978_v41 = vmul.f32 %v13052_v38, %v13052_v38 }
 0x4ed   : > { %v2992_v45 = vsel %vm2724_vm1, %v2976_v42, 0.0 }
 0x4ee   : > { %v2998_v43 = vsel %vm2724_vm1, %v2978_v41, 0.0  ;;  %2993 = vadd.xlane.f32.xlu0 %v2992_v45  ;;  %v2937_v48 = vpop.xlane.xlu1 %2936 }
 0x4ef   : > { %v2943_v46 = vpop.xlane.xlu2 %2942  ;;  %2999 = vadd.xlane.f32.xlu1 %v2998_v43  ;;  %v2957_v50 = vmul.f32 %v2937_v48, %v12904_v47 }
 0x4f0   : > { %v2959_v49 = vmul.f32 %v2943_v46, %v12904_v47 }
 0x4f1   : > { %v13069_v53 = vsub.f32 %v13012_v12, %v2957_v50 }
 0x4f2   : > { %v13066_v51 = vsub.f32 %v13015_v16, %v2959_v49 }
 0x4f3   : > { %v2973_v56 = vmul.f32 %v13069_v53, %v13069_v53 }
 0x4f4   : > { %v2975_v55 = vmul.f32 %v13066_v51, %v13066_v51 }
 0x4f5   : > { %v2983_v59 = vsel %vm2724_vm1, %v2973_v56, 0.0 }
 0x4f6   : > { %v2989_v57 = vsel %vm2724_vm1, %v2975_v55, 0.0  ;;  %2984 = vadd.xlane.f32.xlu0 %v2983_v59 }
 0x4f7   : > { %2990 = vadd.xlane.f32.xlu1 %v2989_v57  ;;  %v2934_v60 = vpop.xlane.xlu2 %2933 }
 0x4f8   : > { %v2956_v5 = vmul.f32 %v2934_v60, %v12904_v47 }
 0x4fa   : > { %v13079_v61 = vsub.f32 %v13024_v20, %v2956_v5 }
 0x4fc   : > { %v2972_v63 = vmul.f32 %v13079_v61, %v13079_v61 }
 0x4fe   : > { %v2980_v1 = vsel %vm2724_vm1, %v2972_v63, 0.0  ;;  %v13116_v63 = vld [vmem:[#allocation16] ss:$0 sm:$0xff] }
 0x4ff   : > { %2981 = vadd.xlane.f32.xlu1 %v2980_v1 }
 0x549   : > { %v2997_v2 = vpop.xlane.xlu2 %2996 }
 0x54a   : > { %v3009_v3 = vmul.f32 %v2997_v2, %v12904_v47 }
 0x54c   : > { %v3017_v4 = vadd.f32 1e-05, %v3009_v3 }
 0x54e   : > { %10514 = vrsqrt.f32 %v3017_v4  ;;  %vm3076_vm3 = vweird.f32 %v3017_v4 }
 0x551   : > { %v2988_v6 = vpop.xlane.xlu2 %2987 }
 0x552   : > { %v3006_v7 = vmul.f32 %v2988_v6, %v12904_v47 }
 0x554   : > { %v13087_v11 = vadd.f32 1e-05, %v3006_v7  ;;  %v13089_v13 = vpop.eup %10514 }
 0x555   : > { %v3071_v8 = vmul.f32 %v13089_v13, %v3017_v4  ;;  %vm3077_vm15 = vweird.f32 %v13089_v13 }
 0x556   : > { %vm13120_vm4 = vmor %vm3076_vm3, %vm3077_vm15  ;;  %vm3046_vm12 = vweird.f32 %v13087_v11 }
 0x557   : > { %v3072_v22 = vmul.f32 %v13089_v13, %v3071_v8 }
 0x559   : > { %v3003_v9 = vpop.xlane.xlu0 %3002  ;;  %v3073_v27 = vmul.f32 0.5, %v3072_v22 }
 0x55a   : > { %v3011_v10 = vmul.f32 %v3003_v9, %v12904_v47 }
 0x55b   : > { %v3074_v36 = vsub.f32 1.5, %v3073_v27 }
 0x55c   : > { %v3019_v15 = vadd.f32 1e-05, %v3011_v10  ;;  %v13126_v10 = vld [vmem:[#allocation14] ss:$0 sm:$0xff] }
 0x55d   : > { %v3075_v57 = vmul.f32 %v13089_v13, %v3074_v36  ;;  %v10466_v36 = vld [vmem:[#allocation10] ss:$0 sm:$0xff] }
 0x55e   : > { %10516 = vrsqrt.f32 %v3019_v15  ;;  %vm3096_vm14 = vweird.f32 %v3019_v15 }
 0x55f   : > { %10518 = vrsqrt.f32 %v13087_v11 }
 0x561   : > { %v2994_v54 = vpop.xlane.xlu0 %2993 }
 0x562   : > { %v3000_v17 = vpop.xlane.xlu1 %2999  ;;  %v3008_v19 = vmul.f32 %v2994_v54, %v12904_v47 }
 0x563   : > { %v3010_v21 = vmul.f32 %v3000_v17, %v12904_v47 }
 0x564   : > { %v10517_v23 = vpop.eup %10516  ;;  %v3016_v25 = vadd.f32 1e-05, %v3008_v19 }
 0x565   : > { %v13096_v18 = vadd.f32 1e-05, %v3010_v21  ;;  %v13098_v40 = vpop.eup %10518  ;;  %v3091_v44 = vmul.f32 %v10517_v23, %v3019_v15  ;;  %vm3097_vm13 = vweird.f32 %v10517_v23 }
 0x566   : > { %10520 = vrsqrt.f32 %v3016_v25  ;;  %v3041_v29 = vmul.f32 %v13098_v40, %v13087_v11  ;;  %vm3098_vm2 = vmor %vm3096_vm14, %vm3097_vm13  ;;  %vm3066_vm6 = vweird.f32 %v3016_v25  ;;  %vm3047_vm10 = vweird.f32 %v13098_v40 }
 0x567   : > { %v3092_v28 = vmul.f32 %v10517_v23, %v3091_v44  ;;  %10522 = vrsqrt.f32 %v13096_v18  ;;  %vm3086_vm9 = vweird.f32 %v13096_v18  ;;  %vm13150_vm13 = vmor %vm3046_vm12, %vm3047_vm10  ;;  %v9926_v44 = vld [vmem:[%s15054_s7] sm:$0xff]  ;;  %vm3287_vm10 = vcmask 130048  }
 0x568   : > { %v3042_v42 = vmul.f32 %v13098_v40, %v3041_v29 }
 0x569   : > { %v3093_v30 = vmul.f32 0.5, %v3092_v28  ;;  %v2985_v32 = vpop.xlane.xlu0 %2984 }
 0x56a   : > { %v2991_v33 = vpop.xlane.xlu1 %2990  ;;  %v3005_v34 = vmul.f32 %v2985_v32, %v12904_v47  ;;  %v3043_v59 = vmul.f32 0.5, %v3042_v42 }
 0x56b   : > { %v3007_v35 = vmul.f32 %v2991_v33, %v12904_v47  ;;  %v3094_v62 = vsub.f32 1.5, %v3093_v30 }
 0x56c   : > { %v10521_v41 = vpop.eup %10520  ;;  %v13106_v43 = vadd.f32 1e-05, %v3005_v34  ;;  %v3044_v8 = vsub.f32 1.5, %v3043_v59 }
 0x56d   : > { %v13108_v45 = vadd.f32 1e-05, %v3007_v35  ;;  %v10523_v46 = vpop.eup %10522  ;;  %v3061_v48 = vmul.f32 %v10521_v41, %v3016_v25  ;;  %v3095_v49 = vmul.f32 %v10517_v23, %v3094_v62  ;;  %vm3067_vm5 = vweird.f32 %v10521_v41 }
 0x56e   : > { %v3081_v50 = vmul.f32 %v10523_v46, %v13096_v18  ;;  %10524 = vrsqrt.f32 %v13106_v43  ;;  %vm3087_vm7 = vweird.f32 %v10523_v46  ;;  %vm13135_vm8 = vmor %vm3066_vm6, %vm3067_vm5  ;;  %v3045_v32 = vmul.f32 %v13098_v40, %v3044_v8 }
 0x56f   : > { %v3062_v55 = vmul.f32 %v10521_v41, %v3061_v48  ;;  %10526 = vrsqrt.f32 %v13108_v45  ;;  %v3099_v56 = vsel %vm3098_vm2, %v10517_v23, %v3095_v49  ;;  %vm3088_vm11 = vmor %vm3086_vm9, %vm3087_vm7  ;;  %vm3036_vm2 = vweird.f32 %v13106_v43 }
 0x570   : > { %v3082_v60 = vmul.f32 %v10523_v46, %v3081_v50  ;;  %v3107_v5 = vmul.f32 %v3099_v56, %v13044_v31  ;;  %v3079_v31 = vsel %vm13120_vm4, %v13089_v13, %v3075_v57  ;;  %v3049_v11 = vsel %vm13150_vm13, %v13098_v40, %v3045_v32 }
 0x571   : > { %v3063_v1 = vmul.f32 0.5, %v3062_v55  ;;  %v3105_v13 = vmul.f32 %v3079_v31, %v13030_v24  ;;  %vm3056_vm4 = vweird.f32 %v13108_v45  ;;  %v3102_v57 = vmul.f32 %v3049_v11, %v13037_v26 }
 0x572   : > { %v2982_v2 = vpop.xlane.xlu1 %2981  ;;  %v3083_v6 = vmul.f32 0.5, %v3082_v60  ;;  %v3118_v9 = vmul.f32 %v13116_v63, %v3107_v5  ;;  %vm3138_vm9 = vcmask 523264  }
 0x573   : > { %v3004_v7 = vmul.f32 %v2982_v2, %v12904_v47  ;;  %v3064_v15 = vsub.f32 1.5, %v3063_v1 }
 0x574   : > { %v10525_v4 = vpop.eup %10524  ;;  %v3084_v54 = vsub.f32 1.5, %v3083_v6  ;;  %v3129_v19 = vadd.f32 %v13126_v10, %v3118_v9  ;;  %v3113_v6 = vmul.f32 %v13116_v63, %v3102_v57 }
 0x575   : > { %v13131_v17 = vadd.f32 1e-05, %v3004_v7  ;;  %v10527_v21 = vpop.eup %10526  ;;  %v3031_v22 = vmul.f32 %v10525_v4, %v13106_v43  ;;  %v3065_v23 = vmul.f32 %v10521_v41, %v3064_v15  ;;  %vm3037_vm14 = vweird.f32 %v10525_v4 }
 0x576   : > { %v3051_v27 = vmul.f32 %v10527_v21, %v13108_v45  ;;  %3171 = vmatpush.msra.mxu1 %v3129_v19  ;;  %v3085_v29 = vmul.f32 %v10523_v46, %v3084_v54  ;;  %vm3057_vm15 = vweird.f32 %v10527_v21  ;;  %vm3038_vm3 = vmor %vm3036_vm2, %vm3037_vm14  ;;  %v3130_v54 = vld [vmem:[%s15052_s16] sm:$0xff]  ;;  %v3133_v19 = vld [vmem:[%s15053_s8 + $0x18] sm:$0xff]  ;;  %s14900_s16 = smov 16  }
 0x577   : > { %10528 = vrsqrt.f32 %v13131_v17  ;;  %v3032_v28 = vmul.f32 %v10525_v4, %v3031_v22  ;;  %v3069_v25 = vsel %vm13135_vm8, %v10521_v41, %v3065_v23  ;;  %v3116_v41 = vmul.f32 %v13116_v63, %v3105_v13  ;;  %vm3058_vm5 = vmor %vm3056_vm4, %vm3057_vm15  ;;  %v3137_v22 = vld [vmem:[%s15053_s8 + $0x38] sm:$0xff]  ;;  %v9927_v23 = vld [vmem:[%s15054_s7 + $0x8] sm:$0xff]  ;;  %s15096_s7 = sld [smem:[#allocation116_spill]] }
 0x578   : > { %v3052_v30 = vmul.f32 %v10527_v21, %v3051_v27  ;;  %v3089_v34 = vsel %vm3088_vm11, %v10523_v46, %v3085_v29  ;;  %v3104_v18 = vmul.f32 %v3069_v25, %v13055_v39  ;;  %vm3026_vm7 = vweird.f32 %v13131_v17  ;;  %3246 = vmatpush.bf16.msra.mxu2 %v9927_v23 }
 0x579   : > { %v3033_v33 = vmul.f32 0.5, %v3032_v28  ;;  %v3106_v24 = vmul.f32 %v3089_v34, %v13052_v38  ;;  %v3127_v40 = vadd.f32 %v13126_v10, %v3116_v41 }
 0x57a   : > { %v3053_v35 = vmul.f32 0.5, %v3052_v30  ;;  %v3115_v50 = vmul.f32 %v13116_v63, %v3104_v18 }
 0x57b   : > { %v3034_v62 = vsub.f32 1.5, %v3033_v33  ;;  %v3117_v46 = vmul.f32 %v13116_v63, %v3106_v24 }
 0x57c   : > { %v3054_v48 = vsub.f32 1.5, %v3053_v35  ;;  %v3126_v45 = vadd.f32 %v13126_v10, %v3115_v50  ;;  %3247 = vmatpush.bf16.msra.mxu2 %v9926_v44 }
 0x57d   : > { %v10529_v42 = vpop.eup %10528  ;;  %v3035_v39 = vmul.f32 %v10525_v4, %v3034_v62  ;;  %v3128_v49 = vadd.f32 %v13126_v10, %v3117_v46 }
 0x57e   : > { %v3021_v38 = vmul.f32 %v10529_v42, %v13131_v17  ;;  %v3055_v55 = vmul.f32 %v10527_v21, %v3054_v48  ;;  %vm3027_vm6 = vweird.f32 %v10529_v42  ;;  %v3131_v17 = vld [vmem:[%s15053_s8 + $0x8] sm:$0xff] }
 0x57f   : > { %v3039_v59 = vsel %vm3038_vm3, %v10525_v4, %v3035_v39  ;;  %3172 = vmatpush.msra.mxu1 %v3128_v49  ;;  %vm3028_vm8 = vmor %vm3026_vm7, %vm3027_vm6 }
 0x580   : > { %v3022_v56 = vmul.f32 %v10529_v42, %v3021_v38  ;;  %v3059_v43 = vsel %vm3058_vm5, %v10527_v21, %v3055_v55  ;;  %v3101_v1 = vmul.f32 %v3039_v59, %v13069_v53  ;;  %v3124_v53 = vadd.f32 %v13126_v10, %v3113_v6  ;;  %v3136_v21 = vld [vmem:[%s15053_s8 + $0x30] sm:$0xff] }
 0x581   : > { %v3103_v5 = vmul.f32 %v3059_v43, %v13066_v51  ;;  %3173 = vmatpush.msra.mxu1 %v3127_v40 }
 0x582   : > { %v3023_v60 = vmul.f32 0.5, %v3022_v56  ;;  %v3112_v7 = vmul.f32 %v13116_v63, %v3101_v1 }
 0x583   : > { %v3114_v3 = vmul.f32 %v13116_v63, %v3103_v5  ;;  %3174 = vmatpush.msra.mxu1 %v3126_v45 }
 0x584   : > { %v3024_v2 = vsub.f32 1.5, %v3023_v60  ;;  %v3123_v31 = vadd.f32 %v13126_v10, %v3112_v7 }
 0x585   : > { %v3125_v26 = vadd.f32 %v13126_v10, %v3114_v3 }
 0x586   : > { %v3025_v51 = vmul.f32 %v10529_v42, %v3024_v2 }
 0x587   : > { %3175 = vmatpush.msra.mxu1 %v3125_v26 }
 0x588   : > { %v3029_v9 = vsel %vm3028_vm8, %v10529_v42, %v3025_v51 }
 0x589   : > { %v3100_v15 = vmul.f32 %v3029_v9, %v13079_v61  ;;  %3176 = vmatpush.msra.mxu1 %v3124_v53  ;;  %v3132_v61 = vld [vmem:[%s15053_s8 + $0x10] sm:$0xff] }
 0x58b   : > { %v3111_v4 = vmul.f32 %v13116_v63, %v3100_v15  ;;  %3177 = vmatpush.msra.mxu1 %v3123_v31  ;;  %v3134_v63 = vld [vmem:[%s15053_s8 + $0x20] sm:$0xff] }
 0x58d   : > { %v3122_v8 = vadd.f32 %v13126_v10, %v3111_v4  ;;  %v3135_v10 = vld [vmem:[%s15053_s8 + $0x28] sm:$0xff] }
 0x58f   : > { %3178 = vmatpush.msra.mxu1 %v3122_v8 }
 0x590   : > { %9286 = vmatmul.msk.f32.vlgmr.msra.gmra.mxu1 %vm3138_vm9, %v3130_v54 }
 0x598   : > { %9287 = vmatmul.msk.f32.gmra.mxu1 %vm3138_vm9, %v3131_v17 }
 0x5a0   : > { %9288 = vmatmul.msk.f32.gmra.mxu1 %vm3138_vm9, %v3132_v61 }
 0x5a8   : > { %9289 = vmatmul.msk.f32.gmra.mxu1 %vm3138_vm9, %v3133_v19 }
 0x5b0   : > { %9290 = vmatmul.msk.f32.gmra.mxu1 %vm3138_vm9, %v3134_v63 }
 0x5b8   : > { %9291 = vmatmul.msk.f32.gmra.mxu1 %vm3138_vm9, %v3135_v10 }
 0x5c0   : > { %9292 = vmatmul.msk.f32.gmra.mxu1 %vm3138_vm9, %v3136_v21 }
 0x5c8   : > { %9293 = vmatmul.msk.f32.gmra.mxu1 %vm3138_vm9, %v3137_v22 }
 0x60d   : > { %v3180_v27 = vpop.f32.mrf.mxu1 }
 0x615   : > { %v3183_v13 = vpop.f32.mrf.mxu1 }
 0x616   : > { %v3204_v28 = vpack.c.bf16 %v3183_v13, %v3180_v27 }
 0x618   : > { %9302 = vmatmul.msk.bf16.vlgmr.msra.gmra.mxu2 %vm2724_vm1, %v3204_v28 }
 0x61d   : > { %v3186_v29 = vpop.f32.mrf.mxu1 }
 0x625   : > { %v3189_v25 = vpop.f32.mrf.mxu1 }
 0x626   : > { %v3205_v30 = vpack.c.bf16 %v3189_v25, %v3186_v29 }
 0x628   : > { %9303 = vmatmul.msk.bf16.gmra.mxu2 %vm2724_vm1, %v3205_v30 }
 0x62d   : > { %v3192_v32 = vpop.f32.mrf.mxu1 }
 0x635   : > { %v3195_v33 = vpop.f32.mrf.mxu1 }
 0x636   : > { %v3206_v34 = vpack.c.bf16 %v3195_v33, %v3192_v32 }
 0x638   : > { %9304 = vmatmul.msk.bf16.gmra.mxu2 %vm2724_vm1, %v3206_v34 }
 0x63d   : > { %v3198_v35 = vpop.f32.mrf.mxu1 }
 0x645   : > { %v3201_v24 = vpop.f32.mrf.mxu1 }
 0x646   : > { %v3207_v18 = vpack.c.bf16 %v3201_v24, %v3198_v35 }
 0x648   : > { %9305 = vmatmul.msk.bf16.gmra.mxu2 %vm2724_vm1, %v3207_v18 }
 0x69b   : > { %v3249_v62 = vpop.f32.mrf.mxu2 }
 0x69c   : > { %v3250_v41 = vadd.f32 %v10466_v36, %v3249_v62 }
 0x69e   : > { %3283 = vrot.lane.b32.xlu0 %v3250_v41, %s14910_s0  ;;  %v3534_v6 = vpack.c.bf16 %v3250_v41, %v3250_v41  ;;  %v3273_v53 = vmul.f32 0.25, %v3250_v41 }
 0x6a0   : > { %v3549_v7 = vunpack.c.l.b16 %v3534_v6 }
 0x6a3   : > { %v3251_v42 = vpop.f32.mrf.mxu2 }
 0x6a4   : > { %v3252_v48 = vadd.f32 %v10466_v36, %v3251_v42  ;;  %v3269_v42 = vld [vmem:[%s15055_s1] sm:$0xff] }
 0x6a6   : > { %3285 = vrot.lane.b32.xlu2 %v3252_v48, %s14910_s0  ;;  %v3535_v3 = vpack.c.bf16 %v3252_v48, %v3252_v48  ;;  %v3274_v8 = vmul.f32 0.25, %v3252_v48 }
 0x6a8   : > { %v3550_v26 = vunpack.c.l.b16 %v3535_v3 }
 0x6aa   : > { %v13225_v51 = vpack.c.b16 %v3550_v26, %v3549_v7 }
 0x6ab   : > { %v3254_v46 = vpop.f32.mrf.mxu2 }
 0x6ac   : > { %v3255_v11 = vadd.f32 %v10466_v36, %v3254_v46 }
 0x6ae   : > { %3323 = vrot.lane.b32.xlu2 %v3255_v11, %s14910_s0  ;;  %v3536_v56 = vpack.c.bf16 %v3255_v11, %v3255_v11  ;;  %v3275_v17 = vmul.f32 0.25, %v3255_v11 }
 0x6b0   : > { %v3579_v59 = vunpack.c.l.b16 %v3536_v56 }
 0x6b3   : > { %v3256_v38 = vpop.f32.mrf.mxu2 }
 0x6b4   : > { %v3257_v39 = vadd.f32 %v10466_v36, %v3256_v38  ;;  %v3270_v38 = vld [vmem:[%s15055_s1 + $0x8] sm:$0xff] }
 0x6b6   : > { %3325 = vrot.lane.b32.xlu1 %v3257_v39, %s14910_s0  ;;  %v3537_v55 = vpack.c.bf16 %v3257_v39, %v3257_v39  ;;  %v3276_v61 = vmul.f32 0.25, %v3257_v39 }
 0x6b8   : > { %v3580_v57 = vunpack.c.l.b16 %v3537_v55 }
 0x6ba   : > { %v13209_v60 = vpack.c.b16 %v3580_v57, %v3579_v59 }
 0x6bb   : > { %v3259_v49 = vpop.f32.mrf.mxu2 }
 0x6bc   : > { %v13205_v50 = vadd.f32 %v10466_v36, %v3259_v49 }
 0x6be   : > { %3362 = vrot.lane.b32.xlu2 %v13205_v50, %s14910_s0  ;;  %v3538_v9 = vpack.c.bf16 %v13205_v50, %v13205_v50  ;;  %v13254_v44 = vmul.f32 0.25, %v13205_v50 }
 0x6c0   : > { %v3609_v31 = vunpack.c.l.b16 %v3538_v9 }
 0x6c3   : > { %v3261_v40 = vpop.f32.mrf.mxu2 }
 0x6c4   : > { %v3262_v43 = vadd.f32 %v10466_v36, %v3261_v40 }
 0x6c6   : > { %3364 = vrot.lane.b32.xlu0 %v3262_v43, %s14910_s0  ;;  %3582 = vrot.lane.b32.xlu2 %v13209_v60, %s14908_s18  ;;  %v3539_v15 = vpack.c.bf16 %v3262_v43, %v3262_v43  ;;  %v13258_v28 = vmul.f32 0.25, %v3262_v43 }
 0x6c8   : > { %v3610_v4 = vunpack.c.l.b16 %v3539_v15 }
 0x6ca   : > { %v13234_v54 = vpack.c.b16 %v3610_v4, %v3609_v31 }
 0x6cb   : > { %v3264_v5 = vpop.f32.mrf.mxu2 }
 0x6cc   : > { %v13214_v1 = vadd.f32 %v10466_v36, %v3264_v5 }
 0x6ce   : > { %3707 = vrot.lane.b32.xlu2 %v3257_v39, %s14906_s9  ;;  %3401 = vrot.lane.b32.xlu0 %v13214_v1, %s14910_s0  ;;  %v13265_v30 = vmul.f32 0.25, %v13214_v1  ;;  %v3540_v55 = vpack.c.bf16 %v13214_v1, %v13214_v1 }
 0x6d3   : > { %v3266_v45 = vpop.f32.mrf.mxu2 }
 0x6d4   : > { %v13219_v2 = vadd.f32 %v10466_v36, %v3266_v45 }
 0x6d6   : > { %3403 = vrot.lane.b32.xlu1 %v13219_v2, %s14910_s0  ;;  %3668 = vrot.lane.b32.xlu0 %v3252_v48, %s14906_s9  ;;  %v13274_v35 = vmul.f32 0.25, %v13219_v2  ;;  %v3541_v56 = vpack.c.bf16 %v13219_v2, %v13219_v2  ;;  %s15073_s0 = sld [smem:[#allocation110_spill]] }
 0x6d7   : > { %3746 = vrot.lane.b32.xlu2 %v3262_v43, %s14906_s9  ;;  %v3639_v43 = vunpack.c.l.b16 %v3540_v55 }
 0x6d8   : > { %v3640_v5 = vunpack.c.l.b16 %v3541_v56 }
 0x6da   : > { %v13297_v45 = vpack.c.b16 %v3640_v5, %v3639_v43 }
 0x6de   : > { %3552 = vrot.lane.b32.xlu1 %v13225_v51, %s14908_s18  ;;  %3662 = vrot.lane.b32.xlu0 %v3273_v53, %s14904_s4 }
 0x6e6   : > { %3666 = vrot.lane.b32.xlu1 %v3250_v41, %s14906_s9  ;;  %3705 = vrot.lane.b32.xlu0 %v3255_v11, %s14906_s9 }
 0x6ee   : > { %3664 = vrot.lane.b32.xlu1 %v3274_v8, %s14904_s4  ;;  %3612 = vrot.lane.b32.xlu0 %v13234_v54, %s14908_s18 }
 0x6f6   : > { %3701 = vrot.lane.b32.xlu1 %v3275_v17, %s14904_s4  ;;  %3744 = vrot.lane.b32.xlu0 %v13205_v50, %s14906_s9 }
 0x6fe   : > { %3703 = vrot.lane.b32.xlu1 %v3276_v61, %s14904_s4 }
 0x700   : > { %v3286_v19 = vpop.permute.xlu2 %3285 }
 0x701   : > { %9306 = vmatpush.xpose.msk.msra.mxu3 %vm3287_vm10, %v3286_v19 }
 0x708   : > { %v3324_v21 = vpop.permute.xlu2 %3323 }
 0x710   : > { %v3284_v63 = vpop.permute.xlu0 %3283 }
 0x711   : > { %9307 = vmatpush.xpose.msk.msra.mxu3 %vm3287_vm10, %v3284_v63 }
 0x714   : > { %9308 = vmatmul.msk.f32.vlgmr.msra.gmra.mxu3 %vm3287_vm10, %v3273_v53 }
 0x718   : > { %v3363_v23 = vpop.permute.xlu2 %3362 }
 0x71c   : > { %9309 = vmatmul.msk.f32.gmra.mxu3 %vm3287_vm10, %v3274_v8 }
 0x720   : > { %v3583_v13 = vpop.permute.xlu2 %3582 }
 0x728   : > { %v3326_v10 = vpop.permute.xlu1 %3325  ;;  %v3708_v32 = vpop.permute.xlu2 %3707 }
 0x729   : > { %9310 = vmatpush.xpose.msk.msrb.mxu3 %vm3287_vm10, %v3326_v10 }
 0x72d   : > { %9311 = vmatpush.xpose.msk.msrb.mxu3 %vm3287_vm10, %v3324_v21 }
 0x730   : > { %9312 = vmatmul.msk.f32.vlgmr.msrb.gmra.mxu3 %vm3287_vm10, %v3275_v17 }
 0x731   : > { %v13280_v62 = vpop.permute.xlu2 %3746 }
 0x738   : > { %9313 = vmatmul.msk.f32.gmra.mxu3 %vm3287_vm10, %v3276_v61  ;;  %v3365_v22 = vpop.permute.xlu0 %3364 }
 0x739   : > { %9314 = vmatpush.xpose.msk.msra.mxu3 %vm3287_vm10, %v3365_v22 }
 0x73d   : > { %9315 = vmatpush.xpose.msk.msra.mxu3 %vm3287_vm10, %v3363_v23 }
 0x740   : > { %9316 = vmatmul.msk.f32.vlgmr.msra.gmra.mxu3 %vm3287_vm10, %v13254_v44  ;;  %v3402_v27 = vpop.permute.xlu0 %3401 }
 0x748   : > { %9317 = vmatmul.msk.f32.gmra.mxu3 %vm3287_vm10, %v13258_v28  ;;  %v3404_v29 = vpop.permute.xlu1 %3403  ;;  %v3669_v25 = vpop.permute.xlu0 %3668 }
 0x749   : > { %9318 = vmatpush.xpose.msk.msrb.mxu3 %vm3287_vm10, %v3404_v29 }
 0x74d   : > { %9319 = vmatpush.xpose.msk.msrb.mxu3 %vm3287_vm10, %v3402_v27 }
 0x750   : > { %v3553_v33 = vpop.permute.xlu1 %3552  ;;  %v13267_v34 = vpop.permute.xlu0 %3662  ;;  %9320 = vmatmul.msk.f32.vlgmr.msrb.gmra.mxu3 %vm3287_vm10, %v13265_v30 }
 0x751   : > { %3595 = vmatpush.bf16.msra.mxu3 %v3583_v13  ;;  %3565 = vmatpush.bf16.msrb.mxu2 %v3553_v33 }
 0x755   : > { %9330 = vmatpush.xpose.msk.msrb.mxu3 %vm3287_vm10, %v3708_v32  ;;  %9326 = vmatpush.xpose.msk.msra.mxu2 %vm3287_vm10, %v3669_v25 }
 0x758   : > { %v3667_v24 = vpop.permute.xlu1 %3666  ;;  %v3706_v18 = vpop.permute.xlu0 %3705  ;;  %9321 = vmatmul.msk.f32.gmra.mxu3 %vm3287_vm10, %v13274_v35 }
 0x759   : > { %9327 = vmatpush.xpose.msk.msra.mxu2 %vm3287_vm10, %v3667_v24  ;;  %9331 = vmatpush.xpose.msk.msrb.mxu3 %vm3287_vm10, %v3706_v18 }
 0x760   : > { %v3613_v36 = vpop.permute.xlu0 %3612  ;;  %v13306_v21 = vpop.permute.xlu1 %3664 }
 0x761   : > { %3625 = vmatpush.bf16.msrb.mxu0 %v3613_v36 }
 0x765   : > { %9334 = vmatpush.xpose.msk.msra.mxu0 %vm3287_vm10, %v13280_v62 }
 0x768   : > { %v13284_v41 = vpop.permute.xlu0 %3744  ;;  %v13308_v22 = vpop.permute.xlu1 %3701 }
 0x769   : > { %9335 = vmatpush.xpose.msk.msra.mxu0 %vm3287_vm10, %v13284_v41 }
 0x770   : > { %v13310_v23 = vpop.permute.xlu1 %3703 }
 0x797   : > { %v3315_v48 = vpop.f32.mrf.mxu3 }
 0x798   : > { %v3316_v46 = vadd.f32 %v3315_v48, %v3269_v42 }
 0x79a   : > { %v3438_v11 = vsel %vm3287_vm10, %v3316_v46, -inf }
 0x79b   : > { %3439 = vmax.xlane.f32.xlu2 %v3438_v11 }
 0x79f   : > { %v3318_v39 = vpop.f32.mrf.mxu3 }
 0x7a0   : > { %v3319_v49 = vadd.f32 %v3318_v39, %v3270_v38 }
 0x7a2   : > { %v3441_v50 = vsel %vm3287_vm10, %v3319_v49, -inf }
 0x7a3   : > { %3442 = vmax.xlane.f32.xlu1 %v3441_v50 }
 0x7b3   : > { %v3354_v57 = vpop.f32.mrf.mxu3 }
 0x7b4   : > { %v3355_v59 = vadd.f32 %v3354_v57, %v3269_v42 }
 0x7b6   : > { %v3444_v40 = vsel %vm3287_vm10, %v3355_v59, -inf }
 0x7b7   : > { %3445 = vmax.xlane.f32.xlu0 %v3444_v40 }
 0x7bb   : > { %v3357_v3 = vpop.f32.mrf.mxu3 }
 0x7bc   : > { %v3358_v6 = vadd.f32 %v3357_v3, %v3270_v38  ;;  %3642 = vrot.lane.b32.xlu1 %v13297_v45, %s14908_s18 }
 0x7be   : > { %v3447_v26 = vsel %vm3287_vm10, %v3358_v6, -inf }
 0x7bf   : > { %3448 = vmax.xlane.f32.xlu2 %v3447_v26 }
 0x7c3   : > { %v3393_v7 = vpop.f32.mrf.mxu3 }
 0x7c4   : > { %v3394_v63 = vadd.f32 %v3393_v7, %v3269_v42 }
 0x7c6   : > { %v3450_v10 = vsel %vm3287_vm10, %v3394_v63, -inf }
 0x7cb   : > { %v3396_v53 = vpop.f32.mrf.mxu3 }
 0x7cc   : > { %v3397_v9 = vadd.f32 %v3396_v53, %v3270_v38 }
 0x7ce   : > { %v3453_v15 = vsel %vm3287_vm10, %v3397_v9, -inf }
 0x7cf   : > { %3454 = vmax.xlane.f32.xlu0 %v3453_v15 }
 0x7d3   : > { %v3432_v31 = vpop.f32.mrf.mxu3 }
 0x7d4   : > { %v3433_v4 = vadd.f32 %v3432_v31, %v3269_v42 }
 0x7d6   : > { %v3456_v8 = vsel %vm3287_vm10, %v3433_v4, -inf }
 0x7d7   : > { %3457 = vmax.xlane.f32.xlu0 %v3456_v8 }
 0x7db   : > { %v3435_v17 = vpop.f32.mrf.mxu3 }
 0x7dc   : > { %v3436_v61 = vadd.f32 %v3435_v17, %v3270_v38 }
 0x7de   : > { %v3459_v19 = vsel %vm3287_vm10, %v3436_v61, -inf }
 0x7df   : > { %3460 = vmax.xlane.f32.xlu2 %v3459_v19 }
 0x7e6   : > { %3451 = vmax.xlane.f32.xlu1 %v3450_v10 }
 0x80e   : > { %v3440_v27 = vpop.xlane.xlu2 %3439 }
 0x80f   : > { %v3462_v13 = vsub.f32 %v3316_v46, %v3440_v27 }
 0x811   : > { %v3470_v29 = vmul.f32 1.442695, %v3462_v13 }
 0x813   : > { %10530 = vpow2.f32 %v3470_v29 }
 0x816   : > { %v3443_v25 = vpop.xlane.xlu1 %3442 }
 0x817   : > { %v3463_v32 = vsub.f32 %v3319_v49, %v3443_v25 }
 0x819   : > { %v10531_v33 = vpop.eup %10530  ;;  %v3472_v24 = vmul.f32 1.442695, %v3463_v32 }
 0x81a   : > { %v3486_v18 = vsel %vm3287_vm10, %v10531_v33, 0.0 }
 0x81b   : > { %10532 = vpow2.f32 %v3472_v24  ;;  %3487 = vadd.xlane.f32.xlu2 %v3486_v18 }
 0x821   : > { %v10533_v36 = vpop.eup %10532 }
 0x822   : > { %v3489_v42 = vsel %vm3287_vm10, %v10533_v36, 0.0 }
 0x823   : > { %3490 = vadd.xlane.f32.xlu1 %v3489_v42 }
 0x82a   : > { %v3446_v48 = vpop.xlane.xlu0 %3445 }
 0x82b   : > { %v3464_v11 = vsub.f32 %v3355_v59, %v3446_v48 }
 0x82d   : > { %v3474_v38 = vmul.f32 1.442695, %v3464_v11 }
 0x82e   : > { %v3643_v39 = vpop.permute.xlu1 %3642 }
 0x82f   : > { %10534 = vpow2.f32 %v3474_v38  ;;  %3655 = vmatpush.bf16.msrb.mxu1 %v3643_v39 }
 0x832   : > { %v3449_v46 = vpop.xlane.xlu2 %3448 }
 0x833   : > { %v3465_v50 = vsub.f32 %v3358_v6, %v3449_v46 }
 0x835   : > { %v13314_v55 = vpop.eup %10534  ;;  %v3476_v49 = vmul.f32 1.442695, %v3465_v50 }
 0x836   : > { %v3492_v56 = vsel %vm3287_vm10, %v13314_v55, 0.0 }
 0x837   : > { %10536 = vpow2.f32 %v3476_v49  ;;  %3493 = vadd.xlane.f32.xlu0 %v3492_v56 }
 0x83c   : > { %3785 = vrot.lane.b32.xlu1 %v13219_v2, %s14906_s9 }
 0x83d   : > { %v13320_v57 = vpop.eup %10536 }
 0x83e   : > { %v3495_v59 = vsel %vm3287_vm10, %v13320_v57, 0.0 }
 0x83f   : > { %3496 = vadd.xlane.f32.xlu2 %v3495_v59 }
 0x842   : > { %v3455_v40 = vpop.xlane.xlu0 %3454 }
 0x843   : > { %v3467_v2 = vsub.f32 %v3397_v9, %v3455_v40 }
 0x845   : > { %v3480_v7 = vmul.f32 1.442695, %v3467_v2 }
 0x84a   : > { %v3458_v43 = vpop.xlane.xlu0 %3457 }
 0x84b   : > { %3742 = vrot.lane.b32.xlu0 %v13258_v28, %s14904_s4  ;;  %v3468_v5 = vsub.f32 %v3433_v4, %v3458_v43 }
 0x84d   : > { %v3482_v3 = vmul.f32 1.442695, %v3468_v5 }
 0x84f   : > { %10538 = vpow2.f32 %v3482_v3 }
 0x850   : > { %10540 = vpow2.f32 %v3480_v7 }
 0x852   : > { %v3461_v4 = vpop.xlane.xlu2 %3460 }
 0x853   : > { %v3469_v8 = vsub.f32 %v3436_v61, %v3461_v4 }
 0x855   : > { %v13328_v6 = vpop.eup %10538  ;;  %v3484_v17 = vmul.f32 1.442695, %v3469_v8 }
 0x856   : > { %v3504_v26 = vsel %vm3287_vm10, %v13328_v6, 0.0  ;;  %v13332_v31 = vpop.eup %10540 }
 0x857   : > { %3740 = vrot.lane.b32.xlu2 %v13254_v44, %s14904_s4  ;;  %v3501_v44 = vsel %vm3287_vm10, %v13332_v31, 0.0 }
 0x859   : > { %v3452_v53 = vpop.xlane.xlu1 %3451 }
 0x85a   : > { %v3466_v15 = vsub.f32 %v3394_v63, %v3452_v53 }
 0x85c   : > { %v3478_v28 = vmul.f32 1.442695, %v3466_v15 }
 0x85e   : > { %10542 = vpow2.f32 %v3478_v28 }
 0x85f   : > { %10544 = vpow2.f32 %v3484_v17 }
 0x864   : > { %v10543_v9 = vpop.eup %10542 }
 0x865   : > { %v3498_v19 = vsel %vm3287_vm10, %v10543_v9, 0.0  ;;  %v13339_v63 = vpop.eup %10544 }
 0x866   : > { %3505 = vadd.xlane.f32.xlu1 %v3504_v26  ;;  %v3507_v10 = vsel %vm3287_vm10, %v13339_v63, 0.0 }
 0x875   : > { %3502 = vadd.xlane.f32.xlu0 %v3501_v44 }
 0x87f   : > { %3781 = vrot.lane.b32.xlu1 %v13274_v35, %s14904_s4 }
 0x880   : > { %3499 = vadd.xlane.f32.xlu2 %v3498_v19 }
 0x888   : > { %3508 = vadd.xlane.f32.xlu2 %v3507_v10 }
 0x889   : > { %3783 = vrot.lane.b32.xlu0 %v13214_v1, %s14906_s9 }
 0x88e   : > { %v3488_v61 = vpop.xlane.xlu2 %3487 }
 0x88f   : > { %10546 = vrcp.f32 %v3488_v61 }
 0x895   : > { %v10547_v13 = vpop.eup %10546 }
 0x896   : > { %v3491_v27 = vpop.xlane.xlu1 %3490  ;;  %v3518_v29 = vmul.f32 %v10547_v13, %v10531_v33 }
 0x897   : > { %10548 = vrcp.f32 %v3491_v27  ;;  %v3271_v27 = vld [vmem:[%s15055_s1 + $0x10] sm:$0xff] }
 0x898   : > { %v3526_v35 = vpack.c.bf16 %v3518_v29, %v3518_v29 }
 0x89a   : > { %v3544_v18 = vunpack.c.l.b16 %v3526_v35  ;;  %v3272_v35 = vld [vmem:[%s15055_s1 + $0x18] sm:$0xff]  ;;  %s15074_s1 = smov %s15073_s0 }
 0x89d   : > { %v10549_v25 = vpop.eup %10548 }
 0x89e   : > { %v3519_v32 = vmul.f32 %v10549_v25, %v10533_v36 }
 0x8a0   : > { %v3527_v24 = vpack.c.bf16 %v3519_v32, %v3519_v32  ;;  %3779 = vrot.lane.b32.xlu2 %v13265_v30, %s14904_s4 }
 0x8a2   : > { %v3545_v42 = vunpack.c.l.b16 %v3527_v24 }
 0x8a4   : > { %v3546_v48 = vpack.c.b16 %v3545_v42, %v3544_v18 }
 0x8a6   : > { %9322 = vmatmul.msk.bf16.vlgmr.msrb.gmra.mxu2 %vm3287_vm10, %v3546_v48 }
 0x8a7   : > { %10034 = vmatpush.xpose.msk.msrb.mxu2 %vm3287_vm10, %v13280_v62 }
 0x8aa   : > { %v3494_v1 = vpop.xlane.xlu0 %3493 }
 0x8ab   : > { %10035 = vmatpush.xpose.msk.msrb.mxu2 %vm3287_vm10, %v13284_v41  ;;  %10550 = vrcp.f32 %v3494_v1 }
 0x8ae   : > { %v3786_v33 = vpop.permute.xlu1 %3785 }
 0x8af   : > { %9338 = vmatpush.xpose.msk.msra.mxu1 %vm3287_vm10, %v3786_v33 }
 0x8b1   : > { %v10551_v11 = vpop.eup %10550 }
 0x8b2   : > { %v3497_v36 = vpop.xlane.xlu2 %3496  ;;  %v3520_v30 = vmul.f32 %v10551_v11, %v13314_v55 }
 0x8b3   : > { %10552 = vrcp.f32 %v3497_v36 }
 0x8b4   : > { %v3528_v39 = vpack.c.bf16 %v3520_v30, %v3520_v30 }
 0x8b6   : > { %9328 = vmatmul.msk.f32.vlgmr.msra.gmra.mxu2 %vm3287_vm10, %v13267_v34  ;;  %v3574_v50 = vunpack.c.l.b16 %v3528_v39 }
 0x8b9   : > { %v10553_v38 = vpop.eup %10552 }
 0x8ba   : > { %v3521_v62 = vmul.f32 %v10553_v38, %v13320_v57  ;;  %v3741_v34 = vpop.permute.xlu2 %3740 }
 0x8bc   : > { %v3529_v46 = vpack.c.bf16 %v3521_v62, %v3521_v62 }
 0x8bd   : > { %v3743_v56 = vpop.permute.xlu0 %3742 }
 0x8be   : > { %v3575_v49 = vunpack.c.l.b16 %v3529_v46  ;;  %9329 = vmatmul.msk.f32.gmra.mxu2 %vm3287_vm10, %v13306_v21 }
 0x8c0   : > { %v3576_v41 = vpack.c.b16 %v3575_v49, %v3574_v50 }
 0x8c2   : > { %9323 = vmatmul.msk.bf16.vlgmr.msra.gmra.mxu3 %vm3287_vm10, %v3576_v41 }
 0x8c6   : > { %9337 = vmatmul.msk.f32.vlgmr.msrb.gmra.mxu2 %vm3287_vm10, %v3743_v56 }
 0x8d2   : > { %9332 = vmatmul.msk.f32.vlgmr.msrb.gmra.mxu3 %vm3287_vm10, %v13308_v22 }
 0x8d9   : > { %v3506_v57 = vpop.xlane.xlu1 %3505 }
 0x8da   : > { %9333 = vmatmul.msk.f32.gmra.mxu3 %vm3287_vm10, %v13310_v23 }
 0x8e8   : > { %v3503_v55 = vpop.xlane.xlu0 %3502 }
 0x8e9   : > { %10554 = vrcp.f32 %v3503_v55 }
 0x8ef   : > { %v10555_v40 = vpop.eup %10554 }
 0x8f0   : > { %v3523_v21 = vmul.f32 %v10555_v40, %v13332_v31 }
 0x8f1   : > { %v3782_v10 = vpop.permute.xlu1 %3781 }
 0x8f2   : > { %v3531_v5 = vpack.c.bf16 %v3523_v21, %v3523_v21 }
 0x8f3   : > { %v3500_v59 = vpop.xlane.xlu2 %3499 }
 0x8f4   : > { %10556 = vrcp.f32 %v3500_v59  ;;  %v3605_v15 = vunpack.c.l.b16 %v3531_v5 }
 0x8f5   : > { %10558 = vrcp.f32 %v3506_v57 }
 0x8fa   : > { %v10557_v43 = vpop.eup %10556 }
 0x8fb   : > { %v3522_v3 = vmul.f32 %v10557_v43, %v10543_v9  ;;  %v3509_v2 = vpop.xlane.xlu2 %3508  ;;  %v3784_v26 = vpop.permute.xlu0 %3783 }
 0x8fc   : > { %v10559_v7 = vpop.eup %10558  ;;  %10560 = vrcp.f32 %v3509_v2  ;;  %9339 = vmatpush.xpose.msk.msra.mxu1 %vm3287_vm10, %v3784_v26 }
 0x8fd   : > { %v3530_v22 = vpack.c.bf16 %v3522_v3, %v3522_v3  ;;  %v3524_v23 = vmul.f32 %v10559_v7, %v13328_v6 }
 0x8ff   : > { %v3604_v53 = vunpack.c.l.b16 %v3530_v22  ;;  %v3532_v44 = vpack.c.bf16 %v3524_v23, %v3524_v23 }
 0x901   : > { %v3606_v28 = vpack.c.b16 %v3605_v15, %v3604_v53  ;;  %v3634_v17 = vunpack.c.l.b16 %v3532_v44 }
 0x902   : > { %v10561_v4 = vpop.eup %10560 }
 0x903   : > { %v3525_v31 = vmul.f32 %v10561_v4, %v13339_v63  ;;  %9324 = vmatmul.msk.bf16.vlgmr.msrb.gmra.mxu0 %vm3287_vm10, %v3606_v28  ;;  %v3780_v6 = vpop.permute.xlu2 %3779 }
 0x905   : > { %v3533_v8 = vpack.c.bf16 %v3525_v31, %v3525_v31 }
 0x907   : > { %v3635_v9 = vunpack.c.l.b16 %v3533_v8 }
 0x909   : > { %v3636_v19 = vpack.c.b16 %v3635_v9, %v3634_v17 }
 0x90b   : > { %9325 = vmatmul.msk.bf16.vlgmr.msrb.gmra.mxu1 %vm3287_vm10, %v3636_v19 }
 0x913   : > { %9336 = vmatmul.msk.f32.vlgmr.msra.gmra.mxu0 %vm3287_vm10, %v3741_v34 }
 0x91b   : > { %9340 = vmatmul.msk.f32.vlgmr.msra.gmra.mxu1 %vm3287_vm10, %v3780_v6 }
 0x923   : > { %9341 = vmatmul.msk.f32.gmra.mxu1 %vm3287_vm10, %v3782_v10 }
 0x929   : > { %v13374_v61 = vpop.f32.mrf.mxu2 }
 0x931   : > { %v13376_v63 = vpop.f32.mrf.mxu2 }
 0x939   : > { %v3695_v13 = vpop.f32.mrf.mxu2 }
 0x93a   : > { %v3696_v29 = vadd.f32 %v3695_v13, %v3271_v27 }
 0x93c   : > { %v3818_v25 = vsel %vm3287_vm10, %v3696_v29, -inf }
 0x93d   : > { %3819 = vmax.xlane.f32.xlu0 %v3818_v25 }
 0x941   : > { %v3698_v32 = vpop.f32.mrf.mxu2 }
 0x942   : > { %v3699_v24 = vadd.f32 %v3698_v32, %v3272_v35 }
 0x944   : > { %v3821_v18 = vsel %vm3287_vm10, %v3699_v24, -inf }
 0x945   : > { %3822 = vmax.xlane.f32.xlu2 %v3821_v18  ;;  %v13382_v42 = vpop.f32.mrf.mxu3 }
 0x949   : > { %v3776_v11 = vpop.f32.mrf.mxu2 }
 0x94a   : > { %v3777_v30 = vadd.f32 %v3776_v11, %v3272_v35 }
 0x94c   : > { %v3833_v46 = vsel %vm3287_vm10, %v3777_v30, -inf }
 0x94d   : > { %v13384_v48 = vpop.f32.mrf.mxu3 }
 0x955   : > { %v3734_v1 = vpop.f32.mrf.mxu3 }
 0x956   : > { %v3735_v33 = vadd.f32 %v3734_v1, %v3271_v27 }
 0x958   : > { %v3824_v36 = vsel %vm3287_vm10, %v3735_v33, -inf }
 0x959   : > { %3825 = vmax.xlane.f32.xlu1 %v3824_v36 }
 0x95d   : > { %3919 = vrot.lane.b32.xlu2 %v13225_v51, %s14902_s5  ;;  %v3737_v38 = vpop.f32.mrf.mxu3 }
 0x95e   : > { %v3738_v39 = vadd.f32 %v3737_v38, %v3272_v35 }
 0x960   : > { %v3827_v62 = vsel %vm3287_vm10, %v3738_v39, -inf }
 0x961   : > { %3828 = vmax.xlane.f32.xlu0 %v3827_v62  ;;  %3834 = vmax.xlane.f32.xlu1 %v3833_v46 }
 0x980   : > { %v13391_v50 = vpop.f32.mrf.mxu0 }
 0x988   : > { %v13393_v49 = vpop.f32.mrf.mxu0  ;;  %v13395_v41 = vpop.f32.mrf.mxu1 }
 0x990   : > { %v13397_v56 = vpop.f32.mrf.mxu1  ;;  %v3773_v34 = vpop.f32.mrf.mxu0 }
 0x991   : > { %v3774_v55 = vadd.f32 %v3773_v34, %v3271_v27 }
 0x993   : > { %v3830_v51 = vsel %vm3287_vm10, %v3774_v55, -inf }
 0x994   : > { %3831 = vmax.xlane.f32.xlu2 %v3830_v51 }
 0x998   : > { %v3812_v57 = vpop.f32.mrf.mxu1 }
 0x999   : > { %v3813_v59 = vadd.f32 %v3812_v57, %v3271_v27 }
 0x99b   : > { %v3836_v40 = vsel %vm3287_vm10, %v3813_v59, -inf }
 0x99c   : > { %3837 = vmax.xlane.f32.xlu1 %v3836_v40 }
 0x9a0   : > { %v3815_v21 = vpop.f32.mrf.mxu1 }
 0x9a1   : > { %v3816_v43 = vadd.f32 %v3815_v21, %v3272_v35 }
 0x9a3   : > { %v3839_v5 = vsel %vm3287_vm10, %v3816_v43, -inf }
 0x9a4   : > { %3840 = vmax.xlane.f32.xlu0 %v3839_v5 }
 0x9b0   : > { %v3820_v3 = vpop.xlane.xlu0 %3819 }
 0x9b1   : > { %v3842_v2 = vsub.f32 %v3696_v29, %v3820_v3 }
 0x9b3   : > { %v3850_v26 = vmul.f32 1.442695, %v3842_v2 }
 0x9b5   : > { %10562 = vpow2.f32 %v3850_v26 }
 0x9b8   : > { %v3823_v7 = vpop.xlane.xlu2 %3822 }
 0x9b9   : > { %v3843_v22 = vsub.f32 %v3699_v24, %v3823_v7 }
 0x9bb   : > { %v10563_v23 = vpop.eup %10562  ;;  %v3852_v53 = vmul.f32 1.442695, %v3843_v22 }
 0x9bc   : > { %v3866_v15 = vsel %vm3287_vm10, %v10563_v23, 0.0 }
 0x9bd   : > { %10564 = vpow2.f32 %v3852_v53  ;;  %3867 = vadd.xlane.f32.xlu0 %v3866_v15 }
 0x9c0   : > { %v3920_v28 = vpop.permute.xlu2 %3919 }
 0x9c1   : > { %3932 = vmatpush.bf16.msra.mxu2 %v3920_v28 }
 0x9c3   : > { %v10565_v4 = vpop.eup %10564 }
 0x9c4   : > { %v3869_v44 = vsel %vm3287_vm10, %v10565_v4, 0.0 }
 0x9c5   : > { %3870 = vadd.xlane.f32.xlu2 %v3869_v44 }
 0x9cc   : > { %v3826_v31 = vpop.xlane.xlu1 %3825 }
 0x9cd   : > { %v3844_v8 = vsub.f32 %v3735_v33, %v3826_v31 }
 0x9cf   : > { %v3854_v17 = vmul.f32 1.442695, %v3844_v8 }
 0x9d1   : > { %10566 = vpow2.f32 %v3854_v17 }
 0x9d4   : > { %v3835_v9 = vpop.xlane.xlu1 %3834  ;;  %v3829_v19 = vpop.xlane.xlu0 %3828 }
 0x9d5   : > { %v3847_v6 = vsub.f32 %v3777_v30, %v3835_v9  ;;  %v3845_v13 = vsub.f32 %v3738_v39, %v3829_v19 }
 0x9d7   : > { %v10567_v10 = vpop.eup %10566  ;;  %v3860_v27 = vmul.f32 1.442695, %v3847_v6  ;;  %v3856_v25 = vmul.f32 1.442695, %v3845_v13 }
 0x9d8   : > { %v3872_v29 = vsel %vm3287_vm10, %v10567_v10, 0.0 }
 0x9d9   : > { %10568 = vpow2.f32 %v3860_v27  ;;  %3873 = vadd.xlane.f32.xlu1 %v3872_v29 }
 0x9da   : > { %10570 = vpow2.f32 %v3856_v25 }
 0x9dd   : > { %3969 = vrot.lane.b32.xlu2 %v13234_v54, %s14902_s5 }
 0x9df   : > { %v13407_v35 = vpop.eup %10568 }
 0x9e0   : > { %v3881_v32 = vsel %vm3287_vm10, %v13407_v35, 0.0  ;;  %v10571_v24 = vpop.eup %10570 }
 0x9e1   : > { %3882 = vadd.xlane.f32.xlu0 %v3881_v32  ;;  %v3875_v18 = vsel %vm3287_vm10, %v10571_v24, 0.0 }
 0x9e9   : > { %3876 = vadd.xlane.f32.xlu0 %v3875_v18 }
 0x9f2   : > { %3944 = vrot.lane.b32.xlu1 %v13209_v60, %s14902_s5 }
 0xa07   : > { %v3832_v1 = vpop.xlane.xlu2 %3831 }
 0xa08   : > { %v3846_v33 = vsub.f32 %v3774_v55, %v3832_v1 }
 0xa0a   : > { %v3858_v36 = vmul.f32 1.442695, %v3846_v33 }
 0xa0c   : > { %10572 = vpow2.f32 %v3858_v36 }
 0xa0f   : > { %v3838_v11 = vpop.xlane.xlu1 %3837 }
 0xa10   : > { %v3848_v54 = vsub.f32 %v3813_v59, %v3838_v11 }
 0xa12   : > { %v10573_v30 = vpop.eup %10572  ;;  %v3862_v38 = vmul.f32 1.442695, %v3848_v54 }
 0xa13   : > { %v3878_v39 = vsel %vm3287_vm10, %v10573_v30, 0.0 }
 0xa14   : > { %10574 = vpow2.f32 %v3862_v38  ;;  %3879 = vadd.xlane.f32.xlu0 %v3878_v39 }
 0xa17   : > { %v3841_v62 = vpop.xlane.xlu0 %3840 }
 0xa18   : > { %v3849_v46 = vsub.f32 %v3816_v43, %v3841_v62 }
 0xa1a   : > { %v10575_v34 = vpop.eup %10574  ;;  %v3864_v51 = vmul.f32 1.442695, %v3849_v46 }
 0xa1b   : > { %v3884_v57 = vsel %vm3287_vm10, %v10575_v34, 0.0 }
 0xa1c   : > { %10576 = vpow2.f32 %v3864_v51  ;;  %3885 = vadd.xlane.f32.xlu0 %v3884_v57 }
 0xa22   : > { %v10577_v60 = vpop.eup %10576 }
 0xa23   : > { %v3887_v55 = vsel %vm3287_vm10, %v10577_v60, 0.0 }
 0xa24   : > { %3888 = vadd.xlane.f32.xlu2 %v3887_v55 }
 0xa30   : > { %3994 = vrot.lane.b32.xlu0 %v13297_v45, %s14902_s5  ;;  %v3868_v59 = vpop.xlane.xlu0 %3867 }
 0xa31   : > { %10578 = vrcp.f32 %v3868_v59 }
 0xa37   : > { %v10579_v21 = vpop.eup %10578 }
 0xa38   : > { %v3871_v40 = vpop.xlane.xlu2 %3870  ;;  %v3898_v5 = vmul.f32 %v10579_v21, %v10563_v23 }
 0xa39   : > { %10580 = vrcp.f32 %v3871_v40 }
 0xa3a   : > { %v3906_v3 = vpack.c.bf16 %v3898_v5, %v3898_v5 }
 0xa3c   : > { %v3916_v22 = vunpack.c.l.b16 %v3906_v3 }
 0xa3f   : > { %v10581_v43 = vpop.eup %10580 }
 0xa40   : > { %v3899_v2 = vmul.f32 %v10581_v43, %v10565_v4  ;;  %v3970_v26 = vpop.permute.xlu2 %3969 }
 0xa41   : > { %3982 = vmatpush.bf16.msrb.mxu0 %v3970_v26 }
 0xa42   : > { %v3907_v7 = vpack.c.bf16 %v3899_v2, %v3899_v2 }
 0xa44   : > { %v3917_v53 = vunpack.c.l.b16 %v3907_v7 }
 0xa46   : > { %v3918_v15 = vpack.c.b16 %v3917_v53, %v3916_v22 }
 0xa48   : > { %9342 = vmatmul.msk.bf16.vlgmr.msra.gmra.mxu2 %vm3287_vm10, %v3918_v15  ;;  %v9928_v15 = vld [vmem:[%s15056_s28] sm:$0xff] }
 0xa4c   : > { %v3874_v28 = vpop.xlane.xlu1 %3873 }
 0xa4d   : > { %10582 = vrcp.f32 %v3874_v28 }
 0xa53   : > { %v10583_v31 = vpop.eup %10582 }
 0xa54   : > { %v3883_v44 = vpop.xlane.xlu0 %3882  ;;  %v3900_v8 = vmul.f32 %v10583_v31, %v10567_v10 }
 0xa56   : > { %v3908_v23 = vpack.c.bf16 %v3900_v8, %v3900_v8 }
 0xa58   : > { %v3941_v6 = vunpack.c.l.b16 %v3908_v23 }
 0xa5c   : > { %v3877_v45 = vpop.xlane.xlu0 %3876 }
 0xa5d   : > { %10584 = vrcp.f32 %v3877_v45 }
 0xa5e   : > { %10586 = vrcp.f32 %v3883_v44 }
 0xa63   : > { %v10585_v17 = vpop.eup %10584 }
 0xa64   : > { %v3901_v9 = vmul.f32 %v10585_v17, %v10571_v24  ;;  %v3945_v19 = vpop.permute.xlu1 %3944  ;;  %v10587_v25 = vpop.eup %10586 }
 0xa65   : > { %3957 = vmatpush.bf16.msra.mxu3 %v3945_v19  ;;  %v3903_v32 = vmul.f32 %v10587_v25, %v13407_v35 }
 0xa66   : > { %v3909_v4 = vpack.c.bf16 %v3901_v9, %v3901_v9 }
 0xa67   : > { %v3911_v1 = vpack.c.bf16 %v3903_v32, %v3903_v32 }
 0xa68   : > { %v3942_v27 = vunpack.c.l.b16 %v3909_v4 }
 0xa69   : > { %v3967_v24 = vunpack.c.l.b16 %v3911_v1 }
 0xa6a   : > { %v3943_v13 = vpack.c.b16 %v3942_v27, %v3941_v6 }
 0xa6c   : > { %9343 = vmatmul.msk.bf16.vlgmr.msra.gmra.mxu3 %vm3287_vm10, %v3943_v13 }
 0xa87   : > { %v3880_v29 = vpop.xlane.xlu0 %3879 }
 0xa88   : > { %10588 = vrcp.f32 %v3880_v29 }
 0xa8e   : > { %v10589_v18 = vpop.eup %10588 }
 0xa8f   : > { %v3902_v10 = vmul.f32 %v10589_v18, %v10573_v30  ;;  %v3886_v33 = vpop.xlane.xlu0 %3885 }
 0xa90   : > { %10590 = vrcp.f32 %v3886_v33 }
 0xa91   : > { %v3910_v36 = vpack.c.bf16 %v3902_v10, %v3902_v10 }
 0xa93   : > { %v3966_v11 = vunpack.c.l.b16 %v3910_v36 }
 0xa95   : > { %v3968_v54 = vpack.c.b16 %v3967_v24, %v3966_v11 }
 0xa96   : > { %v10591_v39 = vpop.eup %10590 }
 0xa97   : > { %v3889_v38 = vpop.xlane.xlu2 %3888  ;;  %9344 = vmatmul.msk.bf16.vlgmr.msrb.gmra.mxu0 %vm3287_vm10, %v3968_v54  ;;  %v3904_v62 = vmul.f32 %v10591_v39, %v10575_v34 }
 0xa98   : > { %10592 = vrcp.f32 %v3889_v38 }
 0xa99   : > { %v3912_v51 = vpack.c.bf16 %v3904_v62, %v3904_v62 }
 0xa9b   : > { %v3991_v59 = vunpack.c.l.b16 %v3912_v51 }
 0xa9e   : > { %v10593_v46 = vpop.eup %10592 }
 0xa9f   : > { %v3905_v57 = vmul.f32 %v10593_v46, %v10577_v60  ;;  %v9929_v60 = vld [vmem:[%s15056_s28 + $0x8] sm:$0xff] }
 0xaa0   : > { %4092 = vmatpush.bf16.msrb.mxu2 %v9929_v60 }
 0xaa1   : > { %v3913_v55 = vpack.c.bf16 %v3905_v57, %v3905_v57 }
 0xaa2   : > { %v3995_v35 = vpop.permute.xlu0 %3994 }
 0xaa3   : > { %v3992_v30 = vunpack.c.l.b16 %v3913_v55  ;;  %4007 = vmatpush.bf16.msrb.mxu1 %v3995_v35 }
 0xaa4   : > { %4093 = vmatpush.bf16.msrb.mxu2 %v9928_v15 }
 0xaa5   : > { %v3993_v40 = vpack.c.b16 %v3992_v30, %v3991_v59 }
 0xaa7   : > { %9345 = vmatmul.msk.bf16.vlgmr.msrb.gmra.mxu1 %vm3287_vm10, %v3993_v40  ;;  %v10467_v40 = vld [vmem:[#allocation8] ss:$0 sm:$0xff] }
 0xacb   : > { %v3934_v21 = vpop.f32.mrf.mxu2 }
 0xad3   : > { %v3936_v5 = vpop.f32.mrf.mxu2 }
 0xad4   : > { %v10391_v43 = vpack.i.bf16 %v3936_v5, %v3934_v21 }
 0xad6   : > { %10392 = vrot.lane.b32.xlu1 %v10391_v43, %s14900_s16 }
 0xaef   : > { %v3959_v34 = vpop.f32.mrf.mxu3 }
 0xaf7   : > { %v3961_v3 = vpop.f32.mrf.mxu3 }
 0xaf8   : > { %v10396_v2 = vpack.i.bf16 %v3961_v3, %v3959_v34 }
 0xafa   : > { %10397 = vrot.lane.b32.xlu1 %v10396_v2, %s14900_s16 }
 0xb14   : > { %v3984_v26 = vpop.f32.mrf.mxu0 }
 0xb1c   : > { %v3986_v7 = vpop.f32.mrf.mxu0 }
 0xb1d   : > { %v10401_v22 = vpack.i.bf16 %v3986_v7, %v3984_v26 }
 0xb1f   : > { %10402 = vrot.lane.b32.xlu1 %v10401_v22, %s14900_s16 }
 0xb24   : > { %v4009_v53 = vpop.f32.mrf.mxu1 }
 0xb2c   : > { %v4011_v28 = vpop.f32.mrf.mxu1 }
 0xb2d   : > { %v10406_v44 = vpack.i.bf16 %v4011_v28, %v4009_v53 }
 0xb2f   : > { %10407 = vrot.lane.b32.xlu0 %v10406_v44, %s14900_s16  ;;  %s15057_s16 = sld [smem:[#allocation93_spill]] }
 0xb35   : > { %s15058_s5 = smov %s15057_s16 }
 0xb36   : > { %v4117_v51 = vld [vmem:[%s15058_s5 + $0x10] sm:$0xff]  ;;  %v4118_v57 = vld [vmem:[%s15058_s5 + $0x18] sm:$0xff]  ;;  %v4119_v55 = vld [vmem:[%s15058_s5 + $0x20] sm:$0xff] }
 0xb37   : > { %v4120_v35 = vld [vmem:[%s15058_s5 + $0x28] sm:$0xff]  ;;  %v4121_v59 = vld [vmem:[%s15058_s5 + $0x30] sm:$0xff]  ;;  %v4122_v30 = vld [vmem:[%s15058_s5 + $0x38] sm:$0xff] }
 0xb48   : > { %v10393_v45 = vpop.permute.xlu1 %10392 }
 0xb49   : > { %v10395_v31 = vunpack.i.h.bf16 %v10393_v45  ;;  %v10394_v8 = vunpack.i.l.bf16 %v10393_v45 }
 0xb4b   : > { %v4047_v17 = vsel %vm3287_vm10, %v13376_v63, %v10395_v31  ;;  %v4046_v23 = vsel %vm3287_vm10, %v13374_v61, %v10394_v8 }
 0xb4c   : > { %v4054_v9 = vpack.c.bf16 %v4047_v17, %v4046_v23 }
 0xb4e   : > { %9354 = vmatmul.msk.bf16.vlgmr.msrb.gmra.mxu2 %vm2724_vm1, %v4054_v9 }
 0xb6c   : > { %v10398_v19 = vpop.permute.xlu1 %10397 }
 0xb6d   : > { %v10400_v4 = vunpack.i.h.bf16 %v10398_v19  ;;  %v10399_v6 = vunpack.i.l.bf16 %v10398_v19 }
 0xb6f   : > { %v4048_v27 = vsel %vm3287_vm10, %v13382_v42, %v10399_v6  ;;  %v4049_v13 = vsel %vm3287_vm10, %v13384_v48, %v10400_v4 }
 0xb70   : > { %v4055_v29 = vpack.c.bf16 %v4049_v13, %v4048_v27 }
 0xb72   : > { %9355 = vmatmul.msk.bf16.gmra.mxu2 %vm2724_vm1, %v4055_v29 }
 0xb91   : > { %v10403_v25 = vpop.permute.xlu1 %10402 }
 0xb92   : > { %v10405_v63 = vunpack.i.h.bf16 %v10403_v25  ;;  %v10404_v32 = vunpack.i.l.bf16 %v10403_v25 }
 0xb94   : > { %v4050_v61 = vsel %vm3287_vm10, %v13391_v50, %v10404_v32  ;;  %v4051_v18 = vsel %vm3287_vm10, %v13393_v49, %v10405_v63 }
 0xb95   : > { %v4056_v1 = vpack.c.bf16 %v4051_v18, %v4050_v61 }
 0xb97   : > { %9356 = vmatmul.msk.bf16.gmra.mxu2 %vm2724_vm1, %v4056_v1 }
 0xba1   : > { %v10408_v10 = vpop.permute.xlu0 %10407 }
 0xba2   : > { %v10410_v42 = vunpack.i.h.bf16 %v10408_v10  ;;  %v10409_v33 = vunpack.i.l.bf16 %v10408_v10 }
 0xba4   : > { %v4052_v48 = vsel %vm3287_vm10, %v13395_v41, %v10409_v33  ;;  %v4053_v36 = vsel %vm3287_vm10, %v13397_v56, %v10410_v42  ;;  %v4115_v41 = vld [vmem:[%s15057_s16] sm:$0xff]  ;;  %v4116_v56 = vld [vmem:[%s15058_s5 + $0x8] sm:$0xff]  ;;  %s15059_s16 = sld [smem:[#allocation86_spill]]  ;;  %s15083_s5 = smov 16  }
 0xba5   : > { %v4057_v24 = vpack.c.bf16 %v4053_v36, %v4052_v48 }
 0xba7   : > { %9357 = vmatmul.msk.bf16.gmra.mxu2 %vm2724_vm1, %v4057_v24 }
 0xbaa   : > { %s15060_s4 = smov %s15059_s16 }
 0xbd1   : > { %v4095_v50 = vpop.f32.mrf.mxu2 }
 0xbd9   : > { %v4097_v11 = vpop.f32.mrf.mxu2 }
 0xbf5   : > { %v4100_v54 = vpop.f32.mrf.mxu2 }
 0xbfd   : > { %v4102_v49 = vpop.f32.mrf.mxu2 }
 0xc1a   : > { %v4105_v38 = vpop.f32.mrf.mxu2 }
 0xc22   : > { %v4107_v39 = vpop.f32.mrf.mxu2 }
 0xc2a   : > { %v4110_v62 = vpop.f32.mrf.mxu2 }
 0xc32   : > { %v4112_v46 = vpop.f32.mrf.mxu2 }
 0xc33   : > { %4155 = vmatpush.msrb.mxu3 %v4112_v46 }
 0xc35   : > { %4156 = vmatpush.msrb.mxu3 %v4110_v62 }
 0xc37   : > { %4157 = vmatpush.msrb.mxu3 %v4107_v39 }
 0xc39   : > { %4158 = vmatpush.msrb.mxu3 %v4105_v38 }
 0xc3b   : > { %4159 = vmatpush.msrb.mxu3 %v4102_v49 }
 0xc3d   : > { %4160 = vmatpush.msrb.mxu3 %v4100_v54 }
 0xc3f   : > { %4161 = vmatpush.msrb.mxu3 %v4097_v11 }
 0xc41   : > { %4162 = vmatpush.msrb.mxu3 %v4095_v50 }
 0xc42   : > { %9358 = vmatmul.msk.f32.vlgmr.msrb.gmra.mxu3 %vm3138_vm9, %v4115_v41 }
 0xc4a   : > { %9359 = vmatmul.msk.f32.gmra.mxu3 %vm3138_vm9, %v4116_v56 }
 0xc52   : > { %9360 = vmatmul.msk.f32.gmra.mxu3 %vm3138_vm9, %v4117_v51 }
 0xc5a   : > { %9361 = vmatmul.msk.f32.gmra.mxu3 %vm3138_vm9, %v4118_v57 }
 0xc62   : > { %9362 = vmatmul.msk.f32.gmra.mxu3 %vm3138_vm9, %v4119_v55 }
 0xc6a   : > { %9363 = vmatmul.msk.f32.gmra.mxu3 %vm3138_vm9, %v4120_v35 }
 0xc72   : > { %9364 = vmatmul.msk.f32.gmra.mxu3 %vm3138_vm9, %v4121_v59 }
 0xc7a   : > { %9365 = vmatmul.msk.f32.gmra.mxu3 %vm3138_vm9, %v4122_v30 }
 0xcc5   : > { %v4164_v21 = vpop.f32.mrf.mxu3 }
 0xcc6   : > { %v4188_v5 = vadd.f32 %v4164_v21, %v13024_v20 }
 0xcc8   : > { %v13467_v43 = vadd.f32 %v10467_v40, %v4188_v5 }
 0xcca   : > { %v4210_v34 = vsel %vm2724_vm1, %v13467_v43, 0.0 }
 0xccb   : > { %4211 = vadd.xlane.f32.xlu1 %v4210_v34 }
 0xccd   : > { %v4167_v3 = vpop.f32.mrf.mxu3 }
 0xcce   : > { %v4189_v2 = vadd.f32 %v4167_v3, %v13012_v12 }
 0xcd0   : > { %v13472_v60 = vadd.f32 %v10467_v40, %v4189_v2 }
 0xcd2   : > { %v4213_v26 = vsel %vm2724_vm1, %v13472_v60, 0.0 }
 0xcd3   : > { %4214 = vadd.xlane.f32.xlu0 %v4213_v26  ;;  %v9931_v26 = vld [vmem:[%s15059_s16 + $0x8] sm:$0xff]  ;;  %s15061_s16 = sld [smem:[#allocation88_spill]] }
 0xcd4   : > { %4450 = vmatpush.bf16.msra.mxu0 %v9931_v26 }
 0xcd5   : > { %v4170_v7 = vpop.f32.mrf.mxu3 }
 0xcd6   : > { %v4190_v22 = vadd.f32 %v4170_v7, %v12978_v14 }
 0xcd8   : > { %v13477_v53 = vadd.f32 %v10467_v40, %v4190_v22 }
 0xcd9   : > { %s15062_s9 = smov %s15061_s16 }
 0xcda   : > { %v4216_v20 = vsel %vm2724_vm1, %v13477_v53, 0.0 }
 0xcdb   : > { %4217 = vadd.xlane.f32.xlu2 %v4216_v20  ;;  %v9930_v20 = vld [vmem:[%s15060_s4] sm:$0xff]  ;;  %s15080_s4 = sld [smem:[#allocation102_spill]] }
 0xcdc   : > { %4451 = vmatpush.bf16.msra.mxu0 %v9930_v20 }
 0xcdd   : > { %v4173_v15 = vpop.f32.mrf.mxu3 }
 0xcde   : > { %v4191_v28 = vadd.f32 %v4173_v15, %v13015_v16 }
 0xce0   : > { %v13482_v44 = vadd.f32 %v10467_v40, %v4191_v28 }
 0xce2   : > { %v4219_v12 = vsel %vm2724_vm1, %v13482_v44, 0.0 }
 0xce3   : > { %4220 = vadd.xlane.f32.xlu2 %v4219_v12 }
 0xce5   : > { %v4176_v45 = vpop.f32.mrf.mxu3 }
 0xce6   : > { %v4192_v31 = vadd.f32 %v4176_v45, %v12997_v52 }
 0xce8   : > { %v13487_v8 = vadd.f32 %v10467_v40, %v4192_v31 }
 0xcea   : > { %v4222_v14 = vsel %vm2724_vm1, %v13487_v8, 0.0 }
 0xceb   : > { %4223 = vadd.xlane.f32.xlu2 %v4222_v14 }
 0xced   : > { %v4179_v17 = vpop.f32.mrf.mxu3 }
 0xcee   : > { %v4193_v23 = vadd.f32 %v4179_v17, %v12967_v58 }
 0xcf0   : > { %v13492_v9 = vadd.f32 %v10467_v40, %v4193_v23 }
 0xcf2   : > { %v4225_v16 = vsel %vm2724_vm1, %v13492_v9, 0.0 }
 0xcf3   : > { %4226 = vadd.xlane.f32.xlu2 %v4225_v16 }
 0xcf5   : > { %v4182_v19 = vpop.f32.mrf.mxu3 }
 0xcf6   : > { %v4194_v4 = vadd.f32 %v4182_v19, %v13000_v0 }
 0xcf8   : > { %v13497_v6 = vadd.f32 %v10467_v40, %v4194_v4 }
 0xcfa   : > { %v4228_v52 = vsel %vm2724_vm1, %v13497_v6, 0.0 }
 0xcfb   : > { %4229 = vadd.xlane.f32.xlu0 %v4228_v52 }
 0xcfd   : > { %v4185_v29 = vpop.f32.mrf.mxu3 }
 0xcfe   : > { %v4195_v63 = vadd.f32 %v4185_v29, %v12987_v37 }
 0xd00   : > { %v13510_v18 = vadd.f32 %v10467_v40, %v4195_v63 }
 0xd02   : > { %v4231_v33 = vsel %vm2724_vm1, %v13510_v18, 0.0 }
 0xd3e   : > { %v4212_v27 = vpop.xlane.xlu1 %4211 }
 0xd3f   : > { %v4234_v13 = vmul.f32 %v4212_v27, %v12904_v47 }
 0xd41   : > { %v13503_v58 = vsub.f32 %v13467_v43, %v4234_v13 }
 0xd43   : > { %v4250_v25 = vmul.f32 %v13503_v58, %v13503_v58 }
 0xd45   : > { %v4258_v0 = vsel %vm2724_vm1, %v4250_v25, 0.0 }
 0xd46   : > { %4259 = vadd.xlane.f32.xlu1 %v4258_v0  ;;  %v4215_v32 = vpop.xlane.xlu0 %4214 }
 0xd47   : > { %v4235_v61 = vmul.f32 %v4215_v32, %v12904_v47 }
 0xd49   : > { %v13513_v1 = vsub.f32 %v13472_v60, %v4235_v61 }
 0xd4b   : > { %v4251_v10 = vmul.f32 %v13513_v1, %v13513_v1 }
 0xd4d   : > { %v4261_v42 = vsel %vm2724_vm1, %v4251_v10, 0.0 }
 0xd4e   : > { %v4218_v37 = vpop.xlane.xlu2 %4217  ;;  %4262 = vadd.xlane.f32.xlu2 %v4261_v42  ;;  %4232 = vadd.xlane.f32.xlu1 %v4231_v33 }
 0xd4f   : > { %v4236_v48 = vmul.f32 %v4218_v37, %v12904_v47 }
 0xd51   : > { %v13522_v36 = vsub.f32 %v13477_v53, %v4236_v48 }
 0xd53   : > { %v4252_v24 = vmul.f32 %v13522_v36, %v13522_v36 }
 0xd55   : > { %v4264_v50 = vsel %vm2724_vm1, %v4252_v24, 0.0 }
 0xd56   : > { %v4221_v11 = vpop.xlane.xlu2 %4220  ;;  %4265 = vadd.xlane.f32.xlu2 %v4264_v50  ;;  %v13568_v50 = vld [vmem:[#allocation19] ss:$0 sm:$0xff] }
 0xd57   : > { %v4237_v54 = vmul.f32 %v4221_v11, %v12904_v47 }
 0xd59   : > { %v13529_v49 = vsub.f32 %v13482_v44, %v4237_v54 }
 0xd5b   : > { %v4253_v38 = vmul.f32 %v13529_v49, %v13529_v49 }
 0xd5d   : > { %v4267_v39 = vsel %vm2724_vm1, %v4253_v38, 0.0 }
 0xd5e   : > { %v4224_v62 = vpop.xlane.xlu2 %4223  ;;  %4268 = vadd.xlane.f32.xlu0 %v4267_v39 }
 0xd5f   : > { %v4238_v46 = vmul.f32 %v4224_v62, %v12904_v47 }
 0xd61   : > { %v13536_v41 = vsub.f32 %v13487_v8, %v4238_v46 }
 0xd63   : > { %v4254_v56 = vmul.f32 %v13536_v41, %v13536_v41 }
 0xd65   : > { %v4270_v51 = vsel %vm2724_vm1, %v4254_v56, 0.0 }
 0xd66   : > { %v4227_v57 = vpop.xlane.xlu2 %4226  ;;  %4271 = vadd.xlane.f32.xlu1 %v4270_v51 }
 0xd67   : > { %v4239_v55 = vmul.f32 %v4227_v57, %v12904_v47  ;;  %v13573_v57 = vld [vmem:[#allocation17] ss:$0 sm:$0xff] }
 0xd69   : > { %v13543_v35 = vsub.f32 %v13492_v9, %v4239_v55 }
 0xd6b   : > { %v4255_v59 = vmul.f32 %v13543_v35, %v13543_v35 }
 0xd6d   : > { %v4273_v30 = vsel %vm2724_vm1, %v4255_v59, 0.0 }
 0xd6e   : > { %4274 = vadd.xlane.f32.xlu2 %v4273_v30  ;;  %v4230_v40 = vpop.xlane.xlu0 %4229 }
 0xd6f   : > { %v4240_v21 = vmul.f32 %v4230_v40, %v12904_v47 }
 0xd71   : > { %v13550_v5 = vsub.f32 %v13497_v6, %v4240_v21 }
 0xd73   : > { %v4256_v34 = vmul.f32 %v13550_v5, %v13550_v5 }
 0xd75   : > { %v4276_v3 = vsel %vm2724_vm1, %v4256_v34, 0.0 }
 0xd76   : > { %4277 = vadd.xlane.f32.xlu0 %v4276_v3 }
 0xdb9   : > { %v4260_v2 = vpop.xlane.xlu1 %4259 }
 0xdba   : > { %v4282_v7 = vmul.f32 %v4260_v2, %v12904_v47 }
 0xdbc   : > { %v4290_v22 = vadd.f32 1e-05, %v4282_v7 }
 0xdbe   : > { %10594 = vrsqrt.f32 %v4290_v22  ;;  %vm4304_vm12 = vweird.f32 %v4290_v22 }
 0xdc1   : > { %v4263_v15 = vpop.xlane.xlu2 %4262  ;;  %v4233_v28 = vpop.xlane.xlu1 %4232 }
 0xdc2   : > { %v4283_v12 = vmul.f32 %v4263_v15, %v12904_v47  ;;  %v4241_v45 = vmul.f32 %v4233_v28, %v12904_v47 }
 0xdc4   : > { %v10595_v31 = vpop.eup %10594  ;;  %v4291_v14 = vadd.f32 1e-05, %v4283_v12  ;;  %v13561_v17 = vsub.f32 %v13510_v18, %v4241_v45 }
 0xdc5   : > { %v4299_v23 = vmul.f32 %v10595_v31, %v4290_v22  ;;  %vm4305_vm11 = vweird.f32 %v10595_v31 }
 0xdc6   : > { %10596 = vrsqrt.f32 %v4291_v14  ;;  %v4257_v16 = vmul.f32 %v13561_v17, %v13561_v17  ;;  %vm4306_vm13 = vmor %vm4304_vm12, %vm4305_vm11  ;;  %vm4314_vm15 = vweird.f32 %v4291_v14 }
 0xdc7   : > { %v4300_v19 = vmul.f32 %v10595_v31, %v4299_v23 }
 0xdc8   : > { %v4279_v4 = vsel %vm2724_vm1, %v4257_v16, 0.0 }
 0xdc9   : > { %v4301_v52 = vmul.f32 0.5, %v4300_v19  ;;  %v4266_v27 = vpop.xlane.xlu2 %4265  ;;  %4280 = vadd.xlane.f32.xlu1 %v4279_v4 }
 0xdca   : > { %v4284_v13 = vmul.f32 %v4266_v27, %v12904_v47 }
 0xdcb   : > { %v4302_v29 = vsub.f32 1.5, %v4301_v52 }
 0xdcc   : > { %v10597_v25 = vpop.eup %10596  ;;  %v4292_v63 = vadd.f32 1e-05, %v4284_v13 }
 0xdcd   : > { %v4303_v0 = vmul.f32 %v10595_v31, %v4302_v29  ;;  %v4309_v32 = vmul.f32 %v10597_v25, %v4291_v14  ;;  %vm4315_vm14 = vweird.f32 %v10597_v25 }
 0xdce   : > { %10598 = vrsqrt.f32 %v4292_v63  ;;  %vm4316_vm2 = vmor %vm4314_vm15, %vm4315_vm14  ;;  %vm4324_vm4 = vweird.f32 %v4292_v63 }
 0xdcf   : > { %v4310_v61 = vmul.f32 %v10597_v25, %v4309_v32  ;;  %v4307_v10 = vsel %vm4306_vm13, %v10595_v31, %v4303_v0 }
 0xdd0   : > { %v4378_v11 = vmul.f32 %v4307_v10, %v13503_v58 }
 0xdd1   : > { %v4311_v42 = vmul.f32 0.5, %v4310_v61  ;;  %v4269_v33 = vpop.xlane.xlu0 %4268 }
 0xdd2   : > { %v4285_v37 = vmul.f32 %v4269_v33, %v12904_v47  ;;  %v4389_v56 = vmul.f32 %v13568_v50, %v4378_v11 }
 0xdd3   : > { %v4312_v48 = vsub.f32 1.5, %v4311_v42 }
 0xdd4   : > { %v10599_v24 = vpop.eup %10598  ;;  %v4293_v54 = vadd.f32 1e-05, %v4285_v37  ;;  %v4400_v3 = vadd.f32 %v13573_v57, %v4389_v56 }
 0xdd5   : > { %v4313_v38 = vmul.f32 %v10597_v25, %v4312_v48  ;;  %v4319_v39 = vmul.f32 %v10599_v24, %v4292_v63  ;;  %vm4325_vm3 = vweird.f32 %v10599_v24 }
 0xdd6   : > { %10600 = vrsqrt.f32 %v4293_v54  ;;  %vm4326_vm5 = vmor %vm4324_vm4, %vm4325_vm3  ;;  %vm4334_vm7 = vweird.f32 %v4293_v54 }
 0xdd7   : > { %v4317_v62 = vsel %vm4316_vm2, %v10597_v25, %v4313_v38  ;;  %v4320_v46 = vmul.f32 %v10599_v24, %v4319_v39 }
 0xdd8   : > { %v4379_v51 = vmul.f32 %v4317_v62, %v13513_v1 }
 0xdd9   : > { %v4321_v55 = vmul.f32 0.5, %v4320_v46  ;;  %v4272_v59 = vpop.xlane.xlu1 %4271 }
 0xdda   : > { %v4390_v30 = vmul.f32 %v13568_v50, %v4379_v51  ;;  %v4286_v58 = vmul.f32 %v4272_v59, %v12904_v47 }
 0xddb   : > { %v4322_v40 = vsub.f32 1.5, %v4321_v55 }
 0xddc   : > { %v10601_v21 = vpop.eup %10600  ;;  %v4294_v34 = vadd.f32 1e-05, %v4286_v58  ;;  %v4401_v2 = vadd.f32 %v13573_v57, %v4390_v30 }
 0xddd   : > { %v4323_v26 = vmul.f32 %v10599_v24, %v4322_v40  ;;  %v4329_v7 = vmul.f32 %v10601_v21, %v4293_v54  ;;  %vm4335_vm6 = vweird.f32 %v10601_v21 }
 0xdde   : > { %10602 = vrsqrt.f32 %v4294_v34  ;;  %v4408_v1 = vpack.c.bf16 %v4401_v2, %v4400_v3  ;;  %vm4336_vm8 = vmor %vm4334_vm7, %vm4335_vm6  ;;  %vm4344_vm12 = vweird.f32 %v4294_v34  ;;  %v9939_v2 = vld [vmem:[%s15061_s16 + $0x38] sm:$0xff]  ;;  %s15071_s16 = sld [smem:[#allocation106_spill]] }
 0xddf   : > { %v4330_v22 = vmul.f32 %v10601_v21, %v4329_v7  ;;  %v4327_v20 = vsel %vm4326_vm5, %v10599_v24, %v4323_v26  ;;  %4613 = vmatpush.bf16.msra.mxu1 %v9939_v2  ;;  %v9938_v7 = vld [vmem:[%s15062_s9 + $0x30] sm:$0xff] }
 0xde0   : > { %9374 = vmatmul.msk.bf16.vlgmr.msra.gmra.mxu0 %vm2724_vm1, %v4408_v1  ;;  %v4380_v23 = vmul.f32 %v4327_v20, %v13522_v36 }
 0xde1   : > { %v4331_v15 = vmul.f32 0.5, %v4330_v22  ;;  %v4275_v28 = vpop.xlane.xlu2 %4274 }
 0xde2   : > { %v4287_v12 = vmul.f32 %v4275_v28, %v12904_v47  ;;  %v4391_v13 = vmul.f32 %v13568_v50, %v4380_v23  ;;  %v9937_v28 = vld [vmem:[%s15062_s9 + $0x28] sm:$0xff] }
 0xde3   : > { %v4332_v45 = vsub.f32 1.5, %v4331_v15  ;;  %4614 = vmatpush.bf16.msra.mxu1 %v9938_v7 }
 0xde4   : > { %v10603_v31 = vpop.eup %10602  ;;  %v4295_v14 = vadd.f32 1e-05, %v4287_v12  ;;  %v4402_v32 = vadd.f32 %v13573_v57, %v4391_v13  ;;  %s15072_s18 = smov %s15071_s16 }
 0xde5   : > { %v4333_v16 = vmul.f32 %v10601_v21, %v4332_v45  ;;  %v4339_v19 = vmul.f32 %v10603_v31, %v4294_v34  ;;  %vm4345_vm11 = vweird.f32 %v10603_v31 }
 0xde6   : > { %10604 = vrsqrt.f32 %v4295_v14  ;;  %vm4346_vm13 = vmor %vm4344_vm12, %vm4345_vm11  ;;  %vm4354_vm15 = vweird.f32 %v4295_v14 }
 0xde7   : > { %v4337_v4 = vsel %vm4336_vm8, %v10601_v21, %v4333_v16  ;;  %v4340_v52 = vmul.f32 %v10603_v31, %v4339_v19  ;;  %4615 = vmatpush.bf16.msra.mxu1 %v9937_v28 }
 0xde8   : > { %v4381_v27 = vmul.f32 %v4337_v4, %v13529_v49  ;;  %v9935_v4 = vld [vmem:[%s15062_s9 + $0x18] sm:$0xff] }
 0xde9   : > { %v4341_v29 = vmul.f32 0.5, %v4340_v52 }
 0xdea   : > { %v4392_v25 = vmul.f32 %v13568_v50, %v4381_v27 }
 0xdeb   : > { %v4342_v63 = vsub.f32 1.5, %v4341_v29  ;;  %v9934_v29 = vld [vmem:[%s15062_s9 + $0x10] sm:$0xff] }
 0xdec   : > { %v10605_v0 = vpop.eup %10604  ;;  %v4403_v36 = vadd.f32 %v13573_v57, %v4392_v25 }
 0xded   : > { %v4343_v61 = vmul.f32 %v10603_v31, %v4342_v63  ;;  %v4349_v10 = vmul.f32 %v10605_v0, %v4295_v14  ;;  %vm4355_vm14 = vweird.f32 %v10605_v0  ;;  %v9936_v14 = vld [vmem:[%s15062_s9 + $0x20] sm:$0xff] }
 0xdee   : > { %v4409_v42 = vpack.c.bf16 %v4403_v36, %v4402_v32  ;;  %vm4356_vm2 = vmor %vm4354_vm15, %vm4355_vm14  ;;  %4616 = vmatpush.bf16.msra.mxu1 %v9936_v14  ;;  %v9933_v32 = vld [vmem:[%s15062_s9 + $0x8] sm:$0xff] }
 0xdef   : > { %v4350_v33 = vmul.f32 %v10605_v0, %v4349_v10  ;;  %v4347_v49 = vsel %vm4346_vm13, %v10603_v31, %v4343_v61  ;;  %v9932_v61 = vld [vmem:[%s15062_s9] sm:$0xff] }
 0xdf0   : > { %9375 = vmatmul.msk.bf16.gmra.mxu0 %vm2724_vm1, %v4409_v42  ;;  %v4382_v24 = vmul.f32 %v4347_v49, %v13536_v41  ;;  %v4278_v41 = vpop.xlane.xlu0 %4277 }
 0xdf1   : > { %v4351_v37 = vmul.f32 0.5, %v4350_v33  ;;  %v4288_v55 = vmul.f32 %v4278_v41, %v12904_v47 }
 0xdf2   : > { %v4393_v39 = vmul.f32 %v13568_v50, %v4382_v24  ;;  %4617 = vmatpush.bf16.msra.mxu1 %v9935_v4 }
 0xdf3   : > { %v4352_v48 = vsub.f32 1.5, %v4351_v37  ;;  %v4296_v59 = vadd.f32 1e-05, %v4288_v55 }
 0xdf4   : > { %v4404_v46 = vadd.f32 %v13573_v57, %v4393_v39 }
 0xdf5   : > { %v4353_v11 = vmul.f32 %v10605_v0, %v4352_v48  ;;  %10606 = vrsqrt.f32 %v4296_v59  ;;  %vm4364_vm4 = vweird.f32 %v4296_v59 }
 0xdf6   : > { %4618 = vmatpush.bf16.msra.mxu1 %v9934_v29 }
 0xdf7   : > { %v4357_v54 = vsel %vm4356_vm2, %v10605_v0, %v4353_v11  ;;  %v13609_v0 = vld [vmem:[#allocation11] ss:$0 sm:$0xff] }
 0xdf8   : > { %v4383_v38 = vmul.f32 %v4357_v54, %v13543_v35 }
 0xdfa   : > { %v4394_v62 = vmul.f32 %v13568_v50, %v4383_v38  ;;  %4619 = vmatpush.bf16.msra.mxu1 %v9933_v32 }
 0xdfb   : > { %v10607_v30 = vpop.eup %10606 }
 0xdfc   : > { %v4405_v56 = vadd.f32 %v13573_v57, %v4394_v62  ;;  %v4359_v35 = vmul.f32 %v10607_v30, %v4296_v59  ;;  %vm4365_vm3 = vweird.f32 %v10607_v30 }
 0xdfd   : > { %vm4366_vm5 = vmor %vm4364_vm4, %vm4365_vm3 }
 0xdfe   : > { %v4410_v51 = vpack.c.bf16 %v4405_v56, %v4404_v46  ;;  %v4360_v58 = vmul.f32 %v10607_v30, %v4359_v35  ;;  %4620 = vmatpush.bf16.msra.mxu1 %v9932_v61 }
 0xe00   : > { %9376 = vmatmul.msk.bf16.gmra.mxu0 %vm2724_vm1, %v4410_v51  ;;  %v4361_v3 = vmul.f32 0.5, %v4360_v58 }
 0xe02   : > { %v4362_v26 = vsub.f32 1.5, %v4361_v3 }
 0xe04   : > { %v4363_v22 = vmul.f32 %v10607_v30, %v4362_v26 }
 0xe06   : > { %v4367_v12 = vsel %vm4366_vm5, %v10607_v30, %v4363_v22 }
 0xe07   : > { %v4384_v23 = vmul.f32 %v4367_v12, %v13550_v5 }
 0xe09   : > { %v4395_v27 = vmul.f32 %v13568_v50, %v4384_v23 }
 0xe0b   : > { %v4406_v25 = vadd.f32 %v13573_v57, %v4395_v27 }
 0xe3c   : > { %v4281_v40 = vpop.xlane.xlu1 %4280 }
 0xe3d   : > { %v4289_v21 = vmul.f32 %v4281_v40, %v12904_v47 }
 0xe3f   : > { %v4297_v34 = vadd.f32 1e-05, %v4289_v21 }
 0xe41   : > { %10608 = vrsqrt.f32 %v4297_v34  ;;  %vm4374_vm7 = vweird.f32 %v4297_v34 }
 0xe47   : > { %v10609_v1 = vpop.eup %10608 }
 0xe48   : > { %v4369_v20 = vmul.f32 %v10609_v1, %v4297_v34  ;;  %vm4375_vm6 = vweird.f32 %v10609_v1 }
 0xe49   : > { %vm4376_vm8 = vmor %vm4374_vm7, %vm4375_vm6 }
 0xe4a   : > { %v4370_v15 = vmul.f32 %v10609_v1, %v4369_v20 }
 0xe4c   : > { %v4371_v45 = vmul.f32 0.5, %v4370_v15 }
 0xe4e   : > { %v4372_v31 = vsub.f32 1.5, %v4371_v45 }
 0xe50   : > { %v4373_v16 = vmul.f32 %v10609_v1, %v4372_v31 }
 0xe52   : > { %v4377_v19 = vsel %vm4376_vm8, %v10609_v1, %v4373_v16 }
 0xe53   : > { %v4385_v52 = vmul.f32 %v4377_v19, %v13561_v17 }
 0xe55   : > { %v4396_v13 = vmul.f32 %v13568_v50, %v4385_v52 }
 0xe57   : > { %v4407_v5 = vadd.f32 %v13573_v57, %v4396_v13 }
 0xe59   : > { %v4411_v63 = vpack.c.bf16 %v4407_v5, %v4406_v25 }
 0xe5b   : > { %9377 = vmatmul.msk.bf16.gmra.mxu0 %vm2724_vm1, %v4411_v63 }
 0xe5d   : > { %v4453_v36 = vpop.f32.mrf.mxu0 }
 0xe5e   : > { %v4454_v17 = vadd.f32 %v13609_v0, %v4453_v36 }
 0xe60   : > { %v4473_v10 = vmul.f32 %v4454_v17, %v4454_v17 }
 0xe62   : > { %v4481_v50 = vmul.f32 %v4473_v10, %v4454_v17 }
 0xe64   : > { %v4489_v42 = vmul.f32 0.044715, %v4481_v50 }
 0xe65   : > { %v4455_v33 = vpop.f32.mrf.mxu0 }
 0xe66   : > { %v4497_v49 = vadd.f32 %v4489_v42, %v4454_v17  ;;  %v4456_v57 = vadd.f32 %v13609_v0, %v4455_v33 }
 0xe68   : > { %v4505_v37 = vmul.f32 0.7978846, %v4497_v49  ;;  %v4474_v48 = vmul.f32 %v4456_v57, %v4456_v57 }
 0xe6a   : > { %v4482_v24 = vmul.f32 %v4474_v48, %v4456_v57  ;;  %10610 = vtanh.f32 %v4505_v37 }
 0xe6c   : > { %v4490_v11 = vmul.f32 0.044715, %v4482_v24 }
 0xe6d   : > { %v4458_v54 = vpop.f32.mrf.mxu0 }
 0xe6e   : > { %v4498_v38 = vadd.f32 %v4490_v11, %v4456_v57  ;;  %v4459_v39 = vadd.f32 %v13609_v0, %v4458_v54 }
 0xe70   : > { %v4506_v62 = vmul.f32 0.7978846, %v4498_v38  ;;  %v4475_v46 = vmul.f32 %v4459_v39, %v4459_v39  ;;  %v10611_v56 = vpop.eup %10610 }
 0xe71   : > { %v4521_v59 = vadd.f32 1.0, %v10611_v56 }
 0xe72   : > { %10612 = vtanh.f32 %v4506_v62  ;;  %v4483_v51 = vmul.f32 %v4475_v46, %v4459_v39 }
 0xe73   : > { %v4529_v3 = vmul.f32 0.5, %v4521_v59 }
 0xe74   : > { %v4491_v41 = vmul.f32 0.044715, %v4483_v51 }
 0xe75   : > { %v4460_v55 = vpop.f32.mrf.mxu0  ;;  %v4537_v22 = vmul.f32 %v4529_v3, %v4454_v17 }
 0xe76   : > { %v4461_v30 = vadd.f32 %v13609_v0, %v4460_v55  ;;  %v4499_v35 = vadd.f32 %v4491_v41, %v4459_v39 }
 0xe78   : > { %v10613_v58 = vpop.eup %10612  ;;  %v4476_v40 = vmul.f32 %v4461_v30, %v4461_v30  ;;  %v4507_v21 = vmul.f32 0.7978846, %v4499_v35 }
 0xe79   : > { %v4522_v34 = vadd.f32 1.0, %v10613_v58 }
 0xe7a   : > { %v4484_v2 = vmul.f32 %v4476_v40, %v4461_v30  ;;  %10614 = vtanh.f32 %v4507_v21 }
 0xe7b   : > { %v4530_v26 = vmul.f32 0.5, %v4522_v34 }
 0xe7c   : > { %v4492_v7 = vmul.f32 0.044715, %v4484_v2 }
 0xe7d   : > { %v4463_v1 = vpop.f32.mrf.mxu0  ;;  %v4538_v20 = vmul.f32 %v4530_v26, %v4456_v57 }
 0xe7e   : > { %v4464_v15 = vadd.f32 %v13609_v0, %v4463_v1  ;;  %v4500_v28 = vadd.f32 %v4492_v7, %v4461_v30 }
 0xe7f   : > { %v4545_v12 = vpack.c.bf16 %v4538_v20, %v4537_v22 }
 0xe80   : > { %v4477_v45 = vmul.f32 %v4464_v15, %v4464_v15  ;;  %v4508_v31 = vmul.f32 0.7978846, %v4500_v28  ;;  %v10615_v14 = vpop.eup %10614 }
 0xe81   : > { %4621 = vmatmul.bf16.vlgmr.msra.gmra.mxu1 %v4545_v12  ;;  %v4523_v4 = vadd.f32 1.0, %v10615_v14 }
 0xe82   : > { %v4485_v23 = vmul.f32 %v4477_v45, %v4464_v15  ;;  %10616 = vtanh.f32 %v4508_v31 }
 0xe83   : > { %v4531_v63 = vmul.f32 0.5, %v4523_v4 }
 0xe84   : > { %v4493_v16 = vmul.f32 0.044715, %v4485_v23 }
 0xe85   : > { %v4465_v19 = vpop.f32.mrf.mxu0  ;;  %v4539_v61 = vmul.f32 %v4531_v63, %v4459_v39 }
 0xe86   : > { %v4466_v52 = vadd.f32 %v13609_v0, %v4465_v19  ;;  %v4501_v27 = vadd.f32 %v4493_v16, %v4464_v15  ;;  %v10471_v19 = vld [vmem:[#allocation13] ss:$0 sm:$0xff] }
 0xe88   : > { %v10617_v13 = vpop.eup %10616  ;;  %v4478_v29 = vmul.f32 %v4466_v52, %v4466_v52  ;;  %v4509_v25 = vmul.f32 0.7978846, %v4501_v27 }
 0xe89   : > { %v4524_v5 = vadd.f32 1.0, %v10617_v13 }
 0xe8a   : > { %v4486_v32 = vmul.f32 %v4478_v29, %v4466_v52  ;;  %10618 = vtanh.f32 %v4509_v25 }
 0xe8b   : > { %v4532_v36 = vmul.f32 0.5, %v4524_v5 }
 0xe8c   : > { %v4494_v17 = vmul.f32 0.044715, %v4486_v32 }
 0xe8d   : > { %v4540_v10 = vmul.f32 %v4532_v36, %v4461_v30 }
 0xe8e   : > { %v4502_v50 = vadd.f32 %v4494_v17, %v4466_v52 }
 0xe8f   : > { %v4546_v42 = vpack.c.bf16 %v4540_v10, %v4539_v61 }
 0xe90   : > { %v4510_v33 = vmul.f32 0.7978846, %v4502_v50  ;;  %v10619_v49 = vpop.eup %10618 }
 0xe91   : > { %4626 = vmatmul.bf16.gmra.mxu1 %v4546_v42  ;;  %v4525_v57 = vadd.f32 1.0, %v10619_v49 }
 0xe92   : > { %10620 = vtanh.f32 %v4510_v33 }
 0xe93   : > { %v4533_v24 = vmul.f32 0.5, %v4525_v57 }
 0xe95   : > { %v4541_v54 = vmul.f32 %v4533_v24, %v4464_v15 }
 0xe98   : > { %v10621_v37 = vpop.eup %10620 }
 0xe99   : > { %v4526_v48 = vadd.f32 1.0, %v10621_v37 }
 0xe9b   : > { %v4534_v11 = vmul.f32 0.5, %v4526_v48 }
 0xe9d   : > { %v4542_v38 = vmul.f32 %v4534_v11, %v4466_v52 }
 0xe9f   : > { %v4547_v62 = vpack.c.bf16 %v4542_v38, %v4541_v54 }
 0xea1   : > { %4631 = vmatmul.bf16.gmra.mxu1 %v4547_v62 }
 0xed8   : > { %v4468_v46 = vpop.f32.mrf.mxu0 }
 0xed9   : > { %v4469_v56 = vadd.f32 %v13609_v0, %v4468_v46 }
 0xedb   : > { %v4479_v39 = vmul.f32 %v4469_v56, %v4469_v56 }
 0xedd   : > { %v4487_v51 = vmul.f32 %v4479_v39, %v4469_v56 }
 0xedf   : > { %v4495_v41 = vmul.f32 0.044715, %v4487_v51 }
 0xee0   : > { %v4470_v55 = vpop.f32.mrf.mxu0 }
 0xee1   : > { %v4503_v59 = vadd.f32 %v4495_v41, %v4469_v56  ;;  %v4471_v30 = vadd.f32 %v13609_v0, %v4470_v55 }
 0xee3   : > { %v4480_v35 = vmul.f32 %v4471_v30, %v4471_v30  ;;  %v4511_v58 = vmul.f32 0.7978846, %v4503_v59 }
 0xee5   : > { %v4488_v40 = vmul.f32 %v4480_v35, %v4471_v30  ;;  %10622 = vtanh.f32 %v4511_v58 }
 0xee7   : > { %v4496_v21 = vmul.f32 0.044715, %v4488_v40 }
 0xee9   : > { %v4504_v34 = vadd.f32 %v4496_v21, %v4471_v30 }
 0xeeb   : > { %v4512_v3 = vmul.f32 0.7978846, %v4504_v34  ;;  %v10623_v2 = vpop.eup %10622 }
 0xeec   : > { %v4527_v26 = vadd.f32 1.0, %v10623_v2 }
 0xeed   : > { %10624 = vtanh.f32 %v4512_v3 }
 0xeee   : > { %v4535_v22 = vmul.f32 0.5, %v4527_v26 }
 0xef0   : > { %v4543_v15 = vmul.f32 %v4535_v22, %v4469_v56 }
 0xef3   : > { %v10625_v7 = vpop.eup %10624 }
 0xef4   : > { %v4528_v1 = vadd.f32 1.0, %v10625_v7 }
 0xef6   : > { %v4536_v20 = vmul.f32 0.5, %v4528_v1 }
 0xef8   : > { %v4544_v28 = vmul.f32 %v4536_v20, %v4471_v30 }
 0xefa   : > { %v4548_v12 = vpack.c.bf16 %v4544_v28, %v4543_v15 }
 0xefc   : > { %4636 = vmatmul.bf16.gmra.mxu1 %v4548_v12 }
 0xefe   : > { %v4622_v45 = vpop.f32.mrf.mxu1 }
 0xeff   : > { %v4642_v50 = vadd.f32 %v4622_v45, %v13467_v43 }
 0xf01   : > { %v13649_v33 = vadd.f32 %v10471_v19, %v4642_v50 }
 0xf03   : > { %v4664_v57 = vsel %vm2724_vm1, %v13649_v33, 0.0 }
 0xf06   : > { %v4624_v0 = vpop.f32.mrf.mxu1 }
 0xf0e   : > { %v4627_v31 = vpop.f32.mrf.mxu1 }
 0xf0f   : > { %v4644_v27 = vadd.f32 %v4627_v31, %v13477_v53 }
 0xf11   : > { %v13628_v29 = vadd.f32 %v10471_v19, %v4644_v27 }
 0xf13   : > { %v4670_v25 = vsel %vm2724_vm1, %v13628_v29, 0.0 }
 0xf16   : > { %v4629_v14 = vpop.f32.mrf.mxu1 }
 0xf1e   : > { %v4632_v23 = vpop.f32.mrf.mxu1 }
 0xf1f   : > { %v4646_v42 = vadd.f32 %v4632_v23, %v13487_v8 }
 0xf21   : > { %v13651_v49 = vadd.f32 %v10471_v19, %v4646_v42 }
 0xf23   : > { %v4676_v43 = vsel %vm2724_vm1, %v13651_v49, 0.0 }
 0xf26   : > { %v4634_v16 = vpop.f32.mrf.mxu1 }
 0xf27   : > { %v4647_v4 = vadd.f32 %v4634_v16, %v13492_v9  ;;  %v4645_v9 = vadd.f32 %v4629_v14, %v13482_v44 }
 0xf29   : > { %v13623_v52 = vadd.f32 %v10471_v19, %v4647_v4  ;;  %v13638_v17 = vadd.f32 %v10471_v19, %v4645_v9 }
 0xf2b   : > { %v4679_v13 = vsel %vm2724_vm1, %v13623_v52, 0.0 }
 0xf2c   : > { %4680 = vadd.xlane.f32.xlu1 %v4679_v13 }
 0xf34   : > { %4671 = vadd.xlane.f32.xlu1 %v4670_v25 }
 0xf79   : > { %v4637_v5 = vpop.f32.mrf.mxu1 }
 0xf7a   : > { %v4648_v63 = vadd.f32 %v4637_v5, %v13497_v6  ;;  %v4673_v6 = vsel %vm2724_vm1, %v13638_v17, 0.0 }
 0xf7c   : > { %v13633_v32 = vadd.f32 %v10471_v19, %v4648_v63 }
 0xf7e   : > { %v4682_v53 = vsel %vm2724_vm1, %v13633_v32, 0.0 }
 0xf7f   : > { %4683 = vadd.xlane.f32.xlu0 %v4682_v53 }
 0xf81   : > { %v4639_v36 = vpop.f32.mrf.mxu1 }
 0xf82   : > { %v4649_v61 = vadd.f32 %v4639_v36, %v13510_v18  ;;  %v4643_v18 = vadd.f32 %v4624_v0, %v13472_v60 }
 0xf84   : > { %v13641_v10 = vadd.f32 %v10471_v19, %v4649_v61  ;;  %v13658_v8 = vadd.f32 %v10471_v19, %v4643_v18 }
 0xf86   : > { %v4685_v44 = vsel %vm2724_vm1, %v13641_v10, 0.0  ;;  %v4667_v37 = vsel %vm2724_vm1, %v13658_v8, 0.0 }
 0xf87   : > { %4674 = vadd.xlane.f32.xlu0 %v4673_v6  ;;  %4686 = vadd.xlane.f32.xlu2 %v4685_v44 }
 0xf8f   : > { %4665 = vadd.xlane.f32.xlu0 %v4664_v57  ;;  %4677 = vadd.xlane.f32.xlu2 %v4676_v43 }
 0xf97   : > { %4668 = vadd.xlane.f32.xlu2 %v4667_v37 }
 0xf9f   : > { %v4681_v48 = vpop.xlane.xlu1 %4680 }
 0xfa0   : > { %v4693_v24 = vmul.f32 %v4681_v48, %v12904_v47 }
 0xfa2   : > { %v13664_v11 = vsub.f32 %v13623_v52, %v4693_v24 }
 0xfa4   : > { %v4709_v60 = vmul.f32 %v13664_v11, %v13664_v11 }
 0xfa6   : > { %v4727_v54 = vsel %vm2724_vm1, %v4709_v60, 0.0 }
 0xfa7   : > { %4728 = vadd.xlane.f32.xlu0 %v4727_v54  ;;  %v4672_v38 = vpop.xlane.xlu1 %4671 }
 0xfa8   : > { %v4690_v62 = vmul.f32 %v4672_v38, %v12904_v47 }
 0xfaa   : > { %v13671_v46 = vsub.f32 %v13628_v29, %v4690_v62 }
 0xfac   : > { %v4706_v56 = vmul.f32 %v13671_v46, %v13671_v46 }
 0xfae   : > { %v4718_v39 = vsel %vm2724_vm1, %v4706_v56, 0.0 }
 0xfaf   : > { %4719 = vadd.xlane.f32.xlu0 %v4718_v39 }
 0xff2   : > { %v4684_v51 = vpop.xlane.xlu0 %4683 }
 0xff3   : > { %v4694_v41 = vmul.f32 %v4684_v51, %v12904_v47 }
 0xff5   : > { %v13678_v55 = vsub.f32 %v13633_v32, %v4694_v41 }
 0xff7   : > { %v4710_v59 = vmul.f32 %v13678_v55, %v13678_v55 }
 0xff9   : > { %v4730_v30 = vsel %vm2724_vm1, %v4710_v59, 0.0 }
 0xffa   : > { %v4675_v35 = vpop.xlane.xlu0 %4674  ;;  %4731 = vadd.xlane.f32.xlu2 %v4730_v30  ;;  %v4687_v58 = vpop.xlane.xlu2 %4686 }
 0xffb   : > { %v4691_v40 = vmul.f32 %v4675_v35, %v12904_v47  ;;  %v4695_v21 = vmul.f32 %v4687_v58, %v12904_v47 }
 0xffd   : > { %v13686_v34 = vsub.f32 %v13638_v17, %v4691_v40  ;;  %v13689_v3 = vsub.f32 %v13641_v10, %v4695_v21 }
 0xfff   : > { %v4707_v2 = vmul.f32 %v13686_v34, %v13686_v34  ;;  %v4711_v26 = vmul.f32 %v13689_v3, %v13689_v3 }
0x1001   : > { %v4721_v7 = vsel %vm2724_vm1, %v4707_v2, 0.0  ;;  %v4733_v1 = vsel %vm2724_vm1, %v4711_v26, 0.0 }
0x1002   : > { %v4666_v22 = vpop.xlane.xlu0 %4665  ;;  %4722 = vadd.xlane.f32.xlu2 %v4721_v7  ;;  %4734 = vadd.xlane.f32.xlu1 %v4733_v1  ;;  %v4678_v20 = vpop.xlane.xlu2 %4677 }
0x1003   : > { %v4688_v15 = vmul.f32 %v4666_v22, %v12904_v47  ;;  %v4692_v28 = vmul.f32 %v4678_v20, %v12904_v47 }
0x1005   : > { %v13700_v12 = vsub.f32 %v13649_v33, %v4688_v15  ;;  %v13703_v45 = vsub.f32 %v13651_v49, %v4692_v28 }
0x1007   : > { %v4704_v0 = vmul.f32 %v13700_v12, %v13700_v12  ;;  %v4708_v31 = vmul.f32 %v13703_v45, %v13703_v45 }
0x1009   : > { %v4712_v14 = vsel %vm2724_vm1, %v4704_v0, 0.0  ;;  %v4724_v23 = vsel %vm2724_vm1, %v4708_v31, 0.0 }
0x100a   : > { %4713 = vadd.xlane.f32.xlu2 %v4712_v14  ;;  %4725 = vadd.xlane.f32.xlu1 %v4724_v23  ;;  %v4669_v16 = vpop.xlane.xlu2 %4668 }
0x100b   : > { %v4689_v19 = vmul.f32 %v4669_v16, %v12904_v47 }
0x100d   : > { %v13713_v4 = vsub.f32 %v13658_v8, %v4689_v19 }
0x100f   : > { %v4705_v27 = vmul.f32 %v13713_v4, %v13713_v4 }
0x1011   : > { %v4715_v13 = vsel %vm2724_vm1, %v4705_v27, 0.0 }
0x1012   : > { %4716 = vadd.xlane.f32.xlu1 %v4715_v13 }
0x101a   : > { %v4729_v25 = vpop.xlane.xlu0 %4728 }
0x101b   : > { %v4741_v5 = vmul.f32 %v4729_v25, %v12904_v47 }
0x101d   : > { %v4749_v63 = vadd.f32 1e-05, %v4741_v5 }
0x101f   : > { %10626 = vrsqrt.f32 %v4749_v63  ;;  %vm4808_vm14 = vweird.f32 %v4749_v63 }
0x1022   : > { %v4720_v9 = vpop.xlane.xlu0 %4719 }
0x1023   : > { %v4738_v53 = vmul.f32 %v4720_v9, %v12904_v47 }
0x1025   : > { %v13721_v50 = vadd.f32 1e-05, %v4738_v53  ;;  %v13723_v6 = vpop.eup %10626 }
0x1026   : > { %v4803_v44 = vmul.f32 %v13723_v6, %v4749_v63  ;;  %vm4809_vm12 = vweird.f32 %v13723_v6 }
0x1027   : > { %vm13760_vm2 = vmor %vm4808_vm14, %vm4809_vm12  ;;  %vm4778_vm12 = vweird.f32 %v13721_v50 }
0x1028   : > { %v4804_v54 = vmul.f32 %v13723_v6, %v4803_v44 }
0x102a   : > { %v4805_v39 = vmul.f32 0.5, %v4804_v54 }
0x102c   : > { %v4806_v1 = vsub.f32 1.5, %v4805_v39 }
0x102e   : > { %v4807_v14 = vmul.f32 %v13723_v6, %v4806_v1 }
0x106d   : > { %v4732_v36 = vpop.xlane.xlu2 %4731 }
0x106e   : > { %v4742_v61 = vmul.f32 %v4732_v36, %v12904_v47 }
0x1070   : > { %v4750_v42 = vadd.f32 1e-05, %v4742_v61 }
0x1072   : > { %10628 = vrsqrt.f32 %v4750_v42  ;;  %vm4818_vm13 = vweird.f32 %v4750_v42 }
0x1073   : > { %10630 = vrsqrt.f32 %v13721_v50 }
0x1075   : > { %v4723_v18 = vpop.xlane.xlu2 %4722  ;;  %v4735_v57 = vpop.xlane.xlu1 %4734 }
0x1076   : > { %v4739_v43 = vmul.f32 %v4723_v18, %v12904_v47  ;;  %v4743_v37 = vmul.f32 %v4735_v57, %v12904_v47  ;;  %v4811_v57 = vsel %vm13760_vm2, %v13723_v6, %v4807_v14 }
0x1077   : > { %v4837_v6 = vmul.f32 %v4811_v57, %v13664_v11  ;;  %v4863_v57 = vld [vmem:[%s15072_s18 + $0x8] sm:$0xff] }
0x1078   : > { %v10629_v48 = vpop.eup %10628  ;;  %v13729_v24 = vadd.f32 1e-05, %v4739_v43  ;;  %v4751_v60 = vadd.f32 1e-05, %v4743_v37 }
0x1079   : > { %v4813_v38 = vmul.f32 %v10629_v48, %v4750_v42  ;;  %v13732_v62 = vpop.eup %10630  ;;  %vm4819_vm11 = vweird.f32 %v10629_v48 }
0x107a   : > { %10632 = vrsqrt.f32 %v13729_v24  ;;  %v4773_v51 = vmul.f32 %v13732_v62, %v13721_v50  ;;  %vm13754_vm15 = vmor %vm4818_vm13, %vm4819_vm11  ;;  %vm4828_vm4 = vweird.f32 %v4751_v60  ;;  %vm4788_vm7 = vweird.f32 %v13729_v24 }
0x107b   : > { %v4814_v56 = vmul.f32 %v10629_v48, %v4813_v38  ;;  %10634 = vrsqrt.f32 %v4751_v60  ;;  %vm4779_vm8 = vweird.f32 %v13732_v62 }
0x107c   : > { %v4774_v22 = vmul.f32 %v13732_v62, %v4773_v51  ;;  %v10472_v51 = vld [vmem:[#allocation28] ss:$0 sm:$0xff]  ;;  %vm13792_vm14 = vmor %vm4778_vm12, %vm4779_vm8 }
0x107d   : > { %v4815_v41 = vmul.f32 0.5, %v4814_v56  ;;  %v4714_v59 = vpop.xlane.xlu2 %4713  ;;  %v4726_v30 = vpop.xlane.xlu1 %4725  ;;  %v4848_v1 = vmul.f32 %v10472_v51, %v4837_v6 }
0x107e   : > { %v4736_v35 = vmul.f32 %v4714_v59, %v12904_v47  ;;  %v4740_v58 = vmul.f32 %v4726_v30, %v12904_v47  ;;  %v4775_v23 = vmul.f32 0.5, %v4774_v22 }
0x107f   : > { %v4816_v21 = vsub.f32 1.5, %v4815_v41 }
0x1080   : > { %v13739_v40 = vpop.eup %10632  ;;  %v13741_v2 = vadd.f32 1e-05, %v4736_v35  ;;  %v13743_v26 = vadd.f32 1e-05, %v4740_v58  ;;  %v4776_v63 = vsub.f32 1.5, %v4775_v23 }
0x1081   : > { %v10635_v7 = vpop.eup %10634  ;;  %v4783_v20 = vmul.f32 %v13739_v40, %v13729_v24  ;;  %v4817_v0 = vmul.f32 %v10629_v48, %v4816_v21  ;;  %vm4789_vm5 = vweird.f32 %v13739_v40  ;;  %v10473_v21 = vld [vmem:[#allocation26] ss:$0 sm:$0xff] }
0x1082   : > { %v4823_v15 = vmul.f32 %v10635_v7, %v4751_v60  ;;  %10636 = vrsqrt.f32 %v13741_v2  ;;  %vm4829_vm3 = vweird.f32 %v10635_v7  ;;  %v4777_v59 = vmul.f32 %v13732_v62, %v4776_v63  ;;  %vm13784_vm11 = vmor %vm4788_vm7, %vm4789_vm5 }
0x1083   : > { %v4784_v28 = vmul.f32 %v13739_v40, %v4783_v20  ;;  %10638 = vrsqrt.f32 %v13743_v26  ;;  %v4821_v42 = vsel %vm13754_vm15, %v10629_v48, %v4817_v0  ;;  %vm4830_vm6 = vmor %vm4828_vm4, %vm4829_vm3  ;;  %vm4798_vm15 = vweird.f32 %v13743_v26 }
0x1084   : > { %v4824_v31 = vmul.f32 %v10635_v7, %v4823_v15  ;;  %v4838_v38 = vmul.f32 %v4821_v42, %v13678_v55  ;;  %v4859_v23 = vadd.f32 %v10473_v21, %v4848_v1  ;;  %vm4758_vm4 = vweird.f32 %v13741_v2 }
0x1085   : > { %v4785_v16 = vmul.f32 0.5, %v4784_v28  ;;  %v4717_v19 = vpop.xlane.xlu1 %4716 }
0x1086   : > { %v4825_v27 = vmul.f32 0.5, %v4824_v31  ;;  %v4737_v13 = vmul.f32 %v4717_v19, %v12904_v47 }
0x1087   : > { %v4786_v5 = vsub.f32 1.5, %v4785_v16 }
0x1088   : > { %v13758_v9 = vpop.eup %10636  ;;  %v4826_v36 = vsub.f32 1.5, %v4825_v27  ;;  %v13764_v61 = vadd.f32 1e-05, %v4737_v13 }
0x1089   : > { %v10639_v44 = vpop.eup %10638  ;;  %v4753_v18 = vmul.f32 %v13758_v9, %v13741_v2  ;;  %v4787_v54 = vmul.f32 %v13739_v40, %v4786_v5  ;;  %vm4759_vm2 = vweird.f32 %v13758_v9 }
0x108a   : > { %v4827_v43 = vmul.f32 %v10635_v7, %v4826_v36  ;;  %v4793_v37 = vmul.f32 %v10639_v44, %v13743_v26  ;;  %10640 = vrsqrt.f32 %v13764_v61  ;;  %vm4799_vm13 = vweird.f32 %v10639_v44  ;;  %vm4760_vm5 = vmor %vm4758_vm4, %vm4759_vm2 }
0x108b   : > { %v4754_v48 = vmul.f32 %v13758_v9, %v4753_v18  ;;  %v4791_v11 = vsel %vm13784_vm11, %v13739_v40, %v4787_v54  ;;  %v4781_v40 = vsel %vm13792_vm14, %v13732_v62, %v4777_v59  ;;  %vm4800_vm3 = vmor %vm4798_vm15, %vm4799_vm13  ;;  %vm4768_vm7 = vweird.f32 %v13764_v61  ;;  %v4867_v54 = vld [vmem:[%s15072_s18 + $0x28] sm:$0xff] }
0x108c   : > { %v4831_v56 = vsel %vm4830_vm6, %v10635_v7, %v4827_v43  ;;  %v4794_v39 = vmul.f32 %v10639_v44, %v4793_v37  ;;  %v4849_v7 = vmul.f32 %v10472_v51, %v4838_v38  ;;  %v4835_v0 = vmul.f32 %v4791_v11, %v13686_v34  ;;  %v4865_v43 = vld [vmem:[%s15072_s18 + $0x18] sm:$0xff]  ;;  %v4866_v37 = vld [vmem:[%s15072_s18 + $0x20] sm:$0xff] }
0x108d   : > { %v4839_v60 = vmul.f32 %v4831_v56, %v13689_v3  ;;  %v4755_v41 = vmul.f32 0.5, %v4754_v48  ;;  %v4834_v26 = vmul.f32 %v4781_v40, %v13671_v46  ;;  %v4868_v48 = vld [vmem:[%s15072_s18 + $0x30] sm:$0xff]  ;;  %v4869_v38 = vld [vmem:[%s15072_s18 + $0x38] sm:$0xff]  ;;  %v9941_v56 = vld [vmem:[%s15073_s0 + $0x8] sm:$0xff]  ;;  %s15075_s0 = smov 96  }
0x108e   : > { %v4795_v35 = vmul.f32 0.5, %v4794_v39  ;;  %v4860_v14 = vadd.f32 %v10473_v21, %v4849_v7  ;;  %v4846_v62 = vmul.f32 %v10472_v51, %v4835_v0  ;;  %4977 = vmatpush.bf16.msra.mxu3 %v9941_v56  ;;  %v9940_v39 = vld [vmem:[%s15074_s1] sm:$0xff]  ;;  %s15077_s1 = smov 112  }
0x108f   : > { %v4756_v55 = vsub.f32 1.5, %v4755_v41  ;;  %v4850_v58 = vmul.f32 %v10472_v51, %v4839_v60  ;;  %v4845_v2 = vmul.f32 %v10472_v51, %v4834_v26 }
0x1090   : > { %v10641_v24 = vpop.eup %10640  ;;  %v4796_v3 = vsub.f32 1.5, %v4795_v35  ;;  %v4857_v46 = vadd.f32 %v10473_v21, %v4846_v62 }
0x1091   : > { %v4763_v20 = vmul.f32 %v10641_v24, %v13764_v61  ;;  %v4861_v15 = vadd.f32 %v10473_v21, %v4850_v58  ;;  %v4757_v50 = vmul.f32 %v13758_v9, %v4756_v55  ;;  %vm4769_vm6 = vweird.f32 %v10641_v24 }
0x1092   : > { %v4797_v28 = vmul.f32 %v10639_v44, %v4796_v3  ;;  %vm4770_vm8 = vmor %vm4768_vm7, %vm4769_vm6  ;;  %4978 = vmatpush.bf16.msra.mxu3 %v9940_v39 }
0x1093   : > { %v4764_v31 = vmul.f32 %v10641_v24, %v4763_v20  ;;  %4902 = vmatpush.msra.mxu2 %v4861_v15  ;;  %v4761_v25 = vsel %vm4760_vm5, %v13758_v9, %v4757_v50 }
0x1094   : > { %v4801_v16 = vsel %vm4800_vm3, %v10639_v44, %v4797_v28  ;;  %v4832_v36 = vmul.f32 %v4761_v25, %v13700_v12  ;;  %v4856_v44 = vadd.f32 %v10473_v21, %v4845_v2  ;;  %v4862_v12 = vld [vmem:[%s15071_s16] sm:$0xff]  ;;  %s15076_s16 = smov 80  }
0x1095   : > { %v4765_v19 = vmul.f32 0.5, %v4764_v31  ;;  %4903 = vmatpush.msra.mxu2 %v4860_v14  ;;  %v4836_v34 = vmul.f32 %v4801_v16, %v13703_v45 }
0x1096   : > { %v4843_v63 = vmul.f32 %v10472_v51, %v4832_v36 }
0x1097   : > { %v4766_v27 = vsub.f32 1.5, %v4765_v19  ;;  %4904 = vmatpush.msra.mxu2 %v4859_v23  ;;  %v4847_v13 = vmul.f32 %v10472_v51, %v4836_v34 }
0x1098   : > { %v4854_v18 = vadd.f32 %v10473_v21, %v4843_v63 }
0x1099   : > { %v4767_v5 = vmul.f32 %v10641_v24, %v4766_v27  ;;  %v4858_v53 = vadd.f32 %v10473_v21, %v4847_v13 }
0x109b   : > { %4905 = vmatpush.msra.mxu2 %v4858_v53  ;;  %v4771_v45 = vsel %vm4770_vm8, %v10641_v24, %v4767_v5  ;;  %v10474_v24 = vld [vmem:[#allocation22] ss:$0 sm:$0xff] }
0x109c   : > { %v4833_v42 = vmul.f32 %v4771_v45, %v13713_v4  ;;  %v4864_v4 = vld [vmem:[%s15072_s18 + $0x10] sm:$0xff] }
0x109d   : > { %4906 = vmatpush.msra.mxu2 %v4857_v46 }
0x109e   : > { %v4844_v9 = vmul.f32 %v10472_v51, %v4833_v42 }
0x109f   : > { %4907 = vmatpush.msra.mxu2 %v4856_v44 }
0x10a0   : > { %v4855_v61 = vadd.f32 %v10473_v21, %v4844_v9 }
0x10a2   : > { %4908 = vmatpush.msra.mxu2 %v4855_v61 }
0x10a4   : > { %4909 = vmatpush.msra.mxu2 %v4854_v18 }
0x10a5   : > { %9410 = vmatmul.msk.f32.vlgmr.msra.gmra.mxu2 %vm3138_vm9, %v4862_v12 }
0x10ad   : > { %9411 = vmatmul.msk.f32.gmra.mxu2 %vm3138_vm9, %v4863_v57 }
0x10b5   : > { %9412 = vmatmul.msk.f32.gmra.mxu2 %vm3138_vm9, %v4864_v4 }
0x10bd   : > { %9413 = vmatmul.msk.f32.gmra.mxu2 %vm3138_vm9, %v4865_v43 }
0x10c5   : > { %9414 = vmatmul.msk.f32.gmra.mxu2 %vm3138_vm9, %v4866_v37 }
0x10cd   : > { %9415 = vmatmul.msk.f32.gmra.mxu2 %vm3138_vm9, %v4867_v54 }
0x10d5   : > { %9416 = vmatmul.msk.f32.gmra.mxu2 %vm3138_vm9, %v4868_v48 }
0x10dd   : > { %9417 = vmatmul.msk.f32.gmra.mxu2 %vm3138_vm9, %v4869_v38 }
0x1128   : > { %v4911_v51 = vpop.f32.mrf.mxu2 }
0x1130   : > { %v4914_v6 = vpop.f32.mrf.mxu2 }
0x1131   : > { %v4935_v60 = vpack.c.bf16 %v4914_v6, %v4911_v51 }
0x1133   : > { %9426 = vmatmul.msk.bf16.vlgmr.msra.gmra.mxu3 %vm2724_vm1, %v4935_v60 }
0x1138   : > { %v4917_v41 = vpop.f32.mrf.mxu2 }
0x1140   : > { %v4920_v59 = vpop.f32.mrf.mxu2 }
0x1141   : > { %v4936_v30 = vpack.c.bf16 %v4920_v59, %v4917_v41 }
0x1143   : > { %9427 = vmatmul.msk.bf16.gmra.mxu3 %vm2724_vm1, %v4936_v30 }
0x1148   : > { %v4923_v35 = vpop.f32.mrf.mxu2 }
0x1150   : > { %v4926_v55 = vpop.f32.mrf.mxu2 }
0x1151   : > { %v4937_v58 = vpack.c.bf16 %v4926_v55, %v4923_v35 }
0x1153   : > { %9428 = vmatmul.msk.bf16.gmra.mxu3 %vm2724_vm1, %v4937_v58 }
0x1158   : > { %v4929_v21 = vpop.f32.mrf.mxu2 }
0x1160   : > { %v4932_v7 = vpop.f32.mrf.mxu2 }
0x1161   : > { %v4938_v11 = vpack.c.bf16 %v4932_v7, %v4929_v21 }
0x1163   : > { %9429 = vmatmul.msk.bf16.gmra.mxu3 %vm2724_vm1, %v4938_v11 }
0x11b6   : > { %v4980_v3 = vpop.f32.mrf.mxu3 }
0x11b7   : > { %v4981_v1 = vadd.f32 %v10474_v24, %v4980_v3 }
0x11b9   : > { %5022 = vrot.lane.b32.xlu1 %v4981_v1, %s15075_s0  ;;  %v5280_v62 = vpack.c.bf16 %v4981_v1, %v4981_v1  ;;  %v5012_v42 = vmul.f32 0.25, %v4981_v1 }
0x11bb   : > { %v5295_v13 = vunpack.c.l.b16 %v5280_v62 }
0x11be   : > { %v4982_v22 = vpop.f32.mrf.mxu3 }
0x11bf   : > { %v4983_v20 = vadd.f32 %v10474_v24, %v4982_v22 }
0x11c1   : > { %5024 = vrot.lane.b32.xlu0 %v4983_v20, %s15075_s0  ;;  %v5013_v34 = vmul.f32 0.25, %v4983_v20  ;;  %v5281_v26 = vpack.c.bf16 %v4983_v20, %v4983_v20 }
0x11c3   : > { %v5296_v27 = vunpack.c.l.b16 %v5281_v26  ;;  %v5001_v26 = vld [vmem:[%s15079_s3 + $0x8] sm:$0xff] }
0x11c5   : > { %v13853_v53 = vpack.c.b16 %v5296_v27, %v5295_v13  ;;  %v13933_v27 = vld [vmem:[%s15080_s4 + $0x8] sm:$0xff] }
0x11c6   : > { %v4985_v15 = vpop.f32.mrf.mxu3 }
0x11c7   : > { %v4986_v28 = vadd.f32 %v10474_v24, %v4985_v15 }
0x11c9   : > { %5061 = vrot.lane.b32.xlu0 %v4986_v28, %s15075_s0  ;;  %v5282_v36 = vpack.c.bf16 %v4986_v28, %v4986_v28  ;;  %v5014_v38 = vmul.f32 0.25, %v4986_v28 }
0x11cb   : > { %v5325_v45 = vunpack.c.l.b16 %v5282_v36  ;;  %v13938_v36 = vld [vmem:[%s15080_s4 + $0x10] sm:$0xff] }
0x11ce   : > { %v4987_v0 = vpop.f32.mrf.mxu3 }
0x11cf   : > { %v4988_v40 = vadd.f32 %v10474_v24, %v4987_v0 }
0x11d1   : > { %5063 = vrot.lane.b32.xlu2 %v4988_v40, %s15075_s0  ;;  %v5283_v2 = vpack.c.bf16 %v4988_v40, %v4988_v40  ;;  %v5015_v12 = vmul.f32 0.25, %v4988_v40 }
0x11d3   : > { %v5326_v46 = vunpack.c.l.b16 %v5283_v2 }
0x11d5   : > { %v13864_v63 = vpack.c.b16 %v5326_v46, %v5325_v45 }
0x11d6   : > { %v4990_v50 = vpop.f32.mrf.mxu3 }
0x11d7   : > { %v13837_v31 = vadd.f32 %v10474_v24, %v4990_v50  ;;  %v13927_v50 = vld [vmem:[%s15080_s4] sm:$0xff] }
0x11d9   : > { %5100 = vrot.lane.b32.xlu2 %v13837_v31, %s15075_s0  ;;  %v5284_v44 = vpack.c.bf16 %v13837_v31, %v13837_v31  ;;  %v13899_v55 = vmul.f32 0.25, %v13837_v31 }
0x11db   : > { %v5355_v61 = vunpack.c.l.b16 %v5284_v44 }
0x11de   : > { %v4992_v14 = vpop.f32.mrf.mxu3 }
0x11df   : > { %v13841_v23 = vadd.f32 %v10474_v24, %v4992_v14 }
0x11e1   : > { %5102 = vrot.lane.b32.xlu0 %v13841_v23, %s15075_s0  ;;  %5414 = vrot.lane.b32.xlu2 %v4983_v20, %s15076_s16  ;;  %v5285_v9 = vpack.c.bf16 %v13841_v23, %v13841_v23  ;;  %v13904_v21 = vmul.f32 0.25, %v13841_v23 }
0x11e3   : > { %v5356_v18 = vunpack.c.l.b16 %v5285_v9 }
0x11e5   : > { %v13874_v43 = vpack.c.b16 %v5356_v18, %v5355_v61  ;;  %v13943_v61 = vld [vmem:[%s15080_s4 + $0x18] sm:$0xff] }
0x11e6   : > { %v4995_v16 = vpop.f32.mrf.mxu3 }
0x11e7   : > { %v13846_v19 = vadd.f32 %v10474_v24, %v4995_v16 }
0x11e9   : > { %5410 = vrot.lane.b32.xlu2 %v5013_v34, %s15077_s1  ;;  %5139 = vrot.lane.b32.xlu0 %v13846_v19, %s15075_s0  ;;  %v5286_v57 = vpack.c.bf16 %v13846_v19, %v13846_v19 }
0x11eb   : > { %v5385_v37 = vunpack.c.l.b16 %v5286_v57 }
0x11ee   : > { %v4997_v25 = vpop.f32.mrf.mxu3 }
0x11ef   : > { %v13851_v5 = vadd.f32 %v10474_v24, %v4997_v25  ;;  %v13912_v24 = vmul.f32 0.25, %v13846_v19 }
0x11f1   : > { %5298 = vrot.lane.b32.xlu2 %v13853_v53, %s15078_s2  ;;  %5141 = vrot.lane.b32.xlu1 %v13851_v5, %s15075_s0  ;;  %v5287_v4 = vpack.c.bf16 %v13851_v5, %v13851_v5  ;;  %v13918_v22 = vmul.f32 0.25, %v13851_v5 }
0x11f2   : > { %5412 = vrot.lane.b32.xlu0 %v4981_v1, %s15076_s16 }
0x11f3   : > { %v5386_v54 = vunpack.c.l.b16 %v5287_v4 }
0x11f5   : > { %v13880_v48 = vpack.c.b16 %v5386_v54, %v5385_v37  ;;  %v13948_v37 = vld [vmem:[%s15080_s4 + $0x20] sm:$0xff] }
0x11f9   : > { %5451 = vrot.lane.b32.xlu2 %v4986_v28, %s15076_s16  ;;  %5408 = vrot.lane.b32.xlu1 %v5012_v42, %s15077_s1 }
0x11fa   : > { %5328 = vrot.lane.b32.xlu0 %v13864_v63, %s15078_s2 }
0x1201   : > { %5449 = vrot.lane.b32.xlu2 %v5015_v12, %s15077_s1  ;;  %5453 = vrot.lane.b32.xlu1 %v4988_v40, %s15076_s16  ;;  %v5000_v40 = vld [vmem:[%s15079_s3] sm:$0xff] }
0x1202   : > { %5358 = vrot.lane.b32.xlu0 %v13874_v43, %s15078_s2 }
0x1209   : > { %5388 = vrot.lane.b32.xlu1 %v13880_v48, %s15078_s2 }
0x120a   : > { %5447 = vrot.lane.b32.xlu0 %v5014_v38, %s15077_s1 }
0x1212   : > { %5492 = vrot.lane.b32.xlu0 %v13841_v23, %s15076_s16 }
0x122b   : > { %v5064_v56 = vpop.permute.xlu2 %5063  ;;  %v5023_v6 = vpop.permute.xlu1 %5022 }
0x1233   : > { %v5025_v39 = vpop.permute.xlu0 %5024  ;;  %v5101_v51 = vpop.permute.xlu2 %5100 }
0x1234   : > { %9430 = vmatpush.xpose.msk.msrb.mxu0 %vm3287_vm10, %v5025_v39 }
0x1238   : > { %9431 = vmatpush.xpose.msk.msrb.mxu0 %vm3287_vm10, %v5023_v6 }
0x123b   : > { %9432 = vmatmul.msk.f32.vlgmr.msrb.gmra.mxu0 %vm3287_vm10, %v5012_v42  ;;  %v5415_v60 = vpop.permute.xlu2 %5414  ;;  %v5062_v41 = vpop.permute.xlu0 %5061 }
0x123c   : > { %9434 = vmatpush.xpose.msk.msra.mxu0 %vm3287_vm10, %v5064_v56  ;;  %9450 = vmatpush.xpose.msk.msrb.mxu3 %vm3287_vm10, %v5415_v60 }
0x1240   : > { %9435 = vmatpush.xpose.msk.msra.mxu0 %vm3287_vm10, %v5062_v41 }
0x1243   : > { %9433 = vmatmul.msk.f32.gmra.mxu0 %vm3287_vm10, %v5013_v34  ;;  %v5411_v59 = vpop.permute.xlu2 %5410 }
0x124b   : > { %9436 = vmatmul.msk.f32.vlgmr.msra.gmra.mxu0 %vm3287_vm10, %v5014_v38  ;;  %v5299_v35 = vpop.permute.xlu2 %5298 }
0x1253   : > { %9437 = vmatmul.msk.f32.gmra.mxu0 %vm3287_vm10, %v5015_v12  ;;  %v5103_v30 = vpop.permute.xlu0 %5102  ;;  %v5452_v28 = vpop.permute.xlu2 %5451 }
0x1254   : > { %9438 = vmatpush.xpose.msk.msrb.mxu1 %vm3287_vm10, %v5103_v30 }
0x1258   : > { %9439 = vmatpush.xpose.msk.msrb.mxu1 %vm3287_vm10, %v5101_v51  ;;  %v13953_v51 = vld [vmem:[%s15080_s4 + $0x28] sm:$0xff] }
0x125b   : > { %9440 = vmatmul.msk.f32.vlgmr.msrb.gmra.mxu1 %vm3287_vm10, %v13899_v55  ;;  %v5140_v58 = vpop.permute.xlu0 %5139 }
0x125c   : > { %5311 = vmatpush.bf16.msra.mxu1 %v5299_v35 }
0x1263   : > { %9441 = vmatmul.msk.f32.gmra.mxu1 %vm3287_vm10, %v13904_v21  ;;  %v5142_v7 = vpop.permute.xlu1 %5141 }
0x1264   : > { %v5413_v11 = vpop.permute.xlu0 %5412  ;;  %9442 = vmatpush.xpose.msk.msrb.mxu0 %vm3287_vm10, %v5142_v7 }
0x1265   : > { %9451 = vmatpush.xpose.msk.msrb.mxu3 %vm3287_vm10, %v5413_v11 }
0x1268   : > { %9443 = vmatpush.xpose.msk.msrb.mxu0 %vm3287_vm10, %v5140_v58 }
0x126b   : > { %v5409_v3 = vpop.permute.xlu1 %5408  ;;  %9444 = vmatmul.msk.f32.vlgmr.msrb.gmra.mxu0 %vm3287_vm10, %v13912_v24 }
0x126c   : > { %v5329_v1 = vpop.permute.xlu0 %5328  ;;  %9452 = vmatmul.msk.f32.vlgmr.msrb.gmra.mxu3 %vm3287_vm10, %v5409_v3  ;;  %v13966_v3 = vld [vmem:[%s15080_s4 + $0x38] sm:$0xff] }
0x126d   : > { %5341 = vmatpush.bf16.msra.mxu0 %v5329_v1 }
0x1273   : > { %v5454_v20 = vpop.permute.xlu1 %5453  ;;  %9445 = vmatmul.msk.f32.gmra.mxu0 %vm3287_vm10, %v13918_v22 }
0x1274   : > { %v5359_v15 = vpop.permute.xlu0 %5358  ;;  %9453 = vmatmul.msk.f32.gmra.mxu3 %vm3287_vm10, %v5411_v59  ;;  %9454 = vmatpush.xpose.msk.msrb.mxu0 %vm3287_vm10, %v5454_v20  ;;  %v13958_v59 = vld [vmem:[%s15080_s4 + $0x30] sm:$0xff]  ;;  %s15082_s4 = sld [smem:[#allocation109_spill]] }
0x1275   : > { %5371 = vmatpush.bf16.msrb.mxu1 %v5359_v15 }
0x1278   : > { %9455 = vmatpush.xpose.msk.msrb.mxu0 %vm3287_vm10, %v5452_v28  ;;  %v13974_v28 = vpop.permute.xlu2 %5449 }
0x127b   : > { %v5389_v0 = vpop.permute.xlu1 %5388 }
0x127c   : > { %5401 = vmatpush.bf16.msrb.mxu2 %v5389_v0  ;;  %v13976_v0 = vpop.permute.xlu0 %5447 }
0x12b8   : > { %v5053_v14 = vpop.f32.mrf.mxu0 }
0x12b9   : > { %v5054_v23 = vadd.f32 %v5053_v14, %v5000_v40 }
0x12bb   : > { %v5176_v16 = vadd.f32 %v5054_v23, %v13927_v50 }
0x12bd   : > { %v5184_v34 = vsel %vm3287_vm10, %v5176_v16, -inf }
0x12be   : > { %5185 = vmax.xlane.f32.xlu2 %v5184_v34  ;;  %v13978_v34 = vpop.permute.xlu0 %5492 }
0x12c0   : > { %v5056_v62 = vpop.f32.mrf.mxu0 }
0x12c1   : > { %v5057_v13 = vadd.f32 %v5056_v62, %v5001_v26 }
0x12c3   : > { %v5177_v25 = vadd.f32 %v5057_v13, %v13933_v27 }
0x12c5   : > { %v5187_v2 = vsel %vm3287_vm10, %v5177_v25, -inf }
0x12c6   : > { %5188 = vmax.xlane.f32.xlu1 %v5187_v2 }
0x12c8   : > { %v5092_v46 = vpop.f32.mrf.mxu0 }
0x12c9   : > { %v5093_v45 = vadd.f32 %v5092_v46, %v5000_v40 }
0x12cb   : > { %v5178_v42 = vadd.f32 %v5093_v45, %v13938_v36 }
0x12cd   : > { %v5190_v44 = vsel %vm3287_vm10, %v5178_v42, -inf }
0x12ce   : > { %5191 = vmax.xlane.f32.xlu0 %v5190_v44 }
0x12d0   : > { %v5095_v9 = vpop.f32.mrf.mxu0 }
0x12d1   : > { %v5096_v18 = vadd.f32 %v5095_v9, %v5001_v26 }
0x12d3   : > { %v5179_v12 = vadd.f32 %v5096_v18, %v13943_v61 }
0x12d5   : > { %v5193_v57 = vsel %vm3287_vm10, %v5179_v12, -inf }
0x12d6   : > { %5194 = vmax.xlane.f32.xlu2 %v5193_v57 }
0x12d8   : > { %v5131_v4 = vpop.f32.mrf.mxu1 }
0x12d9   : > { %v5132_v54 = vadd.f32 %v5131_v4, %v5000_v40 }
0x12db   : > { %v5180_v38 = vadd.f32 %v5132_v54, %v13948_v37 }
0x12dd   : > { %v5196_v56 = vsel %vm3287_vm10, %v5180_v38, -inf }
0x12de   : > { %5197 = vmax.xlane.f32.xlu1 %v5196_v56 }
0x12e0   : > { %v5134_v39 = vpop.f32.mrf.mxu1 }
0x12e1   : > { %v5135_v6 = vadd.f32 %v5134_v39, %v5001_v26 }
0x12e3   : > { %v5181_v60 = vadd.f32 %v5135_v6, %v13953_v51 }
0x12e5   : > { %v5199_v41 = vsel %vm3287_vm10, %v5181_v60, -inf }
0x12e6   : > { %5200 = vmax.xlane.f32.xlu2 %v5199_v41 }
0x12e8   : > { %v5170_v30 = vpop.f32.mrf.mxu0 }
0x12e9   : > { %v5171_v35 = vadd.f32 %v5170_v30, %v5000_v40 }
0x12eb   : > { %v13961_v58 = vadd.f32 %v5171_v35, %v13958_v59 }
0x12ed   : > { %v5202_v7 = vsel %vm3287_vm10, %v13961_v58, -inf }
0x12ee   : > { %5203 = vmax.xlane.f32.xlu0 %v5202_v7 }
0x12f0   : > { %v5173_v11 = vpop.f32.mrf.mxu0 }
0x12f1   : > { %v5174_v1 = vadd.f32 %v5173_v11, %v5001_v26 }
0x12f3   : > { %v5183_v20 = vadd.f32 %v5174_v1, %v13966_v3 }
0x12f5   : > { %v5205_v15 = vsel %vm3287_vm10, %v5183_v20, -inf }
0x12f6   : > { %5206 = vmax.xlane.f32.xlu1 %v5205_v15 }
0x12fe   : > { %5531 = vrot.lane.b32.xlu2 %v13851_v5, %s15076_s16 }
0x130f   : > { %5490 = vrot.lane.b32.xlu1 %v13837_v31, %s15076_s16 }
0x1331   : > { %v5186_v40 = vpop.xlane.xlu2 %5185 }
0x1332   : > { %v5208_v14 = vsub.f32 %v5176_v16, %v5186_v40 }
0x1334   : > { %v5216_v23 = vmul.f32 1.442695, %v5208_v14 }
0x1336   : > { %10642 = vpow2.f32 %v5216_v23 }
0x1339   : > { %v5189_v26 = vpop.xlane.xlu1 %5188 }
0x133a   : > { %v5209_v62 = vsub.f32 %v5177_v25, %v5189_v26 }
0x133c   : > { %v13980_v13 = vpop.eup %10642  ;;  %v5218_v2 = vmul.f32 1.442695, %v5209_v62 }
0x133d   : > { %v5232_v5 = vsel %vm3287_vm10, %v13980_v13, 0.0 }
0x133e   : > { %10644 = vpow2.f32 %v5218_v2  ;;  %5233 = vadd.xlane.f32.xlu0 %v5232_v5 }
0x1341   : > { %v5192_v31 = vpop.xlane.xlu0 %5191 }
0x1342   : > { %v5210_v46 = vsub.f32 %v5178_v42, %v5192_v31 }
0x1344   : > { %v13984_v45 = vpop.eup %10644  ;;  %v5220_v44 = vmul.f32 1.442695, %v5210_v46 }
0x1345   : > { %v5235_v16 = vsel %vm3287_vm10, %v13984_v45, 0.0 }
0x1346   : > { %10646 = vpow2.f32 %v5220_v44  ;;  %5236 = vadd.xlane.f32.xlu1 %v5235_v16 }
0x1349   : > { %v5195_v9 = vpop.xlane.xlu2 %5194 }
0x134a   : > { %v5211_v25 = vsub.f32 %v5179_v12, %v5195_v9  ;;  %v14035_v9 = vld [vmem:[%s15079_s3 + $0x18] sm:$0xff] }
0x134c   : > { %v13988_v18 = vpop.eup %10646  ;;  %v5222_v57 = vmul.f32 1.442695, %v5211_v25 }
0x134d   : > { %v5238_v4 = vsel %vm3287_vm10, %v13988_v18, 0.0 }
0x134e   : > { %10648 = vpow2.f32 %v5222_v57  ;;  %5239 = vadd.xlane.f32.xlu0 %v5238_v4 }
0x1351   : > { %v5198_v54 = vpop.xlane.xlu1 %5197 }
0x1352   : > { %v5212_v42 = vsub.f32 %v5180_v38, %v5198_v54 }
0x1354   : > { %v13992_v56 = vpop.eup %10648  ;;  %v5224_v39 = vmul.f32 1.442695, %v5212_v42 }
0x1355   : > { %v5241_v6 = vsel %vm3287_vm10, %v13992_v56, 0.0 }
0x1356   : > { %10650 = vpow2.f32 %v5224_v39  ;;  %5242 = vadd.xlane.f32.xlu1 %v5241_v6 }
0x1359   : > { %v5201_v41 = vpop.xlane.xlu2 %5200 }
0x135a   : > { %v5213_v12 = vsub.f32 %v5181_v60, %v5201_v41 }
0x135c   : > { %v13996_v30 = vpop.eup %10650  ;;  %v5226_v35 = vmul.f32 1.442695, %v5213_v12 }
0x135d   : > { %v5244_v7 = vsel %vm3287_vm10, %v13996_v30, 0.0 }
0x135e   : > { %10652 = vpow2.f32 %v5226_v35  ;;  %5245 = vadd.xlane.f32.xlu2 %v5244_v7 }
0x1361   : > { %v5532_v11 = vpop.permute.xlu2 %5531  ;;  %v5204_v26 = vpop.xlane.xlu0 %5203 }
0x1362   : > { %9462 = vmatpush.xpose.msk.msra.mxu2 %vm3287_vm10, %v5532_v11  ;;  %5486 = vrot.lane.b32.xlu0 %v13899_v55, %s15077_s1  ;;  %v5214_v55 = vsub.f32 %v13961_v58, %v5204_v26  ;;  %v14025_v58 = vld [vmem:[%s15079_s3 + $0x10] sm:$0xff]  ;;  %s15081_s3 = smov 48  }
0x1364   : > { %v14003_v38 = vpop.eup %10652  ;;  %v5228_v62 = vmul.f32 1.442695, %v5214_v55 }
0x1365   : > { %v5247_v1 = vsel %vm3287_vm10, %v14003_v38, 0.0 }
0x1366   : > { %5248 = vadd.xlane.f32.xlu1 %v5247_v1 }
0x1369   : > { %v5207_v60 = vpop.xlane.xlu1 %5206 }
0x136a   : > { %v5215_v15 = vsub.f32 %v5183_v20, %v5207_v60 }
0x136c   : > { %v5230_v40 = vmul.f32 1.442695, %v5215_v15 }
0x136e   : > { %10654 = vpow2.f32 %v5230_v40 }
0x136f   : > { %10656 = vpow2.f32 %v5228_v62 }
0x1374   : > { %v14007_v14 = vpop.eup %10654 }
0x1375   : > { %v5253_v23 = vsel %vm3287_vm10, %v14007_v14, 0.0  ;;  %v14016_v20 = vpop.eup %10656 }
0x1376   : > { %5254 = vadd.xlane.f32.xlu2 %v5253_v23  ;;  %v5250_v2 = vsel %vm3287_vm10, %v14016_v20, 0.0 }
0x137f   : > { %5529 = vrot.lane.b32.xlu1 %v13846_v19, %s15076_s16  ;;  %v5441_v19 = vpop.f32.mrf.mxu3 }
0x1380   : > { %v5442_v5 = vadd.f32 %v5441_v19, %v14025_v58 }
0x1381   : > { %v5491_v31 = vpop.permute.xlu1 %5490 }
0x1382   : > { %v14029_v46 = vadd.f32 %v5442_v5, %v13927_v50 }
0x1384   : > { %v5572_v44 = vsel %vm3287_vm10, %v14029_v46, -inf }
0x1387   : > { %5527 = vrot.lane.b32.xlu1 %v13918_v22, %s15077_s1  ;;  %v5444_v25 = vpop.f32.mrf.mxu3 }
0x1388   : > { %v5445_v4 = vadd.f32 %v5444_v25, %v14035_v9 }
0x138a   : > { %v14040_v12 = vadd.f32 %v5445_v4, %v13933_v27 }
0x138c   : > { %5251 = vadd.xlane.f32.xlu0 %v5250_v2 }
0x138e   : > { %5525 = vrot.lane.b32.xlu2 %v13912_v24, %s15077_s1 }
0x13a0   : > { %5488 = vrot.lane.b32.xlu0 %v13904_v21, %s15077_s1 }
0x13b1   : > { %v5234_v22 = vpop.xlane.xlu0 %5233 }
0x13b2   : > { %10658 = vrcp.f32 %v5234_v22 }
0x13b7   : > { %5573 = vmax.xlane.f32.xlu2 %v5572_v44 }
0x13b8   : > { %v10659_v24 = vpop.eup %10658 }
0x13b9   : > { %v5237_v16 = vpop.xlane.xlu1 %5236  ;;  %v5264_v21 = vmul.f32 %v10659_v24, %v13980_v13  ;;  %v5575_v13 = vsel %vm3287_vm10, %v14040_v12, -inf }
0x13ba   : > { %10660 = vrcp.f32 %v5237_v16 }
0x13bb   : > { %v5272_v54 = vpack.c.bf16 %v5264_v21, %v5264_v21 }
0x13bd   : > { %v5290_v6 = vunpack.c.l.b16 %v5272_v54 }
0x13c0   : > { %v10661_v57 = vpop.eup %10660 }
0x13c1   : > { %v5265_v50 = vmul.f32 %v10661_v57, %v13984_v45  ;;  %v5240_v42 = vpop.xlane.xlu0 %5239 }
0x13c2   : > { %10662 = vrcp.f32 %v5240_v42 }
0x13c3   : > { %v5273_v39 = vpack.c.bf16 %v5265_v50, %v5265_v50 }
0x13c5   : > { %v5291_v41 = vunpack.c.l.b16 %v5273_v39 }
0x13c7   : > { %v5292_v35 = vpack.c.b16 %v5291_v41, %v5290_v6 }
0x13c8   : > { %v10663_v11 = vpop.eup %10662 }
0x13c9   : > { %v5243_v7 = vpop.xlane.xlu1 %5242  ;;  %9446 = vmatmul.msk.bf16.vlgmr.msra.gmra.mxu1 %vm3287_vm10, %v5292_v35  ;;  %v5266_v45 = vmul.f32 %v10663_v11, %v13988_v18 }
0x13ca   : > { %10664 = vrcp.f32 %v5243_v7  ;;  %9458 = vmatpush.xpose.msk.msra.mxu1 %vm3287_vm10, %v13978_v34  ;;  %5576 = vmax.xlane.f32.xlu0 %v5575_v13 }
0x13cb   : > { %v5274_v27 = vpack.c.bf16 %v5266_v45, %v5266_v45 }
0x13cd   : > { %v5320_v23 = vunpack.c.l.b16 %v5274_v27 }
0x13ce   : > { %9459 = vmatpush.xpose.msk.msra.mxu1 %vm3287_vm10, %v5491_v31 }
0x13d0   : > { %v10665_v1 = vpop.eup %10664 }
0x13d1   : > { %v5267_v60 = vmul.f32 %v10665_v1, %v13992_v56  ;;  %v5246_v15 = vpop.xlane.xlu2 %5245 }
0x13d2   : > { %10666 = vrcp.f32 %v5246_v15 }
0x13d3   : > { %v5275_v40 = vpack.c.bf16 %v5267_v60, %v5267_v60 }
0x13d5   : > { %v5321_v26 = vunpack.c.l.b16 %v5275_v40 }
0x13d7   : > { %v5322_v55 = vpack.c.b16 %v5321_v26, %v5320_v23 }
0x13d8   : > { %v10667_v2 = vpop.eup %10666 }
0x13d9   : > { %v5249_v62 = vpop.xlane.xlu1 %5248  ;;  %9447 = vmatmul.msk.bf16.vlgmr.msra.gmra.mxu0 %vm3287_vm10, %v5322_v55  ;;  %v5268_v34 = vmul.f32 %v10667_v2, %v13996_v30  ;;  %v5487_v30 = vpop.permute.xlu0 %5486 }
0x13da   : > { %10668 = vrcp.f32 %v5249_v62 }
0x13db   : > { %v5276_v19 = vpack.c.bf16 %v5268_v34, %v5268_v34 }
0x13dd   : > { %v5350_v22 = vunpack.c.l.b16 %v5276_v19 }
0x13e0   : > { %v10669_v18 = vpop.eup %10668 }
0x13e1   : > { %v5269_v5 = vmul.f32 %v10669_v18, %v14003_v38 }
0x13e3   : > { %v5277_v31 = vpack.c.bf16 %v5269_v5, %v5269_v5 }
0x13e5   : > { %v5351_v56 = vunpack.c.l.b16 %v5277_v31 }
0x13e7   : > { %v5352_v44 = vpack.c.b16 %v5351_v56, %v5350_v22 }
0x13e9   : > { %9448 = vmatmul.msk.bf16.vlgmr.msrb.gmra.mxu1 %vm3287_vm10, %v5352_v44  ;;  %9456 = vmatmul.msk.f32.vlgmr.msrb.gmra.mxu0 %vm3287_vm10, %v13976_v0  ;;  %v5255_v24 = vpop.xlane.xlu2 %5254 }
0x13ea   : > { %10670 = vrcp.f32 %v5255_v24 }
0x13f0   : > { %v10671_v21 = vpop.eup %10670 }
0x13f1   : > { %v5530_v16 = vpop.permute.xlu1 %5529  ;;  %9457 = vmatmul.msk.f32.gmra.mxu0 %vm3287_vm10, %v13974_v28  ;;  %v5271_v25 = vmul.f32 %v10671_v21, %v14007_v14  ;;  %v5526_v6 = vpop.permute.xlu2 %5525 }
0x13f2   : > { %9463 = vmatpush.xpose.msk.msra.mxu2 %vm3287_vm10, %v5530_v16 }
0x13f3   : > { %v5279_v4 = vpack.c.bf16 %v5271_v25, %v5271_v25 }
0x13f5   : > { %v5381_v50 = vunpack.c.l.b16 %v5279_v4 }
0x13f9   : > { %9460 = vmatmul.msk.f32.vlgmr.msra.gmra.mxu1 %vm3287_vm10, %v5487_v30  ;;  %v5528_v41 = vpop.permute.xlu1 %5527 }
0x13ff   : > { %v5252_v38 = vpop.xlane.xlu0 %5251 }
0x1400   : > { %10672 = vrcp.f32 %v5252_v38 }
0x1406   : > { %v10673_v57 = vpop.eup %10672 }
0x1407   : > { %v5270_v0 = vmul.f32 %v10673_v57, %v14016_v20 }
0x1409   : > { %v5278_v54 = vpack.c.bf16 %v5270_v0, %v5270_v0 }
0x140b   : > { %v5380_v42 = vunpack.c.l.b16 %v5278_v54 }
0x140d   : > { %v5382_v28 = vpack.c.b16 %v5381_v50, %v5380_v42 }
0x140f   : > { %9449 = vmatmul.msk.bf16.vlgmr.msrb.gmra.mxu2 %vm3287_vm10, %v5382_v28 }
0x1412   : > { %v5489_v39 = vpop.permute.xlu0 %5488 }
0x1413   : > { %9461 = vmatmul.msk.f32.gmra.mxu1 %vm3287_vm10, %v5489_v39 }
0x141f   : > { %9464 = vmatmul.msk.f32.vlgmr.msra.gmra.mxu2 %vm3287_vm10, %v5526_v6 }
0x1427   : > { %9465 = vmatmul.msk.f32.gmra.mxu2 %vm3287_vm10, %v5528_v41 }
0x142a   : > { %v5574_v13 = vpop.xlane.xlu2 %5573 }
0x142b   : > { %v5596_v11 = vsub.f32 %v14029_v46, %v5574_v13 }
0x142d   : > { %v5604_v45 = vmul.f32 1.442695, %v5596_v11 }
0x142f   : > { %10674 = vpow2.f32 %v5604_v45 }
0x1435   : > { %v14084_v34 = vpop.eup %10674 }
0x143d   : > { %v5577_v60 = vpop.xlane.xlu0 %5576 }
0x143e   : > { %v5597_v23 = vsub.f32 %v14040_v12, %v5577_v60 }
0x1440   : > { %v5606_v55 = vmul.f32 1.442695, %v5597_v23 }
0x1442   : > { %10676 = vpow2.f32 %v5606_v55 }
0x1446   : > { %v14066_v14 = vpop.f32.mrf.mxu1 }
0x1448   : > { %v14091_v31 = vpop.eup %10676 }
0x144e   : > { %v14070_v20 = vpop.f32.mrf.mxu1 }
0x1456   : > { %v14068_v35 = vpop.f32.mrf.mxu0 }
0x145e   : > { %v14072_v7 = vpop.f32.mrf.mxu0 }
0x1466   : > { %v14075_v1 = vpop.f32.mrf.mxu1  ;;  %v5480_v27 = vpop.f32.mrf.mxu0 }
0x1467   : > { %v5481_v15 = vadd.f32 %v5480_v27, %v14025_v58 }
0x1469   : > { %v5566_v40 = vadd.f32 %v5481_v15, %v13938_v36  ;;  %v5620_v36 = vsel %vm3287_vm10, %v14084_v34, 0.0 }
0x146b   : > { %v5578_v26 = vsel %vm3287_vm10, %v5566_v40, -inf }
0x146c   : > { %5579 = vmax.xlane.f32.xlu1 %v5578_v26 }
0x146e   : > { %v14081_v62 = vpop.f32.mrf.mxu1  ;;  %v5483_v2 = vpop.f32.mrf.mxu0 }
0x146f   : > { %v5484_v46 = vadd.f32 %v5483_v2, %v14035_v9 }
0x1471   : > { %v5567_v18 = vadd.f32 %v5484_v46, %v13943_v61  ;;  %v5623_v61 = vsel %vm3287_vm10, %v14091_v31, 0.0 }
0x1473   : > { %v5581_v19 = vsel %vm3287_vm10, %v5567_v18, -inf }
0x1474   : > { %5582 = vmax.xlane.f32.xlu2 %v5581_v19  ;;  %5621 = vadd.xlane.f32.xlu1 %v5620_v36 }
0x1476   : > { %v5519_v12 = vpop.f32.mrf.mxu1 }
0x1477   : > { %v5520_v5 = vadd.f32 %v5519_v12, %v14025_v58 }
0x1479   : > { %v5568_v22 = vadd.f32 %v5520_v5, %v13948_v37 }
0x147b   : > { %v5584_v56 = vsel %vm3287_vm10, %v5568_v22, -inf }
0x147c   : > { %5585 = vmax.xlane.f32.xlu0 %v5584_v56  ;;  %5624 = vadd.xlane.f32.xlu2 %v5623_v61 }
0x1490   : > { %v5522_v44 = vpop.f32.mrf.mxu1 }
0x1491   : > { %v5523_v16 = vadd.f32 %v5522_v44, %v14035_v9 }
0x1492   : > { %v14098_v30 = vpop.f32.mrf.mxu2 }
0x1493   : > { %v5569_v24 = vadd.f32 %v5523_v16, %v13953_v51 }
0x1495   : > { %v5587_v38 = vsel %vm3287_vm10, %v5569_v24, -inf }
0x1496   : > { %5588 = vmax.xlane.f32.xlu1 %v5587_v38 }
0x149a   : > { %v14102_v21 = vpop.f32.mrf.mxu2 }
0x14a2   : > { %v5558_v37 = vpop.f32.mrf.mxu2 }
0x14a3   : > { %v5559_v25 = vadd.f32 %v5558_v37, %v14025_v58 }
0x14a5   : > { %v5570_v57 = vadd.f32 %v5559_v25, %v13958_v59 }
0x14a7   : > { %v5590_v4 = vsel %vm3287_vm10, %v5570_v57, -inf }
0x14a8   : > { %5591 = vmax.xlane.f32.xlu2 %v5590_v4 }
0x14aa   : > { %v5561_v0 = vpop.f32.mrf.mxu2 }
0x14ab   : > { %v5562_v54 = vadd.f32 %v5561_v0, %v14035_v9 }
0x14ad   : > { %v5571_v50 = vadd.f32 %v5562_v54, %v13966_v3 }
0x14af   : > { %5698 = vrot.lane.b32.xlu1 %v13864_v63, %s15081_s3  ;;  %v5593_v51 = vsel %vm3287_vm10, %v5571_v50, -inf }
0x14b0   : > { %5594 = vmax.xlane.f32.xlu0 %v5593_v51 }
0x14c4   : > { %5673 = vrot.lane.b32.xlu0 %v13853_v53, %s15081_s3 }
0x14df   : > { %v5580_v58 = vpop.xlane.xlu1 %5579 }
0x14e0   : > { %v5598_v42 = vsub.f32 %v5566_v40, %v5580_v58 }
0x14e2   : > { %v5608_v59 = vmul.f32 1.442695, %v5598_v42 }
0x14e4   : > { %10678 = vpow2.f32 %v5608_v59 }
0x14e7   : > { %v5583_v28 = vpop.xlane.xlu2 %5582  ;;  %v5622_v60 = vpop.xlane.xlu1 %5621 }
0x14e8   : > { %v5599_v39 = vsub.f32 %v5567_v18, %v5583_v28 }
0x14ea   : > { %v10679_v6 = vpop.eup %10678  ;;  %v5610_v41 = vmul.f32 1.442695, %v5599_v39 }
0x14eb   : > { %v5626_v9 = vsel %vm3287_vm10, %v10679_v6, 0.0 }
0x14ec   : > { %10680 = vpow2.f32 %v5610_v41  ;;  %5627 = vadd.xlane.f32.xlu1 %v5626_v9 }
0x14ef   : > { %v5586_v3 = vpop.xlane.xlu0 %5585  ;;  %v5625_v26 = vpop.xlane.xlu2 %5624 }
0x14f0   : > { %v5600_v63 = vsub.f32 %v5568_v22, %v5586_v3 }
0x14f2   : > { %v10681_v13 = vpop.eup %10680  ;;  %v5612_v11 = vmul.f32 1.442695, %v5600_v63 }
0x14f3   : > { %v5629_v45 = vsel %vm3287_vm10, %v10681_v13, 0.0 }
0x14f4   : > { %10682 = vpow2.f32 %v5612_v11  ;;  %5630 = vadd.xlane.f32.xlu2 %v5629_v45 }
0x14fa   : > { %v14116_v53 = vpop.eup %10682 }
0x14fb   : > { %v5632_v27 = vsel %vm3287_vm10, %v14116_v53, 0.0 }
0x14fc   : > { %5633 = vadd.xlane.f32.xlu2 %v5632_v27 }
0x1505   : > { %5723 = vrot.lane.b32.xlu1 %v13874_v43, %s15081_s3 }
0x1509   : > { %v5589_v15 = vpop.xlane.xlu1 %5588 }
0x150a   : > { %v5601_v40 = vsub.f32 %v5569_v24, %v5589_v15 }
0x150c   : > { %v5614_v23 = vmul.f32 1.442695, %v5601_v40 }
0x150e   : > { %10684 = vpow2.f32 %v5614_v23 }
0x1514   : > { %v10685_v55 = vpop.eup %10684 }
0x1515   : > { %v5635_v2 = vsel %vm3287_vm10, %v10685_v55, 0.0 }
0x1516   : > { %5636 = vadd.xlane.f32.xlu0 %v5635_v2 }
0x151b   : > { %v5592_v46 = vpop.xlane.xlu2 %5591 }
0x151c   : > { %v5602_v18 = vsub.f32 %v5570_v57, %v5592_v46 }
0x151e   : > { %v5616_v19 = vmul.f32 1.442695, %v5602_v18 }
0x1520   : > { %10686 = vpow2.f32 %v5616_v19 }
0x1521   : > { %v5699_v36 = vpop.permute.xlu1 %5698  ;;  %10688 = vrcp.f32 %v5625_v26 }
0x1522   : > { %5711 = vmatpush.bf16.msra.mxu0 %v5699_v36  ;;  %10690 = vrcp.f32 %v5622_v60 }
0x1523   : > { %v5595_v12 = vpop.xlane.xlu0 %5594 }
0x1524   : > { %v5603_v5 = vsub.f32 %v5571_v50, %v5595_v12 }
0x1526   : > { %v10687_v43 = vpop.eup %10686  ;;  %v5618_v22 = vmul.f32 1.442695, %v5603_v5 }
0x1527   : > { %v5638_v56 = vsel %vm3287_vm10, %v10687_v43, 0.0  ;;  %v10689_v61 = vpop.eup %10688 }
0x1528   : > { %10692 = vpow2.f32 %v5618_v22  ;;  %5639 = vadd.xlane.f32.xlu2 %v5638_v56  ;;  %v10691_v44 = vpop.eup %10690  ;;  %v5653_v16 = vmul.f32 %v10689_v61, %v14091_v31 }
0x1529   : > { %v5652_v38 = vmul.f32 %v10691_v44, %v14084_v34 }
0x152a   : > { %v5661_v25 = vpack.c.bf16 %v5653_v16, %v5653_v16 }
0x152b   : > { %v5660_v57 = vpack.c.bf16 %v5652_v38, %v5652_v38 }
0x152c   : > { %v5671_v4 = vunpack.c.l.b16 %v5661_v25 }
0x152d   : > { %v5670_v0 = vunpack.c.l.b16 %v5660_v57  ;;  %v9943_v57 = vld [vmem:[%s15082_s4 + $0x8] sm:$0xff] }
0x152e   : > { %v10693_v24 = vpop.eup %10692 }
0x152f   : > { %v5641_v37 = vsel %vm3287_vm10, %v10693_v24, 0.0  ;;  %v5672_v50 = vpack.c.b16 %v5671_v4, %v5670_v0  ;;  %v9942_v4 = vld [vmem:[%s15082_s4] sm:$0xff]  ;;  %s15084_s4 = sld [smem:[#allocation107_spill]] }
0x1530   : > { %5642 = vadd.xlane.f32.xlu2 %v5641_v37 }
0x1536   : > { %v5674_v54 = vpop.permute.xlu0 %5673 }
0x1537   : > { %5686 = vmatpush.bf16.msra.mxu3 %v5674_v54 }
0x153a   : > { %9466 = vmatmul.msk.bf16.vlgmr.msra.gmra.mxu3 %vm3287_vm10, %v5672_v50 }
0x153b   : > { %5846 = vmatpush.bf16.msrb.mxu3 %v9943_v57 }
0x153f   : > { %5847 = vmatpush.bf16.msrb.mxu3 %v9942_v4 }
0x1548   : > { %5748 = vrot.lane.b32.xlu2 %v13880_v48, %s15081_s3 }
0x155f   : > { %v5628_v51 = vpop.xlane.xlu1 %5627 }
0x1560   : > { %10694 = vrcp.f32 %v5628_v51 }
0x1566   : > { %v10695_v58 = vpop.eup %10694 }
0x1567   : > { %v5631_v31 = vpop.xlane.xlu2 %5630  ;;  %v5654_v34 = vmul.f32 %v10695_v58, %v10679_v6 }
0x1568   : > { %10696 = vrcp.f32 %v5631_v31 }
0x1569   : > { %v5662_v59 = vpack.c.bf16 %v5654_v34, %v5654_v34 }
0x156b   : > { %v5695_v41 = vunpack.c.l.b16 %v5662_v59 }
0x156e   : > { %v10697_v42 = vpop.eup %10696 }
0x156f   : > { %v5655_v28 = vmul.f32 %v10697_v42, %v10681_v13  ;;  %v5634_v11 = vpop.xlane.xlu2 %5633 }
0x1570   : > { %10698 = vrcp.f32 %v5634_v11 }
0x1571   : > { %v5663_v39 = vpack.c.bf16 %v5655_v28, %v5655_v28 }
0x1573   : > { %v5696_v9 = vunpack.c.l.b16 %v5663_v39 }
0x1575   : > { %v5697_v3 = vpack.c.b16 %v5696_v9, %v5695_v41 }
0x1576   : > { %v10699_v45 = vpop.eup %10698 }
0x1577   : > { %v5724_v63 = vpop.permute.xlu1 %5723  ;;  %9467 = vmatmul.msk.bf16.vlgmr.msra.gmra.mxu0 %vm3287_vm10, %v5697_v3  ;;  %v5656_v27 = vmul.f32 %v10699_v45, %v14116_v53 }
0x1578   : > { %5736 = vmatpush.bf16.msrb.mxu1 %v5724_v63 }
0x1579   : > { %v5664_v6 = vpack.c.bf16 %v5656_v27, %v5656_v27 }
0x157b   : > { %v5720_v13 = vunpack.c.l.b16 %v5664_v6 }
0x1589   : > { %v5637_v48 = vpop.xlane.xlu0 %5636 }
0x158a   : > { %10700 = vrcp.f32 %v5637_v48 }
0x1590   : > { %v10701_v60 = vpop.eup %10700 }
0x1591   : > { %v5657_v15 = vmul.f32 %v10701_v60, %v10685_v55 }
0x1593   : > { %v5665_v40 = vpack.c.bf16 %v5657_v15, %v5657_v15 }
0x1595   : > { %v5721_v23 = vunpack.c.l.b16 %v5665_v40 }
0x1597   : > { %v5722_v26 = vpack.c.b16 %v5721_v23, %v5720_v13 }
0x1599   : > { %9468 = vmatmul.msk.bf16.vlgmr.msrb.gmra.mxu1 %vm3287_vm10, %v5722_v26 }
0x159b   : > { %v5640_v2 = vpop.xlane.xlu2 %5639 }
0x159c   : > { %10702 = vrcp.f32 %v5640_v2 }
0x15a2   : > { %v10703_v18 = vpop.eup %10702 }
0x15a3   : > { %v5643_v46 = vpop.xlane.xlu2 %5642  ;;  %v5658_v19 = vmul.f32 %v10703_v18, %v10687_v43 }
0x15a4   : > { %10704 = vrcp.f32 %v5643_v46 }
0x15a5   : > { %v5666_v12 = vpack.c.bf16 %v5658_v19, %v5658_v19 }
0x15a7   : > { %v5745_v55 = vunpack.c.l.b16 %v5666_v12  ;;  %v5871_v12 = vld [vmem:[%s15084_s4 + $0x10] sm:$0xff] }
0x15aa   : > { %v10705_v36 = vpop.eup %10704 }
0x15ab   : > { %v5659_v5 = vmul.f32 %v10705_v36, %v10693_v24  ;;  %v5749_v22 = vpop.permute.xlu2 %5748 }
0x15ac   : > { %5761 = vmatpush.bf16.msrb.mxu2 %v5749_v22  ;;  %v5873_v22 = vld [vmem:[%s15084_s4 + $0x20] sm:$0xff] }
0x15ad   : > { %v5667_v53 = vpack.c.bf16 %v5659_v5, %v5659_v5  ;;  %v5872_v5 = vld [vmem:[%s15084_s4 + $0x18] sm:$0xff] }
0x15af   : > { %v5746_v56 = vunpack.c.l.b16 %v5667_v53  ;;  %v5874_v53 = vld [vmem:[%s15084_s4 + $0x28] sm:$0xff] }
0x15b1   : > { %v5747_v61 = vpack.c.b16 %v5746_v56, %v5745_v55  ;;  %v5875_v55 = vld [vmem:[%s15084_s4 + $0x30] sm:$0xff]  ;;  %v5876_v56 = vld [vmem:[%s15084_s4 + $0x38] sm:$0xff] }
0x15b3   : > { %9469 = vmatmul.msk.bf16.vlgmr.msrb.gmra.mxu2 %vm3287_vm10, %v5747_v61  ;;  %v10475_v61 = vld [vmem:[#allocation20] ss:$0 sm:$0xff] }
0x15bd   : > { %v5688_v44 = vpop.f32.mrf.mxu3 }
0x15c5   : > { %v5690_v16 = vpop.f32.mrf.mxu3 }
0x15c6   : > { %v10411_v38 = vpack.i.bf16 %v5690_v16, %v5688_v44 }
0x15c8   : > { %10412 = vrot.lane.b32.xlu1 %v10411_v38, %s15083_s5 }
0x15f4   : > { %v5713_v37 = vpop.f32.mrf.mxu0 }
0x15fc   : > { %v5715_v43 = vpop.f32.mrf.mxu0 }
0x15fd   : > { %v10416_v25 = vpack.i.bf16 %v5715_v43, %v5713_v37 }
0x15ff   : > { %10417 = vrot.lane.b32.xlu1 %v10416_v25, %s15083_s5 }
0x1616   : > { %v5738_v24 = vpop.f32.mrf.mxu1 }
0x161e   : > { %v5740_v0 = vpop.f32.mrf.mxu1 }
0x161f   : > { %v10421_v54 = vpack.i.bf16 %v5740_v0, %v5738_v24 }
0x1621   : > { %10422 = vrot.lane.b32.xlu1 %v10421_v54, %s15083_s5 }
0x1636   : > { %v5763_v50 = vpop.f32.mrf.mxu2 }
0x163a   : > { %v10413_v51 = vpop.permute.xlu1 %10412 }
0x163b   : > { %v10415_v31 = vunpack.i.h.bf16 %v10413_v51  ;;  %v10414_v58 = vunpack.i.l.bf16 %v10413_v51 }
0x163d   : > { %v5801_v34 = vsel %vm3287_vm10, %v14070_v20, %v10415_v31  ;;  %v5800_v42 = vsel %vm3287_vm10, %v14066_v14, %v10414_v58 }
0x163e   : > { %v5808_v59 = vpack.c.bf16 %v5801_v34, %v5800_v42  ;;  %v5765_v28 = vpop.f32.mrf.mxu2 }
0x163f   : > { %v10426_v39 = vpack.i.bf16 %v5765_v28, %v5763_v50 }
0x1640   : > { %9478 = vmatmul.msk.bf16.vlgmr.msrb.gmra.mxu3 %vm2724_vm1, %v5808_v59 }
0x1641   : > { %10427 = vrot.lane.b32.xlu2 %v10426_v39, %s15083_s5 }
0x1671   : > { %v10418_v41 = vpop.permute.xlu1 %10417 }
0x1672   : > { %v10420_v9 = vunpack.i.h.bf16 %v10418_v41  ;;  %v10419_v3 = vunpack.i.l.bf16 %v10418_v41 }
0x1674   : > { %v5803_v63 = vsel %vm3287_vm10, %v14072_v7, %v10420_v9  ;;  %v5802_v11 = vsel %vm3287_vm10, %v14068_v35, %v10419_v3 }
0x1675   : > { %v5809_v20 = vpack.c.bf16 %v5803_v63, %v5802_v11 }
0x1677   : > { %9479 = vmatmul.msk.bf16.gmra.mxu3 %vm2724_vm1, %v5809_v20 }
0x1693   : > { %v10423_v14 = vpop.permute.xlu1 %10422 }
0x1694   : > { %v10425_v48 = vunpack.i.h.bf16 %v10423_v14  ;;  %v10424_v45 = vunpack.i.l.bf16 %v10423_v14 }
0x1696   : > { %v5805_v27 = vsel %vm3287_vm10, %v14081_v62, %v10425_v48  ;;  %v5804_v60 = vsel %vm3287_vm10, %v14075_v1, %v10424_v45 }
0x1697   : > { %v5810_v6 = vpack.c.bf16 %v5805_v27, %v5804_v60 }
0x1699   : > { %9480 = vmatmul.msk.bf16.gmra.mxu3 %vm2724_vm1, %v5810_v6 }
0x169b   : > { %v10428_v15 = vpop.permute.xlu2 %10427 }
0x169c   : > { %v10430_v7 = vunpack.i.h.bf16 %v10428_v15  ;;  %v10429_v40 = vunpack.i.l.bf16 %v10428_v15 }
0x169e   : > { %v5807_v35 = vsel %vm3287_vm10, %v14102_v21, %v10430_v7  ;;  %v5806_v13 = vsel %vm3287_vm10, %v14098_v30, %v10429_v40  ;;  %v5869_v30 = vld [vmem:[%s15084_s4] sm:$0xff]  ;;  %v5870_v21 = vld [vmem:[%s15084_s4 + $0x8] sm:$0xff]  ;;  %s15085_s4 = sld [smem:[#allocation99_spill]] }
0x169f   : > { %v5811_v23 = vpack.c.bf16 %v5807_v35, %v5806_v13 }
0x16a9   : > { %9481 = vmatmul.msk.bf16.gmra.mxu3 %vm2724_vm1, %v5811_v23 }
0x16c3   : > { %v5849_v62 = vpop.f32.mrf.mxu3 }
0x16cb   : > { %v5851_v26 = vpop.f32.mrf.mxu3 }
0x16fa   : > { %v5854_v2 = vpop.f32.mrf.mxu3 }
0x1702   : > { %v5856_v1 = vpop.f32.mrf.mxu3 }
0x171c   : > { %v5859_v46 = vpop.f32.mrf.mxu3 }
0x1724   : > { %v5861_v18 = vpop.f32.mrf.mxu3 }
0x172c   : > { %v5864_v19 = vpop.f32.mrf.mxu3 }
0x1734   : > { %v5866_v36 = vpop.f32.mrf.mxu3 }
0x1735   : > { %5909 = vmatpush.msrb.mxu0 %v5866_v36 }
0x1737   : > { %5910 = vmatpush.msrb.mxu0 %v5864_v19 }
0x1739   : > { %5911 = vmatpush.msrb.mxu0 %v5861_v18 }
0x173b   : > { %5912 = vmatpush.msrb.mxu0 %v5859_v46 }
0x173d   : > { %5913 = vmatpush.msrb.mxu0 %v5856_v1 }
0x173f   : > { %5914 = vmatpush.msrb.mxu0 %v5854_v2 }
0x1741   : > { %5915 = vmatpush.msrb.mxu0 %v5851_v26 }
0x1743   : > { %5916 = vmatpush.msrb.mxu0 %v5849_v62 }
0x1744   : > { %9482 = vmatmul.msk.f32.vlgmr.msrb.gmra.mxu0 %vm3138_vm9, %v5869_v30 }
0x174c   : > { %9483 = vmatmul.msk.f32.gmra.mxu0 %vm3138_vm9, %v5870_v21 }
0x1754   : > { %9484 = vmatmul.msk.f32.gmra.mxu0 %vm3138_vm9, %v5871_v12 }
0x175c   : > { %9485 = vmatmul.msk.f32.gmra.mxu0 %vm3138_vm9, %v5872_v5 }
0x1764   : > { %9486 = vmatmul.msk.f32.gmra.mxu0 %vm3138_vm9, %v5873_v22 }
0x176c   : > { %9487 = vmatmul.msk.f32.gmra.mxu0 %vm3138_vm9, %v5874_v53 }
0x1774   : > { %9488 = vmatmul.msk.f32.gmra.mxu0 %vm3138_vm9, %v5875_v55 }
0x177c   : > { %9489 = vmatmul.msk.f32.gmra.mxu0 %vm3138_vm9, %v5876_v56 }
0x17c1   : > { %v5918_v44 = vpop.f32.mrf.mxu0 }
0x17c2   : > { %v5942_v16 = vadd.f32 %v5918_v44, %v13649_v33 }
0x17c4   : > { %v14177_v38 = vadd.f32 %v10475_v61, %v5942_v16 }
0x17c6   : > { %v5964_v37 = vsel %vm2724_vm1, %v14177_v38, 0.0 }
0x17c7   : > { %5965 = vadd.xlane.f32.xlu0 %v5964_v37 }
0x17c9   : > { %v5921_v43 = vpop.f32.mrf.mxu0 }
0x17ca   : > { %v5943_v25 = vadd.f32 %v5921_v43, %v13658_v8 }
0x17cc   : > { %v14182_v24 = vadd.f32 %v10475_v61, %v5943_v25 }
0x17ce   : > { %v5967_v57 = vsel %vm2724_vm1, %v14182_v24, 0.0 }
0x17cf   : > { %5968 = vadd.xlane.f32.xlu1 %v5967_v57  ;;  %v9945_v57 = vld [vmem:[%s15085_s4 + $0x8] sm:$0xff] }
0x17d0   : > { %6204 = vmatpush.bf16.msra.mxu1 %v9945_v57 }
0x17d1   : > { %v5924_v4 = vpop.f32.mrf.mxu0 }
0x17d2   : > { %v5944_v0 = vadd.f32 %v5924_v4, %v13628_v29 }
0x17d4   : > { %v14187_v54 = vadd.f32 %v10475_v61, %v5944_v0 }
0x17d6   : > { %v5970_v33 = vsel %vm2724_vm1, %v14187_v54, 0.0 }
0x17d7   : > { %5971 = vadd.xlane.f32.xlu2 %v5970_v33  ;;  %v9944_v33 = vld [vmem:[%s15085_s4] sm:$0xff]  ;;  %s15086_s4 = sld [smem:[#allocation101_spill]] }
0x17d8   : > { %6205 = vmatpush.bf16.msra.mxu1 %v9944_v33 }
0x17d9   : > { %v5927_v50 = vpop.f32.mrf.mxu0 }
0x17da   : > { %v5945_v51 = vadd.f32 %v5927_v50, %v13638_v17 }
0x17dc   : > { %v14192_v31 = vadd.f32 %v10475_v61, %v5945_v51 }
0x17de   : > { %v5973_v8 = vsel %vm2724_vm1, %v14192_v31, 0.0 }
0x17df   : > { %5974 = vadd.xlane.f32.xlu0 %v5973_v8 }
0x17e1   : > { %v5930_v58 = vpop.f32.mrf.mxu0 }
0x17e2   : > { %v5946_v34 = vadd.f32 %v5930_v58, %v13651_v49 }
0x17e4   : > { %v14197_v42 = vadd.f32 %v10475_v61, %v5946_v34 }
0x17e6   : > { %v5976_v29 = vsel %vm2724_vm1, %v14197_v42, 0.0 }
0x17e7   : > { %5977 = vadd.xlane.f32.xlu0 %v5976_v29 }
0x17e9   : > { %v5933_v59 = vpop.f32.mrf.mxu0 }
0x17ea   : > { %v5947_v28 = vadd.f32 %v5933_v59, %v13623_v52 }
0x17ec   : > { %v14202_v39 = vadd.f32 %v10475_v61, %v5947_v28 }
0x17ee   : > { %v5979_v17 = vsel %vm2724_vm1, %v14202_v39, 0.0 }
0x17ef   : > { %5980 = vadd.xlane.f32.xlu0 %v5979_v17 }
0x17f1   : > { %v5936_v41 = vpop.f32.mrf.mxu0 }
0x17f2   : > { %v5948_v9 = vadd.f32 %v5936_v41, %v13633_v32 }
0x17f4   : > { %v14207_v3 = vadd.f32 %v10475_v61, %v5948_v9 }
0x17f6   : > { %v5982_v62 = vsel %vm2724_vm1, %v14207_v3, 0.0 }
0x17f9   : > { %v5939_v49 = vpop.f32.mrf.mxu0 }
0x17fa   : > { %v5949_v63 = vadd.f32 %v5939_v49, %v13641_v10 }
0x17fc   : > { %v14210_v11 = vadd.f32 %v10475_v61, %v5949_v63 }
0x17fe   : > { %v5985_v20 = vsel %vm2724_vm1, %v14210_v11, 0.0 }
0x17ff   : > { %5986 = vadd.xlane.f32.xlu1 %v5985_v20 }
0x183a   : > { %v5966_v52 = vpop.xlane.xlu0 %5965 }
0x183b   : > { %v5988_v14 = vmul.f32 %v5966_v52, %v12904_v47 }
0x183d   : > { %v14216_v48 = vsub.f32 %v14177_v38, %v5988_v14 }
0x183f   : > { %v6004_v32 = vmul.f32 %v14216_v48, %v14216_v48 }
0x1841   : > { %v6012_v45 = vsel %vm2724_vm1, %v6004_v32, 0.0 }
0x1842   : > { %v5969_v27 = vpop.xlane.xlu1 %5968  ;;  %6013 = vadd.xlane.f32.xlu0 %v6012_v45 }
0x1843   : > { %v5989_v10 = vmul.f32 %v5969_v27, %v12904_v47 }
0x1845   : > { %v14223_v60 = vsub.f32 %v14182_v24, %v5989_v10 }
0x1847   : > { %v6005_v6 = vmul.f32 %v14223_v60, %v14223_v60 }
0x1849   : > { %v6015_v15 = vsel %vm2724_vm1, %v6005_v6, 0.0 }
0x184a   : > { %v5972_v7 = vpop.xlane.xlu2 %5971  ;;  %6016 = vadd.xlane.f32.xlu0 %v6015_v15 }
0x184b   : > { %v5990_v40 = vmul.f32 %v5972_v7, %v12904_v47 }
0x184d   : > { %v14230_v35 = vsub.f32 %v14187_v54, %v5990_v40 }
0x184f   : > { %v6006_v13 = vmul.f32 %v14230_v35, %v14230_v35 }
0x1851   : > { %v6018_v23 = vsel %vm2724_vm1, %v6006_v13, 0.0 }
0x1852   : > { %6019 = vadd.xlane.f32.xlu2 %v6018_v23  ;;  %v5975_v26 = vpop.xlane.xlu0 %5974  ;;  %5983 = vadd.xlane.f32.xlu0 %v5982_v62  ;;  %v14278_v62 = vld [vmem:[#allocation31] ss:$0 sm:$0xff] }
0x1853   : > { %v5991_v2 = vmul.f32 %v5975_v26, %v12904_v47 }
0x1855   : > { %v14239_v1 = vsub.f32 %v14192_v31, %v5991_v2 }
0x1857   : > { %v6007_v46 = vmul.f32 %v14239_v1, %v14239_v1 }
0x1859   : > { %v6021_v18 = vsel %vm2724_vm1, %v6007_v46, 0.0 }
0x185a   : > { %v5978_v19 = vpop.xlane.xlu0 %5977  ;;  %6022 = vadd.xlane.f32.xlu0 %v6021_v18 }
0x185b   : > { %v5992_v36 = vmul.f32 %v5978_v19, %v12904_v47 }
0x185d   : > { %v14246_v30 = vsub.f32 %v14197_v42, %v5992_v36 }
0x185f   : > { %v6008_v21 = vmul.f32 %v14246_v30, %v14246_v30 }
0x1861   : > { %v6024_v12 = vsel %vm2724_vm1, %v6008_v21, 0.0  ;;  %v14281_v21 = vld [vmem:[#allocation29] ss:$0 sm:$0xff] }
0x1862   : > { %v5981_v5 = vpop.xlane.xlu0 %5980  ;;  %6025 = vadd.xlane.f32.xlu1 %v6024_v12 }
0x1863   : > { %v5993_v22 = vmul.f32 %v5981_v5, %v12904_v47 }
0x1865   : > { %v14253_v53 = vsub.f32 %v14202_v39, %v5993_v22 }
0x1867   : > { %v6009_v55 = vmul.f32 %v14253_v53, %v14253_v53 }
0x1869   : > { %v6027_v56 = vsel %vm2724_vm1, %v6009_v55, 0.0 }
0x186a   : > { %6028 = vadd.xlane.f32.xlu2 %v6027_v56 }
0x1872   : > { %v5987_v61 = vpop.xlane.xlu1 %5986 }
0x1873   : > { %v5995_v44 = vmul.f32 %v5987_v61, %v12904_v47 }
0x1875   : > { %v14260_v16 = vsub.f32 %v14210_v11, %v5995_v44 }
0x1877   : > { %v6011_v37 = vmul.f32 %v14260_v16, %v14260_v16 }
0x1879   : > { %v6033_v43 = vsel %vm2724_vm1, %v6011_v37, 0.0 }
0x187a   : > { %6034 = vadd.xlane.f32.xlu1 %v6033_v43 }
0x18b5   : > { %v6014_v25 = vpop.xlane.xlu0 %6013 }
0x18b6   : > { %v6036_v4 = vmul.f32 %v6014_v25, %v12904_v47 }
0x18b8   : > { %v6044_v0 = vadd.f32 1e-05, %v6036_v4 }
0x18ba   : > { %10706 = vrsqrt.f32 %v6044_v0  ;;  %vm6058_vm12 = vweird.f32 %v6044_v0 }
0x18bd   : > { %v6017_v50 = vpop.xlane.xlu0 %6016 }
0x18be   : > { %v6037_v51 = vmul.f32 %v6017_v50, %v12904_v47 }
0x18c0   : > { %v10707_v8 = vpop.eup %10706  ;;  %v6045_v58 = vadd.f32 1e-05, %v6037_v51 }
0x18c1   : > { %v6053_v34 = vmul.f32 %v10707_v8, %v6044_v0  ;;  %vm6059_vm11 = vweird.f32 %v10707_v8 }
0x18c2   : > { %10708 = vrsqrt.f32 %v6045_v58  ;;  %vm6060_vm13 = vmor %vm6058_vm12, %vm6059_vm11  ;;  %vm6068_vm15 = vweird.f32 %v6045_v58 }
0x18c3   : > { %v6054_v29 = vmul.f32 %v10707_v8, %v6053_v34 }
0x18c5   : > { %v6055_v59 = vmul.f32 0.5, %v6054_v29  ;;  %v6020_v28 = vpop.xlane.xlu2 %6019  ;;  %v5984_v17 = vpop.xlane.xlu0 %5983 }
0x18c6   : > { %v6038_v41 = vmul.f32 %v6020_v28, %v12904_v47  ;;  %v5994_v9 = vmul.f32 %v5984_v17, %v12904_v47 }
0x18c7   : > { %v6056_v49 = vsub.f32 1.5, %v6055_v59 }
0x18c8   : > { %v10709_v63 = vpop.eup %10708  ;;  %v6046_v20 = vadd.f32 1e-05, %v6038_v41  ;;  %v14272_v52 = vsub.f32 %v14207_v3, %v5994_v9 }
0x18c9   : > { %v6057_v14 = vmul.f32 %v10707_v8, %v6056_v49  ;;  %v6063_v32 = vmul.f32 %v10709_v63, %v6045_v58  ;;  %vm6069_vm14 = vweird.f32 %v10709_v63 }
0x18ca   : > { %10710 = vrsqrt.f32 %v6046_v20  ;;  %v6010_v45 = vmul.f32 %v14272_v52, %v14272_v52  ;;  %vm6070_vm2 = vmor %vm6068_vm15, %vm6069_vm14  ;;  %vm6078_vm4 = vweird.f32 %v6046_v20 }
0x18cb   : > { %v6064_v27 = vmul.f32 %v10709_v63, %v6063_v32  ;;  %v6061_v6 = vsel %vm6060_vm13, %v10707_v8, %v6057_v14 }
0x18cc   : > { %v6030_v10 = vsel %vm2724_vm1, %v6010_v45, 0.0  ;;  %v6132_v26 = vmul.f32 %v6061_v6, %v14216_v48 }
0x18cd   : > { %v6065_v15 = vmul.f32 0.5, %v6064_v27  ;;  %6031 = vadd.xlane.f32.xlu0 %v6030_v10  ;;  %v6023_v7 = vpop.xlane.xlu0 %6022 }
0x18ce   : > { %v6039_v40 = vmul.f32 %v6023_v7, %v12904_v47  ;;  %v6143_v12 = vmul.f32 %v14278_v62, %v6132_v26 }
0x18cf   : > { %v6066_v13 = vsub.f32 1.5, %v6065_v15 }
0x18d0   : > { %v10711_v23 = vpop.eup %10710  ;;  %v6047_v2 = vadd.f32 1e-05, %v6039_v40  ;;  %v6154_v37 = vadd.f32 %v14281_v21, %v6143_v12 }
0x18d1   : > { %v6067_v46 = vmul.f32 %v10709_v63, %v6066_v13  ;;  %v6073_v18 = vmul.f32 %v10711_v23, %v6046_v20  ;;  %vm6079_vm3 = vweird.f32 %v10711_v23 }
0x18d2   : > { %10712 = vrsqrt.f32 %v6047_v2  ;;  %vm6080_vm5 = vmor %vm6078_vm4, %vm6079_vm3  ;;  %vm6088_vm7 = vweird.f32 %v6047_v2 }
0x18d3   : > { %v6071_v19 = vsel %vm6070_vm2, %v10709_v63, %v6067_v46  ;;  %v6074_v36 = vmul.f32 %v10711_v23, %v6073_v18 }
0x18d4   : > { %v6133_v5 = vmul.f32 %v6071_v19, %v14223_v60 }
0x18d5   : > { %v6075_v22 = vmul.f32 0.5, %v6074_v36  ;;  %v6026_v55 = vpop.xlane.xlu1 %6025 }
0x18d6   : > { %v6144_v56 = vmul.f32 %v14278_v62, %v6133_v5  ;;  %v6040_v48 = vmul.f32 %v6026_v55, %v12904_v47 }
0x18d7   : > { %v6076_v61 = vsub.f32 1.5, %v6075_v22 }
0x18d8   : > { %v10713_v44 = vpop.eup %10712  ;;  %v6155_v43 = vadd.f32 %v14281_v21, %v6144_v56  ;;  %v6048_v25 = vadd.f32 1e-05, %v6040_v48  ;;  %v9953_v48 = vld [vmem:[%s15086_s4 + $0x38] sm:$0xff] }
0x18d9   : > { %v6077_v57 = vmul.f32 %v10711_v23, %v6076_v61  ;;  %v6083_v4 = vmul.f32 %v10713_v44, %v6047_v2  ;;  %vm6089_vm6 = vweird.f32 %v10713_v44  ;;  %6367 = vmatpush.bf16.msra.mxu2 %v9953_v48 }
0x18da   : > { %v6162_v0 = vpack.c.bf16 %v6155_v43, %v6154_v37  ;;  %10714 = vrsqrt.f32 %v6048_v25  ;;  %vm6090_vm8 = vmor %vm6088_vm7, %vm6089_vm6  ;;  %vm6098_vm12 = vweird.f32 %v6048_v25  ;;  %v9952_v43 = vld [vmem:[%s15086_s4 + $0x30] sm:$0xff] }
0x18db   : > { %v6084_v60 = vmul.f32 %v10713_v44, %v6083_v4  ;;  %v6081_v33 = vsel %vm6080_vm5, %v10711_v23, %v6077_v57  ;;  %v9951_v4 = vld [vmem:[%s15086_s4 + $0x28] sm:$0xff] }
0x18dc   : > { %9498 = vmatmul.msk.bf16.vlgmr.msra.gmra.mxu1 %vm2724_vm1, %v6162_v0  ;;  %v6134_v29 = vmul.f32 %v6081_v33, %v14230_v35 }
0x18dd   : > { %v6085_v50 = vmul.f32 0.5, %v6084_v60  ;;  %v6029_v51 = vpop.xlane.xlu2 %6028  ;;  %6368 = vmatpush.bf16.msra.mxu2 %v9952_v43  ;;  %v9950_v60 = vld [vmem:[%s15086_s4 + $0x20] sm:$0xff] }
0x18de   : > { %v6041_v8 = vmul.f32 %v6029_v51, %v12904_v47  ;;  %v6145_v63 = vmul.f32 %v14278_v62, %v6134_v29 }
0x18df   : > { %v6086_v58 = vsub.f32 1.5, %v6085_v50 }
0x18e0   : > { %v10715_v34 = vpop.eup %10714  ;;  %v6049_v59 = vadd.f32 1e-05, %v6041_v8  ;;  %v6156_v27 = vadd.f32 %v14281_v21, %v6145_v63 }
0x18e1   : > { %v6087_v28 = vmul.f32 %v10713_v44, %v6086_v58  ;;  %v6093_v17 = vmul.f32 %v10715_v34, %v6048_v25  ;;  %vm6099_vm11 = vweird.f32 %v10715_v34  ;;  %6369 = vmatpush.bf16.msra.mxu2 %v9951_v4 }
0x18e2   : > { %10716 = vrsqrt.f32 %v6049_v59  ;;  %vm6100_vm13 = vmor %vm6098_vm12, %vm6099_vm11  ;;  %vm6108_vm15 = vweird.f32 %v6049_v59  ;;  %vm6571_vm11 = vcmask 785408  }
0x18e3   : > { %v6091_v41 = vsel %vm6090_vm8, %v10713_v44, %v6087_v28  ;;  %v6094_v9 = vmul.f32 %v10715_v34, %v6093_v17 }
0x18e4   : > { %v6135_v49 = vmul.f32 %v6091_v41, %v14239_v1 }
0x18e5   : > { %v6095_v20 = vmul.f32 0.5, %v6094_v9  ;;  %6370 = vmatpush.bf16.msra.mxu2 %v9950_v60  ;;  %v14314_v9 = vld [vmem:[#allocation23] ss:$0 sm:$0xff] }
0x18e6   : > { %v6146_v14 = vmul.f32 %v14278_v62, %v6135_v49  ;;  %v9947_v49 = vld [vmem:[%s15086_s4 + $0x8] sm:$0xff] }
0x18e7   : > { %v6096_v32 = vsub.f32 1.5, %v6095_v20 }
0x18e8   : > { %v10717_v45 = vpop.eup %10716  ;;  %v6157_v35 = vadd.f32 %v14281_v21, %v6146_v14 }
0x18e9   : > { %v6097_v10 = vmul.f32 %v10715_v34, %v6096_v32  ;;  %v6103_v6 = vmul.f32 %v10717_v45, %v6049_v59  ;;  %vm6109_vm14 = vweird.f32 %v10717_v45  ;;  %v9948_v59 = vld [vmem:[%s15086_s4 + $0x10] sm:$0xff] }
0x18ea   : > { %v6163_v15 = vpack.c.bf16 %v6157_v35, %v6156_v27  ;;  %vm6110_vm2 = vmor %vm6108_vm15, %vm6109_vm14  ;;  %v9946_v27 = vld [vmem:[%s15086_s4] sm:$0xff] }
0x18eb   : > { %v6104_v7 = vmul.f32 %v10717_v45, %v6103_v6  ;;  %v6101_v1 = vsel %vm6100_vm13, %v10715_v34, %v6097_v10 }
0x18ec   : > { %9499 = vmatmul.msk.bf16.gmra.mxu1 %vm2724_vm1, %v6163_v15  ;;  %v6136_v23 = vmul.f32 %v6101_v1, %v14246_v30 }
0x18ed   : > { %v6105_v40 = vmul.f32 0.5, %v6104_v7  ;;  %v6035_v30 = vpop.xlane.xlu1 %6034 }
0x18ee   : > { %v6147_v18 = vmul.f32 %v14278_v62, %v6136_v23  ;;  %v6043_v22 = vmul.f32 %v6035_v30, %v12904_v47 }
0x18ef   : > { %v6106_v13 = vsub.f32 1.5, %v6105_v40 }
0x18f0   : > { %v6158_v36 = vadd.f32 %v14281_v21, %v6147_v18  ;;  %v6051_v55 = vadd.f32 1e-05, %v6043_v22 }
0x18f1   : > { %v6107_v26 = vmul.f32 %v10717_v45, %v6106_v13 }
0x18f2   : > { %10718 = vrsqrt.f32 %v6051_v55  ;;  %vm6128_vm4 = vweird.f32 %v6051_v55 }
0x18f3   : > { %v6111_v2 = vsel %vm6110_vm2, %v10717_v45, %v6107_v26 }
0x18f4   : > { %v6137_v46 = vmul.f32 %v6111_v2, %v14253_v53 }
0x18f6   : > { %v6148_v19 = vmul.f32 %v14278_v62, %v6137_v46 }
0x18f8   : > { %v6159_v12 = vadd.f32 %v14281_v21, %v6148_v19  ;;  %v10719_v53 = vpop.eup %10718 }
0x18f9   : > { %v6123_v56 = vmul.f32 %v10719_v53, %v6051_v55  ;;  %vm6129_vm3 = vweird.f32 %v10719_v53 }
0x18fa   : > { %v6164_v5 = vpack.c.bf16 %v6159_v12, %v6158_v36  ;;  %vm6130_vm5 = vmor %vm6128_vm4, %vm6129_vm3 }
0x18fb   : > { %v6124_v61 = vmul.f32 %v10719_v53, %v6123_v56 }
0x18fc   : > { %9500 = vmatmul.msk.bf16.gmra.mxu1 %vm2724_vm1, %v6164_v5 }
0x18fd   : > { %v6125_v57 = vmul.f32 0.5, %v6124_v61 }
0x18ff   : > { %v6126_v0 = vsub.f32 1.5, %v6125_v57 }
0x1901   : > { %v6127_v50 = vmul.f32 %v10719_v53, %v6126_v0 }
0x1903   : > { %v6131_v58 = vsel %vm6130_vm5, %v10719_v53, %v6127_v50 }
0x1904   : > { %v6139_v28 = vmul.f32 %v6131_v58, %v14260_v16 }
0x1906   : > { %v6150_v20 = vmul.f32 %v14278_v62, %v6139_v28 }
0x1908   : > { %v6161_v35 = vadd.f32 %v14281_v21, %v6150_v20 }
0x1940   : > { %v6032_v44 = vpop.xlane.xlu0 %6031 }
0x1941   : > { %v6042_v37 = vmul.f32 %v6032_v44, %v12904_v47  ;;  %v9949_v47 = vld [vmem:[%s15086_s4 + $0x18] sm:$0xff]  ;;  %s15087_s4 = sld [smem:[#allocation114_spill]] }
0x1942   : > { %6371 = vmatpush.bf16.msra.mxu2 %v9949_v47 }
0x1943   : > { %v6050_v25 = vadd.f32 1e-05, %v6042_v37 }
0x1945   : > { %10720 = vrsqrt.f32 %v6050_v25  ;;  %vm6118_vm7 = vweird.f32 %v6050_v25 }
0x1946   : > { %6372 = vmatpush.bf16.msra.mxu2 %v9948_v59 }
0x194a   : > { %6373 = vmatpush.bf16.msra.mxu2 %v9947_v49 }
0x194b   : > { %v10721_v33 = vpop.eup %10720 }
0x194c   : > { %v6113_v51 = vmul.f32 %v10721_v33, %v6050_v25  ;;  %vm6119_vm6 = vweird.f32 %v10721_v33 }
0x194d   : > { %vm6120_vm8 = vmor %vm6118_vm7, %vm6119_vm6 }
0x194e   : > { %v6114_v8 = vmul.f32 %v10721_v33, %v6113_v51  ;;  %6374 = vmatpush.bf16.msra.mxu2 %v9946_v27 }
0x1950   : > { %v6115_v34 = vmul.f32 0.5, %v6114_v8 }
0x1952   : > { %v6116_v29 = vsub.f32 1.5, %v6115_v34 }
0x1954   : > { %v6117_v17 = vmul.f32 %v10721_v33, %v6116_v29 }
0x1956   : > { %v6121_v41 = vsel %vm6120_vm8, %v10721_v33, %v6117_v17 }
0x1957   : > { %v6138_v63 = vmul.f32 %v6121_v41, %v14272_v52 }
0x1959   : > { %v6207_v14 = vpop.f32.mrf.mxu1  ;;  %v6149_v32 = vmul.f32 %v14278_v62, %v6138_v63 }
0x195a   : > { %v6208_v45 = vadd.f32 %v14314_v9, %v6207_v14 }
0x195b   : > { %v6160_v16 = vadd.f32 %v14281_v21, %v6149_v32 }
0x195c   : > { %v6227_v10 = vmul.f32 %v6208_v45, %v6208_v45 }
0x195d   : > { %v6165_v6 = vpack.c.bf16 %v6161_v35, %v6160_v16 }
0x195e   : > { %v6235_v15 = vmul.f32 %v6227_v10, %v6208_v45 }
0x195f   : > { %9501 = vmatmul.msk.bf16.gmra.mxu1 %vm2724_vm1, %v6165_v6 }
0x1960   : > { %v6243_v52 = vmul.f32 0.044715, %v6235_v15 }
0x1961   : > { %v6209_v7 = vpop.f32.mrf.mxu1 }
0x1962   : > { %v6251_v1 = vadd.f32 %v6243_v52, %v6208_v45  ;;  %v6210_v40 = vadd.f32 %v14314_v9, %v6209_v7 }
0x1964   : > { %v6259_v13 = vmul.f32 0.7978846, %v6251_v1  ;;  %v6228_v62 = vmul.f32 %v6210_v40, %v6210_v40 }
0x1966   : > { %v6236_v23 = vmul.f32 %v6228_v62, %v6210_v40  ;;  %10722 = vtanh.f32 %v6259_v13 }
0x1968   : > { %v6244_v26 = vmul.f32 0.044715, %v6236_v23 }
0x1969   : > { %v6212_v2 = vpop.f32.mrf.mxu1 }
0x196a   : > { %v6252_v46 = vadd.f32 %v6244_v26, %v6210_v40  ;;  %v6213_v21 = vadd.f32 %v14314_v9, %v6212_v2 }
0x196c   : > { %v6260_v18 = vmul.f32 0.7978846, %v6252_v46  ;;  %v6229_v19 = vmul.f32 %v6213_v21, %v6213_v21  ;;  %v10723_v36 = vpop.eup %10722 }
0x196d   : > { %v6275_v30 = vadd.f32 1.0, %v10723_v36 }
0x196e   : > { %10724 = vtanh.f32 %v6260_v18  ;;  %v6237_v12 = vmul.f32 %v6229_v19, %v6213_v21 }
0x196f   : > { %v6283_v44 = vmul.f32 0.5, %v6275_v30 }
0x1970   : > { %v6245_v5 = vmul.f32 0.044715, %v6237_v12 }
0x1971   : > { %v6214_v22 = vpop.f32.mrf.mxu1  ;;  %v6291_v4 = vmul.f32 %v6283_v44, %v6208_v45 }
0x1972   : > { %v6253_v55 = vadd.f32 %v6245_v5, %v6213_v21  ;;  %v6215_v53 = vadd.f32 %v14314_v9, %v6214_v22 }
0x1974   : > { %v10725_v56 = vpop.eup %10724  ;;  %v6261_v48 = vmul.f32 0.7978846, %v6253_v55  ;;  %v6230_v61 = vmul.f32 %v6215_v53, %v6215_v53 }
0x1975   : > { %v6276_v37 = vadd.f32 1.0, %v10725_v56 }
0x1976   : > { %v6238_v43 = vmul.f32 %v6230_v61, %v6215_v53  ;;  %10726 = vtanh.f32 %v6261_v48 }
0x1977   : > { %v6284_v25 = vmul.f32 0.5, %v6276_v37 }
0x1978   : > { %v6246_v57 = vmul.f32 0.044715, %v6238_v43 }
0x1979   : > { %v6292_v0 = vmul.f32 %v6284_v25, %v6210_v40  ;;  %v6217_v60 = vpop.f32.mrf.mxu1 }
0x197a   : > { %v6254_v33 = vadd.f32 %v6246_v57, %v6215_v53  ;;  %v6218_v50 = vadd.f32 %v14314_v9, %v6217_v60 }
0x197b   : > { %v6299_v51 = vpack.c.bf16 %v6292_v0, %v6291_v4 }
0x197c   : > { %v6262_v8 = vmul.f32 0.7978846, %v6254_v33  ;;  %v6231_v47 = vmul.f32 %v6218_v50, %v6218_v50  ;;  %v10727_v58 = vpop.eup %10726 }
0x197d   : > { %6375 = vmatmul.bf16.vlgmr.msra.gmra.mxu2 %v6299_v51  ;;  %v6277_v28 = vadd.f32 1.0, %v10727_v58 }
0x197e   : > { %v6239_v34 = vmul.f32 %v6231_v47, %v6218_v50  ;;  %10728 = vtanh.f32 %v6262_v8 }
0x197f   : > { %v6285_v32 = vmul.f32 0.5, %v6277_v28  ;;  %v10479_v28 = vld [vmem:[#allocation25] ss:$0 sm:$0xff] }
0x1980   : > { %v6247_v29 = vmul.f32 0.044715, %v6239_v34 }
0x1981   : > { %v6219_v59 = vpop.f32.mrf.mxu1  ;;  %v6293_v35 = vmul.f32 %v6285_v32, %v6213_v21 }
0x1982   : > { %v6255_v17 = vadd.f32 %v6247_v29, %v6218_v50  ;;  %v6220_v41 = vadd.f32 %v14314_v9, %v6219_v59 }
0x1984   : > { %v10729_v49 = vpop.eup %10728  ;;  %v6263_v63 = vmul.f32 0.7978846, %v6255_v17  ;;  %v6232_v20 = vmul.f32 %v6220_v41, %v6220_v41 }
0x1985   : > { %v6278_v14 = vadd.f32 1.0, %v10729_v49 }
0x1986   : > { %v6240_v45 = vmul.f32 %v6232_v20, %v6220_v41  ;;  %10730 = vtanh.f32 %v6263_v63 }
0x1987   : > { %v6286_v27 = vmul.f32 0.5, %v6278_v14 }
0x1988   : > { %v6248_v16 = vmul.f32 0.044715, %v6240_v45 }
0x1989   : > { %v6294_v10 = vmul.f32 %v6286_v27, %v6215_v53 }
0x198a   : > { %v6256_v6 = vadd.f32 %v6248_v16, %v6220_v41 }
0x198b   : > { %v6300_v15 = vpack.c.bf16 %v6294_v10, %v6293_v35  ;;  %v9536_v35 = vld [vmem:[%s15087_s4 + $0x10] sm:$0xff]  ;;  %v9540_v10 = vld [vmem:[%s15087_s4 + $0x20] sm:$0xff] }
0x198c   : > { %v6264_v52 = vmul.f32 0.7978846, %v6256_v6  ;;  %v10731_v7 = vpop.eup %10730  ;;  %v9537_v6 = vld [vmem:[%s15087_s4 + $0x18] sm:$0xff] }
0x198d   : > { %6380 = vmatmul.bf16.gmra.mxu2 %v6300_v15  ;;  %v6279_v1 = vadd.f32 1.0, %v10731_v7  ;;  %v9541_v15 = vld [vmem:[%s15087_s4 + $0x28] sm:$0xff]  ;;  %v9545_v7 = vld [vmem:[%s15087_s4 + $0x38] sm:$0xff] }
0x198e   : > { %10732 = vtanh.f32 %v6264_v52  ;;  %v9544_v52 = vld [vmem:[%s15087_s4 + $0x30] sm:$0xff] }
0x198f   : > { %v6287_v62 = vmul.f32 0.5, %v6279_v1 }
0x1991   : > { %v6295_v26 = vmul.f32 %v6287_v62, %v6218_v50 }
0x1994   : > { %v10733_v40 = vpop.eup %10732 }
0x1995   : > { %v6280_v13 = vadd.f32 1.0, %v10733_v40 }
0x1997   : > { %v6288_v23 = vmul.f32 0.5, %v6280_v13 }
0x1999   : > { %v6296_v2 = vmul.f32 %v6288_v23, %v6220_v41 }
0x199b   : > { %v6301_v46 = vpack.c.bf16 %v6296_v2, %v6295_v26 }
0x199d   : > { %6385 = vmatmul.bf16.gmra.mxu2 %v6301_v46 }
0x19dc   : > { %v6222_v18 = vpop.f32.mrf.mxu1 }
0x19dd   : > { %v6223_v19 = vadd.f32 %v14314_v9, %v6222_v18 }
0x19df   : > { %v6233_v21 = vmul.f32 %v6223_v19, %v6223_v19 }
0x19e1   : > { %v6241_v36 = vmul.f32 %v6233_v21, %v6223_v19 }
0x19e3   : > { %v6249_v12 = vmul.f32 0.044715, %v6241_v36 }
0x19e4   : > { %v6224_v5 = vpop.f32.mrf.mxu1 }
0x19e5   : > { %v6257_v30 = vadd.f32 %v6249_v12, %v6223_v19  ;;  %v6225_v22 = vadd.f32 %v14314_v9, %v6224_v5 }
0x19e7   : > { %v6265_v55 = vmul.f32 0.7978846, %v6257_v30  ;;  %v6234_v53 = vmul.f32 %v6225_v22, %v6225_v22 }
0x19e9   : > { %v6242_v56 = vmul.f32 %v6234_v53, %v6225_v22  ;;  %10734 = vtanh.f32 %v6265_v55 }
0x19eb   : > { %v6250_v48 = vmul.f32 0.044715, %v6242_v56 }
0x19ed   : > { %v6258_v61 = vadd.f32 %v6250_v48, %v6225_v22 }
0x19ef   : > { %v6266_v44 = vmul.f32 0.7978846, %v6258_v61  ;;  %v10735_v37 = vpop.eup %10734  ;;  %v12019_v61 = vmov 128.0  }
0x19f0   : > { %v6281_v43 = vadd.f32 1.0, %v10735_v37 }
0x19f1   : > { %10736 = vtanh.f32 %v6266_v44 }
0x19f2   : > { %v6289_v4 = vmul.f32 0.5, %v6281_v43  ;;  %10738 = vrcp.f32 %v12019_v61 }
0x19f4   : > { %v6297_v60 = vmul.f32 %v6289_v4, %v6223_v19 }
0x19f7   : > { %v10737_v25 = vpop.eup %10736 }
0x19f8   : > { %v6282_v57 = vadd.f32 1.0, %v10737_v25  ;;  %v10739_v44 = vpop.eup %10738 }
0x19f9   : > { %v6581_v37 = vmul.f32 128.0, %v10739_v44  ;;  %vm6585_vm12 = vweird.f32 %v10739_v44 }
0x19fa   : > { %v6290_v0 = vmul.f32 0.5, %v6282_v57 }
0x19fb   : > { %v6582_v43 = vsub.f32 1.0, %v6581_v37 }
0x19fc   : > { %v6298_v33 = vmul.f32 %v6290_v0, %v6225_v22 }
0x19fd   : > { %v6583_v25 = vmul.f32 %v10739_v44, %v6582_v43 }
0x19fe   : > { %v6302_v50 = vpack.c.bf16 %v6298_v33, %v6297_v60 }
0x19ff   : > { %v6584_v57 = vadd.f32 %v10739_v44, %v6583_v25 }
0x1a00   : > { %6390 = vmatmul.bf16.gmra.mxu2 %v6302_v50  ;;  %v6376_v51 = vpop.f32.mrf.mxu2 }
0x1a01   : > { %v6586_v4 = vsel %vm6585_vm12, %v10739_v44, %v6584_v57 }
0x1a08   : > { %v6378_v9 = vpop.f32.mrf.mxu2 }
0x1a10   : > { %v6381_v8 = vpop.f32.mrf.mxu2 }
0x1a11   : > { %v6398_v27 = vadd.f32 %v6381_v8, %v14187_v54 }
0x1a18   : > { %v6383_v47 = vpop.f32.mrf.mxu2 }
0x1a19   : > { %v6399_v32 = vadd.f32 %v6383_v47, %v14192_v31  ;;  %v6396_v31 = vadd.f32 %v6376_v51, %v14177_v38  ;;  %v6417_v38 = vld [vmem:[%s15087_s4 + $0x8] sm:$0xff] }
0x1a1b   : > { %v6408_v16 = vadd.f32 %v10479_v28, %v6396_v31 }
0x1a20   : > { %v6386_v58 = vpop.f32.mrf.mxu2 }
0x1a21   : > { %v6400_v20 = vadd.f32 %v6386_v58, %v14197_v42  ;;  %v6410_v42 = vadd.f32 %v10479_v28, %v6398_v27 }
0x1a28   : > { %v6388_v34 = vpop.f32.mrf.mxu2 }
0x1a29   : > { %v6401_v49 = vadd.f32 %v6388_v34, %v14202_v39  ;;  %v6397_v39 = vadd.f32 %v6378_v9, %v14182_v24  ;;  %v6416_v24 = vld [vmem:[%s15087_s4] sm:$0xff]  ;;  %s15089_s4 = sld [smem:[#allocation125_spill]] }
0x1a2b   : > { %v6413_v45 = vadd.f32 %v10479_v28, %v6401_v49  ;;  %v6409_v54 = vadd.f32 %v10479_v28, %v6397_v39 }
0x1a83   : > { %v6391_v29 = vpop.f32.mrf.mxu2 }
0x1a84   : > { %v6402_v17 = vadd.f32 %v6391_v29, %v14207_v3  ;;  %v6412_v3 = vadd.f32 %v10479_v28, %v6400_v20 }
0x1a86   : > { %v6414_v14 = vadd.f32 %v10479_v28, %v6402_v17 }
0x1a8b   : > { %v6393_v59 = vpop.f32.mrf.mxu2 }
0x1a8c   : > { %v6403_v41 = vadd.f32 %v6393_v59, %v14210_v11  ;;  %v6411_v11 = vadd.f32 %v10479_v28, %v6399_v32 }
0x1a8e   : > { %v6415_v63 = vadd.f32 %v10479_v28, %v6403_v41 }
0x1a90   : > { %6432 = vmatpush.msra.mxu3 %v6415_v63  ;;  %6464 = vmatpush.msra.mxu0 %v6415_v63 }
0x1a91   : > { %6496 = vmatpush.msrb.mxu1 %v6415_v63 }
0x1a92   : > { %6433 = vmatpush.msra.mxu3 %v6414_v14  ;;  %6465 = vmatpush.msra.mxu0 %v6414_v14 }
0x1a93   : > { %6497 = vmatpush.msrb.mxu1 %v6414_v14 }
0x1a94   : > { %6434 = vmatpush.msra.mxu3 %v6413_v45  ;;  %6466 = vmatpush.msra.mxu0 %v6413_v45 }
0x1a95   : > { %6498 = vmatpush.msrb.mxu1 %v6413_v45 }
0x1a96   : > { %6435 = vmatpush.msra.mxu3 %v6412_v3  ;;  %6467 = vmatpush.msra.mxu0 %v6412_v3 }
0x1a97   : > { %6499 = vmatpush.msrb.mxu1 %v6412_v3 }
0x1a98   : > { %6436 = vmatpush.msra.mxu3 %v6411_v11  ;;  %6468 = vmatpush.msra.mxu0 %v6411_v11 }
0x1a99   : > { %6500 = vmatpush.msrb.mxu1 %v6411_v11 }
0x1a9a   : > { %6437 = vmatpush.msra.mxu3 %v6410_v42  ;;  %6469 = vmatpush.msra.mxu0 %v6410_v42 }
0x1a9b   : > { %6501 = vmatpush.msrb.mxu1 %v6410_v42 }
0x1a9c   : > { %6438 = vmatpush.msra.mxu3 %v6409_v54  ;;  %6470 = vmatpush.msra.mxu0 %v6409_v54 }
0x1a9d   : > { %6502 = vmatpush.msrb.mxu1 %v6409_v54 }
0x1a9e   : > { %6439 = vmatpush.msra.mxu3 %v6408_v16  ;;  %6471 = vmatpush.msra.mxu0 %v6408_v16 }
0x1a9f   : > { %6503 = vmatpush.msrb.mxu1 %v6408_v16  ;;  %9534 = vmatmul.msk.f32.vlgmr.msra.gmra.mxu3 %vm3138_vm9, %v6416_v24 }
0x1aa0   : > { %9538 = vmatmul.msk.f32.vlgmr.msra.gmra.mxu0 %vm3138_vm9, %v9536_v35  ;;  %9542 = vmatmul.msk.f32.vlgmr.msrb.gmra.mxu1 %vm3138_vm9, %v9540_v10 }
0x1aa1   : > { %6528 = vmatpush.msrb.mxu3 %v6415_v63 }
0x1aa3   : > { %6529 = vmatpush.msrb.mxu3 %v6414_v14 }
0x1aa5   : > { %6530 = vmatpush.msrb.mxu3 %v6413_v45 }
0x1aa7   : > { %6531 = vmatpush.msrb.mxu3 %v6412_v3 }
0x1aa8   : > { %9535 = vmatmul.msk.f32.gmra.mxu3 %vm3138_vm9, %v6417_v38  ;;  %9539 = vmatmul.msk.f32.gmra.mxu0 %vm3138_vm9, %v9537_v6 }
0x1aa9   : > { %6532 = vmatpush.msrb.mxu3 %v6411_v11  ;;  %9543 = vmatmul.msk.f32.gmra.mxu1 %vm3138_vm9, %v9541_v15  ;;  %v10480_v15 = vld [vmem:[#allocation34] ss:$0 sm:$0xff] }
0x1aab   : > { %6533 = vmatpush.msrb.mxu3 %v6410_v42 }
0x1aad   : > { %6534 = vmatpush.msrb.mxu3 %v6409_v54 }
0x1aaf   : > { %6535 = vmatpush.msrb.mxu3 %v6408_v16 }
0x1ab0   : > { %9546 = vmatmul.msk.f32.vlgmr.msrb.gmra.mxu3 %vm3138_vm9, %v9544_v52 }
0x1ab8   : > { %9547 = vmatmul.msk.f32.gmra.mxu3 %vm3138_vm9, %v9545_v7 }
0x1b1d   : > { %v6473_v1 = vpop.f32.mrf.mxu0  ;;  %v6505_v40 = vpop.f32.mrf.mxu1 }
0x1b1e   : > { %6553 = vrot.lane.b32.xlu1 %v6505_v40, %s15078_s2  ;;  %6545 = vrot.lane.b32.xlu2 %v6473_v1, %s14925_s6  ;;  %v10481_v40 = vld [vmem:[#allocation32] ss:$0 sm:$0xff] }
0x1b22   : > { %v6441_v13 = vpop.f32.mrf.mxu3 }
0x1b25   : > { %v6476_v62 = vpop.f32.mrf.mxu0 }
0x1b26   : > { %6547 = vrot.lane.b32.xlu0 %v6476_v62, %s14925_s6  ;;  %v6508_v23 = vpop.f32.mrf.mxu1  ;;  %s15088_s6 = sld [smem:[#allocation113_spill]] }
0x1b27   : > { %6555 = vrot.lane.b32.xlu2 %v6508_v23, %s15078_s2 }
0x1b2b   : > { %v6444_v26 = vpop.f32.mrf.mxu3 }
0x1b2c   : > { %v9961_v58 = vld [vmem:[%s15088_s6 + $0x38] sm:$0xff]  ;;  %v9960_v34 = vld [vmem:[%s15088_s6 + $0x30] sm:$0xff]  ;;  %v9959_v29 = vld [vmem:[%s15088_s6 + $0x28] sm:$0xff] }
0x1b2d   : > { %6698 = vmatpush.bf16.msrb.mxu2 %v9961_v58  ;;  %v9958_v59 = vld [vmem:[%s15088_s6 + $0x20] sm:$0xff]  ;;  %v9957_v28 = vld [vmem:[%s15088_s6 + $0x18] sm:$0xff]  ;;  %v9956_v17 = vld [vmem:[%s15088_s6 + $0x10] sm:$0xff] }
0x1b2e   : > { %v9955_v20 = vld [vmem:[%s15088_s6 + $0x8] sm:$0xff]  ;;  %v9954_v14 = vld [vmem:[%s15088_s6] sm:$0xff]  ;;  %s15092_s6 = sld [smem:[#allocation123_spill]] }
0x1b2f   : > { %v9598_v58 = vld [vmem:[%s15089_s4 + $0x20] sm:$0xf] }
0x1b31   : > { %6699 = vmatpush.bf16.msrb.mxu2 %v9960_v34  ;;  %v9967_v34 = vld [vmem:[%s15089_s4 + $0x24] sm:$0xf0] }
0x1b33   : > { %v6537_v2 = vpop.f32.mrf.mxu3 }
0x1b34   : > { %6561 = vrot.lane.b32.xlu0 %v6537_v2, %s15075_s0 }
0x1b35   : > { %6700 = vmatpush.bf16.msrb.mxu2 %v9959_v29  ;;  %v9966_v29 = vld [vmem:[%s15089_s4 + $0x24] sm:$0xf] }
0x1b39   : > { %6701 = vmatpush.bf16.msrb.mxu2 %v9958_v59  ;;  %v9599_v59 = vor.u32 %v9967_v34, %v9598_v58 }
0x1b3b   : > { %v6540_v46 = vpop.f32.mrf.mxu3 }
0x1b3c   : > { %6563 = vrot.lane.b32.xlu2 %v6540_v46, %s15075_s0 }
0x1b3d   : > { %6702 = vmatpush.bf16.msrb.mxu2 %v9957_v28  ;;  %v9600_v28 = vld [vmem:[%s15089_s4 + $0x28] sm:$0xf0] }
0x1b41   : > { %6703 = vmatpush.bf16.msrb.mxu2 %v9956_v17  ;;  %v9603_v17 = vor.u32 %v9966_v29, %v9600_v28 }
0x1b45   : > { %6704 = vmatpush.bf16.msrb.mxu2 %v9955_v20 }
0x1b49   : > { %6705 = vmatpush.bf16.msrb.mxu2 %v9954_v14  ;;  %v9592_v14 = vld [vmem:[%s15089_s4 + $0x18] sm:$0xf0] }
0x1b78   : > { %v6546_v18 = vpop.permute.xlu2 %6545 }
0x1b79   : > { %v6567_v55 = vsel %vm2724_vm1, %v6441_v13, %v6546_v18 }
0x1b81   : > { %v6556_v19 = vpop.permute.xlu2 %6555 }
0x1b90   : > { %v6554_v22 = vpop.permute.xlu1 %6553 }
0x1b91   : > { %v6569_v53 = vsel %vm3138_vm9, %v6567_v55, %v6554_v22 }
0x1b96   : > { %v6564_v36 = vpop.permute.xlu2 %6563 }
0x1b98   : > { %v6548_v21 = vpop.permute.xlu0 %6547 }
0x1b99   : > { %v6568_v12 = vsel %vm2724_vm1, %v6444_v26, %v6548_v21 }
0x1b9a   : > { %v6570_v5 = vsel %vm3138_vm9, %v6568_v12, %v6556_v19  ;;  %v12020_v12 = vmov 64.0  }
0x1b9b   : > { %v6573_v30 = vsel %vm6571_vm11, %v6570_v5, %v6564_v36 }
0x1b9c   : > { %6578 = vadd.xlane.f32.xlu0 %v6573_v30 }
0x1ba6   : > { %v6562_v56 = vpop.permute.xlu0 %6561 }
0x1ba7   : > { %v6572_v48 = vsel %vm6571_vm11, %v6569_v53, %v6562_v56 }
0x1ba8   : > { %6576 = vadd.xlane.f32.xlu1 %v6572_v48 }
0x1c0f   : > { %v6579_v0 = vpop.xlane.xlu0 %6578 }
0x1c10   : > { %v6588_v60 = vmul.f32 %v6586_v4, %v6579_v0 }
0x1c12   : > { %v6590_v33 = vsub.f32 %v6573_v30, %v6588_v60 }
0x1c14   : > { %v6592_v50 = vmul.f32 %v6590_v33, %v6590_v33 }
0x1c16   : > { %6595 = vadd.xlane.f32.xlu1 %v6592_v50  ;;  %v9969_v50 = vld [vmem:[%s15089_s4 + $0x34] sm:$0xf0] }
0x1c1b   : > { %v6577_v51 = vpop.xlane.xlu1 %6576 }
0x1c1c   : > { %v6587_v9 = vmul.f32 %v6586_v4, %v6577_v51  ;;  %v9968_v51 = vld [vmem:[%s15089_s4 + $0x34] sm:$0xf] }
0x1c1e   : > { %v6589_v8 = vsub.f32 %v6572_v48, %v6587_v9 }
0x1c20   : > { %v6591_v47 = vmul.f32 %v6589_v8, %v6589_v8 }
0x1c22   : > { %6593 = vadd.xlane.f32.xlu2 %v6591_v47 }
0x1c89   : > { %v6596_v41 = vpop.xlane.xlu1 %6595 }
0x1c8a   : > { %v6598_v49 = vmul.f32 %v6596_v41, %v6586_v4  ;;  %v9590_v41 = vld [vmem:[%s15089_s4 + $0x10] sm:$0xf] }
0x1c8c   : > { %v6600_v63 = vadd.f32 1e-05, %v6598_v49  ;;  %v9965_v49 = vld [vmem:[%s15089_s4 + $0x14] sm:$0xf0] }
0x1c8d   : > { %v9591_v20 = vor.u32 %v9965_v49, %v9590_v41 }
0x1c8e   : > { %10740 = vrsqrt.f32 %v6600_v63  ;;  %vm6617_vm14 = vweird.f32 %v6600_v63 }
0x1c94   : > { %v10741_v32 = vpop.eup %10740 }
0x1c95   : > { %v6612_v45 = vmul.f32 %v10741_v32, %v6600_v63  ;;  %v6594_v27 = vpop.xlane.xlu2 %6593  ;;  %vm6618_vm13 = vweird.f32 %v10741_v32  ;;  %v9964_v63 = vld [vmem:[%s15089_s4 + $0x14] sm:$0xf] }
0x1c96   : > { %v6597_v3 = vmul.f32 %v6594_v27, %v6586_v4  ;;  %vm6619_vm15 = vmor %vm6617_vm14, %vm6618_vm13 }
0x1c97   : > { %v6613_v39 = vmul.f32 %v10741_v32, %v6612_v45  ;;  %v9595_v45 = vor.u32 %v9964_v63, %v9592_v14 }
0x1c98   : > { %v6599_v11 = vadd.f32 1e-05, %v6597_v3  ;;  %v9582_v3 = vld [vmem:[%s15089_s4] sm:$0xf] }
0x1c99   : > { %v6614_v31 = vmul.f32 0.5, %v6613_v39  ;;  %v9963_v39 = vld [vmem:[%s15089_s4 + $0x4] sm:$0xf0] }
0x1c9a   : > { %10742 = vrsqrt.f32 %v6599_v11  ;;  %vm6607_vm3 = vweird.f32 %v6599_v11 }
0x1c9b   : > { %v6615_v42 = vsub.f32 1.5, %v6614_v31  ;;  %10744 = vrcp.f32 %v12020_v12 }
0x1c9d   : > { %v6616_v16 = vmul.f32 %v10741_v32, %v6615_v42  ;;  %v9583_v42 = vor.u32 %v9963_v39, %v9582_v3 }
0x1c9f   : > { %v6620_v10 = vsel %vm6619_vm15, %v10741_v32, %v6616_v16 }
0x1ca0   : > { %v10743_v54 = vpop.eup %10742  ;;  %v6622_v52 = vmul.f32 %v6620_v10, %v6590_v33  ;;  %v9606_v33 = vld [vmem:[%s15089_s4 + $0x30] sm:$0xf] }
0x1ca1   : > { %v6602_v24 = vmul.f32 %v10743_v54, %v6599_v11  ;;  %vm6608_vm2 = vweird.f32 %v10743_v54  ;;  %v10745_v5 = vpop.eup %10744  ;;  %v9607_v9 = vor.u32 %v9969_v50, %v9606_v33  ;;  %v9962_v11 = vld [vmem:[%s15089_s4 + $0x4] sm:$0xf] }
0x1ca2   : > { %vm6609_vm4 = vmor %vm6607_vm3, %vm6608_vm2  ;;  %v6627_v13 = vmul.f32 %v10480_v15, %v6622_v52  ;;  %v6721_v30 = vmul.f32 64.0, %v10745_v5  ;;  %vm6725_vm5 = vweird.f32 %v10745_v5 }
0x1ca3   : > { %v6603_v35 = vmul.f32 %v10743_v54, %v6602_v24  ;;  %6837 = vmatpush.bf16.msrb.mxu0 %v9607_v9 }
0x1ca4   : > { %v6632_v26 = vadd.f32 %v10481_v40, %v6627_v13  ;;  %v6722_v22 = vsub.f32 1.0, %v6721_v30 }
0x1ca5   : > { %v6604_v38 = vmul.f32 0.5, %v6603_v35 }
0x1ca6   : > { %v6723_v55 = vmul.f32 %v10745_v5, %v6722_v22 }
0x1ca7   : > { %v6605_v6 = vsub.f32 1.5, %v6604_v38  ;;  %6838 = vmatpush.bf16.msrb.mxu0 %v9599_v59 }
0x1ca8   : > { %v6724_v53 = vadd.f32 %v10745_v5, %v6723_v55 }
0x1ca9   : > { %v6606_v7 = vmul.f32 %v10743_v54, %v6605_v6 }
0x1caa   : > { %v14382_v56 = vsel %vm6725_vm5, %v10745_v5, %v6724_v53  ;;  %v10483_v5 = vld [vmem:[#allocation38] ss:$0 sm:$0xff] }
0x1cab   : > { %v6610_v1 = vsel %vm6609_vm4, %v10743_v54, %v6606_v7  ;;  %6839 = vmatpush.bf16.msrb.mxu0 %v9591_v20  ;;  %v9584_v54 = vld [vmem:[%s15089_s4 + $0x8] sm:$0xf0] }
0x1cac   : > { %v6621_v62 = vmul.f32 %v6610_v1, %v6589_v8  ;;  %v9608_v8 = vld [vmem:[%s15089_s4 + $0x38] sm:$0xf0]  ;;  %v9587_v16 = vor.u32 %v9962_v11, %v9584_v54  ;;  %s15090_s4 = sld [smem:[#allocation115_spill]] }
0x1cad   : > { %v9611_v47 = vor.u32 %v9968_v51, %v9608_v8 }
0x1cae   : > { %v6626_v23 = vmul.f32 %v10480_v15, %v6621_v62 }
0x1caf   : > { %6851 = vmatpush.bf16.msra.mxu1 %v9611_v47  ;;  %6840 = vmatpush.bf16.msrb.mxu0 %v9583_v42  ;;  %v6861_v42 = vld [vmem:[%s15092_s6] sm:$0xff] }
0x1cb0   : > { %v6631_v2 = vadd.f32 %v10481_v40, %v6626_v23 }
0x1cb2   : > { %v6633_v46 = vpack.c.bf16 %v6632_v26, %v6631_v2 }
0x1cb3   : > { %6852 = vmatpush.bf16.msra.mxu1 %v9603_v17 }
0x1cb4   : > { %6706 = vmatmul.bf16.vlgmr.msrb.gmra.mxu2 %v6633_v46  ;;  %v10482_v46 = vld [vmem:[#allocation40] ss:$0 sm:$0xff] }
0x1cb7   : > { %6853 = vmatpush.bf16.msra.mxu1 %v9595_v45 }
0x1cbb   : > { %6854 = vmatpush.bf16.msra.mxu1 %v9587_v16 }
0x1d37   : > { %v14374_v18 = vpop.f32.mrf.mxu2 }
0x1d38   : > { %v6714_v19 = vsel %vm3138_vm9, %v14374_v18, 0.0 }
0x1d39   : > { %6715 = vadd.xlane.f32.xlu0 %v6714_v19 }
0x1d3f   : > { %v14378_v21 = vpop.f32.mrf.mxu2 }
0x1d40   : > { %v6717_v36 = vsel %vm3138_vm9, %v14378_v21, 0.0 }
0x1d41   : > { %6718 = vadd.xlane.f32.xlu2 %v6717_v36 }
0x1dac   : > { %v6716_v48 = vpop.xlane.xlu0 %6715 }
0x1dad   : > { %v6727_v61 = vmul.f32 %v14382_v56, %v6716_v48 }
0x1daf   : > { %v14386_v44 = vsub.f32 %v14374_v18, %v6727_v61 }
0x1db1   : > { %v6731_v37 = vmul.f32 %v14386_v44, %v14386_v44 }
0x1db3   : > { %v6733_v43 = vsel %vm3138_vm9, %v6731_v37, 0.0  ;;  %v6784_v37 = vld [vmem:[%s15090_s4] sm:$0x3]  ;;  %s15091_s4 = smov 32  }
0x1db4   : > { %6734 = vadd.xlane.f32.xlu1 %v6733_v43  ;;  %v6719_v25 = vpop.xlane.xlu2 %6718  ;;  %v6786_v43 = vperm.slane %v6784_v37, 0 }
0x1db5   : > { %v6728_v57 = vmul.f32 %v14382_v56, %v6719_v25 }
0x1db7   : > { %v14393_v4 = vsub.f32 %v14378_v21, %v6728_v57 }
0x1db9   : > { %v6732_v0 = vmul.f32 %v14393_v4, %v14393_v4 }
0x1dbb   : > { %v6736_v60 = vsel %vm3138_vm9, %v6732_v0, 0.0  ;;  %v6787_v0 = vperm.slane %v6784_v37, 1 }
0x1dbc   : > { %6737 = vadd.xlane.f32.xlu0 %v6736_v60 }
0x1e27   : > { %v6735_v32 = vpop.xlane.xlu1 %6734 }
0x1e28   : > { %v6739_v27 = vmul.f32 %v6735_v32, %v14382_v56 }
0x1e2a   : > { %v6741_v31 = vadd.f32 1e-05, %v6739_v27 }
0x1e2c   : > { %10746 = vrsqrt.f32 %v6741_v31  ;;  %vm6749_vm7 = vweird.f32 %v6741_v31 }
0x1e2f   : > { %v6738_v24 = vpop.xlane.xlu0 %6737 }
0x1e30   : > { %v6740_v35 = vmul.f32 %v6738_v24, %v14382_v56 }
0x1e32   : > { %v10747_v10 = vpop.eup %10746  ;;  %v6742_v38 = vadd.f32 1e-05, %v6740_v35  ;;  %v6863_v35 = vld [vmem:[%s15092_s6 + $0x10] sm:$0xff] }
0x1e33   : > { %v6744_v6 = vmul.f32 %v10747_v10, %v6741_v31  ;;  %vm6750_vm6 = vweird.f32 %v10747_v10 }
0x1e34   : > { %10748 = vrsqrt.f32 %v6742_v38  ;;  %vm6751_vm8 = vmor %vm6749_vm7, %vm6750_vm6  ;;  %vm6759_vm12 = vweird.f32 %v6742_v38 }
0x1e35   : > { %v6745_v15 = vmul.f32 %v10747_v10, %v6744_v6 }
0x1e37   : > { %v6746_v52 = vmul.f32 0.5, %v6745_v15  ;;  %v6862_v15 = vld [vmem:[%s15092_s6 + $0x8] sm:$0xff] }
0x1e39   : > { %v6747_v7 = vsub.f32 1.5, %v6746_v52 }
0x1e3a   : > { %v10749_v1 = vpop.eup %10748 }
0x1e3b   : > { %v6748_v40 = vmul.f32 %v10747_v10, %v6747_v7  ;;  %v6754_v13 = vmul.f32 %v10749_v1, %v6742_v38  ;;  %vm6760_vm11 = vweird.f32 %v10749_v1 }
0x1e3c   : > { %vm6761_vm13 = vmor %vm6759_vm12, %vm6760_vm11 }
0x1e3d   : > { %v6755_v62 = vmul.f32 %v10749_v1, %v6754_v13  ;;  %v6752_v23 = vsel %vm6751_vm8, %v10747_v10, %v6748_v40 }
0x1e3e   : > { %v6763_v19 = vmul.f32 %v6752_v23, %v14386_v44 }
0x1e3f   : > { %v6756_v26 = vmul.f32 0.5, %v6755_v62 }
0x1e40   : > { %v6768_v30 = vmul.f32 %v10482_v46, %v6763_v19 }
0x1e41   : > { %v6757_v2 = vsub.f32 1.5, %v6756_v26  ;;  %v6865_v26 = vld [vmem:[%s15092_s6 + $0x20] sm:$0xff] }
0x1e42   : > { %v6773_v53 = vadd.f32 %v10483_v5, %v6768_v30 }
0x1e43   : > { %v6758_v36 = vmul.f32 %v10749_v1, %v6757_v2  ;;  %v6867_v2 = vld [vmem:[%s15092_s6 + $0x30] sm:$0xff] }
0x1e45   : > { %v6762_v12 = vsel %vm6761_vm13, %v10749_v1, %v6758_v36  ;;  %v6864_v1 = vld [vmem:[%s15092_s6 + $0x18] sm:$0xff] }
0x1e46   : > { %v6764_v22 = vmul.f32 %v6762_v12, %v14393_v4 }
0x1e48   : > { %v6769_v55 = vmul.f32 %v10482_v46, %v6764_v22  ;;  %v6866_v22 = vld [vmem:[%s15092_s6 + $0x28] sm:$0xff] }
0x1e4a   : > { %v6774_v48 = vadd.f32 %v10483_v5, %v6769_v55  ;;  %v6868_v55 = vld [vmem:[%s15092_s6 + $0x38] sm:$0xff]  ;;  %s15093_s6 = sld [smem:[#allocation124_spill]] }
0x1e4c   : > { %v6775_v61 = vpack.c.bf16 %v6774_v48, %v6773_v53 }
0x1e4e   : > { %9612 = vmatmul.msk.bf16.vlgmr.msrb.gmra.mxu0 %vm3138_vm9, %v6775_v61  ;;  %9613 = vmatmul.msk.bf16.vlgmr.msra.gmra.mxu1 %vm3138_vm9, %v6775_v61 }
0x1ecb   : > { %v6842_v25 = vpop.f32.mrf.mxu0  ;;  %v6856_v44 = vpop.f32.mrf.mxu1 }
0x1ecc   : > { %v6843_v57 = vadd.f32 %v6842_v25, %v6786_v43  ;;  %v6857_v60 = vadd.f32 %v6856_v44, %v6787_v0 }
0x1ece   : > { %6873 = vrot.lane.b32.xlu0 %v6843_v57, %s15078_s2  ;;  %v6934_v4 = vpack.c.bf16 %v6857_v60, %v6857_v60  ;;  %v6869_v8 = vmul.f32 0.25, %v6843_v57 }
0x1ed0   : > { %v6943_v58 = vunpack.c.l.b16 %v6934_v4 }
0x1ed3   : > { %v6844_v33 = vpop.f32.mrf.mxu0  ;;  %v6858_v50 = vpop.f32.mrf.mxu1 }
0x1ed4   : > { %v6845_v51 = vadd.f32 %v6844_v33, %v6786_v43  ;;  %v6859_v9 = vadd.f32 %v6858_v50, %v6787_v0 }
0x1ed6   : > { %v6935_v47 = vpack.c.bf16 %v6859_v9, %v6859_v9  ;;  %6970 = vrot.lane.b32.xlu1 %v6845_v51, %s15081_s3  ;;  %6875 = vrot.lane.b32.xlu2 %v6845_v51, %s15078_s2  ;;  %v6870_v59 = vmul.f32 0.25, %v6845_v51 }
0x1ed7   : > { %6964 = vrot.lane.b32.xlu0 %v6869_v8, %s15077_s1 }
0x1ed8   : > { %v6944_v34 = vunpack.c.l.b16 %v6935_v47 }
0x1eda   : > { %v14425_v29 = vpack.c.b16 %v6944_v34, %v6943_v58 }
0x1edc   : > { %6957 = vmatpush.bf16.msra.mxu0 %v14425_v29 }
0x1ede   : > { %7056 = vrot.lane.b32.xlu1 %v6843_v57, %s15091_s4  ;;  %6968 = vrot.lane.b32.xlu2 %v6843_v57, %s15081_s3 }
0x1edf   : > { %7146 = vrot.lane.b32.xlu0 %v6845_v51, %s15083_s5 }
0x1ee6   : > { %6966 = vrot.lane.b32.xlu1 %v6870_v59, %s15077_s1  ;;  %7058 = vrot.lane.b32.xlu2 %v6845_v51, %s15091_s4 }
0x1ee7   : > { %7052 = vrot.lane.b32.xlu0 %v6869_v8, %s15075_s0 }
0x1eee   : > { %7144 = vrot.lane.b32.xlu2 %v6843_v57, %s15083_s5  ;;  %7140 = vrot.lane.b32.xlu1 %v6869_v8, %s15076_s16 }
0x1eef   : > { %7142 = vrot.lane.b32.xlu0 %v6870_v59, %s15076_s16 }
0x1ef6   : > { %7054 = vrot.lane.b32.xlu2 %v6870_v59, %s15075_s0 }
0x1f30   : > { %v6876_v28 = vpop.permute.xlu2 %6875 }
0x1f31   : > { %9614 = vmatpush.xpose.msk.msra.mxu3 %vm3287_vm10, %v6876_v28 }
0x1f38   : > { %v6969_v17 = vpop.permute.xlu2 %6968 }
0x1f40   : > { %v7059_v41 = vpop.permute.xlu2 %7058  ;;  %v6874_v49 = vpop.permute.xlu0 %6873 }
0x1f41   : > { %9615 = vmatpush.xpose.msk.msra.mxu3 %vm3287_vm10, %v6874_v49 }
0x1f44   : > { %9616 = vmatmul.msk.f32.vlgmr.msra.gmra.mxu3 %vm3287_vm10, %v6869_v8 }
0x1f45   : > { %9624 = vmatpush.xpose.msk.msrb.mxu3 %vm3287_vm10, %v7059_v41 }
0x1f48   : > { %v6971_v63 = vpop.permute.xlu1 %6970  ;;  %v7145_v45 = vpop.permute.xlu2 %7144 }
0x1f49   : > { %v6965_v20 = vpop.permute.xlu0 %6964  ;;  %9619 = vmatpush.xpose.msk.msrb.mxu1 %vm3287_vm10, %v6971_v63 }
0x1f4c   : > { %9617 = vmatmul.msk.f32.gmra.mxu3 %vm3287_vm10, %v6870_v59 }
0x1f4d   : > { %9620 = vmatpush.xpose.msk.msrb.mxu1 %vm3287_vm10, %v6969_v17 }
0x1f50   : > { %v7057_v14 = vpop.permute.xlu1 %7056  ;;  %9621 = vmatmul.msk.f32.vlgmr.msrb.gmra.mxu1 %vm3287_vm10, %v6965_v20  ;;  %v7055_v11 = vpop.permute.xlu2 %7054 }
0x1f51   : > { %v7147_v32 = vpop.permute.xlu0 %7146  ;;  %9625 = vmatpush.xpose.msk.msrb.mxu3 %vm3287_vm10, %v7057_v14 }
0x1f52   : > { %9629 = vmatpush.xpose.msk.msra.mxu1 %vm3287_vm10, %v7147_v32 }
0x1f56   : > { %9630 = vmatpush.xpose.msk.msra.mxu1 %vm3287_vm10, %v7145_v45 }
0x1f58   : > { %v6967_v27 = vpop.permute.xlu1 %6966 }
0x1f59   : > { %v7053_v3 = vpop.permute.xlu0 %7052  ;;  %9622 = vmatmul.msk.f32.gmra.mxu1 %vm3287_vm10, %v6967_v27 }
0x1f5a   : > { %9626 = vmatmul.msk.f32.vlgmr.msrb.gmra.mxu3 %vm3287_vm10, %v7053_v3 }
0x1f60   : > { %v7141_v39 = vpop.permute.xlu1 %7140 }
0x1f61   : > { %9631 = vmatmul.msk.f32.vlgmr.msra.gmra.mxu1 %vm3287_vm10, %v7141_v39  ;;  %v7143_v31 = vpop.permute.xlu0 %7142 }
0x1f62   : > { %9627 = vmatmul.msk.f32.gmra.mxu3 %vm3287_vm10, %v7055_v11 }
0x1f69   : > { %9632 = vmatmul.msk.f32.gmra.mxu1 %vm3287_vm10, %v7143_v31 }
0x1fc7   : > { %v6904_v54 = vpop.f32.mrf.mxu3 }
0x1fc8   : > { %v6905_v16 = vadd.f32 %v6904_v54, %v6861_v42 }
0x1fca   : > { %v6910_v24 = vsel %vm3287_vm10, %v6905_v16, -inf }
0x1fcb   : > { %6911 = vmax.xlane.f32.xlu0 %v6910_v24 }
0x1fcd   : > { %v6997_v10 = vpop.f32.mrf.mxu1 }
0x1fce   : > { %v6998_v38 = vadd.f32 %v6997_v10, %v6863_v35 }
0x1fcf   : > { %v6907_v52 = vpop.f32.mrf.mxu3 }
0x1fd0   : > { %v7003_v6 = vsel %vm3287_vm10, %v6998_v38, -inf  ;;  %v6908_v7 = vadd.f32 %v6907_v52, %v6862_v15 }
0x1fd1   : > { %7004 = vmax.xlane.f32.xlu1 %v7003_v6 }
0x1fd2   : > { %v6913_v62 = vsel %vm3287_vm10, %v6908_v7, -inf }
0x1fd6   : > { %v7000_v40 = vpop.f32.mrf.mxu1 }
0x1fd7   : > { %v7001_v13 = vadd.f32 %v7000_v40, %v6864_v1 }
0x1fd9   : > { %6914 = vmax.xlane.f32.xlu1 %v6913_v62  ;;  %v7006_v23 = vsel %vm3287_vm10, %v7001_v13, -inf }
0x1fda   : > { %7007 = vmax.xlane.f32.xlu2 %v7006_v23 }
0x1fdd   : > { %v7085_v46 = vpop.f32.mrf.mxu3 }
0x1fde   : > { %v7086_v19 = vadd.f32 %v7085_v46, %v6865_v26  ;;  %v7173_v36 = vpop.f32.mrf.mxu1 }
0x1fdf   : > { %v7174_v12 = vadd.f32 %v7173_v36, %v6867_v2 }
0x1fe0   : > { %v7091_v5 = vsel %vm3287_vm10, %v7086_v19, -inf }
0x1fe1   : > { %7092 = vmax.xlane.f32.xlu1 %v7091_v5  ;;  %v7179_v30 = vsel %vm3287_vm10, %v7174_v12, -inf }
0x1fe2   : > { %7180 = vmax.xlane.f32.xlu2 %v7179_v30 }
0x1fe5   : > { %v7088_v53 = vpop.f32.mrf.mxu3 }
0x1fe6   : > { %v7089_v48 = vadd.f32 %v7088_v53, %v6866_v22  ;;  %v7176_v61 = vpop.f32.mrf.mxu1 }
0x1fe7   : > { %v7177_v37 = vadd.f32 %v7176_v61, %v6868_v55 }
0x1fe8   : > { %v7094_v43 = vsel %vm3287_vm10, %v7089_v48, -inf }
0x1fe9   : > { %v7182_v25 = vsel %vm3287_vm10, %v7177_v37, -inf }
0x1fea   : > { %7095 = vmax.xlane.f32.xlu2 %v7094_v43  ;;  %7183 = vmax.xlane.f32.xlu0 %v7182_v25 }
0x203e   : > { %v6912_v44 = vpop.xlane.xlu0 %6911 }
0x203f   : > { %v6916_v57 = vsub.f32 %v6905_v16, %v6912_v44 }
0x2041   : > { %v6918_v0 = vmul.f32 1.442695, %v6916_v57 }
0x2043   : > { %10750 = vpow2.f32 %v6918_v0 }
0x2044   : > { %v7005_v60 = vpop.xlane.xlu1 %7004 }
0x2045   : > { %v7009_v33 = vsub.f32 %v6998_v38, %v7005_v60 }
0x2047   : > { %v7011_v50 = vmul.f32 1.442695, %v7009_v33 }
0x2049   : > { %v10751_v4 = vpop.eup %10750  ;;  %10752 = vpow2.f32 %v7011_v50 }
0x204a   : > { %v6922_v51 = vsel %vm3287_vm10, %v10751_v4, 0.0 }
0x204b   : > { %6923 = vadd.xlane.f32.xlu2 %v6922_v51 }
0x204c   : > { %v6915_v9 = vpop.xlane.xlu1 %6914 }
0x204d   : > { %v6917_v8 = vsub.f32 %v6908_v7, %v6915_v9  ;;  %v7008_v47 = vpop.xlane.xlu2 %7007 }
0x204e   : > { %v7010_v58 = vsub.f32 %v7001_v13, %v7008_v47 }
0x204f   : > { %v14471_v34 = vpop.eup %10752  ;;  %v6920_v59 = vmul.f32 1.442695, %v6917_v8 }
0x2050   : > { %v7013_v28 = vmul.f32 1.442695, %v7010_v58  ;;  %v7015_v17 = vsel %vm3287_vm10, %v14471_v34, 0.0 }
0x2051   : > { %10754 = vpow2.f32 %v6920_v59  ;;  %7016 = vadd.xlane.f32.xlu0 %v7015_v17 }
0x2052   : > { %10756 = vpow2.f32 %v7013_v28 }
0x2054   : > { %v7093_v41 = vpop.xlane.xlu1 %7092 }
0x2055   : > { %v7181_v49 = vpop.xlane.xlu2 %7180  ;;  %v7097_v32 = vsub.f32 %v7086_v19, %v7093_v41 }
0x2056   : > { %v7185_v63 = vsub.f32 %v7174_v12, %v7181_v49 }
0x2057   : > { %v10755_v20 = vpop.eup %10754  ;;  %v7099_v39 = vmul.f32 1.442695, %v7097_v32 }
0x2058   : > { %v10757_v14 = vpop.eup %10756  ;;  %v7187_v45 = vmul.f32 1.442695, %v7185_v63  ;;  %v6925_v27 = vsel %vm3287_vm10, %v10755_v20, 0.0 }
0x2059   : > { %6926 = vadd.xlane.f32.xlu0 %v6925_v27  ;;  %v7018_v3 = vsel %vm3287_vm10, %v10757_v14, 0.0 }
0x205a   : > { %10758 = vpow2.f32 %v7187_v45  ;;  %7019 = vadd.xlane.f32.xlu1 %v7018_v3 }
0x205b   : > { %10760 = vpow2.f32 %v7099_v39 }
0x205d   : > { %v7184_v11 = vpop.xlane.xlu0 %7183  ;;  %v7096_v31 = vpop.xlane.xlu2 %7095 }
0x205e   : > { %v7186_v42 = vsub.f32 %v7177_v37, %v7184_v11  ;;  %v7098_v24 = vsub.f32 %v7089_v48, %v7096_v31 }
0x2060   : > { %v14477_v54 = vpop.eup %10758  ;;  %v7189_v16 = vmul.f32 1.442695, %v7186_v42  ;;  %v7101_v10 = vmul.f32 1.442695, %v7098_v24 }
0x2061   : > { %v7191_v35 = vsel %vm3287_vm10, %v14477_v54, 0.0  ;;  %v10761_v38 = vpop.eup %10760 }
0x2062   : > { %7192 = vadd.xlane.f32.xlu2 %v7191_v35  ;;  %10762 = vpow2.f32 %v7189_v16  ;;  %v7103_v15 = vsel %vm3287_vm10, %v10761_v38, 0.0 }
0x2063   : > { %10764 = vpow2.f32 %v7101_v10 }
0x2068   : > { %v10763_v6 = vpop.eup %10762 }
0x2069   : > { %v7194_v52 = vsel %vm3287_vm10, %v10763_v6, 0.0  ;;  %v10765_v7 = vpop.eup %10764 }
0x206a   : > { %7104 = vadd.xlane.f32.xlu2 %v7103_v15  ;;  %7195 = vadd.xlane.f32.xlu0 %v7194_v52  ;;  %v7106_v1 = vsel %vm3287_vm10, %v10765_v7, 0.0  ;;  %v9973_v52 = vld [vmem:[%s15093_s6 + $0x18] sm:$0xff] }
0x206b   : > { %7298 = vmatpush.bf16.msra.mxu3 %v9973_v52 }
0x2072   : > { %7107 = vadd.xlane.f32.xlu0 %v7106_v1  ;;  %v9971_v1 = vld [vmem:[%s15093_s6 + $0x8] sm:$0xff] }
0x2073   : > { %7032 = vrot.lane.b32.xlu1 %v14425_v29, %s15077_s1 }
0x2082   : > { %7208 = vrot.lane.b32.xlu2 %v14425_v29, %s15076_s16 }
0x2086   : > { %7120 = vrot.lane.b32.xlu0 %v14425_v29, %s15075_s0 }
0x20be   : > { %v6924_v40 = vpop.xlane.xlu2 %6923 }
0x20bf   : > { %10766 = vrcp.f32 %v6924_v40  ;;  %v9970_v40 = vld [vmem:[%s15093_s6] sm:$0xff] }
0x20c4   : > { %v7017_v13 = vpop.xlane.xlu0 %7016 }
0x20c5   : > { %v10767_v23 = vpop.eup %10766 }
0x20c6   : > { %v6930_v2 = vmul.f32 %v10767_v23, %v10751_v4 }
0x20c8   : > { %v6932_v19 = vpack.c.bf16 %v6930_v2, %v6930_v2 }
0x20ca   : > { %v6938_v22 = vunpack.c.l.b16 %v6932_v19 }
0x20cc   : > { %v6927_v62 = vpop.xlane.xlu0 %6926 }
0x20cd   : > { %10768 = vrcp.f32 %v6927_v62  ;;  %v7020_v26 = vpop.xlane.xlu1 %7019 }
0x20ce   : > { %10770 = vrcp.f32 %v7020_v26 }
0x20cf   : > { %10772 = vrcp.f32 %v7017_v13 }
0x20d3   : > { %v10769_v46 = vpop.eup %10768 }
0x20d4   : > { %v6931_v36 = vmul.f32 %v10769_v46, %v10755_v20  ;;  %v10771_v30 = vpop.eup %10770 }
0x20d5   : > { %v7193_v12 = vpop.xlane.xlu2 %7192  ;;  %v10773_v53 = vpop.eup %10772  ;;  %v7024_v48 = vmul.f32 %v10771_v30, %v10757_v14 }
0x20d6   : > { %v6933_v5 = vpack.c.bf16 %v6931_v36, %v6931_v36  ;;  %v7023_v61 = vmul.f32 %v10773_v53, %v14471_v34 }
0x20d7   : > { %v7026_v25 = vpack.c.bf16 %v7024_v48, %v7024_v48 }
0x20d8   : > { %v6939_v55 = vunpack.c.l.b16 %v6933_v5  ;;  %v7025_v44 = vpack.c.bf16 %v7023_v61, %v7023_v61  ;;  %v10484_v61 = vld [vmem:[#allocation35] ss:$0 sm:$0xff] }
0x20d9   : > { %v7030_v57 = vunpack.c.l.b16 %v7026_v25 }
0x20da   : > { %v6940_v29 = vpack.c.b16 %v6939_v55, %v6938_v22  ;;  %v7029_v0 = vunpack.c.l.b16 %v7025_v44 }
0x20dc   : > { %9618 = vmatmul.msk.bf16.vlgmr.msra.gmra.mxu0 %vm3287_vm10, %v6940_v29  ;;  %v7031_v4 = vpack.c.b16 %v7030_v57, %v7029_v0 }
0x20dd   : > { %v7105_v37 = vpop.xlane.xlu2 %7104  ;;  %v7196_v43 = vpop.xlane.xlu0 %7195 }
0x20de   : > { %10774 = vrcp.f32 %v7196_v43 }
0x20df   : > { %10776 = vrcp.f32 %v7193_v12 }
0x20e4   : > { %v10775_v51 = vpop.eup %10774 }
0x20e5   : > { %v7033_v60 = vpop.permute.xlu1 %7032  ;;  %v7209_v33 = vpop.permute.xlu2 %7208  ;;  %v7200_v8 = vmul.f32 %v10775_v51, %v10763_v6 }
0x20e6   : > { %v7108_v50 = vpop.xlane.xlu0 %7107  ;;  %7045 = vmatpush.bf16.msra.mxu2 %v7033_v60  ;;  %v10777_v9 = vpop.eup %10776 }
0x20e7   : > { %10778 = vrcp.f32 %v7108_v50  ;;  %v7199_v58 = vmul.f32 %v10777_v9, %v14477_v54  ;;  %v7202_v59 = vpack.c.bf16 %v7200_v8, %v7200_v8 }
0x20e8   : > { %10780 = vrcp.f32 %v7105_v37 }
0x20e9   : > { %9623 = vmatmul.msk.bf16.vlgmr.msra.gmra.mxu2 %vm3287_vm10, %v7031_v4  ;;  %v7201_v17 = vpack.c.bf16 %v7199_v58, %v7199_v58  ;;  %v7206_v49 = vunpack.c.l.b16 %v7202_v59 }
0x20ea   : > { %7221 = vmatpush.bf16.msrb.mxu2 %v7209_v33 }
0x20eb   : > { %v7205_v20 = vunpack.c.l.b16 %v7201_v17 }
0x20ed   : > { %v10779_v47 = vpop.eup %10778  ;;  %v7207_v32 = vpack.c.b16 %v7206_v49, %v7205_v20 }
0x20ee   : > { %v10781_v34 = vpop.eup %10780  ;;  %v7112_v28 = vmul.f32 %v10779_v47, %v10765_v7  ;;  %v9972_v7 = vld [vmem:[%s15093_s6 + $0x10] sm:$0xff]  ;;  %s15094_s6 = sld [smem:[#allocation117_spill]] }
0x20ef   : > { %v7111_v41 = vmul.f32 %v10781_v34, %v10761_v38  ;;  %7299 = vmatpush.bf16.msra.mxu3 %v9972_v7 }
0x20f0   : > { %v7114_v63 = vpack.c.bf16 %v7112_v28, %v7112_v28 }
0x20f1   : > { %v7113_v14 = vpack.c.bf16 %v7111_v41, %v7111_v41 }
0x20f2   : > { %v7118_v45 = vunpack.c.l.b16 %v7114_v63 }
0x20f3   : > { %v7117_v27 = vunpack.c.l.b16 %v7113_v14  ;;  %7300 = vmatpush.bf16.msra.mxu3 %v9971_v1 }
0x20f4   : > { %v9677_v59 = vld [vmem:[%s15094_s6 + $0x30] sm:$0xf]  ;;  %v9981_v28 = vld [vmem:[%s15094_s6 + $0x34] sm:$0xf0]  ;;  %v9980_v17 = vld [vmem:[%s15094_s6 + $0x34] sm:$0xf] }
0x20f5   : > { %v7119_v39 = vpack.c.b16 %v7118_v45, %v7117_v27  ;;  %v9678_v41 = vor.u32 %v9981_v28, %v9677_v59  ;;  %v9679_v49 = vld [vmem:[%s15094_s6 + $0x38] sm:$0xf0]  ;;  %v9669_v20 = vld [vmem:[%s15094_s6 + $0x20] sm:$0xf]  ;;  %v9979_v14 = vld [vmem:[%s15094_s6 + $0x24] sm:$0xf0] }
0x20f6   : > { %v9682_v63 = vor.u32 %v9980_v17, %v9679_v49  ;;  %v9670_v45 = vor.u32 %v9979_v14, %v9669_v20  ;;  %v9671_v27 = vld [vmem:[%s15094_s6 + $0x28] sm:$0xf0]  ;;  %v7381_v49 = vld [vmem:[%s15096_s7] sm:$0x3]  ;;  %s15097_s7 = sld [smem:[#allocation126_spill]] }
0x20f7   : > { %7301 = vmatpush.bf16.msra.mxu3 %v9970_v40  ;;  %v9655_v52 = vld [vmem:[%s15094_s6 + $0x8] sm:$0xf0]  ;;  %v7383_v14 = vperm.slane %v7381_v49, 0 }
0x20f8   : > { %v7121_v3 = vpop.permute.xlu0 %7120  ;;  %7448 = vmatpush.bf16.msrb.mxu1 %v9682_v63 }
0x20f9   : > { %9633 = vmatmul.msk.bf16.vlgmr.msrb.gmra.mxu2 %vm3287_vm10, %v7207_v32  ;;  %7133 = vmatpush.bf16.msrb.mxu0 %v7121_v3  ;;  %v9978_v32 = vld [vmem:[%s15094_s6 + $0x24] sm:$0xf] }
0x20fa   : > { %v9674_v3 = vor.u32 %v9978_v32, %v9671_v27  ;;  %v7384_v32 = vperm.slane %v7381_v49, 1 }
0x20fc   : > { %9628 = vmatmul.msk.bf16.vlgmr.msrb.gmra.mxu0 %vm3287_vm10, %v7119_v39  ;;  %7449 = vmatpush.bf16.msrb.mxu1 %v9674_v3  ;;  %v9661_v39 = vld [vmem:[%s15094_s6 + $0x10] sm:$0xf] }
0x20fd   : > { %7434 = vmatpush.bf16.msra.mxu0 %v9678_v41 }
0x2101   : > { %7435 = vmatpush.bf16.msra.mxu0 %v9670_v45 }
0x2159   : > { %v6959_v11 = vpop.f32.mrf.mxu0 }
0x2161   : > { %v6961_v42 = vpop.f32.mrf.mxu0 }
0x216c   : > { %v7047_v31 = vpop.f32.mrf.mxu2 }
0x2174   : > { %v7049_v54 = vpop.f32.mrf.mxu2 }
0x2175   : > { %v10431_v16 = vpack.i.bf16 %v7049_v54, %v7047_v31  ;;  %v9976_v31 = vld [vmem:[%s15094_s6 + $0x14] sm:$0xf]  ;;  %v9663_v54 = vld [vmem:[%s15094_s6 + $0x18] sm:$0xf0] }
0x2177   : > { %10432 = vrot.lane.b32.xlu1 %v10431_v16, %s15083_s5  ;;  %v9666_v16 = vor.u32 %v9976_v31, %v9663_v54 }
0x2179   : > { %v7135_v24 = vpop.f32.mrf.mxu0  ;;  %7450 = vmatpush.bf16.msrb.mxu1 %v9666_v16 }
0x217c   : > { %v7223_v35 = vpop.f32.mrf.mxu2 }
0x2181   : > { %v7137_v10 = vpop.f32.mrf.mxu0 }
0x2182   : > { %v10436_v38 = vpack.i.bf16 %v7137_v10, %v7135_v24  ;;  %v9653_v10 = vld [vmem:[%s15094_s6] sm:$0xf] }
0x2184   : > { %10437 = vrot.lane.b32.xlu1 %v10436_v38, %s15091_s4  ;;  %v7225_v6 = vpop.f32.mrf.mxu2  ;;  %v9975_v38 = vld [vmem:[%s15094_s6 + $0x4] sm:$0xf0] }
0x2185   : > { %v10441_v15 = vpack.i.bf16 %v7225_v6, %v7223_v35  ;;  %v9974_v6 = vld [vmem:[%s15094_s6 + $0x4] sm:$0xf] }
0x2186   : > { %v9658_v1 = vor.u32 %v9974_v6, %v9655_v52 }
0x2188   : > { %7451 = vmatpush.bf16.msrb.mxu1 %v9658_v1 }
0x218c   : > { %10442 = vrot.lane.b32.xlu1 %v10441_v15, %s15081_s3  ;;  %v9654_v15 = vor.u32 %v9975_v38, %v9653_v10 }
0x21e9   : > { %v10433_v13 = vpop.permute.xlu1 %10432 }
0x21ea   : > { %v10435_v23 = vunpack.i.h.bf16 %v10433_v13  ;;  %v10434_v26 = vunpack.i.l.bf16 %v10433_v13 }
0x21ec   : > { %v7252_v36 = vsel %vm3287_vm10, %v6959_v11, %v10434_v26  ;;  %v7253_v12 = vsel %vm3287_vm10, %v6961_v42, %v10435_v23  ;;  %v9977_v11 = vld [vmem:[%s15094_s6 + $0x14] sm:$0xf0]  ;;  %s15095_s6 = sld [smem:[#allocation119_spill]] }
0x21ed   : > { %v9662_v42 = vor.u32 %v9977_v11, %v9661_v39 }
0x21ef   : > { %7436 = vmatpush.bf16.msra.mxu0 %v9662_v42 }
0x21f2   : > { %v9985_v59 = vld [vmem:[%s15095_s6 + $0x18] sm:$0xff]  ;;  %v9984_v17 = vld [vmem:[%s15095_s6 + $0x10] sm:$0xff]  ;;  %v9983_v63 = vld [vmem:[%s15095_s6 + $0x8] sm:$0xff] }
0x21f3   : > { %7437 = vmatpush.bf16.msra.mxu0 %v9654_v15  ;;  %v9993_v28 = vld [vmem:[%s15095_s6 + $0x58] sm:$0xff]  ;;  %v9992_v41 = vld [vmem:[%s15095_s6 + $0x50] sm:$0xff]  ;;  %v9991_v20 = vld [vmem:[%s15095_s6 + $0x48] sm:$0xff] }
0x21f4   : > { %v9982_v3 = vld [vmem:[%s15095_s6] sm:$0xff] }
0x21f5   : > { %v9990_v39 = vld [vmem:[%s15095_s6 + $0x40] sm:$0xff] }
0x21f6   : > { %v10438_v62 = vpop.permute.xlu1 %10437 }
0x21f7   : > { %v10440_v2 = vunpack.i.h.bf16 %v10438_v62  ;;  %v10439_v46 = vunpack.i.l.bf16 %v10438_v62 }
0x21f9   : > { %v7255_v22 = vsel %vm2724_vm1, %v7253_v12, %v10440_v2  ;;  %v7254_v55 = vsel %vm2724_vm1, %v7252_v36, %v10439_v46 }
0x21fe   : > { %v10443_v19 = vpop.permute.xlu1 %10442 }
0x21ff   : > { %v10445_v5 = vunpack.i.h.bf16 %v10443_v19  ;;  %v10444_v30 = vunpack.i.l.bf16 %v10443_v19 }
0x2201   : > { %v7256_v53 = vsel %vm2680_vm0, %v7254_v55, %v10444_v30  ;;  %v7257_v29 = vsel %vm2680_vm0, %v7255_v22, %v10445_v5 }
0x2202   : > { %v7258_v48 = vpack.c.bf16 %v7257_v29, %v7256_v53  ;;  %v10485_v29 = vld [vmem:[#allocation43] ss:$0 sm:$0xff] }
0x2204   : > { %9650 = vmatmul.msk.bf16.vlgmr.msra.gmra.mxu3 %vm3138_vm9, %v7258_v48 }
0x2287   : > { %v7303_v37 = vpop.f32.mrf.mxu3 }
0x2288   : > { %v7308_v43 = vadd.f32 %v7303_v37, %v14374_v18 }
0x228a   : > { %v14511_v25 = vadd.f32 %v10484_v61, %v7308_v43  ;;  %v10486_v43 = vld [vmem:[#allocation41] ss:$0 sm:$0xff] }
0x228c   : > { %v7318_v44 = vsel %vm3138_vm9, %v14511_v25, 0.0 }
0x228d   : > { %7319 = vadd.xlane.f32.xlu0 %v7318_v44 }
0x228f   : > { %v7305_v57 = vpop.f32.mrf.mxu3 }
0x2290   : > { %v7309_v0 = vadd.f32 %v7305_v57, %v14378_v21 }
0x2292   : > { %v14516_v60 = vadd.f32 %v10484_v61, %v7309_v0 }
0x2294   : > { %v7321_v33 = vsel %vm3138_vm9, %v14516_v60, 0.0 }
0x2295   : > { %7322 = vadd.xlane.f32.xlu2 %v7321_v33 }
0x2300   : > { %v7320_v50 = vpop.xlane.xlu0 %7319 }
0x2301   : > { %v7324_v18 = vmul.f32 %v7320_v50, %v14382_v56 }
0x2303   : > { %v14522_v4 = vsub.f32 %v14511_v25, %v7324_v18 }
0x2305   : > { %v7328_v51 = vmul.f32 %v14522_v4, %v14522_v4 }
0x2307   : > { %v7330_v21 = vsel %vm3138_vm9, %v7328_v51, 0.0  ;;  %v9997_v51 = vld [vmem:[%s15095_s6 + $0x78] sm:$0xff] }
0x2308   : > { %7331 = vadd.xlane.f32.xlu1 %v7330_v21  ;;  %v7323_v9 = vpop.xlane.xlu2 %7322  ;;  %7638 = vmatpush.bf16.msrb.mxu3 %v9997_v51  ;;  %v9988_v21 = vld [vmem:[%s15095_s6 + $0x30] sm:$0xff] }
0x2309   : > { %v7325_v8 = vmul.f32 %v7323_v9, %v14382_v56  ;;  %v9996_v9 = vld [vmem:[%s15095_s6 + $0x70] sm:$0xff] }
0x230b   : > { %v14529_v47 = vsub.f32 %v14516_v60, %v7325_v8  ;;  %v9987_v8 = vld [vmem:[%s15095_s6 + $0x28] sm:$0xff] }
0x230c   : > { %7639 = vmatpush.bf16.msrb.mxu3 %v9996_v9 }
0x230d   : > { %v7329_v58 = vmul.f32 %v14529_v47, %v14529_v47 }
0x230f   : > { %v7333_v34 = vsel %vm3138_vm9, %v7329_v58, 0.0  ;;  %v9986_v58 = vld [vmem:[%s15095_s6 + $0x20] sm:$0xff] }
0x2310   : > { %7334 = vadd.xlane.f32.xlu0 %v7333_v34  ;;  %v9994_v34 = vld [vmem:[%s15095_s6 + $0x60] sm:$0xff] }
0x237b   : > { %v7332_v24 = vpop.xlane.xlu1 %7331 }
0x237c   : > { %v7336_v35 = vmul.f32 %v7332_v24, %v14382_v56 }
0x237e   : > { %v7338_v7 = vadd.f32 1e-05, %v7336_v35 }
0x2380   : > { %10782 = vrsqrt.f32 %v7338_v7  ;;  %vm7346_vm15 = vweird.f32 %v7338_v7 }
0x2383   : > { %v7335_v40 = vpop.xlane.xlu0 %7334 }
0x2384   : > { %v7337_v13 = vmul.f32 %v7335_v40, %v14382_v56 }
0x2386   : > { %v10783_v62 = vpop.eup %10782  ;;  %v7339_v23 = vadd.f32 1e-05, %v7337_v13 }
0x2387   : > { %v7341_v26 = vmul.f32 %v10783_v62, %v7338_v7  ;;  %vm7347_vm14 = vweird.f32 %v10783_v62 }
0x2388   : > { %10784 = vrsqrt.f32 %v7339_v23  ;;  %vm7348_vm2 = vmor %vm7346_vm15, %vm7347_vm14  ;;  %vm7356_vm4 = vweird.f32 %v7339_v23 }
0x2389   : > { %v7342_v2 = vmul.f32 %v10783_v62, %v7341_v26 }
0x238b   : > { %v7343_v46 = vmul.f32 0.5, %v7342_v2 }
0x238d   : > { %v7344_v19 = vsub.f32 1.5, %v7343_v46 }
0x238e   : > { %v10785_v36 = vpop.eup %10784 }
0x238f   : > { %v7345_v12 = vmul.f32 %v10783_v62, %v7344_v19  ;;  %v7351_v5 = vmul.f32 %v10785_v36, %v7339_v23  ;;  %vm7357_vm3 = vweird.f32 %v10785_v36 }
0x2390   : > { %vm7358_vm5 = vmor %vm7356_vm4, %vm7357_vm3 }
0x2391   : > { %v7352_v30 = vmul.f32 %v10785_v36, %v7351_v5  ;;  %v7349_v22 = vsel %vm7348_vm2, %v10783_v62, %v7345_v12 }
0x2392   : > { %v7360_v48 = vmul.f32 %v7349_v22, %v14522_v4  ;;  %v9989_v4 = vld [vmem:[%s15095_s6 + $0x38] sm:$0xff] }
0x2393   : > { %v7353_v55 = vmul.f32 0.5, %v7352_v30  ;;  %7624 = vmatpush.bf16.msra.mxu2 %v9989_v4 }
0x2394   : > { %v7365_v44 = vmul.f32 %v10485_v29, %v7360_v48 }
0x2395   : > { %v7354_v53 = vsub.f32 1.5, %v7353_v55 }
0x2396   : > { %v7370_v33 = vadd.f32 %v10486_v43, %v7365_v44 }
0x2397   : > { %v7355_v61 = vmul.f32 %v10785_v36, %v7354_v53  ;;  %7625 = vmatpush.bf16.msra.mxu2 %v9988_v21 }
0x2399   : > { %v7359_v37 = vsel %vm7358_vm5, %v10785_v36, %v7355_v61 }
0x239a   : > { %v7361_v57 = vmul.f32 %v7359_v37, %v14529_v47  ;;  %v9995_v47 = vld [vmem:[%s15095_s6 + $0x68] sm:$0xff] }
0x239b   : > { %7626 = vmatpush.bf16.msra.mxu2 %v9987_v8  ;;  %7640 = vmatpush.bf16.msrb.mxu3 %v9995_v47 }
0x239c   : > { %v7366_v0 = vmul.f32 %v10485_v29, %v7361_v57 }
0x239e   : > { %v7371_v50 = vadd.f32 %v10486_v43, %v7366_v0 }
0x239f   : > { %7627 = vmatpush.bf16.msra.mxu2 %v9986_v58  ;;  %7641 = vmatpush.bf16.msrb.mxu3 %v9994_v34  ;;  %v10487_v34 = vld [vmem:[#allocation37] ss:$0 sm:$0xff] }
0x23a0   : > { %v7372_v18 = vpack.c.bf16 %v7371_v50, %v7370_v33 }
0x23a2   : > { %9683 = vmatmul.msk.bf16.vlgmr.msra.gmra.mxu0 %vm3138_vm9, %v7372_v18  ;;  %9684 = vmatmul.msk.bf16.vlgmr.msrb.gmra.mxu1 %vm3138_vm9, %v7372_v18 }
0x23a3   : > { %7628 = vmatpush.bf16.msra.mxu2 %v9985_v59  ;;  %7642 = vmatpush.bf16.msrb.mxu3 %v9993_v28 }
0x23a7   : > { %7629 = vmatpush.bf16.msra.mxu2 %v9984_v17  ;;  %7643 = vmatpush.bf16.msrb.mxu3 %v9992_v41 }
0x23ab   : > { %7630 = vmatpush.bf16.msra.mxu2 %v9983_v63  ;;  %7644 = vmatpush.bf16.msrb.mxu3 %v9991_v20 }
0x23af   : > { %7631 = vmatpush.bf16.msra.mxu2 %v9982_v3  ;;  %7645 = vmatpush.bf16.msrb.mxu3 %v9990_v39 }
0x241f   : > { %v7439_v45 = vpop.f32.mrf.mxu0  ;;  %v7453_v27 = vpop.f32.mrf.mxu1 }
0x2420   : > { %v7440_v11 = vadd.f32 %v7439_v45, %v7383_v14  ;;  %v7454_v31 = vadd.f32 %v7453_v27, %v7384_v32 }
0x2422   : > { %v7458_v42 = vmul.f32 %v7440_v11, %v7440_v11  ;;  %v7459_v54 = vmul.f32 %v7454_v31, %v7454_v31 }
0x2424   : > { %v7462_v16 = vmul.f32 %v7458_v42, %v7440_v11  ;;  %v7463_v24 = vmul.f32 %v7459_v54, %v7454_v31 }
0x2426   : > { %v7466_v35 = vmul.f32 0.044715, %v7462_v16  ;;  %v7467_v10 = vmul.f32 0.044715, %v7463_v24  ;;  %v9775_v16 = vld [vmem:[%s12395_s14 + $0x30] sm:$0xf] }
0x2427   : > { %v7441_v38 = vpop.f32.mrf.mxu0  ;;  %v7455_v6 = vpop.f32.mrf.mxu1  ;;  %v10005_v24 = vld [vmem:[%s12395_s14 + $0x34] sm:$0xf0] }
0x2428   : > { %v7470_v15 = vadd.f32 %v7466_v35, %v7440_v11  ;;  %v7471_v52 = vadd.f32 %v7467_v10, %v7454_v31  ;;  %v7442_v7 = vadd.f32 %v7441_v38, %v7383_v14  ;;  %v7456_v1 = vadd.f32 %v7455_v6, %v7384_v32  ;;  %v10004_v35 = vld [vmem:[%s12395_s14 + $0x34] sm:$0xf]  ;;  %v9777_v38 = vld [vmem:[%s12395_s14 + $0x38] sm:$0xf0] }
0x2429   : > { %v9776_v10 = vor.u32 %v10005_v24, %v9775_v16  ;;  %v9780_v6 = vor.u32 %v10004_v35, %v9777_v38 }
0x242a   : > { %v7474_v40 = vmul.f32 0.7978846, %v7470_v15  ;;  %v7460_v13 = vmul.f32 %v7442_v7, %v7442_v7  ;;  %v7461_v62 = vmul.f32 %v7456_v1, %v7456_v1  ;;  %v7475_v23 = vmul.f32 0.7978846, %v7471_v52  ;;  %v9767_v15 = vld [vmem:[%s12395_s14 + $0x20] sm:$0xf] }
0x242b   : > { %7778 = vmatpush.bf16.msrb.mxu0 %v9776_v10  ;;  %7792 = vmatpush.bf16.msra.mxu1 %v9780_v6  ;;  %v10003_v52 = vld [vmem:[%s12395_s14 + $0x24] sm:$0xf0] }
0x242c   : > { %v7464_v26 = vmul.f32 %v7460_v13, %v7442_v7  ;;  %v7465_v2 = vmul.f32 %v7461_v62, %v7456_v1  ;;  %10786 = vtanh.f32 %v7474_v40  ;;  %v9769_v40 = vld [vmem:[%s12395_s14 + $0x28] sm:$0xf0]  ;;  %v9759_v62 = vld [vmem:[%s12395_s14 + $0x10] sm:$0xf] }
0x242d   : > { %10788 = vtanh.f32 %v7475_v23  ;;  %v10001_v23 = vld [vmem:[%s12395_s14 + $0x14] sm:$0xf0] }
0x242e   : > { %v7468_v46 = vmul.f32 0.044715, %v7464_v26  ;;  %v7469_v19 = vmul.f32 0.044715, %v7465_v2  ;;  %v10000_v26 = vld [vmem:[%s12395_s14 + $0x14] sm:$0xf]  ;;  %v9760_v2 = vor.u32 %v10001_v23, %v9759_v62 }
0x2430   : > { %v7472_v36 = vadd.f32 %v7468_v46, %v7442_v7  ;;  %v7473_v12 = vadd.f32 %v7469_v19, %v7456_v1  ;;  %v9761_v46 = vld [vmem:[%s12395_s14 + $0x18] sm:$0xf0] }
0x2431   : > { %v9764_v19 = vor.u32 %v10000_v26, %v9761_v46 }
0x2432   : > { %v7476_v5 = vmul.f32 0.7978846, %v7472_v36  ;;  %v7477_v30 = vmul.f32 0.7978846, %v7473_v12  ;;  %v10787_v22 = vpop.eup %10786 }
0x2433   : > { %v10789_v55 = vpop.eup %10788  ;;  %v7482_v53 = vadd.f32 1.0, %v10787_v22  ;;  %v9998_v22 = vld [vmem:[%s12395_s14 + $0x4] sm:$0xf] }
0x2434   : > { %10790 = vtanh.f32 %v7476_v5  ;;  %v7483_v29 = vadd.f32 1.0, %v10789_v55  ;;  %v9751_v5 = vld [vmem:[%s12395_s14] sm:$0xf] }
0x2435   : > { %10792 = vtanh.f32 %v7477_v30  ;;  %v7486_v37 = vmul.f32 0.5, %v7482_v53  ;;  %v9999_v30 = vld [vmem:[%s12395_s14 + $0x4] sm:$0xf0]  ;;  %v9753_v53 = vld [vmem:[%s12395_s14 + $0x8] sm:$0xf0] }
0x2436   : > { %v7487_v44 = vmul.f32 0.5, %v7483_v29  ;;  %v9752_v55 = vor.u32 %v9999_v30, %v9751_v5 }
0x2437   : > { %v7490_v50 = vmul.f32 %v7486_v37, %v7440_v11 }
0x2438   : > { %v7491_v4 = vmul.f32 %v7487_v44, %v7454_v31 }
0x243a   : > { %v10791_v48 = vpop.eup %10790 }
0x243b   : > { %v10793_v61 = vpop.eup %10792  ;;  %v7484_v43 = vadd.f32 1.0, %v10791_v48  ;;  %v9756_v48 = vor.u32 %v9998_v22, %v9753_v53  ;;  %v7802_v53 = vld [vmem:[%s12385_s13] sm:$0xff] }
0x243c   : > { %v7485_v57 = vadd.f32 1.0, %v10793_v61 }
0x243d   : > { %v7488_v0 = vmul.f32 0.5, %v7484_v43 }
0x243e   : > { %v7489_v33 = vmul.f32 0.5, %v7485_v57 }
0x243f   : > { %v7492_v18 = vmul.f32 %v7488_v0, %v7442_v7  ;;  %v10002_v7 = vld [vmem:[%s12395_s14 + $0x24] sm:$0xf] }
0x2440   : > { %v7493_v51 = vmul.f32 %v7489_v33, %v7456_v1  ;;  %v9768_v1 = vor.u32 %v10003_v52, %v9767_v15  ;;  %v9772_v13 = vor.u32 %v10002_v7, %v9769_v40 }
0x2441   : > { %v7494_v21 = vpack.c.bf16 %v7492_v18, %v7490_v50 }
0x2442   : > { %v7495_v9 = vpack.c.bf16 %v7493_v51, %v7491_v4  ;;  %7779 = vmatpush.bf16.msrb.mxu0 %v9768_v1  ;;  %7793 = vmatpush.bf16.msra.mxu1 %v9772_v13 }
0x2443   : > { %7632 = vmatmul.bf16.vlgmr.msra.gmra.mxu2 %v7494_v21 }
0x2444   : > { %7646 = vmatmul.bf16.vlgmr.msrb.gmra.mxu3 %v7495_v9 }
0x2446   : > { %7780 = vmatpush.bf16.msrb.mxu0 %v9760_v2  ;;  %7794 = vmatpush.bf16.msra.mxu1 %v9764_v19 }
0x244a   : > { %7781 = vmatpush.bf16.msrb.mxu0 %v9752_v55  ;;  %7795 = vmatpush.bf16.msra.mxu1 %v9756_v48  ;;  %v7804_v48 = vld [vmem:[%s12385_s13 + $0x10] sm:$0xff] }
0x24c6   : > { %v7633_v8 = vpop.f32.mrf.mxu2 }
0x24c7   : > { %v7647_v47 = vpop.f32.mrf.mxu3 }
0x24c8   : > { %v7648_v58 = vadd.f32 %v7647_v47, %v7633_v8 }
0x24ca   : > { %v7652_v59 = vadd.f32 %v7648_v58, %v14511_v25  ;;  %v10488_v58 = vld [vmem:[#allocation49] ss:$0 sm:$0xff] }
0x24cc   : > { %v14574_v28 = vadd.f32 %v10487_v34, %v7652_v59 }
0x24ce   : > { %v7662_v17 = vsel %vm3138_vm9, %v14574_v28, 0.0  ;;  %v7635_v41 = vpop.f32.mrf.mxu2 }
0x24cf   : > { %v7649_v49 = vpop.f32.mrf.mxu3  ;;  %7663 = vadd.xlane.f32.xlu2 %v7662_v17 }
0x24d0   : > { %v7650_v63 = vadd.f32 %v7649_v49, %v7635_v41  ;;  %v10489_v41 = vld [vmem:[#allocation47] ss:$0 sm:$0xff] }
0x24d2   : > { %v7653_v20 = vadd.f32 %v7650_v63, %v14516_v60 }
0x24d4   : > { %v14579_v14 = vadd.f32 %v10487_v34, %v7653_v20 }
0x24d6   : > { %v7665_v32 = vsel %vm3138_vm9, %v14579_v14, 0.0 }
0x24d7   : > { %7666 = vadd.xlane.f32.xlu1 %v7665_v32 }
0x2542   : > { %v7664_v25 = vpop.xlane.xlu2 %7663 }
0x2543   : > { %v7668_v45 = vmul.f32 %v7664_v25, %v14382_v56 }
0x2545   : > { %v14585_v27 = vsub.f32 %v14574_v28, %v7668_v45 }
0x2547   : > { %v7672_v3 = vmul.f32 %v14585_v27, %v14585_v27 }
0x2549   : > { %v7674_v60 = vsel %vm3138_vm9, %v7672_v3, 0.0  ;;  %v7725_v3 = vld [vmem:[%s15097_s7] sm:$0x3]  ;;  %s15105_s7 = sld [smem:[#allocation73_spill]] }
0x254a   : > { %7675 = vadd.xlane.f32.xlu0 %v7674_v60  ;;  %v7667_v39 = vpop.xlane.xlu1 %7666  ;;  %v7727_v60 = vperm.slane %v7725_v3, 0 }
0x254b   : > { %v7669_v11 = vmul.f32 %v7667_v39, %v14382_v56 }
0x254d   : > { %v14592_v31 = vsub.f32 %v14579_v14, %v7669_v11 }
0x254f   : > { %v7673_v42 = vmul.f32 %v14592_v31, %v14592_v31 }
0x2551   : > { %v7677_v54 = vsel %vm3138_vm9, %v7673_v42, 0.0  ;;  %v7728_v42 = vperm.slane %v7725_v3, 1 }
0x2552   : > { %7678 = vadd.xlane.f32.xlu2 %v7677_v54 }
0x25bd   : > { %v7676_v36 = vpop.xlane.xlu0 %7675 }
0x25be   : > { %v7680_v12 = vmul.f32 %v7676_v36, %v14382_v56 }
0x25c0   : > { %v7682_v29 = vadd.f32 1e-05, %v7680_v12 }
0x25c2   : > { %10794 = vrsqrt.f32 %v7682_v29  ;;  %vm7690_vm7 = vweird.f32 %v7682_v29 }
0x25c5   : > { %v7679_v61 = vpop.xlane.xlu2 %7678 }
0x25c6   : > { %v7681_v37 = vmul.f32 %v7679_v61, %v14382_v56 }
0x25c8   : > { %v10795_v43 = vpop.eup %10794  ;;  %v7683_v44 = vadd.f32 1e-05, %v7681_v37 }
0x25c9   : > { %v7685_v57 = vmul.f32 %v10795_v43, %v7682_v29  ;;  %vm7691_vm6 = vweird.f32 %v10795_v43 }
0x25ca   : > { %10796 = vrsqrt.f32 %v7683_v44  ;;  %vm7692_vm8 = vmor %vm7690_vm7, %vm7691_vm6  ;;  %vm7700_vm12 = vweird.f32 %v7683_v44 }
0x25cb   : > { %v7686_v0 = vmul.f32 %v10795_v43, %v7685_v57 }
0x25cd   : > { %v7687_v33 = vmul.f32 0.5, %v7686_v0  ;;  %v7803_v0 = vld [vmem:[%s12385_s13 + $0x8] sm:$0xff] }
0x25cf   : > { %v7688_v50 = vsub.f32 1.5, %v7687_v33 }
0x25d0   : > { %v10797_v18 = vpop.eup %10796 }
0x25d1   : > { %v7689_v4 = vmul.f32 %v10795_v43, %v7688_v50  ;;  %v7695_v51 = vmul.f32 %v10797_v18, %v7683_v44  ;;  %vm7701_vm11 = vweird.f32 %v10797_v18  ;;  %v7805_v50 = vld [vmem:[%s12385_s13 + $0x18] sm:$0xff] }
0x25d2   : > { %vm7702_vm13 = vmor %vm7700_vm12, %vm7701_vm11 }
0x25d3   : > { %v7696_v21 = vmul.f32 %v10797_v18, %v7695_v51  ;;  %v7693_v9 = vsel %vm7692_vm8, %v10795_v43, %v7689_v4 }
0x25d4   : > { %v7704_v34 = vmul.f32 %v7693_v9, %v14585_v27 }
0x25d5   : > { %v7697_v8 = vmul.f32 0.5, %v7696_v21 }
0x25d6   : > { %v7709_v49 = vmul.f32 %v10488_v58, %v7704_v34 }
0x25d7   : > { %v7698_v47 = vsub.f32 1.5, %v7697_v8  ;;  %v7806_v8 = vld [vmem:[%s12385_s13 + $0x20] sm:$0xff] }
0x25d8   : > { %v7714_v32 = vadd.f32 %v10489_v41, %v7709_v49 }
0x25d9   : > { %v7699_v59 = vmul.f32 %v10797_v18, %v7698_v47 }
0x25db   : > { %v7703_v17 = vsel %vm7702_vm13, %v10797_v18, %v7699_v59 }
0x25dc   : > { %v7705_v63 = vmul.f32 %v7703_v17, %v14592_v31 }
0x25de   : > { %v7710_v20 = vmul.f32 %v10488_v58, %v7705_v63  ;;  %v7808_v58 = vld [vmem:[%s12385_s13 + $0x30] sm:$0xff]  ;;  %v7807_v63 = vld [vmem:[%s12385_s13 + $0x28] sm:$0xff] }
0x25e0   : > { %v7715_v25 = vadd.f32 %v10489_v41, %v7710_v20 }
0x25e2   : > { %v7716_v45 = vpack.c.bf16 %v7715_v25, %v7714_v32  ;;  %v7809_v32 = vld [vmem:[%s12385_s13 + $0x38] sm:$0xff] }
0x25e4   : > { %9781 = vmatmul.msk.bf16.vlgmr.msrb.gmra.mxu0 %vm3138_vm9, %v7716_v45  ;;  %9782 = vmatmul.msk.bf16.vlgmr.msra.gmra.mxu1 %vm3138_vm9, %v7716_v45 }
0x2661   : > { %v7783_v39 = vpop.f32.mrf.mxu0  ;;  %v7797_v27 = vpop.f32.mrf.mxu1 }
0x2662   : > { %v7784_v11 = vadd.f32 %v7783_v39, %v7727_v60  ;;  %v7798_v16 = vadd.f32 %v7797_v27, %v7728_v42 }
0x2664   : > { %7909 = vrot.lane.b32.xlu0 %v7784_v11, %s15081_s3  ;;  %v7810_v54 = vmul.f32 0.25, %v7784_v11  ;;  %v7875_v35 = vpack.c.bf16 %v7798_v16, %v7798_v16 }
0x2666   : > { %7905 = vrot.lane.b32.xlu2 %v7810_v54, %s15077_s1  ;;  %v7884_v52 = vunpack.c.l.b16 %v7875_v35 }
0x2669   : > { %v7785_v31 = vpop.f32.mrf.mxu0  ;;  %v7799_v24 = vpop.f32.mrf.mxu1 }
0x266a   : > { %v7786_v10 = vadd.f32 %v7785_v31, %v7727_v60  ;;  %v7800_v38 = vadd.f32 %v7799_v24, %v7728_v42 }
0x266c   : > { %v7876_v6 = vpack.c.bf16 %v7800_v38, %v7800_v38  ;;  %7911 = vrot.lane.b32.xlu1 %v7786_v10, %s15081_s3  ;;  %7816 = vrot.lane.b32.xlu0 %v7786_v10, %s15078_s2  ;;  %v7811_v15 = vmul.f32 0.25, %v7786_v10 }
0x266e   : > { %v7885_v7 = vunpack.c.l.b16 %v7876_v6  ;;  %7907 = vrot.lane.b32.xlu2 %v7811_v15, %s15077_s1 }
0x2670   : > { %v14625_v1 = vpack.c.b16 %v7885_v7, %v7884_v52 }
0x2672   : > { %7898 = vmatpush.bf16.msrb.mxu1 %v14625_v1 }
0x2674   : > { %7814 = vrot.lane.b32.xlu1 %v7784_v11, %s15078_s2  ;;  %8087 = vrot.lane.b32.xlu0 %v7786_v10, %s15083_s5  ;;  %s15099_s2 = sld [smem:[#allocation130_spill]] }
0x2676   : > { %8081 = vrot.lane.b32.xlu2 %v7810_v54, %s15076_s16 }
0x267c   : > { %8085 = vrot.lane.b32.xlu1 %v7784_v11, %s15083_s5  ;;  %7999 = vrot.lane.b32.xlu0 %v7786_v10, %s15091_s4 }
0x267e   : > { %8083 = vrot.lane.b32.xlu2 %v7811_v15, %s15076_s16 }
0x2684   : > { %7997 = vrot.lane.b32.xlu1 %v7784_v11, %s15091_s4  ;;  %7993 = vrot.lane.b32.xlu0 %v7810_v54, %s15075_s0 }
0x268c   : > { %7995 = vrot.lane.b32.xlu1 %v7811_v15, %s15075_s0 }
0x26c0   : > { %v7906_v23 = vpop.permute.xlu2 %7905 }
0x26c8   : > { %v7908_v46 = vpop.permute.xlu2 %7907 }
0x26d0   : > { %v8082_v12 = vpop.permute.xlu2 %8081 }
0x26d6   : > { %v7910_v40 = vpop.permute.xlu0 %7909 }
0x26d8   : > { %v8084_v22 = vpop.permute.xlu2 %8083 }
0x26de   : > { %v7912_v13 = vpop.permute.xlu1 %7911  ;;  %v7817_v62 = vpop.permute.xlu0 %7816 }
0x26df   : > { %9783 = vmatpush.xpose.msk.msra.mxu0 %vm3287_vm10, %v7817_v62  ;;  %9788 = vmatpush.xpose.msk.msrb.mxu2 %vm3287_vm10, %v7912_v13 }
0x26e3   : > { %9789 = vmatpush.xpose.msk.msrb.mxu2 %vm3287_vm10, %v7910_v40 }
0x26e6   : > { %v7815_v26 = vpop.permute.xlu1 %7814  ;;  %v8088_v2 = vpop.permute.xlu0 %8087  ;;  %9790 = vmatmul.msk.f32.vlgmr.msrb.gmra.mxu2 %vm3287_vm10, %v7906_v23 }
0x26e7   : > { %9784 = vmatpush.xpose.msk.msra.mxu0 %vm3287_vm10, %v7815_v26  ;;  %9798 = vmatpush.xpose.msk.msra.mxu2 %vm3287_vm10, %v8088_v2 }
0x26ea   : > { %9785 = vmatmul.msk.f32.vlgmr.msra.gmra.mxu0 %vm3287_vm10, %v7810_v54 }
0x26ee   : > { %v8086_v19 = vpop.permute.xlu1 %8085  ;;  %v8000_v36 = vpop.permute.xlu0 %7999  ;;  %9791 = vmatmul.msk.f32.gmra.mxu2 %vm3287_vm10, %v7908_v46 }
0x26ef   : > { %9793 = vmatpush.xpose.msk.msrb.mxu0 %vm3287_vm10, %v8000_v36  ;;  %9799 = vmatpush.xpose.msk.msra.mxu2 %vm3287_vm10, %v8086_v19 }
0x26f2   : > { %9786 = vmatmul.msk.f32.gmra.mxu0 %vm3287_vm10, %v7811_v15 }
0x26f6   : > { %v7998_v5 = vpop.permute.xlu1 %7997  ;;  %9800 = vmatmul.msk.f32.vlgmr.msra.gmra.mxu2 %vm3287_vm10, %v8082_v12  ;;  %v7994_v30 = vpop.permute.xlu0 %7993 }
0x26f7   : > { %9794 = vmatpush.xpose.msk.msrb.mxu0 %vm3287_vm10, %v7998_v5 }
0x26fa   : > { %9795 = vmatmul.msk.f32.vlgmr.msrb.gmra.mxu0 %vm3287_vm10, %v7994_v30 }
0x26fe   : > { %9801 = vmatmul.msk.f32.gmra.mxu2 %vm3287_vm10, %v8084_v22  ;;  %v7996_v55 = vpop.permute.xlu1 %7995 }
0x2702   : > { %9796 = vmatmul.msk.f32.gmra.mxu0 %vm3287_vm10, %v7996_v55 }
0x2767   : > { %v7845_v29 = vpop.f32.mrf.mxu0 }
0x2768   : > { %v7846_v61 = vadd.f32 %v7845_v29, %v7802_v53 }
0x2769   : > { %v7938_v37 = vpop.f32.mrf.mxu2 }
0x276a   : > { %v7939_v43 = vadd.f32 %v7938_v37, %v7804_v48  ;;  %v7851_v44 = vsel %vm3287_vm10, %v7846_v61, -inf }
0x276b   : > { %7852 = vmax.xlane.f32.xlu1 %v7851_v44 }
0x276c   : > { %v7944_v57 = vsel %vm3287_vm10, %v7939_v43, -inf }
0x276d   : > { %7945 = vmax.xlane.f32.xlu2 %v7944_v57 }
0x276f   : > { %v7848_v33 = vpop.f32.mrf.mxu0 }
0x2770   : > { %v7849_v18 = vadd.f32 %v7848_v33, %v7803_v0 }
0x2771   : > { %v7941_v4 = vpop.f32.mrf.mxu2 }
0x2772   : > { %v7942_v51 = vadd.f32 %v7941_v4, %v7805_v50  ;;  %v7854_v9 = vsel %vm3287_vm10, %v7849_v18, -inf }
0x2774   : > { %v7947_v21 = vsel %vm3287_vm10, %v7942_v51, -inf }
0x2775   : > { %7948 = vmax.xlane.f32.xlu0 %v7947_v21  ;;  %7855 = vmax.xlane.f32.xlu2 %v7854_v9 }
0x2777   : > { %v8026_v47 = vpop.f32.mrf.mxu0 }
0x2778   : > { %v8027_v34 = vadd.f32 %v8026_v47, %v7806_v8 }
0x2779   : > { %v8114_v59 = vpop.f32.mrf.mxu2 }
0x277a   : > { %v8115_v17 = vadd.f32 %v8114_v59, %v7808_v58  ;;  %v8032_v49 = vsel %vm3287_vm10, %v8027_v34, -inf }
0x277c   : > { %v8120_v41 = vsel %vm3287_vm10, %v8115_v17, -inf }
0x277d   : > { %8121 = vmax.xlane.f32.xlu0 %v8120_v41  ;;  %8033 = vmax.xlane.f32.xlu2 %v8032_v49 }
0x277f   : > { %v8029_v20 = vpop.f32.mrf.mxu0 }
0x2780   : > { %v8030_v25 = vadd.f32 %v8029_v20, %v7807_v63 }
0x2781   : > { %v8117_v45 = vpop.f32.mrf.mxu2 }
0x2782   : > { %v8118_v3 = vadd.f32 %v8117_v45, %v7809_v32  ;;  %v8035_v60 = vsel %vm3287_vm10, %v8030_v25, -inf }
0x2784   : > { %v8123_v39 = vsel %vm3287_vm10, %v8118_v3, -inf }
0x2785   : > { %8036 = vmax.xlane.f32.xlu0 %v8035_v60  ;;  %8124 = vmax.xlane.f32.xlu1 %v8123_v39 }
0x27de   : > { %v7853_v27 = vpop.xlane.xlu1 %7852 }
0x27df   : > { %v7857_v11 = vsub.f32 %v7846_v61, %v7853_v27 }
0x27e0   : > { %v7946_v42 = vpop.xlane.xlu2 %7945 }
0x27e1   : > { %v7859_v54 = vmul.f32 1.442695, %v7857_v11  ;;  %v7950_v16 = vsub.f32 %v7939_v43, %v7946_v42 }
0x27e3   : > { %10798 = vpow2.f32 %v7859_v54  ;;  %v7952_v31 = vmul.f32 1.442695, %v7950_v16 }
0x27e5   : > { %10800 = vpow2.f32 %v7952_v31 }
0x27e8   : > { %v7949_v24 = vpop.xlane.xlu0 %7948  ;;  %v7856_v35 = vpop.xlane.xlu2 %7855 }
0x27e9   : > { %v10799_v10 = vpop.eup %10798  ;;  %v7951_v38 = vsub.f32 %v7942_v51, %v7949_v24  ;;  %v7858_v6 = vsub.f32 %v7849_v18, %v7856_v35 }
0x27ea   : > { %v7863_v15 = vsel %vm3287_vm10, %v10799_v10, 0.0 }
0x27eb   : > { %v10801_v52 = vpop.eup %10800  ;;  %v7954_v7 = vmul.f32 1.442695, %v7951_v38  ;;  %v7861_v40 = vmul.f32 1.442695, %v7858_v6  ;;  %7864 = vadd.xlane.f32.xlu0 %v7863_v15 }
0x27ec   : > { %v7956_v13 = vsel %vm3287_vm10, %v10801_v52, 0.0 }
0x27ed   : > { %10802 = vpow2.f32 %v7954_v7  ;;  %7957 = vadd.xlane.f32.xlu1 %v7956_v13 }
0x27ee   : > { %10804 = vpow2.f32 %v7861_v40 }
0x27f0   : > { %v8122_v62 = vpop.xlane.xlu0 %8121  ;;  %v8034_v23 = vpop.xlane.xlu2 %8033 }
0x27f1   : > { %v8038_v26 = vsub.f32 %v8027_v34, %v8034_v23  ;;  %v8126_v36 = vsub.f32 %v8115_v17, %v8122_v62 }
0x27f3   : > { %v10803_v2 = vpop.eup %10802  ;;  %v8040_v46 = vmul.f32 1.442695, %v8038_v26  ;;  %v8128_v30 = vmul.f32 1.442695, %v8126_v36 }
0x27f4   : > { %v10805_v19 = vpop.eup %10804  ;;  %v7959_v12 = vsel %vm3287_vm10, %v10803_v2, 0.0 }
0x27f5   : > { %7960 = vadd.xlane.f32.xlu2 %v7959_v12  ;;  %v7866_v5 = vsel %vm3287_vm10, %v10805_v19, 0.0  ;;  %10806 = vpow2.f32 %v8040_v46 }
0x27f6   : > { %7867 = vadd.xlane.f32.xlu1 %v7866_v5  ;;  %10808 = vpow2.f32 %v8128_v30 }
0x27f8   : > { %v8037_v22 = vpop.xlane.xlu0 %8036  ;;  %v8125_v55 = vpop.xlane.xlu1 %8124 }
0x27f9   : > { %v8039_v53 = vsub.f32 %v8030_v25, %v8037_v22  ;;  %v8127_v48 = vsub.f32 %v8118_v3, %v8125_v55 }
0x27fb   : > { %v8042_v29 = vmul.f32 1.442695, %v8039_v53  ;;  %v14673_v61 = vpop.eup %10806  ;;  %v8130_v43 = vmul.f32 1.442695, %v8127_v48 }
0x27fc   : > { %v8044_v37 = vsel %vm3287_vm10, %v14673_v61, 0.0  ;;  %v10809_v44 = vpop.eup %10808 }
0x27fd   : > { %10810 = vpow2.f32 %v8042_v29  ;;  %8045 = vadd.xlane.f32.xlu0 %v8044_v37  ;;  %v8132_v33 = vsel %vm3287_vm10, %v10809_v44, 0.0 }
0x27fe   : > { %10812 = vpow2.f32 %v8130_v43 }
0x2803   : > { %v10811_v57 = vpop.eup %10810 }
0x2804   : > { %v8047_v0 = vsel %vm3287_vm10, %v10811_v57, 0.0  ;;  %v10813_v50 = vpop.eup %10812 }
0x2805   : > { %8048 = vadd.xlane.f32.xlu1 %v8047_v0  ;;  %8133 = vadd.xlane.f32.xlu0 %v8132_v33  ;;  %v8135_v18 = vsel %vm3287_vm10, %v10813_v50, 0.0  ;;  %v10009_v33 = vld [vmem:[%s12390_s24 + $0x18] sm:$0xff] }
0x2806   : > { %8239 = vmatpush.bf16.msra.mxu0 %v10009_v33 }
0x280d   : > { %7973 = vrot.lane.b32.xlu2 %v14625_v1, %s15077_s1  ;;  %8136 = vadd.xlane.f32.xlu1 %v8135_v18  ;;  %v10007_v18 = vld [vmem:[%s12390_s24 + $0x8] sm:$0xff]  ;;  %s15100_s1 = sld [smem:[#allocation127_spill]] }
0x2819   : > { %8149 = vrot.lane.b32.xlu0 %v14625_v1, %s15076_s16  ;;  %s15103_s16 = sld [smem:[#allocation79_spill]] }
0x2826   : > { %8061 = vrot.lane.b32.xlu1 %v14625_v1, %s15075_s0  ;;  %s15102_s0 = sld [smem:[#allocation80_spill]] }
0x285e   : > { %v7865_v51 = vpop.xlane.xlu0 %7864 }
0x2860   : > { %v7958_v4 = vpop.xlane.xlu1 %7957 }
0x2861   : > { %10814 = vrcp.f32 %v7958_v4  ;;  %v10006_v4 = vld [vmem:[%s12390_s24] sm:$0xff] }
0x2862   : > { %10816 = vrcp.f32 %v7865_v51 }
0x2867   : > { %v10815_v9 = vpop.eup %10814 }
0x2868   : > { %v7961_v21 = vpop.xlane.xlu2 %7960  ;;  %v10817_v47 = vpop.eup %10816  ;;  %v7964_v58 = vmul.f32 %v10815_v9, %v10801_v52 }
0x2869   : > { %10818 = vrcp.f32 %v7961_v21  ;;  %v7868_v8 = vpop.xlane.xlu1 %7867  ;;  %v7871_v34 = vmul.f32 %v10817_v47, %v10799_v10 }
0x286a   : > { %10820 = vrcp.f32 %v7868_v8  ;;  %v7966_v41 = vpack.c.bf16 %v7964_v58, %v7964_v58 }
0x286b   : > { %v7873_v20 = vpack.c.bf16 %v7871_v34, %v7871_v34 }
0x286c   : > { %v7970_v3 = vunpack.c.l.b16 %v7966_v41 }
0x286d   : > { %v7879_v39 = vunpack.c.l.b16 %v7873_v20 }
0x286f   : > { %v10819_v59 = vpop.eup %10818 }
0x2870   : > { %v10821_v17 = vpop.eup %10820  ;;  %v7965_v49 = vmul.f32 %v10819_v59, %v10803_v2  ;;  %v7974_v63 = vpop.permute.xlu2 %7973 }
0x2871   : > { %v7872_v32 = vmul.f32 %v10821_v17, %v10805_v19  ;;  %v8046_v1 = vpop.xlane.xlu0 %8045  ;;  %7986 = vmatpush.bf16.msra.mxu3 %v7974_v63 }
0x2872   : > { %v7967_v25 = vpack.c.bf16 %v7965_v49, %v7965_v49 }
0x2873   : > { %v7874_v45 = vpack.c.bf16 %v7872_v32, %v7872_v32 }
0x2874   : > { %v7971_v60 = vunpack.c.l.b16 %v7967_v25 }
0x2875   : > { %v7880_v27 = vunpack.c.l.b16 %v7874_v45  ;;  %v10490_v45 = vld [vmem:[#allocation44] ss:$0 sm:$0xff] }
0x2876   : > { %v7972_v11 = vpack.c.b16 %v7971_v60, %v7970_v3 }
0x2877   : > { %v7881_v42 = vpack.c.b16 %v7880_v27, %v7879_v39 }
0x2878   : > { %9792 = vmatmul.msk.bf16.vlgmr.msra.gmra.mxu3 %vm3287_vm10, %v7972_v11  ;;  %v8049_v54 = vpop.xlane.xlu1 %8048 }
0x2879   : > { %v8134_v16 = vpop.xlane.xlu0 %8133  ;;  %9787 = vmatmul.msk.bf16.vlgmr.msrb.gmra.mxu1 %vm3287_vm10, %v7881_v42 }
0x287a   : > { %10822 = vrcp.f32 %v8134_v16 }
0x2880   : > { %v8137_v31 = vpop.xlane.xlu1 %8136  ;;  %v10823_v24 = vpop.eup %10822 }
0x2881   : > { %10824 = vrcp.f32 %v8137_v31  ;;  %v8140_v35 = vmul.f32 %v10823_v24, %v10809_v44 }
0x2882   : > { %10826 = vrcp.f32 %v8049_v54 }
0x2883   : > { %10828 = vrcp.f32 %v8046_v1  ;;  %v8142_v38 = vpack.c.bf16 %v8140_v35, %v8140_v35 }
0x2885   : > { %v8146_v7 = vunpack.c.l.b16 %v8142_v38 }
0x2887   : > { %v10825_v10 = vpop.eup %10824 }
0x2888   : > { %v8141_v6 = vmul.f32 %v10825_v10, %v10813_v50  ;;  %v10827_v52 = vpop.eup %10826  ;;  %v10008_v50 = vld [vmem:[%s12390_s24 + $0x10] sm:$0xff] }
0x2889   : > { %v10829_v62 = vpop.eup %10828  ;;  %v8053_v23 = vmul.f32 %v10827_v52, %v10811_v57  ;;  %8240 = vmatpush.bf16.msra.mxu0 %v10008_v50 }
0x288a   : > { %v8143_v15 = vpack.c.bf16 %v8141_v6, %v8141_v6  ;;  %v8052_v2 = vmul.f32 %v10829_v62, %v14673_v61 }
0x288b   : > { %v8150_v13 = vpop.permute.xlu0 %8149  ;;  %v8055_v46 = vpack.c.bf16 %v8053_v23, %v8053_v23 }
0x288c   : > { %v8147_v40 = vunpack.c.l.b16 %v8143_v15  ;;  %8162 = vmatpush.bf16.msrb.mxu3 %v8150_v13  ;;  %v8054_v19 = vpack.c.bf16 %v8052_v2, %v8052_v2 }
0x288d   : > { %v8059_v36 = vunpack.c.l.b16 %v8055_v46  ;;  %8241 = vmatpush.bf16.msra.mxu0 %v10007_v18 }
0x288e   : > { %v8148_v26 = vpack.c.b16 %v8147_v40, %v8146_v7  ;;  %v8058_v12 = vunpack.c.l.b16 %v8054_v19 }
0x2890   : > { %9802 = vmatmul.msk.bf16.vlgmr.msrb.gmra.mxu3 %vm3287_vm10, %v8148_v26  ;;  %v8060_v30 = vpack.c.b16 %v8059_v36, %v8058_v12 }
0x2891   : > { %8242 = vmatpush.bf16.msra.mxu0 %v10006_v4 }
0x2898   : > { %v8062_v5 = vpop.permute.xlu1 %8061 }
0x2899   : > { %8074 = vmatpush.bf16.msra.mxu1 %v8062_v5 }
0x289c   : > { %9797 = vmatmul.msk.bf16.vlgmr.msra.gmra.mxu1 %vm3287_vm10, %v8060_v30 }
0x28f6   : > { %v7900_v29 = vpop.f32.mrf.mxu1 }
0x28fb   : > { %v7988_v22 = vpop.f32.mrf.mxu3 }
0x28fe   : > { %v7902_v48 = vpop.f32.mrf.mxu1 }
0x2903   : > { %v7990_v55 = vpop.f32.mrf.mxu3 }
0x2904   : > { %v10446_v53 = vpack.i.bf16 %v7990_v55, %v7988_v22 }
0x2906   : > { %10447 = vrot.lane.b32.xlu2 %v10446_v53, %s15083_s5  ;;  %s15101_s5 = sld [smem:[#allocation74_spill]] }
0x2913   : > { %v8164_v61 = vpop.f32.mrf.mxu3 }
0x2919   : > { %v8076_v37 = vpop.f32.mrf.mxu1 }
0x291b   : > { %v8166_v43 = vpop.f32.mrf.mxu3 }
0x291c   : > { %v10456_v44 = vpack.i.bf16 %v8166_v43, %v8164_v61 }
0x291e   : > { %10457 = vrot.lane.b32.xlu0 %v10456_v44, %s15081_s3  ;;  %s15098_s3 = sld [smem:[#allocation128_spill]] }
0x2921   : > { %v8078_v57 = vpop.f32.mrf.mxu1 }
0x2922   : > { %v10451_v0 = vpack.i.bf16 %v8078_v57, %v8076_v37 }
0x2924   : > { %10452 = vrot.lane.b32.xlu2 %v10451_v0, %s15091_s4  ;;  %v9846_v7 = vld [vmem:[%s15098_s3 + $0x30] sm:$0xf]  ;;  %v10017_v40 = vld [vmem:[%s15098_s3 + $0x34] sm:$0xf0]  ;;  %v10016_v13 = vld [vmem:[%s15098_s3 + $0x34] sm:$0xf] }
0x2925   : > { %v9847_v62 = vor.u32 %v10017_v40, %v9846_v7  ;;  %v9848_v23 = vld [vmem:[%s15098_s3 + $0x38] sm:$0xf0]  ;;  %v9838_v2 = vld [vmem:[%s15098_s3 + $0x20] sm:$0xf]  ;;  %v10015_v46 = vld [vmem:[%s15098_s3 + $0x24] sm:$0xf0] }
0x2926   : > { %v9851_v26 = vor.u32 %v10016_v13, %v9848_v23  ;;  %v10014_v19 = vld [vmem:[%s15098_s3 + $0x24] sm:$0xf]  ;;  %v9839_v36 = vor.u32 %v10015_v46, %v9838_v2  ;;  %v9840_v12 = vld [vmem:[%s15098_s3 + $0x28] sm:$0xf0]  ;;  %v9830_v30 = vld [vmem:[%s15098_s3 + $0x10] sm:$0xf] }
0x2927   : > { %8375 = vmatpush.bf16.msrb.mxu1 %v9847_v62  ;;  %v9843_v5 = vor.u32 %v10014_v19, %v9840_v12  ;;  %v10013_v22 = vld [vmem:[%s15098_s3 + $0x14] sm:$0xf0]  ;;  %v10012_v55 = vld [vmem:[%s15098_s3 + $0x14] sm:$0xf]  ;;  %v9822_v43 = vld [vmem:[%s15098_s3] sm:$0xf] }
0x2928   : > { %8389 = vmatpush.bf16.msrb.mxu2 %v9851_v26  ;;  %v9831_v53 = vor.u32 %v10013_v22, %v9830_v30  ;;  %v10011_v44 = vld [vmem:[%s15098_s3 + $0x4] sm:$0xf0]  ;;  %v10010_v57 = vld [vmem:[%s15098_s3 + $0x4] sm:$0xf]  ;;  %v9824_v50 = vld [vmem:[%s15098_s3 + $0x8] sm:$0xf0] }
0x2929   : > { %v9823_v33 = vor.u32 %v10011_v44, %v9822_v43  ;;  %v9827_v18 = vor.u32 %v10010_v57, %v9824_v50  ;;  %v10030_v7 = vld [vmem:[%s15099_s2 + $0x60] sm:$0xff]  ;;  %v10020_v40 = vld [vmem:[%s15099_s2 + $0x10] sm:$0xff]  ;;  %v10029_v62 = vld [vmem:[%s15099_s2 + $0x58] sm:$0xff]  ;;  %s15104_s4 = sld [smem:[#allocation78_spill]] }
0x292a   : > { %v8322_v13 = vld [vmem:[%s15100_s1] sm:$0x3]  ;;  %v10019_v23 = vld [vmem:[%s15099_s2 + $0x8] sm:$0xff]  ;;  %v10028_v2 = vld [vmem:[%s15099_s2 + $0x50] sm:$0xff]  ;;  %s15106_s1 = sld [smem:[#allocation75_spill]] }
0x292b   : > { %8376 = vmatpush.bf16.msrb.mxu1 %v9839_v36  ;;  %v8324_v26 = vperm.slane %v8322_v13, 0  ;;  %v10018_v19 = vld [vmem:[%s15099_s2] sm:$0xff]  ;;  %v10027_v12 = vld [vmem:[%s15099_s2 + $0x48] sm:$0xff]  ;;  %v8325_v30 = vperm.slane %v8322_v13, 1 }
0x292c   : > { %8390 = vmatpush.bf16.msrb.mxu2 %v9843_v5 }
0x292f   : > { %8377 = vmatpush.bf16.msrb.mxu1 %v9831_v53  ;;  %v10026_v53 = vld [vmem:[%s15099_s2 + $0x40] sm:$0xff] }
0x2933   : > { %8378 = vmatpush.bf16.msrb.mxu1 %v9823_v33 }
0x2960   : > { %v10448_v51 = vpop.permute.xlu2 %10447 }
0x2961   : > { %v10450_v9 = vunpack.i.h.bf16 %v10448_v51  ;;  %v10449_v8 = vunpack.i.l.bf16 %v10448_v51 }
0x2963   : > { %v8193_v59 = vsel %vm3287_vm10, %v7900_v29, %v10449_v8  ;;  %v8194_v17 = vsel %vm3287_vm10, %v7902_v48, %v10450_v9  ;;  %v9832_v29 = vld [vmem:[%s15098_s3 + $0x18] sm:$0xf0]  ;;  %s8749_s3 = scalar_lea.hbm %s12400_s12, %s12423_s22  ;;  %s11792_s22 = scalar_lea.hbm %s12400_s12, 2 }
0x2964   : > { %v9835_v61 = vor.u32 %v10012_v55, %v9832_v29  ;;  %s8753_s9 = sshll.u32 %s8749_s3, 4  ;;  %s8754_s9 = int_to_ptr.hbm [resolvable:$true] %s8753_s9 }
0x2966   : > { %8391 = vmatpush.bf16.msrb.mxu2 %v9835_v61 }
0x296a   : > { %8392 = vmatpush.bf16.msrb.mxu2 %v9827_v18 }
0x297e   : > { %v10453_v21 = vpop.permute.xlu2 %10452 }
0x297f   : > { %v10455_v47 = vunpack.i.h.bf16 %v10453_v21  ;;  %v10454_v58 = vunpack.i.l.bf16 %v10453_v21 }
0x2981   : > { %v8196_v63 = vsel %vm2724_vm1, %v8194_v17, %v10455_v47  ;;  %v8195_v20 = vsel %vm2724_vm1, %v8193_v59, %v10454_v58 }
0x2990   : > { %v10458_v34 = vpop.permute.xlu0 %10457 }
0x2991   : > { %v10460_v41 = vunpack.i.h.bf16 %v10458_v34  ;;  %v10459_v49 = vunpack.i.l.bf16 %v10458_v34 }
0x2993   : > { %v8197_v32 = vsel %vm2680_vm0, %v8195_v20, %v10459_v49  ;;  %v8198_v1 = vsel %vm2680_vm0, %v8196_v63, %v10460_v41 }
0x2994   : > { %v8199_v25 = vpack.c.bf16 %v8198_v1, %v8197_v32  ;;  %v10491_v1 = vld [vmem:[#allocation52] ss:$0 sm:$0xff] }
0x2996   : > { %9819 = vmatmul.msk.bf16.vlgmr.msra.gmra.mxu0 %vm3138_vm9, %v8199_v25 }
0x2a13   : > { %v8244_v3 = vpop.f32.mrf.mxu0 }
0x2a14   : > { %v8249_v60 = vadd.f32 %v8244_v3, %v14574_v28 }
0x2a16   : > { %v14706_v39 = vadd.f32 %v10490_v45, %v8249_v60  ;;  %v10492_v60 = vld [vmem:[#allocation50] ss:$0 sm:$0xff] }
0x2a18   : > { %v8259_v27 = vsel %vm3138_vm9, %v14706_v39, 0.0 }
0x2a19   : > { %8260 = vadd.xlane.f32.xlu2 %v8259_v27 }
0x2a1b   : > { %v8246_v11 = vpop.f32.mrf.mxu0 }
0x2a1c   : > { %v8250_v42 = vadd.f32 %v8246_v11, %v14579_v14 }
0x2a1e   : > { %v14711_v54 = vadd.f32 %v10490_v45, %v8250_v42 }
0x2a20   : > { %v8262_v16 = vsel %vm3138_vm9, %v14711_v54, 0.0 }
0x2a21   : > { %8263 = vadd.xlane.f32.xlu0 %v8262_v16 }
0x2a8c   : > { %v8261_v31 = vpop.xlane.xlu2 %8260 }
0x2a8d   : > { %v8265_v28 = vmul.f32 %v8261_v31, %v14382_v56 }
0x2a8f   : > { %v14717_v24 = vsub.f32 %v14706_v39, %v8265_v28 }
0x2a91   : > { %v8269_v35 = vmul.f32 %v14717_v24, %v14717_v24 }
0x2a93   : > { %v8271_v14 = vsel %vm3138_vm9, %v8269_v35, 0.0  ;;  %v10024_v35 = vld [vmem:[%s15099_s2 + $0x30] sm:$0xff] }
0x2a94   : > { %8272 = vadd.xlane.f32.xlu1 %v8271_v14  ;;  %v8264_v10 = vpop.xlane.xlu0 %8263  ;;  %v10033_v14 = vld [vmem:[%s15099_s2 + $0x78] sm:$0xff] }
0x2a95   : > { %v8266_v38 = vmul.f32 %v8264_v10, %v14382_v56  ;;  %8579 = vmatpush.bf16.msrb.mxu0 %v10033_v14  ;;  %v10023_v10 = vld [vmem:[%s15099_s2 + $0x28] sm:$0xff] }
0x2a97   : > { %v14724_v6 = vsub.f32 %v14711_v54, %v8266_v38  ;;  %v10032_v38 = vld [vmem:[%s15099_s2 + $0x70] sm:$0xff] }
0x2a99   : > { %v8270_v15 = vmul.f32 %v14724_v6, %v14724_v6  ;;  %8580 = vmatpush.bf16.msrb.mxu0 %v10032_v38 }
0x2a9b   : > { %v8274_v52 = vsel %vm3138_vm9, %v8270_v15, 0.0  ;;  %v10031_v15 = vld [vmem:[%s15099_s2 + $0x68] sm:$0xff] }
0x2a9c   : > { %8275 = vadd.xlane.f32.xlu2 %v8274_v52  ;;  %v10021_v52 = vld [vmem:[%s15099_s2 + $0x18] sm:$0xff] }
0x2a9d   : > { %8581 = vmatpush.bf16.msrb.mxu0 %v10031_v15 }
0x2aa1   : > { %8582 = vmatpush.bf16.msrb.mxu0 %v10030_v7 }
0x2aa5   : > { %8583 = vmatpush.bf16.msrb.mxu0 %v10029_v62 }
0x2aa9   : > { %8584 = vmatpush.bf16.msrb.mxu0 %v10028_v2 }
0x2aad   : > { %8585 = vmatpush.bf16.msrb.mxu0 %v10027_v12 }
0x2ab1   : > { %8586 = vmatpush.bf16.msrb.mxu0 %v10026_v53 }
0x2b07   : > { %v8273_v48 = vpop.xlane.xlu1 %8272 }
0x2b08   : > { %v8277_v37 = vmul.f32 %v8273_v48, %v14382_v56 }
0x2b0a   : > { %v8279_v0 = vadd.f32 1e-05, %v8277_v37 }
0x2b0c   : > { %10830 = vrsqrt.f32 %v8279_v0  ;;  %vm8287_vm10 = vweird.f32 %v8279_v0 }
0x2b0f   : > { %v8276_v4 = vpop.xlane.xlu2 %8275 }
0x2b10   : > { %v8278_v51 = vmul.f32 %v8276_v4, %v14382_v56 }
0x2b12   : > { %v10831_v21 = vpop.eup %10830  ;;  %v8280_v9 = vadd.f32 1e-05, %v8278_v51 }
0x2b13   : > { %v8282_v8 = vmul.f32 %v10831_v21, %v8279_v0  ;;  %vm8288_vm0 = vweird.f32 %v10831_v21 }
0x2b14   : > { %10832 = vrsqrt.f32 %v8280_v9  ;;  %vm8289_vm14 = vmor %vm8287_vm10, %vm8288_vm0  ;;  %vm8297_vm2 = vweird.f32 %v8280_v9 }
0x2b15   : > { %v8283_v47 = vmul.f32 %v10831_v21, %v8282_v8 }
0x2b17   : > { %v8284_v58 = vmul.f32 0.5, %v8283_v47 }
0x2b19   : > { %v8285_v34 = vsub.f32 1.5, %v8284_v58 }
0x2b1a   : > { %v10833_v59 = vpop.eup %10832 }
0x2b1b   : > { %v8286_v17 = vmul.f32 %v10831_v21, %v8285_v34  ;;  %v8292_v41 = vmul.f32 %v10833_v59, %v8280_v9  ;;  %vm8298_vm15 = vweird.f32 %v10833_v59 }
0x2b1c   : > { %vm8299_vm3 = vmor %vm8297_vm2, %vm8298_vm15 }
0x2b1d   : > { %v8293_v49 = vmul.f32 %v10833_v59, %v8292_v41  ;;  %v8290_v63 = vsel %vm8289_vm14, %v10831_v21, %v8286_v17 }
0x2b1e   : > { %v8301_v25 = vmul.f32 %v8290_v63, %v14717_v24  ;;  %v10025_v24 = vld [vmem:[%s15099_s2 + $0x38] sm:$0xff] }
0x2b1f   : > { %v8294_v20 = vmul.f32 0.5, %v8293_v49  ;;  %8565 = vmatpush.bf16.msra.mxu3 %v10025_v24 }
0x2b20   : > { %v8306_v27 = vmul.f32 %v10491_v1, %v8301_v25 }
0x2b21   : > { %v8295_v32 = vsub.f32 1.5, %v8294_v20 }
0x2b22   : > { %v8311_v16 = vadd.f32 %v10492_v60, %v8306_v27 }
0x2b23   : > { %v8296_v45 = vmul.f32 %v10833_v59, %v8295_v32  ;;  %8566 = vmatpush.bf16.msra.mxu3 %v10024_v35 }
0x2b25   : > { %v8300_v3 = vsel %vm8299_vm3, %v10833_v59, %v8296_v45 }
0x2b26   : > { %v8302_v11 = vmul.f32 %v8300_v3, %v14724_v6  ;;  %v10022_v6 = vld [vmem:[%s15099_s2 + $0x20] sm:$0xff]  ;;  %s2632_s2 = sand.u32 1, %s11894_s15  }
0x2b27   : > { %8567 = vmatpush.bf16.msra.mxu3 %v10023_v10  ;;  %s2633_s6 = scalar_lea.vmem [#allocation53], %s2632_s2 }
0x2b28   : > { %v8307_v42 = vmul.f32 %v10491_v1, %v8302_v11  ;;  %s8751_s8 = sshll.u32 %s2633_s6, 4  ;;  %s8752_s8 = int_to_ptr.vmem [resolvable:$true] %s8751_s8 }
0x2b2a   : > { %v8312_v31 = vadd.f32 %v10492_v60, %v8307_v42 }
0x2b2b   : > { %8568 = vmatpush.bf16.msra.mxu3 %v10022_v6 }
0x2b2c   : > { %v8313_v28 = vpack.c.bf16 %v8312_v31, %v8311_v16 }
0x2b2e   : > { %9852 = vmatmul.msk.bf16.vlgmr.msrb.gmra.mxu1 %vm3138_vm9, %v8313_v28  ;;  %9853 = vmatmul.msk.bf16.vlgmr.msrb.gmra.mxu2 %vm3138_vm9, %v8313_v28 }
0x2b2f   : > { %8569 = vmatpush.bf16.msra.mxu3 %v10021_v52  ;;  %v10493_v52 = vld [vmem:[#allocation46] ss:$0 sm:$0xff] }
0x2b33   : > { %8570 = vmatpush.bf16.msra.mxu3 %v10020_v40 }
0x2b37   : > { %8571 = vmatpush.bf16.msra.mxu3 %v10019_v23 }
0x2b3b   : > { %8572 = vmatpush.bf16.msra.mxu3 %v10018_v19 }
0x2bab   : > { %v8380_v46 = vpop.f32.mrf.mxu1 }
0x2bac   : > { %v8381_v36 = vadd.f32 %v8380_v46, %v8324_v26 }
0x2bae   : > { %v8399_v5 = vmul.f32 %v8381_v36, %v8381_v36 }
0x2bb0   : > { %v8403_v22 = vmul.f32 %v8399_v5, %v8381_v36 }
0x2bb1   : > { %v8394_v55 = vpop.f32.mrf.mxu2 }
0x2bb2   : > { %v8407_v29 = vmul.f32 0.044715, %v8403_v22  ;;  %v8395_v48 = vadd.f32 %v8394_v55, %v8325_v30 }
0x2bb3   : > { %v8382_v61 = vpop.f32.mrf.mxu1 }
0x2bb4   : > { %v8411_v37 = vadd.f32 %v8407_v29, %v8381_v36  ;;  %v8400_v43 = vmul.f32 %v8395_v48, %v8395_v48  ;;  %v8383_v44 = vadd.f32 %v8382_v61, %v8324_v26 }
0x2bb6   : > { %v8415_v57 = vmul.f32 0.7978846, %v8411_v37  ;;  %v8404_v0 = vmul.f32 %v8400_v43, %v8395_v48  ;;  %v8401_v33 = vmul.f32 %v8383_v44, %v8383_v44  ;;  %v8681_v43 = vld [vmem:[%s15101_s5 + $0x38] sm:$0xff] }
0x2bb7   : > { %8694 = vmatpush.msra.mxu1 %v8681_v43 }
0x2bb8   : > { %v8408_v50 = vmul.f32 0.044715, %v8404_v0  ;;  %v8405_v18 = vmul.f32 %v8401_v33, %v8383_v44  ;;  %10834 = vtanh.f32 %v8415_v57  ;;  %v8680_v0 = vld [vmem:[%s15101_s5 + $0x30] sm:$0xff] }
0x2bb9   : > { %v8396_v4 = vpop.f32.mrf.mxu2  ;;  %8695 = vmatpush.msra.mxu1 %v8680_v0 }
0x2bba   : > { %v8412_v51 = vadd.f32 %v8408_v50, %v8395_v48  ;;  %v8409_v21 = vmul.f32 0.044715, %v8405_v18  ;;  %v8397_v9 = vadd.f32 %v8396_v4, %v8325_v30  ;;  %v8679_v18 = vld [vmem:[%s15101_s5 + $0x28] sm:$0xff] }
0x2bbb   : > { %8696 = vmatpush.msra.mxu1 %v8679_v18 }
0x2bbc   : > { %v8416_v8 = vmul.f32 0.7978846, %v8412_v51  ;;  %v8413_v47 = vadd.f32 %v8409_v21, %v8383_v44  ;;  %v8402_v58 = vmul.f32 %v8397_v9, %v8397_v9  ;;  %v8678_v51 = vld [vmem:[%s15101_s5 + $0x20] sm:$0xff] }
0x2bbd   : > { %8697 = vmatpush.msra.mxu1 %v8678_v51 }
0x2bbe   : > { %v8417_v34 = vmul.f32 0.7978846, %v8413_v47  ;;  %v8406_v59 = vmul.f32 %v8402_v58, %v8397_v9  ;;  %10836 = vtanh.f32 %v8416_v8  ;;  %v10835_v17 = vpop.eup %10834  ;;  %v8676_v8 = vld [vmem:[%s15101_s5 + $0x10] sm:$0xff]  ;;  %v8675_v58 = vld [vmem:[%s15101_s5 + $0x8] sm:$0xff] }
0x2bbf   : > { %v8423_v63 = vadd.f32 1.0, %v10835_v17 }
0x2bc0   : > { %10838 = vtanh.f32 %v8417_v34  ;;  %v8410_v41 = vmul.f32 0.044715, %v8406_v59  ;;  %v8674_v59 = vld [vmem:[%s15101_s5] sm:$0xff] }
0x2bc1   : > { %v8427_v25 = vmul.f32 0.5, %v8423_v63 }
0x2bc2   : > { %v8414_v49 = vadd.f32 %v8410_v41, %v8397_v9 }
0x2bc3   : > { %v8431_v27 = vmul.f32 %v8427_v25, %v8381_v36 }
0x2bc4   : > { %v8418_v20 = vmul.f32 0.7978846, %v8414_v49  ;;  %v10837_v32 = vpop.eup %10836 }
0x2bc5   : > { %v8424_v3 = vadd.f32 1.0, %v10837_v32  ;;  %v12021_v32 = vmov 16.0  }
0x2bc6   : > { %v10839_v1 = vpop.eup %10838  ;;  %10840 = vtanh.f32 %v8418_v20 }
0x2bc7   : > { %v8425_v45 = vadd.f32 1.0, %v10839_v1  ;;  %v8428_v16 = vmul.f32 0.5, %v8424_v3  ;;  %v10494_v1 = vld [vmem:[%s15102_s0] ss:$0 sm:$0xff]  ;;  %s15107_s0 = sld [smem:[#allocation76_spill]] }
0x2bc9   : > { %v8429_v60 = vmul.f32 0.5, %v8425_v45  ;;  %v8432_v35 = vmul.f32 %v8428_v16, %v8395_v48 }
0x2bcb   : > { %v8433_v11 = vmul.f32 %v8429_v60, %v8383_v44  ;;  %v10495_v60 = vld [vmem:[%s15103_s16] ss:$0 sm:$0xff]  ;;  %s15108_s16 = sld [smem:[#allocation77_spill]] }
0x2bcc   : > { %v10841_v42 = vpop.eup %10840 }
0x2bcd   : > { %v8435_v31 = vpack.c.bf16 %v8433_v11, %v8431_v27  ;;  %v8426_v28 = vadd.f32 1.0, %v10841_v42 }
0x2bcf   : > { %v8430_v24 = vmul.f32 0.5, %v8426_v28  ;;  %8573 = vmatmul.bf16.vlgmr.msra.gmra.mxu3 %v8435_v31 }
0x2bd1   : > { %v8434_v14 = vmul.f32 %v8430_v24, %v8397_v9  ;;  %v8677_v9 = vld [vmem:[%s15101_s5 + $0x18] sm:$0xff] }
0x2bd2   : > { %8698 = vmatpush.msra.mxu1 %v8677_v9 }
0x2bd3   : > { %v8436_v10 = vpack.c.bf16 %v8434_v14, %v8432_v35 }
0x2bd4   : > { %8699 = vmatpush.msra.mxu1 %v8676_v8 }
0x2bd5   : > { %8587 = vmatmul.bf16.vlgmr.msrb.gmra.mxu0 %v8436_v10 }
0x2bd6   : > { %8700 = vmatpush.msra.mxu1 %v8675_v58 }
0x2bd8   : > { %8701 = vmatpush.msra.mxu1 %v8674_v59 }
0x2c52   : > { %v8574_v38 = vpop.f32.mrf.mxu3  ;;  %v8588_v6 = vpop.f32.mrf.mxu0 }
0x2c53   : > { %v8589_v15 = vadd.f32 %v8588_v6, %v8574_v38 }
0x2c55   : > { %v8593_v7 = vadd.f32 %v8589_v15, %v14706_v39 }
0x2c57   : > { %v8599_v40 = vadd.f32 %v10493_v52, %v8593_v7 }
0x2c59   : > { %v8603_v13 = vsel %vm3138_vm9, %v8599_v40, 0.0 }
0x2c5a   : > { %v8590_v62 = vpop.f32.mrf.mxu0  ;;  %8604 = vadd.xlane.f32.xlu2 %v8603_v13  ;;  %v8576_v23 = vpop.f32.mrf.mxu3 }
0x2c5b   : > { %v8591_v26 = vadd.f32 %v8590_v62, %v8576_v23 }
0x2c5d   : > { %v8594_v2 = vadd.f32 %v8591_v26, %v14711_v54 }
0x2c5f   : > { %v8600_v46 = vadd.f32 %v10493_v52, %v8594_v2 }
0x2c61   : > { %v8606_v19 = vsel %vm3138_vm9, %v8600_v46, 0.0 }
0x2c62   : > { %8607 = vadd.xlane.f32.xlu0 %v8606_v19  ;;  %v8713_v19 = vld [vmem:[%s15104_s4 + $0x18] sm:$0xff] }
0x2c63   : > { %8730 = vmatpush.msrb.mxu1 %v8713_v19 }
0x2ccd   : > { %v8605_v36 = vpop.xlane.xlu2 %8604 }
0x2cce   : > { %v8609_v12 = vmul.f32 %v8605_v36, %v14382_v56  ;;  %v8712_v36 = vld [vmem:[%s15104_s4 + $0x10] sm:$0xff] }
0x2ccf   : > { %8731 = vmatpush.msrb.mxu1 %v8712_v36 }
0x2cd0   : > { %v8611_v5 = vsub.f32 %v8599_v40, %v8609_v12  ;;  %v8711_v12 = vld [vmem:[%s15104_s4 + $0x8] sm:$0xff] }
0x2cd1   : > { %8732 = vmatpush.msrb.mxu1 %v8711_v12 }
0x2cd2   : > { %v8613_v30 = vmul.f32 %v8611_v5, %v8611_v5 }
0x2cd4   : > { %v8615_v39 = vsel %vm3138_vm9, %v8613_v30, 0.0  ;;  %v8682_v30 = vld [vmem:[%s15105_s7] sm:$0x1]  ;;  %s8741_s7 = scalar_lea.sflag [#allocation4], %s2632_s2 }
0x2cd5   : > { %8616 = vadd.xlane.f32.xlu1 %v8615_v39  ;;  %v8608_v22 = vpop.xlane.xlu0 %8607 }
0x2cd6   : > { %v8610_v55 = vmul.f32 %v8608_v22, %v14382_v56  ;;  %v8706_v22 = vld [vmem:[%s15106_s1] sm:$0x1]  ;;  %s11786_s1 = sshra.s32 %s8754_s9, 4  ;;  %s11787_s1 = int_to_ptr.hbm [resolvable:$true] %s11786_s1 }
0x2cd7   : > { %p11793_p1 = scmp.lt.s32.totalorder %s11787_s1, %s12400_s12 }
0x2cd8   : > { %v8612_v53 = vsub.f32 %v8600_v46, %v8610_v55 }
0x2cda   : > { %v8614_v54 = vmul.f32 %v8612_v53, %v8612_v53 }
0x2cdc   : > { %v8618_v29 = vsel %vm3138_vm9, %v8614_v54, 0.0 }
0x2cdd   : > { %8619 = vadd.xlane.f32.xlu2 %v8618_v29 }
0x2d48   : > { %v8617_v48 = vpop.xlane.xlu1 %8616 }
0x2d49   : > { %v8621_v61 = vmul.f32 %v8617_v48, %v14382_v56  ;;  %v8714_v48 = vld [vmem:[%s15108_s16] sm:$0x1] }
0x2d4b   : > { %v8623_v37 = vadd.f32 1e-05, %v8621_v61 }
0x2d4d   : > { %10842 = vrsqrt.f32 %v8623_v37  ;;  %vm8631_vm5 = vweird.f32 %v8623_v37 }
0x2d50   : > { %v8620_v44 = vpop.xlane.xlu2 %8619 }
0x2d51   : > { %v8622_v57 = vmul.f32 %v8620_v44, %v14382_v56 }
0x2d53   : > { %v10843_v33 = vpop.eup %10842  ;;  %v8624_v50 = vadd.f32 1e-05, %v8622_v57 }
0x2d54   : > { %v8626_v4 = vmul.f32 %v10843_v33, %v8623_v37  ;;  %vm8632_vm4 = vweird.f32 %v10843_v33 }
0x2d55   : > { %10844 = vrsqrt.f32 %v8624_v50  ;;  %vm8633_vm6 = vmor %vm8631_vm5, %vm8632_vm4  ;;  %vm8641_vm8 = vweird.f32 %v8624_v50 }
0x2d56   : > { %v8627_v21 = vmul.f32 %v10843_v33, %v8626_v4  ;;  %10846 = vrcp.f32 %v12021_v32 }
0x2d58   : > { %v8628_v47 = vmul.f32 0.5, %v8627_v21 }
0x2d5a   : > { %v8629_v34 = vsub.f32 1.5, %v8628_v47 }
0x2d5b   : > { %v10845_v56 = vpop.eup %10844 }
0x2d5c   : > { %v8630_v17 = vmul.f32 %v10843_v33, %v8629_v34  ;;  %v8636_v41 = vmul.f32 %v10845_v56, %v8624_v50  ;;  %vm8642_vm7 = vweird.f32 %v10845_v56  ;;  %v10847_v11 = vpop.eup %10846 }
0x2d5d   : > { %vm8643_vm11 = vmor %vm8641_vm8, %vm8642_vm7  ;;  %v8667_v24 = vmul.f32 16.0, %v10847_v11  ;;  %vm8671_vm12 = vweird.f32 %v10847_v11 }
0x2d5e   : > { %v8634_v49 = vsel %vm8633_vm6, %v10843_v33, %v8630_v17  ;;  %v8637_v63 = vmul.f32 %v10845_v56, %v8636_v41 }
0x2d5f   : > { %v8645_v25 = vmul.f32 %v8634_v49, %v8611_v5  ;;  %v8668_v38 = vsub.f32 1.0, %v8667_v24  ;;  %v8710_v5 = vld [vmem:[%s15104_s4] sm:$0xff] }
0x2d60   : > { %v8638_v20 = vmul.f32 0.5, %v8637_v63  ;;  %8733 = vmatpush.msrb.mxu1 %v8710_v5 }
0x2d61   : > { %v8650_v27 = vmul.f32 %v10494_v1, %v8645_v25  ;;  %v8669_v52 = vmul.f32 %v10847_v11, %v8668_v38 }
0x2d62   : > { %v8639_v45 = vsub.f32 1.5, %v8638_v20 }
0x2d63   : > { %v8655_v31 = vadd.f32 %v10495_v60, %v8650_v27  ;;  %v8670_v13 = vadd.f32 %v10847_v11, %v8669_v52 }
0x2d64   : > { %v8640_v3 = vmul.f32 %v10845_v56, %v8639_v45 }
0x2d65   : > { %v8657_v14 = vsel %vm3138_vm9, %v8655_v31, 0.0  ;;  %v8672_v26 = vsel %vm8671_vm12, %v10847_v11, %v8670_v13 }
0x2d66   : > { %v8644_v42 = vsel %vm8643_vm11, %v10845_v56, %v8640_v3 }
0x2d67   : > { %v8646_v16 = vmul.f32 %v8644_v42, %v8612_v53  ;;  %v8708_v53 = vld [vmem:[%s15107_s0] sm:$0x1]  ;;  %s11788_s0 = scalar_lea.hbm %s11787_s1, 1 }
0x2d68   : > { %p11789_p10 = scmp.ne.s32.totalorder %s11787_s1, %s11788_s0  ;;  %p11794_p2 = scmp.lt.s32.totalorder %s11792_s22, %s11788_s0 }
0x2d69   : > { %v8651_v28 = vmul.f32 %v10494_v1, %v8646_v16 }
0x2d6a   : > { %p11790_p13 = pnand %p11789_p10, %p12440_p5  ;;  %p11795_p3 = por %p11794_p2, %p11793_p1 }
0x2d6b   : > { %v8656_v35 = vadd.f32 %v10495_v60, %v8651_v28 }
0x2d6c   : > { %p11791_p0 = pneg %p11790_p13 }
0x2d6d   : > { %v8658_v10 = vsel %vm3138_vm9, %v8656_v35, 0.0 }
0x2d6e   : > { %v8659_v6 = vadd.f32 %v8658_v10, %v8657_v14  ;;  %p11796_p4 = pnand %p11795_p3, %p11791_p0 }
0x2d70   : > { %v8660_v15 = vrot.slane %v8659_v6, 4 }
0x2d72   : > { %v8661_v7 = vadd.f32 %v8660_v15, %v8659_v6 }
0x2d74   : > { %v8662_v40 = vrot.slane %v8661_v7, 2 }
0x2d76   : > { %v8663_v62 = vadd.f32 %v8662_v40, %v8661_v7 }
0x2d78   : > { %v8664_v23 = vrot.slane %v8663_v62, 1 }
0x2d7a   : > { %v8665_v2 = vadd.f32 %v8664_v23, %v8663_v62 }
0x2d7c   : > { %v8673_v46 = vmul.f32 %v8672_v26, %v8665_v2 }
0x2d7e   : > { %9918 = vmatmul.msk.f32.vlgmr.msra.gmra.mxu1 %vm3138_vm9, %v8673_v46  ;;  %vm8738_vm9 = vcmask 73728  }
0x2dfb   : > { %v8703_v39 = vpop.f32.mrf.mxu1 }
0x2dfc   : > { %v8704_v55 = vadd.f32 %v8703_v39, %v8682_v30 }
0x2dfe   : > { %v8707_v54 = vmul.f32 %v8706_v22, %v8704_v55 }
0x2e00   : > { %v8709_v29 = vadd.f32 %v8708_v53, %v8707_v54 }
0x2e02   : > { %9919 = vmatmul.msk.f32.vlgmr.msrb.gmra.mxu1 %vm2724_vm1, %v8709_v29 }
0x2e7f   : > { %v8735_v61 = vpop.f32.mrf.mxu1 }
0x2e80   : > { %v8736_v37 = vadd.f32 %v8735_v61, %v8714_v48 }
0x2e82   : > { %8739 = vst.msk [vmem:[%s2633_s6] sm:$0x1] %vm8738_vm9, %v8736_v37 }
0x2e83   : > { %11799 = shalt.err (!%p11796_p4)
}
0x2e84   : > { %10168 = dma.vmem_to_hbm [thread:$0]  (%p12440_p5), %s8752_s8, 16, %s8754_s9, %s8741_s7  }
0x2e85 PF: > { %s15110_s3 = sld [smem:[#allocation137_spill]] }
0x2e86   : > { %s15111_s6 = sld [smem:[#allocation135_spill]] }
0x2e8b   : > { %p10240_p7 = scmp.ge.s32.totalorder %s15110_s3, 2 }
0x2e8c   : > { %s8765_s16 = sand.u32 1, %s15111_s6  }
0x2e8d   : > { %p10171_p8 = pnand %p10240_p7, %p12444_p6  ;;  %s8766_s4 = scalar_lea.sflag [#allocation4], %s8765_s16 }
0x2e8f   : > { %p10172_p11 = pneg %p10171_p8 }
0x2e91   : > { %11885 = dma.done.wait (%p10172_p11), %s8766_s4, 16  }
0x2e92   : > { %11887 = vsyncadd (%p10172_p11), %s8766_s4, 4294967280  ;;  %s15113_s1 = sld [smem:[#allocation138_spill]]  ;;  %s15116_s0 = smov %s11894_s15 }
0x2e93   : > { %s15114_s22 = sld [smem:[#allocation136_spill]] }
0x2e94   : > { %s15115_s16 = sld [smem:[#allocation139_spill]] }
0x2e98   : > { %p176_p12 = scmp.ge.s32.totalorder %s15113_s1, 4   ;;  %15118 = sst [smem:[#allocation135_spill]] %s15113_s1 }
0x2e99   : > { %s15117_s15 = smov %s15114_s22 }
0x2e9a   :  { %178 = sbr.rel (!%p176_p12) target bundleno = 167 (0xa7), region = 561 }
0x2e9f   :  { %8771 = vsyncpa [#allocation3], 1 }
0x2ea0   :  { %8773 = vsyncpa [#allocation3 + $0x1], 1 }
0x2ea1   :  { %8774 = vsyncpa [#allocation6], 1 }
0x2ea2   :  { %8775 = vsyncpa [#allocation9], 1 }
0x2ea3   :  { %8776 = vsyncpa [#allocation12], 1 }
0x2ea4   :  { %8777 = vsyncpa [#allocation15], 1 }
0x2ea5   :  { %8778 = vsyncpa [#allocation18], 1 }
0x2ea6   :  { %8779 = vsyncpa [#allocation21], 1 }
0x2ea7   :  { %8780 = vsyncpa [#allocation24], 1 }
0x2ea8   :  { %8781 = vsyncpa [#allocation27], 1 }
0x2ea9   :  { %8782 = vsyncpa [#allocation30], 1 }
0x2eaa   :  { %8783 = vsyncpa [#allocation33], 1 }
0x2eab   :  { %8784 = vsyncpa [#allocation36], 1 }
0x2eac   :  { %8785 = vsyncpa [#allocation39], 1 }
0x2ead   :  { %8786 = vsyncpa [#allocation42], 1 }
0x2eae   :  { %8787 = vsyncpa [#allocation45], 1 }
0x2eaf   :  { %8788 = vsyncpa [#allocation48], 1 }
0x2eb0   :  { %8789 = vsyncpa [#allocation51], 1 }
0x2eb1   :  { %8790 = vsyncpa [#allocation4], 1 }
0x2eb2   :  { %8792 = vsyncpa [#allocation4 + $0x1], 1 }

</bundles_post_ra>
